<compile_context>
chip_gen: v7x
topology: tpu7x:2x2x1
jax: 0.10.0
libtpu: 0.0.40
codegen_flags: <defaults>
</compile_context>

<pallas_src>
import functools

import jax
import jax.numpy as jnp
import numpy as np
from jax.experimental import pallas as pl
from jax.experimental.pallas import tpu as pltpu

EPS = 1e-5
LANE = 128


# ---------------------------------------------------------------------------
# helpers
# ---------------------------------------------------------------------------
def _round_up(x, m):
    return (x + m - 1) // m * m


def _pad_last(a, target):
    pad = target - a.shape[-1]
    if pad == 0:
        return a
    return jnp.pad(a, [(0, 0)] * (a.ndim - 1) + [(0, pad)])


def _largest_divisor(n, cap):
    best = 1
    for d in range(1, n + 1):
        if n % d == 0 and d <= cap:
            best = d
    return best


def _vmem_capacity_bytes():
    # Per-generation VMEM capacity; fall back to the smallest part (v7x: 64 MiB/core).
    try:
        info = pltpu.get_tpu_info()
        cap = getattr(info, "vmem_capacity_bytes", None)
        if cap:
            return int(cap)
    except Exception:
        pass
    return 64 << 20


def _conv_row_tile(h, w, cin_p, cout_p, budget_bytes):
    """Largest divisor of `h` whose full per-step VMEM footprint fits the budget."""
    # weights/bias/scales are VMEM-resident but still double-buffered by the pipeline
    fixed = 4 * (2 * 9 * cin_p * cout_p + 2 * 4 * cout_p + 2 * 4 * cin_p)
    best = 1
    for th in range(1, h + 1):
        if h % th:
            continue
        slab = 2 * (th + 2) * (w + 2) * cin_p            # double-buffered DMA slab
        vals = 3 * (th + 2) * (w + 2) * cin_p            # loaded slab value + mask temps
        lhs = 2 * 3 * th * w * cin_p                     # per-dy K-folded lhs copies
        accs = 3 * th * w * cout_p                       # acc / pre / epilogue temps
        outs = 2 * th * w * cout_p + 4 * cout_p          # double-buffered out blocks
        total = fixed + 4 * (slab + vals + lhs + accs + outs)
        if total <= budget_bytes:
            best = th
    return best


# ---------------------------------------------------------------------------
# Pallas kernels
# ---------------------------------------------------------------------------
def _unpool_kernel(x_ref, idx_ref, out_ref, *, hp_tile, wp_dim, c_dim, w_out):
    # x_ref/idx_ref: (hp_tile, WP, Cp) pooled block; out_ref: (hp_tile, 2, WP, 2*Cp).
    # Output packs (dy, wp, dx, c) so a wrapper reshape gives the (H, W, Cp) map.
    t = pl.program_id(1)
    hp0 = t * hp_tile
    hp = jax.lax.broadcasted_iota(jnp.int32, (hp_tile, wp_dim, c_dim), 0) + hp0
    wq = jax.lax.broadcasted_iota(jnp.int32, (hp_tile, wp_dim, c_dim), 1)
    x = x_ref[...]
    idx = idx_ref[...]
    zero = jnp.zeros_like(x)
    rows = []
    for dy in (0, 1):
        quads = []
        for dx in (0, 1):
            flat = (2 * hp + dy) * w_out + (2 * wq + dx)
            quads.append(jnp.where(idx == flat, x, zero))
        rows.append(jnp.concatenate(quads, axis=-1))        # (hp_tile, WP, 2*Cp)
    out_ref[...] = jnp.stack(rows, axis=1)                  # (hp_tile, 2, WP, 2*Cp)


def _conv_kernel(act_hbm, scale_ref, shift_ref, w_ref, b_ref,
                 pre_ref, stats_ref, slab_ref, sem,
                 *, th, w_dim, cin_p, cout_p, fuse_input_bnrelu):
    # act_hbm : (N, H, W, cin_p) un-padded activation in HBM (memory_space=ANY)
    # scale/shift: (1, cin_p) BN(prev layer) affine, applied in the prologue if fused
    # w_ref   : (3, 3*cin_p, cout_p)   b_ref: (1, cout_p)       (VMEM-resident)
    # pre_ref : (th, W, cout_p)        stats_ref: (2, cout_p)   (sum, centered M2)
    # slab_ref: (2, th+2, W+2, cin_p)  sem: DMA((3, 2))  [body / top halo / bottom halo]
    n = pl.program_id(0)
    t = pl.program_id(1)
    n_tiles = pl.num_programs(1)
    slot = t % 2

    def issue(tt, s):
        # body rows -> slab rows [1, th+1), cols [1, W+1)
        pltpu.make_async_copy(
            act_hbm.at[n, pl.ds(tt * th, th)],
            slab_ref.at[s, pl.ds(1, th), pl.ds(1, w_dim)],
            sem.at[0, s]).start()

        @pl.when(tt > 0)
        def _():
            pltpu.make_async_copy(
                act_hbm.at[n, pl.ds(tt * th - 1, 1)],
                slab_ref.at[s, pl.ds(0, 1), pl.ds(1, w_dim)],
                sem.at[1, s]).start()

        @pl.when(tt < n_tiles - 1)
        def _():
            pltpu.make_async_copy(
                act_hbm.at[n, pl.ds(tt * th + th, 1)],
                slab_ref.at[s, pl.ds(th + 1, 1), pl.ds(1, w_dim)],
                sem.at[2, s]).start()

    def drain(tt, s):
        pltpu.make_async_copy(
            act_hbm.at[n, pl.ds(0, th)],
            slab_ref.at[s, pl.ds(1, th), pl.ds(1, w_dim)],
            sem.at[0, s]).wait()

        @pl.when(tt > 0)
        def _():
            pltpu.make_async_copy(
                act_hbm.at[n, pl.ds(0, 1)],
                slab_ref.at[s, pl.ds(0, 1), pl.ds(1, w_dim)],
                sem.at[1, s]).wait()

        @pl.when(tt < n_tiles - 1)
        def _():
            pltpu.make_async_copy(
                act_hbm.at[n, pl.ds(0, 1)],
                slab_ref.at[s, pl.ds(th + 1, 1), pl.ds(1, w_dim)],
                sem.at[2, s]).wait()

    # Prime the pipeline at the first row-tile of every image, then always prefetch
    # the next tile into the other slot so its DMA overlaps this tile's matmuls.
    @pl.when(t == 0)
    def _():
        issue(t, slot)

    @pl.when(t + 1 < n_tiles)
    def _():
        issue(t + 1, 1 - slot)

    drain(t, slot)

    x = slab_ref[slot]                                     # (th+2, W+2, cin_p)
    if fuse_input_bnrelu:                                  # BN+ReLU of the previous layer
        x = jnp.maximum(x * scale_ref[...] + shift_ref[...], 0.0)

    # Zero the 1-pixel halo: the border columns are never DMA'd and the first/last
    # row-tiles have no neighbour row.  Done AFTER the BN transform so ReLU(shift)
    # never leaks into the conv border.
    r = jax.lax.broadcasted_iota(jnp.int32, (th + 2, w_dim + 2, cin_p), 0)
    c = jax.lax.broadcasted_iota(jnp.int32, (th + 2, w_dim + 2, cin_p), 1)
    valid = (c >= 1) & (c <= w_dim)
    valid = valid & ((r >= 1) | (t > 0))
    valid = valid & ((r <= th) | (t < n_tiles - 1))
    x = jnp.where(valid, x, 0.0)

    # 3x3 conv: fold the 3 dx taps into the contraction (K = 3*cin_p) -> 3 MXU calls.
    acc = jnp.zeros((th * w_dim, cout_p), jnp.float32)
    for dy in range(3):
        rows = x[dy:dy + th]                               # (th, W+2, cin_p)
        lhs = jnp.concatenate(
            [rows[:, 0:w_dim], rows[:, 1:1 + w_dim], rows[:, 2:2 + w_dim]],
            axis=-1).reshape(th * w_dim, 3 * cin_p)
        acc = acc + jnp.dot(lhs, w_ref[dy], preferred_element_type=jnp.float32)
    pre = acc + b_ref[...]
    pre_ref[...] = pre.reshape(th, w_dim, cout_p)

    # Per-tile BN statistics: sum + tile-centered M2 (Chan combine in the wrapper
    # avoids the E[x^2]-E[x]^2 cancellation).
    cnt = float(th * w_dim)
    s1 = jnp.sum(pre, axis=0, keepdims=True)
    d = pre - s1 / cnt
    m2 = jnp.sum(d * d, axis=0, keepdims=True)
    stats_ref[...] = jnp.concatenate([s1, m2], axis=0)


def _bn_relu_nchw_kernel(pre_ref, scale_ref, shift_ref, out_ref, *, c_out):
    # pre_ref: (tm, cout_p); out_ref: (c_out, tm)   (fused BN apply + ReLU + channel
    # strip + transpose -> lane-dense NCHW output, no extra XLA transpose pass).
    y = jnp.maximum(pre_ref[...] * scale_ref[...] + shift_ref[...], 0.0)
    out_ref[...] = jnp.transpose(y, (1, 0))[:c_out]


# ---------------------------------------------------------------------------
# wrappers
# ---------------------------------------------------------------------------
def max_unpool2x2_nhwc(x_nchw, idx_nchw, out_hw, cin_p):
    """Unpool (k=2, s=2) producing channel-padded NHWC (N, H, W, cin_p)."""
    N, _, HP, WP = x_nchw.shape
    H, W = out_hw
    x = _pad_last(jnp.transpose(x_nchw, (0, 2, 3, 1)), cin_p)
    idx = _pad_last(jnp.transpose(idx_nchw, (0, 2, 3, 1)).astype(jnp.int32), cin_p)

    # ~8 MiB of blocks + temporaries per step (mem-bound roofline sweet spot).
    cap = max(1, (8 << 20) // max(1, 20 * WP * cin_p * 4))
    hp_tile = _largest_divisor(HP, cap)
    kern = functools.partial(_unpool_kernel, hp_tile=hp_tile, wp_dim=WP,
                             c_dim=cin_p, w_out=W)
    out5 = pl.pallas_call(
        kern,
        out_shape=jax.ShapeDtypeStruct((N, HP, 2, WP, 2 * cin_p), x.dtype),
        grid=(N, HP // hp_tile),
        in_specs=[
            pl.BlockSpec((None, hp_tile, WP, cin_p), lambda n, t: (n, t, 0, 0)),
            pl.BlockSpec((None, hp_tile, WP, cin_p), lambda n, t: (n, t, 0, 0)),
        ],
        out_specs=pl.BlockSpec((None, hp_tile, 2, WP, 2 * cin_p),
                               lambda n, t: (n, t, 0, 0, 0)),
        compiler_params=pltpu.CompilerParams(
            dimension_semantics=("parallel", "parallel")),
    )(x, idx)
    # row-major adjacent-dim merge -> essentially free reshape
    return out5.reshape(N, H, W, cin_p)


def conv3x3_with_stats(act, w, b, cin_p, cout_p, *, in_scale=None, in_shift=None):
    """3x3 / pad-1 conv over an (un-padded) channel-padded NHWC HBM activation.

    Optionally fuses y = relu(act*in_scale + in_shift) (previous layer's BN+ReLU)
    into the slab prologue.  Emits per-row-tile BN statistics for this layer.
    """
    N, H, W, _ = act.shape
    fuse = in_scale is not None
    if not fuse:
        in_scale = jnp.ones((1, cin_p), jnp.float32)
        in_shift = jnp.zeros((1, cin_p), jnp.float32)

    # weights as (3, 3*cin_p, cout_p): dx folded into the contraction dim.
    w_pad = jnp.zeros((3, 3, cin_p, cout_p), jnp.float32)
    w_pad = w_pad.at[:, :, :w.shape[2], :w.shape[3]].set(w.astype(jnp.float32))
    w_pad = w_pad.reshape(3, 3 * cin_p, cout_p)
    b_pad = _pad_last(b.reshape(1, -1).astype(jnp.float32), cout_p)

    cap = _vmem_capacity_bytes()
    budget = min(cap // 2, 40 << 20)
    vmem_limit = max(min(3 * cap // 4, 96 << 20), 32 << 20)
    th = _conv_row_tile(H, W, cin_p, cout_p, budget)
    n_tiles = H // th

    kern = functools.partial(_conv_kernel, th=th, w_dim=W, cin_p=cin_p,
                             cout_p=cout_p, fuse_input_bnrelu=fuse)
    pre, stats = pl.pallas_call(
        kern,
        out_shape=(
            jax.ShapeDtypeStruct((N, H, W, cout_p), jnp.float32),
            jax.ShapeDtypeStruct((N, n_tiles, 2, cout_p), jnp.float32),
        ),
        grid=(N, n_tiles),
        in_specs=[
            pl.BlockSpec(memory_space=pl.ANY),                               # HBM, manual DMA
            pl.BlockSpec((1, cin_p), lambda n, t: (0, 0)),                   # input BN scale
            pl.BlockSpec((1, cin_p), lambda n, t: (0, 0)),                   # input BN shift
            pl.BlockSpec((3, 3 * cin_p, cout_p), lambda n, t: (0, 0, 0)),    # weights
            pl.BlockSpec((1, cout_p), lambda n, t: (0, 0)),                  # bias
        ],
        out_specs=(
            pl.BlockSpec((None, th, W, cout_p), lambda n, t: (n, t, 0, 0)),
            pl.BlockSpec((None, None, 2, cout_p), lambda n, t: (n, t, 0, 0)),
        ),
        scratch_shapes=[
            pltpu.VMEM((2, th + 2, W + 2, cin_p), jnp.float32),
            pltpu.SemaphoreType.DMA((3, 2)),
        ],
        compiler_params=pltpu.CompilerParams(
            # row-tile axis carries the cross-step prefetch state -> keep it on one
            # core ("arbitrary"); batch axis shards across the two TensorCores.
            dimension_semantics=("parallel", "arbitrary"),
            vmem_limit_bytes=int(vmem_limit)),
    )(act, in_scale, in_shift, w_pad, b_pad)
    return pre, stats, th


def _bn_scale_shift(stats, gamma, beta, cout_p, tile_count, total_count):
    """Chan-style combine of per-tile (sum, centered M2) into BN scale/shift."""
    sums = stats[:, :, 0, :]                               # (N, n_tiles, cout_p)
    m2s = stats[:, :, 1, :]
    total_sum = jnp.sum(sums, axis=(0, 1))
    mean = total_sum / total_count
    tile_mean = sums / tile_count
    m2 = jnp.sum(m2s, axis=(0, 1)) + tile_count * jnp.sum(
        jnp.square(tile_mean - mean), axis=(0, 1))
    var = jnp.maximum(m2 / total_count, 0.0)               # biased (train-mode) variance
    g = _pad_last(gamma.reshape(1, -1).astype(jnp.float32), cout_p)
    b = _pad_last(beta.reshape(1, -1).astype(jnp.float32), cout_p)
    scale = g * jax.lax.rsqrt(var + EPS)                   # (1, cout_p)
    shift = b - mean[None, :] * scale                      # (1, cout_p)
    return scale, shift


def bn_relu_to_nchw(pre, scale, shift, c_out, cout_p):
    """BN-apply + ReLU fused with channel strip + NHWC->NCHW transpose."""
    N, H, W, _ = pre.shape
    hw = H * W
    pre2 = pre.reshape(N, hw, cout_p)                      # adjacent-dim merge: free

    # ~8 MiB of blocks per step; tm must be a multiple of 128 (lane-dense output)
    # or the full spatial extent.
    cap_rows = max(LANE, (8 << 20) // (4 * (5 * cout_p + 2 * c_out)))
    tm = hw
    for d in range(LANE, hw + 1, LANE):
        if hw % d == 0 and d <= cap_rows:
            tm = d
    if hw % tm:
        tm = hw

    out = pl.pallas_call(
        functools.partial(_bn_relu_nchw_kernel, c_out=c_out),
        out_shape=jax.ShapeDtypeStruct((N, c_out, hw), jnp.float32),
        grid=(N, hw // tm),
        in_specs=[
            pl.BlockSpec((None, tm, cout_p), lambda n, t: (n, t, 0)),
            pl.BlockSpec((1, cout_p), lambda n, t: (0, 0)),
            pl.BlockSpec((1, cout_p), lambda n, t: (0, 0)),
        ],
        out_specs=pl.BlockSpec((None, c_out, tm), lambda n, t: (n, 0, t)),
        compiler_params=pltpu.CompilerParams(
            dimension_semantics=("parallel", "parallel")),
    )(pre2, scale, shift)
    return out.reshape(N, c_out, H, W)


@functools.partial(jax.jit, static_argnames=("size",))
def decoder_forward(x, indices, size, params):
    """_Decoder.forward: max_unpool2d then n_block=2 conv-bn-relu blocks. NCHW in/out."""
    N, Cin, H, W = size
    Cout = params["b1"].shape[0]
    cin_p = _round_up(Cin, LANE)
    cout_p = _round_up(Cout, LANE)

    u = max_unpool2x2_nhwc(x, indices, (H, W), cin_p)                 # (N, H, W, cin_p)

    # conv1 (+ per-tile BN stats in its epilogue)
    pre1, st1, th1 = conv3x3_with_stats(u, params["w1"], params["b1"], cin_p, cout_p)
    scale1, shift1 = _bn_scale_shift(st1, params["g1"], params["be1"], cout_p,
                                     th1 * W, N * H * W)

    # conv2 with BN1+ReLU fused into its slab prologue
    pre2, st2, th2 = conv3x3_with_stats(pre1, params["w2"], params["b2"], cout_p, cout_p,
                                        in_scale=scale1, in_shift=shift1)
    scale2, shift2 = _bn_scale_shift(st2, params["g2"], params["be2"], cout_p,
                                     th2 * W, N * H * W)

    # BN2+ReLU fused with channel strip + NHWC->NCHW (interface layout)
    return bn_relu_to_nchw(pre2, scale2, shift2, Cout, cout_p)


# ---------------------------------------------------------------------------
# Pure-JAX reference (correctness check)
# ---------------------------------------------------------------------------
def reference_forward(x, indices, size, params):
    N, C, H, W = size
    flat_idx = indices.reshape(N, C, -1)
    vals = x.reshape(N, C, -1)
    up = jax.vmap(jax.vmap(lambda i, v: jnp.zeros(H * W, x.dtype).at[i].set(v)))(flat_idx, vals)
    up = up.reshape(N, C, H, W)

    def conv(u, w, b):
        wt = jnp.transpose(w, (3, 2, 0, 1))  # (3,3,Cin,Cout) -> OIHW
        y = jax.lax.conv_general_dilated(
            u, wt, (1, 1), ((1, 1), (1, 1)),
            dimension_numbers=("NCHW", "OIHW", "NCHW"))
        return y + b[None, :, None, None]

    def bnr(y, gamma, beta):
        mean = jnp.mean(y, axis=(0, 2, 3), keepdims=True)
        var = jnp.mean(jnp.square(y - mean), axis=(0, 2, 3), keepdims=True)
        yn = (y - mean) * jax.lax.rsqrt(var + EPS)
        return jnp.maximum(gamma[None, :, None, None] * yn + beta[None, :, None, None], 0.0)

    y = bnr(conv(up, params["w1"], params["b1"]), params["g1"], params["be1"])
    y = bnr(conv(y, params["w2"], params["b2"]), params["g2"], params["be2"])
    return y


# ---------------------------------------------------------------------------
if __name__ == "__main__":
    N, CIN, COUT = 2, 4, 8
    HP = WP = 8
    H, W = 2 * HP, 2 * WP
    size = (N, CIN, H, W)

    key = jax.random.PRNGKey(0)
    kx, kdy, kdx, kw1, kb1, kw2, kb2 = jax.random.split(key, 7)

    # pooled input + valid max-pool indices (flat index into the unpooled HxW plane)
    x = jax.random.normal(kx, (N, CIN, HP, WP), dtype=jnp.float32)
    dy = jax.random.bernoulli(kdy, 0.5, (N, CIN, HP, WP)).astype(jnp.int32)
    dx = jax.random.bernoulli(kdx, 0.5, (N, CIN, HP, WP)).astype(jnp.int32)
    ph = jnp.arange(HP, dtype=jnp.int32)[None, None, :, None]
    pw = jnp.arange(WP, dtype=jnp.int32)[None, None, None, :]
    indices = (2 * ph + dy) * W + (2 * pw + dx)  # int32, per-plane flat indices

    params = {
        "w1": 0.1 * jax.random.normal(kw1, (3, 3, CIN, COUT), dtype=jnp.float32),
        "b1": 0.1 * jax.random.normal(kb1, (COUT,), dtype=jnp.float32),
        "g1": 1.0 + 0.1 * jnp.arange(COUT, dtype=jnp.float32),
        "be1": 0.05 * jnp.arange(COUT, dtype=jnp.float32),
        "w2": 0.1 * jax.random.normal(kw2, (3, 3, COUT, COUT), dtype=jnp.float32),
        "b2": 0.1 * jax.random.normal(kb2, (COUT,), dtype=jnp.float32),
        "g2": 1.0 - 0.05 * jnp.arange(COUT, dtype=jnp.float32),
        "be2": -0.03 * jnp.arange(COUT, dtype=jnp.float32),
    }

    out = decoder_forward(x, indices, size, params)
    out = jax.block_until_ready(out)
    assert out.shape == (N, COUT, H, W), out.shape

    ref = jax.block_until_ready(reference_forward(x, indices, size, params))
    np.testing.assert_allclose(np.asarray(out), np.asarray(ref), rtol=1e-3, atol=1e-3)

    print("KERNEL_OK")
</pallas_src>

<mosaic_0001>
module attributes {stable_mosaic.version = 11 : i64} {
  func.func @_conv_kernel(%arg0: i32, %arg1: i32, %arg2: memref<2x16x16x128xf32, #tpu.memory_space<any>>, %arg3: memref<1x128xf32, #tpu.memory_space<vmem>>, %arg4: memref<1x128xf32, #tpu.memory_space<vmem>>, %arg5: memref<3x384x128xf32, #tpu.memory_space<vmem>>, %arg6: memref<1x128xf32, #tpu.memory_space<vmem>>, %arg7: memref<1x16x16x128xf32, #tpu.memory_space<vmem>>, %arg8: memref<1x1x2x128xf32, #tpu.memory_space<vmem>>, %arg9: memref<2x18x18x128xf32, #tpu.memory_space<vmem>>, %arg10: memref<3x2x!tpu.dma_semaphore, #tpu.memory_space<semaphore_mem>>) attributes {dimension_semantics = [#tpu.dimension_semantics<parallel>, #tpu.dimension_semantics<arbitrary>], iteration_bounds = array<i64: 2, 1>, scalar_prefetch = 0 : i64, scratch_operands = 2 : i64, tpu.core_type = #tpu.core_type<tc>, window_params = [{}, {pipeline_mode = #tpu.pipeline_mode<synchronous>, transform_indices = @transform_1, window_bounds = array<i64: 1, 128>}, {pipeline_mode = #tpu.pipeline_mode<synchronous>, transform_indices = @transform_2, window_bounds = array<i64: 1, 128>}, {pipeline_mode = #tpu.pipeline_mode<synchronous>, transform_indices = @transform_3, window_bounds = array<i64: 3, 384, 128>}, {pipeline_mode = #tpu.pipeline_mode<synchronous>, transform_indices = @transform_4, window_bounds = array<i64: 1, 128>}, {transform_indices = @transform_5, window_bounds = array<i64: 1, 16, 16, 128>}, {transform_indices = @transform_6, window_bounds = array<i64: 1, 1, 2, 128>}]} {
    %c2_i32 = arith.constant 2 : i32
    %c0_i32 = arith.constant 0 : i32
    %0 = arith.cmpi eq, %c2_i32, %c0_i32 : i32
    %c1_i32 = arith.constant 1 : i32
    %1 = arith.select %0, %c1_i32, %c2_i32 : i32
    %2 = arith.remsi %arg1, %1 : i32
    %c0_i32_0 = arith.constant 0 : i32
    %3 = arith.cmpi ne, %2, %c0_i32_0 : i32
    %c0_i32_1 = arith.constant 0 : i32
    %4 = arith.cmpi slt, %2, %c0_i32_1 : i32
    %c0_i32_2 = arith.constant 0 : i32
    %5 = arith.cmpi slt, %1, %c0_i32_2 : i32
    %6 = arith.xori %4, %5 : i1
    %7 = arith.andi %6, %3 : i1
    %8 = arith.addi %2, %1 : i32
    %9 = arith.select %7, %8, %2 : i32
    %c0_i32_3 = arith.constant 0 : i32
    %10 = arith.cmpi eq, %arg1, %c0_i32_3 : i32
    %11 = arith.extui %10 : i1 to i32
    %c0_i32_4 = arith.constant 0 : i32
    %12 = arith.cmpi ne, %11, %c0_i32_4 : i32
    scf.if %12 {
      %c16_i32_50 = arith.constant 16 : i32
      %104 = arith.muli %arg1, %c16_i32_50 : i32
      %c0_i32_51 = arith.constant 0 : i32
      %c0_i32_52 = arith.constant 0 : i32
      %c0_i32_53 = arith.constant 0 : i32
      %105 = tpu.memref_slice %arg2[%arg0, %104, %c0_i32_52, %c0_i32_53] : memref<2x16x16x128xf32, #tpu.memory_space<any>> -> memref<1x16x16x128xf32, #tpu.memory_space<any>>
      %106 = tpu.memref_squeeze %105 : memref<1x16x16x128xf32, #tpu.memory_space<any>> -> memref<16x16x128xf32, #tpu.memory_space<any>>
      %c1_i32_54 = arith.constant 1 : i32
      %c1_i32_55 = arith.constant 1 : i32
      %c0_i32_56 = arith.constant 0 : i32
      %107 = tpu.memref_slice %arg9[%9, %c1_i32_54, %c1_i32_55, %c0_i32_56] : memref<2x18x18x128xf32, #tpu.memory_space<vmem>> -> memref<1x16x16x128xf32, #tpu.memory_space<vmem>>
      %108 = tpu.memref_squeeze %107 : memref<1x16x16x128xf32, #tpu.memory_space<vmem>> -> memref<16x16x128xf32, #tpu.memory_space<vmem>>
      %109 = tpu.memref_slice %arg10[%c0_i32_51, %9] : memref<3x2x!tpu.dma_semaphore, #tpu.memory_space<semaphore_mem>> -> memref<1x1x!tpu.dma_semaphore, #tpu.memory_space<semaphore_mem>>
      %110 = tpu.memref_squeeze %109 : memref<1x1x!tpu.dma_semaphore, #tpu.memory_space<semaphore_mem>> -> memref<!tpu.dma_semaphore, #tpu.memory_space<semaphore_mem>>
      tpu.enqueue_dma source(%106 : memref<16x16x128xf32, #tpu.memory_space<any>>) target(%108 : memref<16x16x128xf32, #tpu.memory_space<vmem>>) target_semaphore(%110 : memref<!tpu.dma_semaphore, #tpu.memory_space<semaphore_mem>>)
      %c0_i32_57 = arith.constant 0 : i32
      %111 = arith.cmpi sgt, %arg1, %c0_i32_57 : i32
      %112 = arith.extui %111 : i1 to i32
      %c0_i32_58 = arith.constant 0 : i32
      %113 = arith.cmpi ne, %112, %c0_i32_58 : i32
      scf.if %113 {
        %c16_i32_61 = arith.constant 16 : i32
        %117 = arith.muli %arg1, %c16_i32_61 : i32
        %c1_i32_62 = arith.constant 1 : i32
        %118 = arith.subi %117, %c1_i32_62 : i32
        %c1_i32_63 = arith.constant 1 : i32
        %c0_i32_64 = arith.constant 0 : i32
        %c0_i32_65 = arith.constant 0 : i32
        %119 = tpu.memref_slice %arg2[%arg0, %118, %c0_i32_64, %c0_i32_65] : memref<2x16x16x128xf32, #tpu.memory_space<any>> -> memref<1x1x16x128xf32, #tpu.memory_space<any>>
        %120 = tpu.memref_squeeze %119 : memref<1x1x16x128xf32, #tpu.memory_space<any>> -> memref<1x16x128xf32, #tpu.memory_space<any>>
        %c0_i32_66 = arith.constant 0 : i32
        %c1_i32_67 = arith.constant 1 : i32
        %c0_i32_68 = arith.constant 0 : i32
        %121 = tpu.memref_slice %arg9[%9, %c0_i32_66, %c1_i32_67, %c0_i32_68] : memref<2x18x18x128xf32, #tpu.memory_space<vmem>> -> memref<1x1x16x128xf32, #tpu.memory_space<vmem>>
        %122 = tpu.memref_squeeze %121 : memref<1x1x16x128xf32, #tpu.memory_space<vmem>> -> memref<1x16x128xf32, #tpu.memory_space<vmem>>
        %123 = tpu.memref_slice %arg10[%c1_i32_63, %9] : memref<3x2x!tpu.dma_semaphore, #tpu.memory_space<semaphore_mem>> -> memref<1x1x!tpu.dma_semaphore, #tpu.memory_space<semaphore_mem>>
        %124 = tpu.memref_squeeze %123 : memref<1x1x!tpu.dma_semaphore, #tpu.memory_space<semaphore_mem>> -> memref<!tpu.dma_semaphore, #tpu.memory_space<semaphore_mem>>
        tpu.enqueue_dma source(%120 : memref<1x16x128xf32, #tpu.memory_space<any>>) target(%122 : memref<1x16x128xf32, #tpu.memory_space<vmem>>) target_semaphore(%124 : memref<!tpu.dma_semaphore, #tpu.memory_space<semaphore_mem>>)
      } else {
      }
      %c0_i32_59 = arith.constant 0 : i32
      %114 = arith.cmpi slt, %arg1, %c0_i32_59 : i32
      %115 = arith.extui %114 : i1 to i32
      %c0_i32_60 = arith.constant 0 : i32
      %116 = arith.cmpi ne, %115, %c0_i32_60 : i32
      scf.if %116 {
        %c16_i32_61 = arith.constant 16 : i32
        %117 = arith.muli %arg1, %c16_i32_61 : i32
        %c16_i32_62 = arith.constant 16 : i32
        %118 = arith.addi %117, %c16_i32_62 : i32
        %c2_i32_63 = arith.constant 2 : i32
        %c0_i32_64 = arith.constant 0 : i32
        %c0_i32_65 = arith.constant 0 : i32
        %119 = tpu.memref_slice %arg2[%arg0, %118, %c0_i32_64, %c0_i32_65] : memref<2x16x16x128xf32, #tpu.memory_space<any>> -> memref<1x1x16x128xf32, #tpu.memory_space<any>>
        %120 = tpu.memref_squeeze %119 : memref<1x1x16x128xf32, #tpu.memory_space<any>> -> memref<1x16x128xf32, #tpu.memory_space<any>>
        %c17_i32 = arith.constant 17 : i32
        %c1_i32_66 = arith.constant 1 : i32
        %c0_i32_67 = arith.constant 0 : i32
        %121 = tpu.memref_slice %arg9[%9, %c17_i32, %c1_i32_66, %c0_i32_67] : memref<2x18x18x128xf32, #tpu.memory_space<vmem>> -> memref<1x1x16x128xf32, #tpu.memory_space<vmem>>
        %122 = tpu.memref_squeeze %121 : memref<1x1x16x128xf32, #tpu.memory_space<vmem>> -> memref<1x16x128xf32, #tpu.memory_space<vmem>>
        %123 = tpu.memref_slice %arg10[%c2_i32_63, %9] : memref<3x2x!tpu.dma_semaphore, #tpu.memory_space<semaphore_mem>> -> memref<1x1x!tpu.dma_semaphore, #tpu.memory_space<semaphore_mem>>
        %124 = tpu.memref_squeeze %123 : memref<1x1x!tpu.dma_semaphore, #tpu.memory_space<semaphore_mem>> -> memref<!tpu.dma_semaphore, #tpu.memory_space<semaphore_mem>>
        tpu.enqueue_dma source(%120 : memref<1x16x128xf32, #tpu.memory_space<any>>) target(%122 : memref<1x16x128xf32, #tpu.memory_space<vmem>>) target_semaphore(%124 : memref<!tpu.dma_semaphore, #tpu.memory_space<semaphore_mem>>)
      } else {
      }
    } else {
    }
    %c1_i32_5 = arith.constant 1 : i32
    %13 = arith.addi %arg1, %c1_i32_5 : i32
    %c1_i32_6 = arith.constant 1 : i32
    %14 = arith.cmpi slt, %13, %c1_i32_6 : i32
    %15 = arith.extui %14 : i1 to i32
    %c0_i32_7 = arith.constant 0 : i32
    %16 = arith.cmpi ne, %15, %c0_i32_7 : i32
    scf.if %16 {
      %c1_i32_50 = arith.constant 1 : i32
      %104 = arith.addi %arg1, %c1_i32_50 : i32
      %c1_i32_51 = arith.constant 1 : i32
      %105 = arith.subi %c1_i32_51, %9 : i32
      %c16_i32_52 = arith.constant 16 : i32
      %106 = arith.muli %104, %c16_i32_52 : i32
      %c0_i32_53 = arith.constant 0 : i32
      %c0_i32_54 = arith.constant 0 : i32
      %c0_i32_55 = arith.constant 0 : i32
      %107 = tpu.memref_slice %arg2[%arg0, %106, %c0_i32_54, %c0_i32_55] : memref<2x16x16x128xf32, #tpu.memory_space<any>> -> memref<1x16x16x128xf32, #tpu.memory_space<any>>
      %108 = tpu.memref_squeeze %107 : memref<1x16x16x128xf32, #tpu.memory_space<any>> -> memref<16x16x128xf32, #tpu.memory_space<any>>
      %c1_i32_56 = arith.constant 1 : i32
      %c1_i32_57 = arith.constant 1 : i32
      %c0_i32_58 = arith.constant 0 : i32
      %109 = tpu.memref_slice %arg9[%105, %c1_i32_56, %c1_i32_57, %c0_i32_58] : memref<2x18x18x128xf32, #tpu.memory_space<vmem>> -> memref<1x16x16x128xf32, #tpu.memory_space<vmem>>
      %110 = tpu.memref_squeeze %109 : memref<1x16x16x128xf32, #tpu.memory_space<vmem>> -> memref<16x16x128xf32, #tpu.memory_space<vmem>>
      %111 = tpu.memref_slice %arg10[%c0_i32_53, %105] : memref<3x2x!tpu.dma_semaphore, #tpu.memory_space<semaphore_mem>> -> memref<1x1x!tpu.dma_semaphore, #tpu.memory_space<semaphore_mem>>
      %112 = tpu.memref_squeeze %111 : memref<1x1x!tpu.dma_semaphore, #tpu.memory_space<semaphore_mem>> -> memref<!tpu.dma_semaphore, #tpu.memory_space<semaphore_mem>>
      tpu.enqueue_dma source(%108 : memref<16x16x128xf32, #tpu.memory_space<any>>) target(%110 : memref<16x16x128xf32, #tpu.memory_space<vmem>>) target_semaphore(%112 : memref<!tpu.dma_semaphore, #tpu.memory_space<semaphore_mem>>)
      %c0_i32_59 = arith.constant 0 : i32
      %113 = arith.cmpi sgt, %104, %c0_i32_59 : i32
      %114 = arith.extui %113 : i1 to i32
      %c0_i32_60 = arith.constant 0 : i32
      %115 = arith.cmpi ne, %114, %c0_i32_60 : i32
      scf.if %115 {
        %c16_i32_63 = arith.constant 16 : i32
        %119 = arith.muli %104, %c16_i32_63 : i32
        %c1_i32_64 = arith.constant 1 : i32
        %120 = arith.subi %119, %c1_i32_64 : i32
        %c1_i32_65 = arith.constant 1 : i32
        %c0_i32_66 = arith.constant 0 : i32
        %c0_i32_67 = arith.constant 0 : i32
        %121 = tpu.memref_slice %arg2[%arg0, %120, %c0_i32_66, %c0_i32_67] : memref<2x16x16x128xf32, #tpu.memory_space<any>> -> memref<1x1x16x128xf32, #tpu.memory_space<any>>
        %122 = tpu.memref_squeeze %121 : memref<1x1x16x128xf32, #tpu.memory_space<any>> -> memref<1x16x128xf32, #tpu.memory_space<any>>
        %c0_i32_68 = arith.constant 0 : i32
        %c1_i32_69 = arith.constant 1 : i32
        %c0_i32_70 = arith.constant 0 : i32
        %123 = tpu.memref_slice %arg9[%105, %c0_i32_68, %c1_i32_69, %c0_i32_70] : memref<2x18x18x128xf32, #tpu.memory_space<vmem>> -> memref<1x1x16x128xf32, #tpu.memory_space<vmem>>
        %124 = tpu.memref_squeeze %123 : memref<1x1x16x128xf32, #tpu.memory_space<vmem>> -> memref<1x16x128xf32, #tpu.memory_space<vmem>>
        %125 = tpu.memref_slice %arg10[%c1_i32_65, %105] : memref<3x2x!tpu.dma_semaphore, #tpu.memory_space<semaphore_mem>> -> memref<1x1x!tpu.dma_semaphore, #tpu.memory_space<semaphore_mem>>
        %126 = tpu.memref_squeeze %125 : memref<1x1x!tpu.dma_semaphore, #tpu.memory_space<semaphore_mem>> -> memref<!tpu.dma_semaphore, #tpu.memory_space<semaphore_mem>>
        tpu.enqueue_dma source(%122 : memref<1x16x128xf32, #tpu.memory_space<any>>) target(%124 : memref<1x16x128xf32, #tpu.memory_space<vmem>>) target_semaphore(%126 : memref<!tpu.dma_semaphore, #tpu.memory_space<semaphore_mem>>)
      } else {
      }
      %c0_i32_61 = arith.constant 0 : i32
      %116 = arith.cmpi slt, %104, %c0_i32_61 : i32
      %117 = arith.extui %116 : i1 to i32
      %c0_i32_62 = arith.constant 0 : i32
      %118 = arith.cmpi ne, %117, %c0_i32_62 : i32
      scf.if %118 {
        %c16_i32_63 = arith.constant 16 : i32
        %119 = arith.muli %104, %c16_i32_63 : i32
        %c16_i32_64 = arith.constant 16 : i32
        %120 = arith.addi %119, %c16_i32_64 : i32
        %c2_i32_65 = arith.constant 2 : i32
        %c0_i32_66 = arith.constant 0 : i32
        %c0_i32_67 = arith.constant 0 : i32
        %121 = tpu.memref_slice %arg2[%arg0, %120, %c0_i32_66, %c0_i32_67] : memref<2x16x16x128xf32, #tpu.memory_space<any>> -> memref<1x1x16x128xf32, #tpu.memory_space<any>>
        %122 = tpu.memref_squeeze %121 : memref<1x1x16x128xf32, #tpu.memory_space<any>> -> memref<1x16x128xf32, #tpu.memory_space<any>>
        %c17_i32 = arith.constant 17 : i32
        %c1_i32_68 = arith.constant 1 : i32
        %c0_i32_69 = arith.constant 0 : i32
        %123 = tpu.memref_slice %arg9[%105, %c17_i32, %c1_i32_68, %c0_i32_69] : memref<2x18x18x128xf32, #tpu.memory_space<vmem>> -> memref<1x1x16x128xf32, #tpu.memory_space<vmem>>
        %124 = tpu.memref_squeeze %123 : memref<1x1x16x128xf32, #tpu.memory_space<vmem>> -> memref<1x16x128xf32, #tpu.memory_space<vmem>>
        %125 = tpu.memref_slice %arg10[%c2_i32_65, %105] : memref<3x2x!tpu.dma_semaphore, #tpu.memory_space<semaphore_mem>> -> memref<1x1x!tpu.dma_semaphore, #tpu.memory_space<semaphore_mem>>
        %126 = tpu.memref_squeeze %125 : memref<1x1x!tpu.dma_semaphore, #tpu.memory_space<semaphore_mem>> -> memref<!tpu.dma_semaphore, #tpu.memory_space<semaphore_mem>>
        tpu.enqueue_dma source(%122 : memref<1x16x128xf32, #tpu.memory_space<any>>) target(%124 : memref<1x16x128xf32, #tpu.memory_space<vmem>>) target_semaphore(%126 : memref<!tpu.dma_semaphore, #tpu.memory_space<semaphore_mem>>)
      } else {
      }
    } else {
    }
    %c0_i32_8 = arith.constant 0 : i32
    %c0_i32_9 = arith.constant 0 : i32
    %c0_i32_10 = arith.constant 0 : i32
    %c0_i32_11 = arith.constant 0 : i32
    %17 = tpu.memref_slice %arg2[%arg0, %c0_i32_9, %c0_i32_10, %c0_i32_11] : memref<2x16x16x128xf32, #tpu.memory_space<any>> -> memref<1x16x16x128xf32, #tpu.memory_space<any>>
    %18 = tpu.memref_squeeze %17 : memref<1x16x16x128xf32, #tpu.memory_space<any>> -> memref<16x16x128xf32, #tpu.memory_space<any>>
    %c1_i32_12 = arith.constant 1 : i32
    %c1_i32_13 = arith.constant 1 : i32
    %c0_i32_14 = arith.constant 0 : i32
    %19 = tpu.memref_slice %arg9[%9, %c1_i32_12, %c1_i32_13, %c0_i32_14] : memref<2x18x18x128xf32, #tpu.memory_space<vmem>> -> memref<1x16x16x128xf32, #tpu.memory_space<vmem>>
    %20 = tpu.memref_squeeze %19 : memref<1x16x16x128xf32, #tpu.memory_space<vmem>> -> memref<16x16x128xf32, #tpu.memory_space<vmem>>
    %21 = tpu.memref_slice %arg10[%c0_i32_8, %9] : memref<3x2x!tpu.dma_semaphore, #tpu.memory_space<semaphore_mem>> -> memref<1x1x!tpu.dma_semaphore, #tpu.memory_space<semaphore_mem>>
    %22 = tpu.memref_squeeze %21 : memref<1x1x!tpu.dma_semaphore, #tpu.memory_space<semaphore_mem>> -> memref<!tpu.dma_semaphore, #tpu.memory_space<semaphore_mem>>
    tpu.wait_dma2 semaphore(%22 : memref<!tpu.dma_semaphore, #tpu.memory_space<semaphore_mem>>) src(%18 : memref<16x16x128xf32, #tpu.memory_space<any>>) dst(%20 : memref<16x16x128xf32, #tpu.memory_space<vmem>>)
    %c0_i32_15 = arith.constant 0 : i32
    %23 = arith.cmpi sgt, %arg1, %c0_i32_15 : i32
    %24 = arith.extui %23 : i1 to i32
    %c0_i32_16 = arith.constant 0 : i32
    %25 = arith.cmpi ne, %24, %c0_i32_16 : i32
    scf.if %25 {
      %c1_i32_50 = arith.constant 1 : i32
      %c0_i32_51 = arith.constant 0 : i32
      %c0_i32_52 = arith.constant 0 : i32
      %c0_i32_53 = arith.constant 0 : i32
      %104 = tpu.memref_slice %arg2[%arg0, %c0_i32_51, %c0_i32_52, %c0_i32_53] : memref<2x16x16x128xf32, #tpu.memory_space<any>> -> memref<1x1x16x128xf32, #tpu.memory_space<any>>
      %105 = tpu.memref_squeeze %104 : memref<1x1x16x128xf32, #tpu.memory_space<any>> -> memref<1x16x128xf32, #tpu.memory_space<any>>
      %c0_i32_54 = arith.constant 0 : i32
      %c1_i32_55 = arith.constant 1 : i32
      %c0_i32_56 = arith.constant 0 : i32
      %106 = tpu.memref_slice %arg9[%9, %c0_i32_54, %c1_i32_55, %c0_i32_56] : memref<2x18x18x128xf32, #tpu.memory_space<vmem>> -> memref<1x1x16x128xf32, #tpu.memory_space<vmem>>
      %107 = tpu.memref_squeeze %106 : memref<1x1x16x128xf32, #tpu.memory_space<vmem>> -> memref<1x16x128xf32, #tpu.memory_space<vmem>>
      %108 = tpu.memref_slice %arg10[%c1_i32_50, %9] : memref<3x2x!tpu.dma_semaphore, #tpu.memory_space<semaphore_mem>> -> memref<1x1x!tpu.dma_semaphore, #tpu.memory_space<semaphore_mem>>
      %109 = tpu.memref_squeeze %108 : memref<1x1x!tpu.dma_semaphore, #tpu.memory_space<semaphore_mem>> -> memref<!tpu.dma_semaphore, #tpu.memory_space<semaphore_mem>>
      tpu.wait_dma2 semaphore(%109 : memref<!tpu.dma_semaphore, #tpu.memory_space<semaphore_mem>>) src(%105 : memref<1x16x128xf32, #tpu.memory_space<any>>) dst(%107 : memref<1x16x128xf32, #tpu.memory_space<vmem>>)
    } else {
    }
    %c0_i32_17 = arith.constant 0 : i32
    %26 = arith.cmpi slt, %arg1, %c0_i32_17 : i32
    %27 = arith.extui %26 : i1 to i32
    %c0_i32_18 = arith.constant 0 : i32
    %28 = arith.cmpi ne, %27, %c0_i32_18 : i32
    scf.if %28 {
      %c2_i32_50 = arith.constant 2 : i32
      %c0_i32_51 = arith.constant 0 : i32
      %c0_i32_52 = arith.constant 0 : i32
      %c0_i32_53 = arith.constant 0 : i32
      %104 = tpu.memref_slice %arg2[%arg0, %c0_i32_51, %c0_i32_52, %c0_i32_53] : memref<2x16x16x128xf32, #tpu.memory_space<any>> -> memref<1x1x16x128xf32, #tpu.memory_space<any>>
      %105 = tpu.memref_squeeze %104 : memref<1x1x16x128xf32, #tpu.memory_space<any>> -> memref<1x16x128xf32, #tpu.memory_space<any>>
      %c17_i32 = arith.constant 17 : i32
      %c1_i32_54 = arith.constant 1 : i32
      %c0_i32_55 = arith.constant 0 : i32
      %106 = tpu.memref_slice %arg9[%9, %c17_i32, %c1_i32_54, %c0_i32_55] : memref<2x18x18x128xf32, #tpu.memory_space<vmem>> -> memref<1x1x16x128xf32, #tpu.memory_space<vmem>>
      %107 = tpu.memref_squeeze %106 : memref<1x1x16x128xf32, #tpu.memory_space<vmem>> -> memref<1x16x128xf32, #tpu.memory_space<vmem>>
      %108 = tpu.memref_slice %arg10[%c2_i32_50, %9] : memref<3x2x!tpu.dma_semaphore, #tpu.memory_space<semaphore_mem>> -> memref<1x1x!tpu.dma_semaphore, #tpu.memory_space<semaphore_mem>>
      %109 = tpu.memref_squeeze %108 : memref<1x1x!tpu.dma_semaphore, #tpu.memory_space<semaphore_mem>> -> memref<!tpu.dma_semaphore, #tpu.memory_space<semaphore_mem>>
      tpu.wait_dma2 semaphore(%109 : memref<!tpu.dma_semaphore, #tpu.memory_space<semaphore_mem>>) src(%105 : memref<1x16x128xf32, #tpu.memory_space<any>>) dst(%107 : memref<1x16x128xf32, #tpu.memory_space<vmem>>)
    } else {
    }
    %29 = arith.index_cast %9 : i32 to index
    %c0 = arith.constant 0 : index
    %c0_19 = arith.constant 0 : index
    %c0_20 = arith.constant 0 : index
    %30 = vector.load %arg9[%29, %c0, %c0_19, %c0_20] : memref<2x18x18x128xf32, #tpu.memory_space<vmem>>, vector<1x18x18x128xf32>
    %31 = vector.shape_cast %30 : vector<1x18x18x128xf32> to vector<18x18x128xf32>
    %32 = tpu.iota {dimensions = array<i32: 0>} : vector<18x18x128xi32>
    %33 = tpu.iota {dimensions = array<i32: 1>} : vector<18x18x128xi32>
    %c1_i32_21 = arith.constant 1 : i32
    %34 = vector.broadcast %c1_i32_21 : i32 to vector<18x18x128xi32>
    %35 = arith.cmpi sge, %33, %34 : vector<18x18x128xi32>
    %c16_i32 = arith.constant 16 : i32
    %36 = vector.broadcast %c16_i32 : i32 to vector<18x18x128xi32>
    %37 = arith.cmpi sle, %33, %36 : vector<18x18x128xi32>
    %38 = arith.andi %35, %37 : vector<18x18x128xi1>
    %c1_i32_22 = arith.constant 1 : i32
    %39 = vector.broadcast %c1_i32_22 : i32 to vector<18x18x128xi32>
    %40 = arith.cmpi sge, %32, %39 : vector<18x18x128xi32>
    %c0_i32_23 = arith.constant 0 : i32
    %41 = arith.cmpi sgt, %arg1, %c0_i32_23 : i32
    %42 = vector.broadcast %41 : i1 to vector<18x18x128xi1>
    %43 = arith.ori %40, %42 : vector<18x18x128xi1>
    %44 = arith.andi %38, %43 : vector<18x18x128xi1>
    %c16_i32_24 = arith.constant 16 : i32
    %45 = vector.broadcast %c16_i32_24 : i32 to vector<18x18x128xi32>
    %46 = arith.cmpi sle, %32, %45 : vector<18x18x128xi32>
    %c0_i32_25 = arith.constant 0 : i32
    %47 = arith.cmpi slt, %arg1, %c0_i32_25 : i32
    %48 = vector.broadcast %47 : i1 to vector<18x18x128xi1>
    %49 = arith.ori %46, %48 : vector<18x18x128xi1>
    %50 = arith.andi %44, %49 : vector<18x18x128xi1>
    %cst = arith.constant 0.000000e+00 : f32
    %51 = vector.broadcast %cst : f32 to vector<18x18x128xf32>
    %52 = arith.select %50, %31, %51 : vector<18x18x128xi1>, vector<18x18x128xf32>
    %cst_26 = arith.constant 0.000000e+00 : f32
    %53 = vector.broadcast %cst_26 : f32 to vector<256x128xf32>
    %54 = vector.extract_strided_slice %52 {offsets = [0, 0, 0], sizes = [16, 18, 128], strides = [1, 1, 1]} : vector<18x18x128xf32> to vector<16x18x128xf32>
    %55 = vector.extract_strided_slice %54 {offsets = [0, 0, 0], sizes = [16, 16, 128], strides = [1, 1, 1]} : vector<16x18x128xf32> to vector<16x16x128xf32>
    %56 = vector.extract_strided_slice %54 {offsets = [0, 1, 0], sizes = [16, 16, 128], strides = [1, 1, 1]} : vector<16x18x128xf32> to vector<16x16x128xf32>
    %57 = vector.extract_strided_slice %54 {offsets = [0, 2, 0], sizes = [16, 16, 128], strides = [1, 1, 1]} : vector<16x18x128xf32> to vector<16x16x128xf32>
    %58 = tpu.concatenate %55, %56, %57 in 2 : vector<16x16x128xf32>, vector<16x16x128xf32>, vector<16x16x128xf32> -> vector<16x16x384xf32>
    %59 = vector.shape_cast %58 : vector<16x16x384xf32> to vector<256x384xf32>
    %c0_27 = arith.constant 0 : index
    %c0_28 = arith.constant 0 : index
    %c0_29 = arith.constant 0 : index
    %60 = vector.load %arg5[%c0_27, %c0_28, %c0_29] : memref<3x384x128xf32, #tpu.memory_space<vmem>>, vector<1x384x128xf32>
    %61 = vector.shape_cast %60 : vector<1x384x128xf32> to vector<384x128xf32>
    %cst_30 = arith.constant dense<0.000000e+00> : vector<256x128xf32>
    %62 = tpu.matmul %59, %61, %cst_30 {dimension_numbers = #tpu.dot_dimension_numbers<[1], [0], [0], [1], [0, 0, 1, 1], [], []>} : vector<256x384xf32>, vector<384x128xf32>, vector<256x128xf32> -> vector<256x128xf32>
    %63 = arith.addf %53, %62 : vector<256x128xf32>
    %64 = vector.extract_strided_slice %52 {offsets = [1, 0, 0], sizes = [16, 18, 128], strides = [1, 1, 1]} : vector<18x18x128xf32> to vector<16x18x128xf32>
    %65 = vector.extract_strided_slice %64 {offsets = [0, 0, 0], sizes = [16, 16, 128], strides = [1, 1, 1]} : vector<16x18x128xf32> to vector<16x16x128xf32>
    %66 = vector.extract_strided_slice %64 {offsets = [0, 1, 0], sizes = [16, 16, 128], strides = [1, 1, 1]} : vector<16x18x128xf32> to vector<16x16x128xf32>
    %67 = vector.extract_strided_slice %64 {offsets = [0, 2, 0], sizes = [16, 16, 128], strides = [1, 1, 1]} : vector<16x18x128xf32> to vector<16x16x128xf32>
    %68 = tpu.concatenate %65, %66, %67 in 2 : vector<16x16x128xf32>, vector<16x16x128xf32>, vector<16x16x128xf32> -> vector<16x16x384xf32>
    %69 = vector.shape_cast %68 : vector<16x16x384xf32> to vector<256x384xf32>
    %c1 = arith.constant 1 : index
    %c0_31 = arith.constant 0 : index
    %c0_32 = arith.constant 0 : index
    %70 = vector.load %arg5[%c1, %c0_31, %c0_32] : memref<3x384x128xf32, #tpu.memory_space<vmem>>, vector<1x384x128xf32>
    %71 = vector.shape_cast %70 : vector<1x384x128xf32> to vector<384x128xf32>
    %cst_33 = arith.constant dense<0.000000e+00> : vector<256x128xf32>
    %72 = tpu.matmul %69, %71, %cst_33 {dimension_numbers = #tpu.dot_dimension_numbers<[1], [0], [0], [1], [0, 0, 1, 1], [], []>} : vector<256x384xf32>, vector<384x128xf32>, vector<256x128xf32> -> vector<256x128xf32>
    %73 = arith.addf %63, %72 : vector<256x128xf32>
    %74 = vector.extract_strided_slice %52 {offsets = [2, 0, 0], sizes = [16, 18, 128], strides = [1, 1, 1]} : vector<18x18x128xf32> to vector<16x18x128xf32>
    %75 = vector.extract_strided_slice %74 {offsets = [0, 0, 0], sizes = [16, 16, 128], strides = [1, 1, 1]} : vector<16x18x128xf32> to vector<16x16x128xf32>
    %76 = vector.extract_strided_slice %74 {offsets = [0, 1, 0], sizes = [16, 16, 128], strides = [1, 1, 1]} : vector<16x18x128xf32> to vector<16x16x128xf32>
    %77 = vector.extract_strided_slice %74 {offsets = [0, 2, 0], sizes = [16, 16, 128], strides = [1, 1, 1]} : vector<16x18x128xf32> to vector<16x16x128xf32>
    %78 = tpu.concatenate %75, %76, %77 in 2 : vector<16x16x128xf32>, vector<16x16x128xf32>, vector<16x16x128xf32> -> vector<16x16x384xf32>
    %79 = vector.shape_cast %78 : vector<16x16x384xf32> to vector<256x384xf32>
    %c2 = arith.constant 2 : index
    %c0_34 = arith.constant 0 : index
    %c0_35 = arith.constant 0 : index
    %80 = vector.load %arg5[%c2, %c0_34, %c0_35] : memref<3x384x128xf32, #tpu.memory_space<vmem>>, vector<1x384x128xf32>
    %81 = vector.shape_cast %80 : vector<1x384x128xf32> to vector<384x128xf32>
    %cst_36 = arith.constant dense<0.000000e+00> : vector<256x128xf32>
    %82 = tpu.matmul %79, %81, %cst_36 {dimension_numbers = #tpu.dot_dimension_numbers<[1], [0], [0], [1], [0, 0, 1, 1], [], []>} : vector<256x384xf32>, vector<384x128xf32>, vector<256x128xf32> -> vector<256x128xf32>
    %83 = arith.addf %73, %82 : vector<256x128xf32>
    %c0_37 = arith.constant 0 : index
    %c0_38 = arith.constant 0 : index
    %84 = vector.load %arg6[%c0_37, %c0_38] : memref<1x128xf32, #tpu.memory_space<vmem>>, vector<1x128xf32>
    %85 = vector.broadcast %84 : vector<1x128xf32> to vector<256x128xf32>
    %86 = arith.addf %83, %85 : vector<256x128xf32>
    %87 = vector.shape_cast %86 : vector<256x128xf32> to vector<16x16x128xf32>
    %c0_39 = arith.constant 0 : index
    %c0_40 = arith.constant 0 : index
    %c0_41 = arith.constant 0 : index
    %c0_42 = arith.constant 0 : index
    %88 = vector.load %arg7[%c0_39, %c0_40, %c0_41, %c0_42] : memref<1x16x16x128xf32, #tpu.memory_space<vmem>>, vector<1x16x16x128xf32>
    %89 = vector.shape_cast %88 : vector<1x16x16x128xf32> to vector<16x16x128xf32>
    %90 = vector.shape_cast %87 : vector<16x16x128xf32> to vector<1x16x16x128xf32>
    tpu.vector_store %arg7[%c0_39, %c0_40, %c0_41, %c0_42], %90 {strides = array<i32>} : memref<1x16x16x128xf32, #tpu.memory_space<vmem>>, vector<1x16x16x128xf32>,
    %cst_43 = arith.constant dense<0.000000e+00> : vector<128xf32>
    %91 = vector.multi_reduction <add>, %86, %cst_43 [0] : vector<256x128xf32> to vector<128xf32>
    %92 = vector.shape_cast %91 : vector<128xf32> to vector<1x128xf32>
    %cst_44 = arith.constant 2.560000e+02 : f32
    %93 = vector.broadcast %cst_44 : f32 to vector<1x128xf32>
    %94 = arith.divf %92, %93 : vector<1x128xf32>
    %95 = vector.broadcast %94 : vector<1x128xf32> to vector<256x128xf32>
    %96 = arith.subf %86, %95 : vector<256x128xf32>
    %97 = arith.mulf %96, %96 : vector<256x128xf32>
    %cst_45 = arith.constant dense<0.000000e+00> : vector<128xf32>
    %98 = vector.multi_reduction <add>, %97, %cst_45 [0] : vector<256x128xf32> to vector<128xf32>
    %99 = vector.shape_cast %98 : vector<128xf32> to vector<1x128xf32>
    %100 = tpu.concatenate %92, %99 in 0 : vector<1x128xf32>, vector<1x128xf32> -> vector<2x128xf32>
    %c0_46 = arith.constant 0 : index
    %c0_47 = arith.constant 0 : index
    %c0_48 = arith.constant 0 : index
    %c0_49 = arith.constant 0 : index
    %101 = vector.load %arg8[%c0_46, %c0_47, %c0_48, %c0_49] : memref<1x1x2x128xf32, #tpu.memory_space<vmem>>, vector<1x1x2x128xf32>
    %102 = vector.shape_cast %101 : vector<1x1x2x128xf32> to vector<2x128xf32>
    %103 = vector.shape_cast %100 : vector<2x128xf32> to vector<1x1x2x128xf32>
    tpu.vector_store %arg8[%c0_46, %c0_47, %c0_48, %c0_49], %103 {strides = array<i32>} : memref<1x1x2x128xf32, #tpu.memory_space<vmem>>, vector<1x1x2x128xf32>,
    return
  }
  func.func @transform_1(%arg0: i32, %arg1: i32) -> (i32, i32) {
    %c0_i32 = arith.constant 0 : i32
    %c0_i32_0 = arith.constant 0 : i32
    %c0_i32_1 = arith.constant 0 : i32
    return %c0_i32, %c0_i32_0 : i32, i32
  }
  func.func @transform_2(%arg0: i32, %arg1: i32) -> (i32, i32) {
    %c0_i32 = arith.constant 0 : i32
    %c0_i32_0 = arith.constant 0 : i32
    %c0_i32_1 = arith.constant 0 : i32
    return %c0_i32, %c0_i32_0 : i32, i32
  }
  func.func @transform_3(%arg0: i32, %arg1: i32) -> (i32, i32, i32) {
    %c0_i32 = arith.constant 0 : i32
    %c0_i32_0 = arith.constant 0 : i32
    %c0_i32_1 = arith.constant 0 : i32
    %c0_i32_2 = arith.constant 0 : i32
    return %c0_i32, %c0_i32_0, %c0_i32_1 : i32, i32, i32
  }
  func.func @transform_4(%arg0: i32, %arg1: i32) -> (i32, i32) {
    %c0_i32 = arith.constant 0 : i32
    %c0_i32_0 = arith.constant 0 : i32
    %c0_i32_1 = arith.constant 0 : i32
    return %c0_i32, %c0_i32_0 : i32, i32
  }
  func.func @transform_5(%arg0: i32, %arg1: i32) -> (i32, i32, i32, i32) {
    %c0_i32 = arith.constant 0 : i32
    %c0_i32_0 = arith.constant 0 : i32
    %c0_i32_1 = arith.constant 0 : i32
    return %arg0, %arg1, %c0_i32, %c0_i32_0 : i32, i32, i32, i32
  }
  func.func @transform_6(%arg0: i32, %arg1: i32) -> (i32, i32, i32, i32) {
    %c0_i32 = arith.constant 0 : i32
    %c0_i32_0 = arith.constant 0 : i32
    %c0_i32_1 = arith.constant 0 : i32
    return %arg0, %arg1, %c0_i32, %c0_i32_0 : i32, i32, i32, i32
  }
}

module attributes {stable_mosaic.version = 11 : i64} {
  func.func @_unpool_kernel(%arg0: i32, %arg1: i32, %arg2: memref<1x8x8x128xf32, #tpu.memory_space<vmem>>, %arg3: memref<1x8x8x128xi32, #tpu.memory_space<vmem>>, %arg4: memref<1x8x2x8x256xf32, #tpu.memory_space<vmem>>) attributes {dimension_semantics = [#tpu.dimension_semantics<parallel>, #tpu.dimension_semantics<parallel>], iteration_bounds = array<i64: 2, 1>, scalar_prefetch = 0 : i64, scratch_operands = 0 : i64, tpu.core_type = #tpu.core_type<tc>, window_params = [{transform_indices = @transform_0, window_bounds = array<i64: 1, 8, 8, 128>}, {transform_indices = @transform_1, window_bounds = array<i64: 1, 8, 8, 128>}, {transform_indices = @transform_2, window_bounds = array<i64: 1, 8, 2, 8, 256>}]} {
    %c8_i32 = arith.constant 8 : i32
    %0 = arith.muli %arg1, %c8_i32 : i32
    %1 = tpu.iota {dimensions = array<i32: 0>} : vector<8x8x128xi32>
    %2 = vector.broadcast %0 : i32 to vector<8x8x128xi32>
    %3 = arith.addi %1, %2 : vector<8x8x128xi32>
    %4 = tpu.iota {dimensions = array<i32: 1>} : vector<8x8x128xi32>
    %c0 = arith.constant 0 : index
    %c0_0 = arith.constant 0 : index
    %c0_1 = arith.constant 0 : index
    %c0_2 = arith.constant 0 : index
    %5 = vector.load %arg2[%c0, %c0_0, %c0_1, %c0_2] : memref<1x8x8x128xf32, #tpu.memory_space<vmem>>, vector<1x8x8x128xf32>
    %6 = vector.shape_cast %5 : vector<1x8x8x128xf32> to vector<8x8x128xf32>
    %c0_3 = arith.constant 0 : index
    %c0_4 = arith.constant 0 : index
    %c0_5 = arith.constant 0 : index
    %c0_6 = arith.constant 0 : index
    %7 = vector.load %arg3[%c0_3, %c0_4, %c0_5, %c0_6] : memref<1x8x8x128xi32, #tpu.memory_space<vmem>>, vector<1x8x8x128xi32>
    %8 = vector.shape_cast %7 : vector<1x8x8x128xi32> to vector<8x8x128xi32>
    %cst = arith.constant 0.000000e+00 : f32
    %9 = vector.broadcast %cst : f32 to vector<8x8x128xf32>
    %c2_i32 = arith.constant 2 : i32
    %10 = vector.broadcast %c2_i32 : i32 to vector<8x8x128xi32>
    %11 = arith.muli %10, %3 : vector<8x8x128xi32>
    %c0_i32 = arith.constant 0 : i32
    %12 = vector.broadcast %c0_i32 : i32 to vector<8x8x128xi32>
    %13 = arith.addi %11, %12 : vector<8x8x128xi32>
    %c16_i32 = arith.constant 16 : i32
    %14 = vector.broadcast %c16_i32 : i32 to vector<8x8x128xi32>
    %15 = arith.muli %13, %14 : vector<8x8x128xi32>
    %c2_i32_7 = arith.constant 2 : i32
    %16 = vector.broadcast %c2_i32_7 : i32 to vector<8x8x128xi32>
    %17 = arith.muli %16, %4 : vector<8x8x128xi32>
    %c0_i32_8 = arith.constant 0 : i32
    %18 = vector.broadcast %c0_i32_8 : i32 to vector<8x8x128xi32>
    %19 = arith.addi %17, %18 : vector<8x8x128xi32>
    %20 = arith.addi %15, %19 : vector<8x8x128xi32>
    %21 = arith.cmpi eq, %8, %20 : vector<8x8x128xi32>
    %22 = arith.select %21, %6, %9 : vector<8x8x128xi1>, vector<8x8x128xf32>
    %c2_i32_9 = arith.constant 2 : i32
    %23 = vector.broadcast %c2_i32_9 : i32 to vector<8x8x128xi32>
    %24 = arith.muli %23, %3 : vector<8x8x128xi32>
    %c0_i32_10 = arith.constant 0 : i32
    %25 = vector.broadcast %c0_i32_10 : i32 to vector<8x8x128xi32>
    %26 = arith.addi %24, %25 : vector<8x8x128xi32>
    %c16_i32_11 = arith.constant 16 : i32
    %27 = vector.broadcast %c16_i32_11 : i32 to vector<8x8x128xi32>
    %28 = arith.muli %26, %27 : vector<8x8x128xi32>
    %c2_i32_12 = arith.constant 2 : i32
    %29 = vector.broadcast %c2_i32_12 : i32 to vector<8x8x128xi32>
    %30 = arith.muli %29, %4 : vector<8x8x128xi32>
    %c1_i32 = arith.constant 1 : i32
    %31 = vector.broadcast %c1_i32 : i32 to vector<8x8x128xi32>
    %32 = arith.addi %30, %31 : vector<8x8x128xi32>
    %33 = arith.addi %28, %32 : vector<8x8x128xi32>
    %34 = arith.cmpi eq, %8, %33 : vector<8x8x128xi32>
    %35 = arith.select %34, %6, %9 : vector<8x8x128xi1>, vector<8x8x128xf32>
    %36 = tpu.concatenate %22, %35 in 2 : vector<8x8x128xf32>, vector<8x8x128xf32> -> vector<8x8x256xf32>
    %c2_i32_13 = arith.constant 2 : i32
    %37 = vector.broadcast %c2_i32_13 : i32 to vector<8x8x128xi32>
    %38 = arith.muli %37, %3 : vector<8x8x128xi32>
    %c1_i32_14 = arith.constant 1 : i32
    %39 = vector.broadcast %c1_i32_14 : i32 to vector<8x8x128xi32>
    %40 = arith.addi %38, %39 : vector<8x8x128xi32>
    %c16_i32_15 = arith.constant 16 : i32
    %41 = vector.broadcast %c16_i32_15 : i32 to vector<8x8x128xi32>
    %42 = arith.muli %40, %41 : vector<8x8x128xi32>
    %c2_i32_16 = arith.constant 2 : i32
    %43 = vector.broadcast %c2_i32_16 : i32 to vector<8x8x128xi32>
    %44 = arith.muli %43, %4 : vector<8x8x128xi32>
    %c0_i32_17 = arith.constant 0 : i32
    %45 = vector.broadcast %c0_i32_17 : i32 to vector<8x8x128xi32>
    %46 = arith.addi %44, %45 : vector<8x8x128xi32>
    %47 = arith.addi %42, %46 : vector<8x8x128xi32>
    %48 = arith.cmpi eq, %8, %47 : vector<8x8x128xi32>
    %49 = arith.select %48, %6, %9 : vector<8x8x128xi1>, vector<8x8x128xf32>
    %c2_i32_18 = arith.constant 2 : i32
    %50 = vector.broadcast %c2_i32_18 : i32 to vector<8x8x128xi32>
    %51 = arith.muli %50, %3 : vector<8x8x128xi32>
    %c1_i32_19 = arith.constant 1 : i32
    %52 = vector.broadcast %c1_i32_19 : i32 to vector<8x8x128xi32>
    %53 = arith.addi %51, %52 : vector<8x8x128xi32>
    %c16_i32_20 = arith.constant 16 : i32
    %54 = vector.broadcast %c16_i32_20 : i32 to vector<8x8x128xi32>
    %55 = arith.muli %53, %54 : vector<8x8x128xi32>
    %c2_i32_21 = arith.constant 2 : i32
    %56 = vector.broadcast %c2_i32_21 : i32 to vector<8x8x128xi32>
    %57 = arith.muli %56, %4 : vector<8x8x128xi32>
    %c1_i32_22 = arith.constant 1 : i32
    %58 = vector.broadcast %c1_i32_22 : i32 to vector<8x8x128xi32>
    %59 = arith.addi %57, %58 : vector<8x8x128xi32>
    %60 = arith.addi %55, %59 : vector<8x8x128xi32>
    %61 = arith.cmpi eq, %8, %60 : vector<8x8x128xi32>
    %62 = arith.select %61, %6, %9 : vector<8x8x128xi1>, vector<8x8x128xf32>
    %63 = tpu.concatenate %49, %62 in 2 : vector<8x8x128xf32>, vector<8x8x128xf32> -> vector<8x8x256xf32>
    %64 = vector.shape_cast %36 : vector<8x8x256xf32> to vector<8x1x8x256xf32>
    %65 = vector.shape_cast %63 : vector<8x8x256xf32> to vector<8x1x8x256xf32>
    %66 = tpu.concatenate %64, %65 in 1 : vector<8x1x8x256xf32>, vector<8x1x8x256xf32> -> vector<8x2x8x256xf32>
    %c0_23 = arith.constant 0 : index
    %c0_24 = arith.constant 0 : index
    %c0_25 = arith.constant 0 : index
    %c0_26 = arith.constant 0 : index
    %c0_27 = arith.constant 0 : index
    %67 = vector.load %arg4[%c0_23, %c0_24, %c0_25, %c0_26, %c0_27] : memref<1x8x2x8x256xf32, #tpu.memory_space<vmem>>, vector<1x8x2x8x256xf32>
    %68 = vector.shape_cast %67 : vector<1x8x2x8x256xf32> to vector<8x2x8x256xf32>
    %69 = vector.shape_cast %66 : vector<8x2x8x256xf32> to vector<1x8x2x8x256xf32>
    tpu.vector_store %arg4[%c0_23, %c0_24, %c0_25, %c0_26, %c0_27], %69 {strides = array<i32>} : memref<1x8x2x8x256xf32, #tpu.memory_space<vmem>>, vector<1x8x2x8x256xf32>,
    return
  }
  func.func @transform_0(%arg0: i32, %arg1: i32) -> (i32, i32, i32, i32) {
    %c0_i32 = arith.constant 0 : i32
    %c0_i32_0 = arith.constant 0 : i32
    %c0_i32_1 = arith.constant 0 : i32
    return %arg0, %arg1, %c0_i32, %c0_i32_0 : i32, i32, i32, i32
  }
  func.func @transform_1(%arg0: i32, %arg1: i32) -> (i32, i32, i32, i32) {
    %c0_i32 = arith.constant 0 : i32
    %c0_i32_0 = arith.constant 0 : i32
    %c0_i32_1 = arith.constant 0 : i32
    return %arg0, %arg1, %c0_i32, %c0_i32_0 : i32, i32, i32, i32
  }
  func.func @transform_2(%arg0: i32, %arg1: i32) -> (i32, i32, i32, i32, i32) {
    %c0_i32 = arith.constant 0 : i32
    %c0_i32_0 = arith.constant 0 : i32
    %c0_i32_1 = arith.constant 0 : i32
    %c0_i32_2 = arith.constant 0 : i32
    return %arg0, %arg1, %c0_i32, %c0_i32_0, %c0_i32_1 : i32, i32, i32, i32, i32
  }
}

module attributes {stable_mosaic.version = 11 : i64} {
  func.func @_bn_relu_nchw_kernel(%arg0: i32, %arg1: i32, %arg2: memref<1x256x128xf32, #tpu.memory_space<vmem>>, %arg3: memref<1x128xf32, #tpu.memory_space<vmem>>, %arg4: memref<1x128xf32, #tpu.memory_space<vmem>>, %arg5: memref<1x8x256xf32, #tpu.memory_space<vmem>>) attributes {dimension_semantics = [#tpu.dimension_semantics<parallel>, #tpu.dimension_semantics<parallel>], iteration_bounds = array<i64: 2, 1>, scalar_prefetch = 0 : i64, scratch_operands = 0 : i64, tpu.core_type = #tpu.core_type<tc>, window_params = [{transform_indices = @transform_0, window_bounds = array<i64: 1, 256, 128>}, {pipeline_mode = #tpu.pipeline_mode<synchronous>, transform_indices = @transform_1, window_bounds = array<i64: 1, 128>}, {pipeline_mode = #tpu.pipeline_mode<synchronous>, transform_indices = @transform_2, window_bounds = array<i64: 1, 128>}, {transform_indices = @transform_3, window_bounds = array<i64: 1, 8, 256>}]} {
    %c0 = arith.constant 0 : index
    %c0_0 = arith.constant 0 : index
    %c0_1 = arith.constant 0 : index
    %0 = vector.load %arg2[%c0, %c0_0, %c0_1] : memref<1x256x128xf32, #tpu.memory_space<vmem>>, vector<1x256x128xf32>
    %1 = vector.shape_cast %0 : vector<1x256x128xf32> to vector<256x128xf32>
    %c0_2 = arith.constant 0 : index
    %c0_3 = arith.constant 0 : index
    %2 = vector.load %arg3[%c0_2, %c0_3] : memref<1x128xf32, #tpu.memory_space<vmem>>, vector<1x128xf32>
    %3 = vector.broadcast %2 : vector<1x128xf32> to vector<256x128xf32>
    %4 = arith.mulf %1, %3 : vector<256x128xf32>
    %c0_4 = arith.constant 0 : index
    %c0_5 = arith.constant 0 : index
    %5 = vector.load %arg4[%c0_4, %c0_5] : memref<1x128xf32, #tpu.memory_space<vmem>>, vector<1x128xf32>
    %6 = vector.broadcast %5 : vector<1x128xf32> to vector<256x128xf32>
    %7 = arith.addf %4, %6 : vector<256x128xf32>
    %cst = arith.constant 0.000000e+00 : f32
    %8 = vector.broadcast %cst : f32 to vector<256x128xf32>
    %9 = arith.maximumf %7, %8 : vector<256x128xf32>
    %10 = tpu.transpose %9, [1, 0] : vector<256x128xf32> -> vector<128x256xf32>
    %11 = vector.extract_strided_slice %10 {offsets = [0, 0], sizes = [8, 256], strides = [1, 1]} : vector<128x256xf32> to vector<8x256xf32>
    %c0_6 = arith.constant 0 : index
    %c0_7 = arith.constant 0 : index
    %c0_8 = arith.constant 0 : index
    %12 = vector.load %arg5[%c0_6, %c0_7, %c0_8] : memref<1x8x256xf32, #tpu.memory_space<vmem>>, vector<1x8x256xf32>
    %13 = vector.shape_cast %12 : vector<1x8x256xf32> to vector<8x256xf32>
    %14 = vector.shape_cast %11 : vector<8x256xf32> to vector<1x8x256xf32>
    tpu.vector_store %arg5[%c0_6, %c0_7, %c0_8], %14 {strides = array<i32>} : memref<1x8x256xf32, #tpu.memory_space<vmem>>, vector<1x8x256xf32>,
    return
  }
  func.func @transform_0(%arg0: i32, %arg1: i32) -> (i32, i32, i32) {
    %c0_i32 = arith.constant 0 : i32
    %c0_i32_0 = arith.constant 0 : i32
    return %arg0, %arg1, %c0_i32 : i32, i32, i32
  }
  func.func @transform_1(%arg0: i32, %arg1: i32) -> (i32, i32) {
    %c0_i32 = arith.constant 0 : i32
    %c0_i32_0 = arith.constant 0 : i32
    %c0_i32_1 = arith.constant 0 : i32
    return %c0_i32, %c0_i32_0 : i32, i32
  }
  func.func @transform_2(%arg0: i32, %arg1: i32) -> (i32, i32) {
    %c0_i32 = arith.constant 0 : i32
    %c0_i32_0 = arith.constant 0 : i32
    %c0_i32_1 = arith.constant 0 : i32
    return %c0_i32, %c0_i32_0 : i32, i32
  }
  func.func @transform_3(%arg0: i32, %arg1: i32) -> (i32, i32, i32) {
    %c0_i32 = arith.constant 0 : i32
    %c0_i32_0 = arith.constant 0 : i32
    return %arg0, %c0_i32, %arg1 : i32, i32, i32
  }
}

module attributes {stable_mosaic.version = 11 : i64} {
  func.func @_conv_kernel(%arg0: i32, %arg1: i32, %arg2: memref<2x16x16x128xf32, #tpu.memory_space<any>>, %arg3: memref<1x128xf32, #tpu.memory_space<vmem>>, %arg4: memref<1x128xf32, #tpu.memory_space<vmem>>, %arg5: memref<3x384x128xf32, #tpu.memory_space<vmem>>, %arg6: memref<1x128xf32, #tpu.memory_space<vmem>>, %arg7: memref<1x16x16x128xf32, #tpu.memory_space<vmem>>, %arg8: memref<1x1x2x128xf32, #tpu.memory_space<vmem>>, %arg9: memref<2x18x18x128xf32, #tpu.memory_space<vmem>>, %arg10: memref<3x2x!tpu.dma_semaphore, #tpu.memory_space<semaphore_mem>>) attributes {dimension_semantics = [#tpu.dimension_semantics<parallel>, #tpu.dimension_semantics<arbitrary>], iteration_bounds = array<i64: 2, 1>, scalar_prefetch = 0 : i64, scratch_operands = 2 : i64, tpu.core_type = #tpu.core_type<tc>, window_params = [{}, {pipeline_mode = #tpu.pipeline_mode<synchronous>, transform_indices = @transform_1, window_bounds = array<i64: 1, 128>}, {pipeline_mode = #tpu.pipeline_mode<synchronous>, transform_indices = @transform_2, window_bounds = array<i64: 1, 128>}, {pipeline_mode = #tpu.pipeline_mode<synchronous>, transform_indices = @transform_3, window_bounds = array<i64: 3, 384, 128>}, {pipeline_mode = #tpu.pipeline_mode<synchronous>, transform_indices = @transform_4, window_bounds = array<i64: 1, 128>}, {transform_indices = @transform_5, window_bounds = array<i64: 1, 16, 16, 128>}, {transform_indices = @transform_6, window_bounds = array<i64: 1, 1, 2, 128>}]} {
    %c2_i32 = arith.constant 2 : i32
    %c0_i32 = arith.constant 0 : i32
    %0 = arith.cmpi eq, %c2_i32, %c0_i32 : i32
    %c1_i32 = arith.constant 1 : i32
    %1 = arith.select %0, %c1_i32, %c2_i32 : i32
    %2 = arith.remsi %arg1, %1 : i32
    %c0_i32_0 = arith.constant 0 : i32
    %3 = arith.cmpi ne, %2, %c0_i32_0 : i32
    %c0_i32_1 = arith.constant 0 : i32
    %4 = arith.cmpi slt, %2, %c0_i32_1 : i32
    %c0_i32_2 = arith.constant 0 : i32
    %5 = arith.cmpi slt, %1, %c0_i32_2 : i32
    %6 = arith.xori %4, %5 : i1
    %7 = arith.andi %6, %3 : i1
    %8 = arith.addi %2, %1 : i32
    %9 = arith.select %7, %8, %2 : i32
    %c0_i32_3 = arith.constant 0 : i32
    %10 = arith.cmpi eq, %arg1, %c0_i32_3 : i32
    %11 = arith.extui %10 : i1 to i32
    %c0_i32_4 = arith.constant 0 : i32
    %12 = arith.cmpi ne, %11, %c0_i32_4 : i32
    scf.if %12 {
      %c16_i32_55 = arith.constant 16 : i32
      %114 = arith.muli %arg1, %c16_i32_55 : i32
      %c0_i32_56 = arith.constant 0 : i32
      %c0_i32_57 = arith.constant 0 : i32
      %c0_i32_58 = arith.constant 0 : i32
      %115 = tpu.memref_slice %arg2[%arg0, %114, %c0_i32_57, %c0_i32_58] : memref<2x16x16x128xf32, #tpu.memory_space<any>> -> memref<1x16x16x128xf32, #tpu.memory_space<any>>
      %116 = tpu.memref_squeeze %115 : memref<1x16x16x128xf32, #tpu.memory_space<any>> -> memref<16x16x128xf32, #tpu.memory_space<any>>
      %c1_i32_59 = arith.constant 1 : i32
      %c1_i32_60 = arith.constant 1 : i32
      %c0_i32_61 = arith.constant 0 : i32
      %117 = tpu.memref_slice %arg9[%9, %c1_i32_59, %c1_i32_60, %c0_i32_61] : memref<2x18x18x128xf32, #tpu.memory_space<vmem>> -> memref<1x16x16x128xf32, #tpu.memory_space<vmem>>
      %118 = tpu.memref_squeeze %117 : memref<1x16x16x128xf32, #tpu.memory_space<vmem>> -> memref<16x16x128xf32, #tpu.memory_space<vmem>>
      %119 = tpu.memref_slice %arg10[%c0_i32_56, %9] : memref<3x2x!tpu.dma_semaphore, #tpu.memory_space<semaphore_mem>> -> memref<1x1x!tpu.dma_semaphore, #tpu.memory_space<semaphore_mem>>
      %120 = tpu.memref_squeeze %119 : memref<1x1x!tpu.dma_semaphore, #tpu.memory_space<semaphore_mem>> -> memref<!tpu.dma_semaphore, #tpu.memory_space<semaphore_mem>>
      tpu.enqueue_dma source(%116 : memref<16x16x128xf32, #tpu.memory_space<any>>) target(%118 : memref<16x16x128xf32, #tpu.memory_space<vmem>>) target_semaphore(%120 : memref<!tpu.dma_semaphore, #tpu.memory_space<semaphore_mem>>)
      %c0_i32_62 = arith.constant 0 : i32
      %121 = arith.cmpi sgt, %arg1, %c0_i32_62 : i32
      %122 = arith.extui %121 : i1 to i32
      %c0_i32_63 = arith.constant 0 : i32
      %123 = arith.cmpi ne, %122, %c0_i32_63 : i32
      scf.if %123 {
        %c16_i32_66 = arith.constant 16 : i32
        %127 = arith.muli %arg1, %c16_i32_66 : i32
        %c1_i32_67 = arith.constant 1 : i32
        %128 = arith.subi %127, %c1_i32_67 : i32
        %c1_i32_68 = arith.constant 1 : i32
        %c0_i32_69 = arith.constant 0 : i32
        %c0_i32_70 = arith.constant 0 : i32
        %129 = tpu.memref_slice %arg2[%arg0, %128, %c0_i32_69, %c0_i32_70] : memref<2x16x16x128xf32, #tpu.memory_space<any>> -> memref<1x1x16x128xf32, #tpu.memory_space<any>>
        %130 = tpu.memref_squeeze %129 : memref<1x1x16x128xf32, #tpu.memory_space<any>> -> memref<1x16x128xf32, #tpu.memory_space<any>>
        %c0_i32_71 = arith.constant 0 : i32
        %c1_i32_72 = arith.constant 1 : i32
        %c0_i32_73 = arith.constant 0 : i32
        %131 = tpu.memref_slice %arg9[%9, %c0_i32_71, %c1_i32_72, %c0_i32_73] : memref<2x18x18x128xf32, #tpu.memory_space<vmem>> -> memref<1x1x16x128xf32, #tpu.memory_space<vmem>>
        %132 = tpu.memref_squeeze %131 : memref<1x1x16x128xf32, #tpu.memory_space<vmem>> -> memref<1x16x128xf32, #tpu.memory_space<vmem>>
        %133 = tpu.memref_slice %arg10[%c1_i32_68, %9] : memref<3x2x!tpu.dma_semaphore, #tpu.memory_space<semaphore_mem>> -> memref<1x1x!tpu.dma_semaphore, #tpu.memory_space<semaphore_mem>>
        %134 = tpu.memref_squeeze %133 : memref<1x1x!tpu.dma_semaphore, #tpu.memory_space<semaphore_mem>> -> memref<!tpu.dma_semaphore, #tpu.memory_space<semaphore_mem>>
        tpu.enqueue_dma source(%130 : memref<1x16x128xf32, #tpu.memory_space<any>>) target(%132 : memref<1x16x128xf32, #tpu.memory_space<vmem>>) target_semaphore(%134 : memref<!tpu.dma_semaphore, #tpu.memory_space<semaphore_mem>>)
      } else {
      }
      %c0_i32_64 = arith.constant 0 : i32
      %124 = arith.cmpi slt, %arg1, %c0_i32_64 : i32
      %125 = arith.extui %124 : i1 to i32
      %c0_i32_65 = arith.constant 0 : i32
      %126 = arith.cmpi ne, %125, %c0_i32_65 : i32
      scf.if %126 {
        %c16_i32_66 = arith.constant 16 : i32
        %127 = arith.muli %arg1, %c16_i32_66 : i32
        %c16_i32_67 = arith.constant 16 : i32
        %128 = arith.addi %127, %c16_i32_67 : i32
        %c2_i32_68 = arith.constant 2 : i32
        %c0_i32_69 = arith.constant 0 : i32
        %c0_i32_70 = arith.constant 0 : i32
        %129 = tpu.memref_slice %arg2[%arg0, %128, %c0_i32_69, %c0_i32_70] : memref<2x16x16x128xf32, #tpu.memory_space<any>> -> memref<1x1x16x128xf32, #tpu.memory_space<any>>
        %130 = tpu.memref_squeeze %129 : memref<1x1x16x128xf32, #tpu.memory_space<any>> -> memref<1x16x128xf32, #tpu.memory_space<any>>
        %c17_i32 = arith.constant 17 : i32
        %c1_i32_71 = arith.constant 1 : i32
        %c0_i32_72 = arith.constant 0 : i32
        %131 = tpu.memref_slice %arg9[%9, %c17_i32, %c1_i32_71, %c0_i32_72] : memref<2x18x18x128xf32, #tpu.memory_space<vmem>> -> memref<1x1x16x128xf32, #tpu.memory_space<vmem>>
        %132 = tpu.memref_squeeze %131 : memref<1x1x16x128xf32, #tpu.memory_space<vmem>> -> memref<1x16x128xf32, #tpu.memory_space<vmem>>
        %133 = tpu.memref_slice %arg10[%c2_i32_68, %9] : memref<3x2x!tpu.dma_semaphore, #tpu.memory_space<semaphore_mem>> -> memref<1x1x!tpu.dma_semaphore, #tpu.memory_space<semaphore_mem>>
        %134 = tpu.memref_squeeze %133 : memref<1x1x!tpu.dma_semaphore, #tpu.memory_space<semaphore_mem>> -> memref<!tpu.dma_semaphore, #tpu.memory_space<semaphore_mem>>
        tpu.enqueue_dma source(%130 : memref<1x16x128xf32, #tpu.memory_space<any>>) target(%132 : memref<1x16x128xf32, #tpu.memory_space<vmem>>) target_semaphore(%134 : memref<!tpu.dma_semaphore, #tpu.memory_space<semaphore_mem>>)
      } else {
      }
    } else {
    }
    %c1_i32_5 = arith.constant 1 : i32
    %13 = arith.addi %arg1, %c1_i32_5 : i32
    %c1_i32_6 = arith.constant 1 : i32
    %14 = arith.cmpi slt, %13, %c1_i32_6 : i32
    %15 = arith.extui %14 : i1 to i32
    %c0_i32_7 = arith.constant 0 : i32
    %16 = arith.cmpi ne, %15, %c0_i32_7 : i32
    scf.if %16 {
      %c1_i32_55 = arith.constant 1 : i32
      %114 = arith.addi %arg1, %c1_i32_55 : i32
      %c1_i32_56 = arith.constant 1 : i32
      %115 = arith.subi %c1_i32_56, %9 : i32
      %c16_i32_57 = arith.constant 16 : i32
      %116 = arith.muli %114, %c16_i32_57 : i32
      %c0_i32_58 = arith.constant 0 : i32
      %c0_i32_59 = arith.constant 0 : i32
      %c0_i32_60 = arith.constant 0 : i32
      %117 = tpu.memref_slice %arg2[%arg0, %116, %c0_i32_59, %c0_i32_60] : memref<2x16x16x128xf32, #tpu.memory_space<any>> -> memref<1x16x16x128xf32, #tpu.memory_space<any>>
      %118 = tpu.memref_squeeze %117 : memref<1x16x16x128xf32, #tpu.memory_space<any>> -> memref<16x16x128xf32, #tpu.memory_space<any>>
      %c1_i32_61 = arith.constant 1 : i32
      %c1_i32_62 = arith.constant 1 : i32
      %c0_i32_63 = arith.constant 0 : i32
      %119 = tpu.memref_slice %arg9[%115, %c1_i32_61, %c1_i32_62, %c0_i32_63] : memref<2x18x18x128xf32, #tpu.memory_space<vmem>> -> memref<1x16x16x128xf32, #tpu.memory_space<vmem>>
      %120 = tpu.memref_squeeze %119 : memref<1x16x16x128xf32, #tpu.memory_space<vmem>> -> memref<16x16x128xf32, #tpu.memory_space<vmem>>
      %121 = tpu.memref_slice %arg10[%c0_i32_58, %115] : memref<3x2x!tpu.dma_semaphore, #tpu.memory_space<semaphore_mem>> -> memref<1x1x!tpu.dma_semaphore, #tpu.memory_space<semaphore_mem>>
      %122 = tpu.memref_squeeze %121 : memref<1x1x!tpu.dma_semaphore, #tpu.memory_space<semaphore_mem>> -> memref<!tpu.dma_semaphore, #tpu.memory_space<semaphore_mem>>
      tpu.enqueue_dma source(%118 : memref<16x16x128xf32, #tpu.memory_space<any>>) target(%120 : memref<16x16x128xf32, #tpu.memory_space<vmem>>) target_semaphore(%122 : memref<!tpu.dma_semaphore, #tpu.memory_space<semaphore_mem>>)
      %c0_i32_64 = arith.constant 0 : i32
      %123 = arith.cmpi sgt, %114, %c0_i32_64 : i32
      %124 = arith.extui %123 : i1 to i32
      %c0_i32_65 = arith.constant 0 : i32
      %125 = arith.cmpi ne, %124, %c0_i32_65 : i32
      scf.if %125 {
        %c16_i32_68 = arith.constant 16 : i32
        %129 = arith.muli %114, %c16_i32_68 : i32
        %c1_i32_69 = arith.constant 1 : i32
        %130 = arith.subi %129, %c1_i32_69 : i32
        %c1_i32_70 = arith.constant 1 : i32
        %c0_i32_71 = arith.constant 0 : i32
        %c0_i32_72 = arith.constant 0 : i32
        %131 = tpu.memref_slice %arg2[%arg0, %130, %c0_i32_71, %c0_i32_72] : memref<2x16x16x128xf32, #tpu.memory_space<any>> -> memref<1x1x16x128xf32, #tpu.memory_space<any>>
        %132 = tpu.memref_squeeze %131 : memref<1x1x16x128xf32, #tpu.memory_space<any>> -> memref<1x16x128xf32, #tpu.memory_space<any>>
        %c0_i32_73 = arith.constant 0 : i32
        %c1_i32_74 = arith.constant 1 : i32
        %c0_i32_75 = arith.constant 0 : i32
        %133 = tpu.memref_slice %arg9[%115, %c0_i32_73, %c1_i32_74, %c0_i32_75] : memref<2x18x18x128xf32, #tpu.memory_space<vmem>> -> memref<1x1x16x128xf32, #tpu.memory_space<vmem>>
        %134 = tpu.memref_squeeze %133 : memref<1x1x16x128xf32, #tpu.memory_space<vmem>> -> memref<1x16x128xf32, #tpu.memory_space<vmem>>
        %135 = tpu.memref_slice %arg10[%c1_i32_70, %115] : memref<3x2x!tpu.dma_semaphore, #tpu.memory_space<semaphore_mem>> -> memref<1x1x!tpu.dma_semaphore, #tpu.memory_space<semaphore_mem>>
        %136 = tpu.memref_squeeze %135 : memref<1x1x!tpu.dma_semaphore, #tpu.memory_space<semaphore_mem>> -> memref<!tpu.dma_semaphore, #tpu.memory_space<semaphore_mem>>
        tpu.enqueue_dma source(%132 : memref<1x16x128xf32, #tpu.memory_space<any>>) target(%134 : memref<1x16x128xf32, #tpu.memory_space<vmem>>) target_semaphore(%136 : memref<!tpu.dma_semaphore, #tpu.memory_space<semaphore_mem>>)
      } else {
      }
      %c0_i32_66 = arith.constant 0 : i32
      %126 = arith.cmpi slt, %114, %c0_i32_66 : i32
      %127 = arith.extui %126 : i1 to i32
      %c0_i32_67 = arith.constant 0 : i32
      %128 = arith.cmpi ne, %127, %c0_i32_67 : i32
      scf.if %128 {
        %c16_i32_68 = arith.constant 16 : i32
        %129 = arith.muli %114, %c16_i32_68 : i32
        %c16_i32_69 = arith.constant 16 : i32
        %130 = arith.addi %129, %c16_i32_69 : i32
        %c2_i32_70 = arith.constant 2 : i32
        %c0_i32_71 = arith.constant 0 : i32
        %c0_i32_72 = arith.constant 0 : i32
        %131 = tpu.memref_slice %arg2[%arg0, %130, %c0_i32_71, %c0_i32_72] : memref<2x16x16x128xf32, #tpu.memory_space<any>> -> memref<1x1x16x128xf32, #tpu.memory_space<any>>
        %132 = tpu.memref_squeeze %131 : memref<1x1x16x128xf32, #tpu.memory_space<any>> -> memref<1x16x128xf32, #tpu.memory_space<any>>
        %c17_i32 = arith.constant 17 : i32
        %c1_i32_73 = arith.constant 1 : i32
        %c0_i32_74 = arith.constant 0 : i32
        %133 = tpu.memref_slice %arg9[%115, %c17_i32, %c1_i32_73, %c0_i32_74] : memref<2x18x18x128xf32, #tpu.memory_space<vmem>> -> memref<1x1x16x128xf32, #tpu.memory_space<vmem>>
        %134 = tpu.memref_squeeze %133 : memref<1x1x16x128xf32, #tpu.memory_space<vmem>> -> memref<1x16x128xf32, #tpu.memory_space<vmem>>
        %135 = tpu.memref_slice %arg10[%c2_i32_70, %115] : memref<3x2x!tpu.dma_semaphore, #tpu.memory_space<semaphore_mem>> -> memref<1x1x!tpu.dma_semaphore, #tpu.memory_space<semaphore_mem>>
        %136 = tpu.memref_squeeze %135 : memref<1x1x!tpu.dma_semaphore, #tpu.memory_space<semaphore_mem>> -> memref<!tpu.dma_semaphore, #tpu.memory_space<semaphore_mem>>
        tpu.enqueue_dma source(%132 : memref<1x16x128xf32, #tpu.memory_space<any>>) target(%134 : memref<1x16x128xf32, #tpu.memory_space<vmem>>) target_semaphore(%136 : memref<!tpu.dma_semaphore, #tpu.memory_space<semaphore_mem>>)
      } else {
      }
    } else {
    }
    %c0_i32_8 = arith.constant 0 : i32
    %c0_i32_9 = arith.constant 0 : i32
    %c0_i32_10 = arith.constant 0 : i32
    %c0_i32_11 = arith.constant 0 : i32
    %17 = tpu.memref_slice %arg2[%arg0, %c0_i32_9, %c0_i32_10, %c0_i32_11] : memref<2x16x16x128xf32, #tpu.memory_space<any>> -> memref<1x16x16x128xf32, #tpu.memory_space<any>>
    %18 = tpu.memref_squeeze %17 : memref<1x16x16x128xf32, #tpu.memory_space<any>> -> memref<16x16x128xf32, #tpu.memory_space<any>>
    %c1_i32_12 = arith.constant 1 : i32
    %c1_i32_13 = arith.constant 1 : i32
    %c0_i32_14 = arith.constant 0 : i32
    %19 = tpu.memref_slice %arg9[%9, %c1_i32_12, %c1_i32_13, %c0_i32_14] : memref<2x18x18x128xf32, #tpu.memory_space<vmem>> -> memref<1x16x16x128xf32, #tpu.memory_space<vmem>>
    %20 = tpu.memref_squeeze %19 : memref<1x16x16x128xf32, #tpu.memory_space<vmem>> -> memref<16x16x128xf32, #tpu.memory_space<vmem>>
    %21 = tpu.memref_slice %arg10[%c0_i32_8, %9] : memref<3x2x!tpu.dma_semaphore, #tpu.memory_space<semaphore_mem>> -> memref<1x1x!tpu.dma_semaphore, #tpu.memory_space<semaphore_mem>>
    %22 = tpu.memref_squeeze %21 : memref<1x1x!tpu.dma_semaphore, #tpu.memory_space<semaphore_mem>> -> memref<!tpu.dma_semaphore, #tpu.memory_space<semaphore_mem>>
    tpu.wait_dma2 semaphore(%22 : memref<!tpu.dma_semaphore, #tpu.memory_space<semaphore_mem>>) src(%18 : memref<16x16x128xf32, #tpu.memory_space<any>>) dst(%20 : memref<16x16x128xf32, #tpu.memory_space<vmem>>)
    %c0_i32_15 = arith.constant 0 : i32
    %23 = arith.cmpi sgt, %arg1, %c0_i32_15 : i32
    %24 = arith.extui %23 : i1 to i32
    %c0_i32_16 = arith.constant 0 : i32
    %25 = arith.cmpi ne, %24, %c0_i32_16 : i32
    scf.if %25 {
      %c1_i32_55 = arith.constant 1 : i32
      %c0_i32_56 = arith.constant 0 : i32
      %c0_i32_57 = arith.constant 0 : i32
      %c0_i32_58 = arith.constant 0 : i32
      %114 = tpu.memref_slice %arg2[%arg0, %c0_i32_56, %c0_i32_57, %c0_i32_58] : memref<2x16x16x128xf32, #tpu.memory_space<any>> -> memref<1x1x16x128xf32, #tpu.memory_space<any>>
      %115 = tpu.memref_squeeze %114 : memref<1x1x16x128xf32, #tpu.memory_space<any>> -> memref<1x16x128xf32, #tpu.memory_space<any>>
      %c0_i32_59 = arith.constant 0 : i32
      %c1_i32_60 = arith.constant 1 : i32
      %c0_i32_61 = arith.constant 0 : i32
      %116 = tpu.memref_slice %arg9[%9, %c0_i32_59, %c1_i32_60, %c0_i32_61] : memref<2x18x18x128xf32, #tpu.memory_space<vmem>> -> memref<1x1x16x128xf32, #tpu.memory_space<vmem>>
      %117 = tpu.memref_squeeze %116 : memref<1x1x16x128xf32, #tpu.memory_space<vmem>> -> memref<1x16x128xf32, #tpu.memory_space<vmem>>
      %118 = tpu.memref_slice %arg10[%c1_i32_55, %9] : memref<3x2x!tpu.dma_semaphore, #tpu.memory_space<semaphore_mem>> -> memref<1x1x!tpu.dma_semaphore, #tpu.memory_space<semaphore_mem>>
      %119 = tpu.memref_squeeze %118 : memref<1x1x!tpu.dma_semaphore, #tpu.memory_space<semaphore_mem>> -> memref<!tpu.dma_semaphore, #tpu.memory_space<semaphore_mem>>
      tpu.wait_dma2 semaphore(%119 : memref<!tpu.dma_semaphore, #tpu.memory_space<semaphore_mem>>) src(%115 : memref<1x16x128xf32, #tpu.memory_space<any>>) dst(%117 : memref<1x16x128xf32, #tpu.memory_space<vmem>>)
    } else {
    }
    %c0_i32_17 = arith.constant 0 : i32
    %26 = arith.cmpi slt, %arg1, %c0_i32_17 : i32
    %27 = arith.extui %26 : i1 to i32
    %c0_i32_18 = arith.constant 0 : i32
    %28 = arith.cmpi ne, %27, %c0_i32_18 : i32
    scf.if %28 {
      %c2_i32_55 = arith.constant 2 : i32
      %c0_i32_56 = arith.constant 0 : i32
      %c0_i32_57 = arith.constant 0 : i32
      %c0_i32_58 = arith.constant 0 : i32
      %114 = tpu.memref_slice %arg2[%arg0, %c0_i32_56, %c0_i32_57, %c0_i32_58] : memref<2x16x16x128xf32, #tpu.memory_space<any>> -> memref<1x1x16x128xf32, #tpu.memory_space<any>>
      %115 = tpu.memref_squeeze %114 : memref<1x1x16x128xf32, #tpu.memory_space<any>> -> memref<1x16x128xf32, #tpu.memory_space<any>>
      %c17_i32 = arith.constant 17 : i32
      %c1_i32_59 = arith.constant 1 : i32
      %c0_i32_60 = arith.constant 0 : i32
      %116 = tpu.memref_slice %arg9[%9, %c17_i32, %c1_i32_59, %c0_i32_60] : memref<2x18x18x128xf32, #tpu.memory_space<vmem>> -> memref<1x1x16x128xf32, #tpu.memory_space<vmem>>
      %117 = tpu.memref_squeeze %116 : memref<1x1x16x128xf32, #tpu.memory_space<vmem>> -> memref<1x16x128xf32, #tpu.memory_space<vmem>>
      %118 = tpu.memref_slice %arg10[%c2_i32_55, %9] : memref<3x2x!tpu.dma_semaphore, #tpu.memory_space<semaphore_mem>> -> memref<1x1x!tpu.dma_semaphore, #tpu.memory_space<semaphore_mem>>
      %119 = tpu.memref_squeeze %118 : memref<1x1x!tpu.dma_semaphore, #tpu.memory_space<semaphore_mem>> -> memref<!tpu.dma_semaphore, #tpu.memory_space<semaphore_mem>>
      tpu.wait_dma2 semaphore(%119 : memref<!tpu.dma_semaphore, #tpu.memory_space<semaphore_mem>>) src(%115 : memref<1x16x128xf32, #tpu.memory_space<any>>) dst(%117 : memref<1x16x128xf32, #tpu.memory_space<vmem>>)
    } else {
    }
    %29 = arith.index_cast %9 : i32 to index
    %c0 = arith.constant 0 : index
    %c0_19 = arith.constant 0 : index
    %c0_20 = arith.constant 0 : index
    %30 = vector.load %arg9[%29, %c0, %c0_19, %c0_20] : memref<2x18x18x128xf32, #tpu.memory_space<vmem>>, vector<1x18x18x128xf32>
    %31 = vector.shape_cast %30 : vector<1x18x18x128xf32> to vector<18x18x128xf32>
    %c0_21 = arith.constant 0 : index
    %c0_22 = arith.constant 0 : index
    %32 = vector.load %arg3[%c0_21, %c0_22] : memref<1x128xf32, #tpu.memory_space<vmem>>, vector<1x128xf32>
    %33 = vector.shape_cast %32 : vector<1x128xf32> to vector<1x1x128xf32>
    %34 = vector.broadcast %33 : vector<1x1x128xf32> to vector<18x18x128xf32>
    %35 = arith.mulf %31, %34 : vector<18x18x128xf32>
    %c0_23 = arith.constant 0 : index
    %c0_24 = arith.constant 0 : index
    %36 = vector.load %arg4[%c0_23, %c0_24] : memref<1x128xf32, #tpu.memory_space<vmem>>, vector<1x128xf32>
    %37 = vector.shape_cast %36 : vector<1x128xf32> to vector<1x1x128xf32>
    %38 = vector.broadcast %37 : vector<1x1x128xf32> to vector<18x18x128xf32>
    %39 = arith.addf %35, %38 : vector<18x18x128xf32>
    %cst = arith.constant 0.000000e+00 : f32
    %40 = vector.broadcast %cst : f32 to vector<18x18x128xf32>
    %41 = arith.maximumf %39, %40 : vector<18x18x128xf32>
    %42 = tpu.iota {dimensions = array<i32: 0>} : vector<18x18x128xi32>
    %43 = tpu.iota {dimensions = array<i32: 1>} : vector<18x18x128xi32>
    %c1_i32_25 = arith.constant 1 : i32
    %44 = vector.broadcast %c1_i32_25 : i32 to vector<18x18x128xi32>
    %45 = arith.cmpi sge, %43, %44 : vector<18x18x128xi32>
    %c16_i32 = arith.constant 16 : i32
    %46 = vector.broadcast %c16_i32 : i32 to vector<18x18x128xi32>
    %47 = arith.cmpi sle, %43, %46 : vector<18x18x128xi32>
    %48 = arith.andi %45, %47 : vector<18x18x128xi1>
    %c1_i32_26 = arith.constant 1 : i32
    %49 = vector.broadcast %c1_i32_26 : i32 to vector<18x18x128xi32>
    %50 = arith.cmpi sge, %42, %49 : vector<18x18x128xi32>
    %c0_i32_27 = arith.constant 0 : i32
    %51 = arith.cmpi sgt, %arg1, %c0_i32_27 : i32
    %52 = vector.broadcast %51 : i1 to vector<18x18x128xi1>
    %53 = arith.ori %50, %52 : vector<18x18x128xi1>
    %54 = arith.andi %48, %53 : vector<18x18x128xi1>
    %c16_i32_28 = arith.constant 16 : i32
    %55 = vector.broadcast %c16_i32_28 : i32 to vector<18x18x128xi32>
    %56 = arith.cmpi sle, %42, %55 : vector<18x18x128xi32>
    %c0_i32_29 = arith.constant 0 : i32
    %57 = arith.cmpi slt, %arg1, %c0_i32_29 : i32
    %58 = vector.broadcast %57 : i1 to vector<18x18x128xi1>
    %59 = arith.ori %56, %58 : vector<18x18x128xi1>
    %60 = arith.andi %54, %59 : vector<18x18x128xi1>
    %cst_30 = arith.constant 0.000000e+00 : f32
    %61 = vector.broadcast %cst_30 : f32 to vector<18x18x128xf32>
    %62 = arith.select %60, %41, %61 : vector<18x18x128xi1>, vector<18x18x128xf32>
    %cst_31 = arith.constant 0.000000e+00 : f32
    %63 = vector.broadcast %cst_31 : f32 to vector<256x128xf32>
    %64 = vector.extract_strided_slice %62 {offsets = [0, 0, 0], sizes = [16, 18, 128], strides = [1, 1, 1]} : vector<18x18x128xf32> to vector<16x18x128xf32>
    %65 = vector.extract_strided_slice %64 {offsets = [0, 0, 0], sizes = [16, 16, 128], strides = [1, 1, 1]} : vector<16x18x128xf32> to vector<16x16x128xf32>
    %66 = vector.extract_strided_slice %64 {offsets = [0, 1, 0], sizes = [16, 16, 128], strides = [1, 1, 1]} : vector<16x18x128xf32> to vector<16x16x128xf32>
    %67 = vector.extract_strided_slice %64 {offsets = [0, 2, 0], sizes = [16, 16, 128], strides = [1, 1, 1]} : vector<16x18x128xf32> to vector<16x16x128xf32>
    %68 = tpu.concatenate %65, %66, %67 in 2 : vector<16x16x128xf32>, vector<16x16x128xf32>, vector<16x16x128xf32> -> vector<16x16x384xf32>
    %69 = vector.shape_cast %68 : vector<16x16x384xf32> to vector<256x384xf32>
    %c0_32 = arith.constant 0 : index
    %c0_33 = arith.constant 0 : index
    %c0_34 = arith.constant 0 : index
    %70 = vector.load %arg5[%c0_32, %c0_33, %c0_34] : memref<3x384x128xf32, #tpu.memory_space<vmem>>, vector<1x384x128xf32>
    %71 = vector.shape_cast %70 : vector<1x384x128xf32> to vector<384x128xf32>
    %cst_35 = arith.constant dense<0.000000e+00> : vector<256x128xf32>
    %72 = tpu.matmul %69, %71, %cst_35 {dimension_numbers = #tpu.dot_dimension_numbers<[1], [0], [0], [1], [0, 0, 1, 1], [], []>} : vector<256x384xf32>, vector<384x128xf32>, vector<256x128xf32> -> vector<256x128xf32>
    %73 = arith.addf %63, %72 : vector<256x128xf32>
    %74 = vector.extract_strided_slice %62 {offsets = [1, 0, 0], sizes = [16, 18, 128], strides = [1, 1, 1]} : vector<18x18x128xf32> to vector<16x18x128xf32>
    %75 = vector.extract_strided_slice %74 {offsets = [0, 0, 0], sizes = [16, 16, 128], strides = [1, 1, 1]} : vector<16x18x128xf32> to vector<16x16x128xf32>
    %76 = vector.extract_strided_slice %74 {offsets = [0, 1, 0], sizes = [16, 16, 128], strides = [1, 1, 1]} : vector<16x18x128xf32> to vector<16x16x128xf32>
    %77 = vector.extract_strided_slice %74 {offsets = [0, 2, 0], sizes = [16, 16, 128], strides = [1, 1, 1]} : vector<16x18x128xf32> to vector<16x16x128xf32>
    %78 = tpu.concatenate %75, %76, %77 in 2 : vector<16x16x128xf32>, vector<16x16x128xf32>, vector<16x16x128xf32> -> vector<16x16x384xf32>
    %79 = vector.shape_cast %78 : vector<16x16x384xf32> to vector<256x384xf32>
    %c1 = arith.constant 1 : index
    %c0_36 = arith.constant 0 : index
    %c0_37 = arith.constant 0 : index
    %80 = vector.load %arg5[%c1, %c0_36, %c0_37] : memref<3x384x128xf32, #tpu.memory_space<vmem>>, vector<1x384x128xf32>
    %81 = vector.shape_cast %80 : vector<1x384x128xf32> to vector<384x128xf32>
    %cst_38 = arith.constant dense<0.000000e+00> : vector<256x128xf32>
    %82 = tpu.matmul %79, %81, %cst_38 {dimension_numbers = #tpu.dot_dimension_numbers<[1], [0], [0], [1], [0, 0, 1, 1], [], []>} : vector<256x384xf32>, vector<384x128xf32>, vector<256x128xf32> -> vector<256x128xf32>
    %83 = arith.addf %73, %82 : vector<256x128xf32>
    %84 = vector.extract_strided_slice %62 {offsets = [2, 0, 0], sizes = [16, 18, 128], strides = [1, 1, 1]} : vector<18x18x128xf32> to vector<16x18x128xf32>
    %85 = vector.extract_strided_slice %84 {offsets = [0, 0, 0], sizes = [16, 16, 128], strides = [1, 1, 1]} : vector<16x18x128xf32> to vector<16x16x128xf32>
    %86 = vector.extract_strided_slice %84 {offsets = [0, 1, 0], sizes = [16, 16, 128], strides = [1, 1, 1]} : vector<16x18x128xf32> to vector<16x16x128xf32>
    %87 = vector.extract_strided_slice %84 {offsets = [0, 2, 0], sizes = [16, 16, 128], strides = [1, 1, 1]} : vector<16x18x128xf32> to vector<16x16x128xf32>
    %88 = tpu.concatenate %85, %86, %87 in 2 : vector<16x16x128xf32>, vector<16x16x128xf32>, vector<16x16x128xf32> -> vector<16x16x384xf32>
    %89 = vector.shape_cast %88 : vector<16x16x384xf32> to vector<256x384xf32>
    %c2 = arith.constant 2 : index
    %c0_39 = arith.constant 0 : index
    %c0_40 = arith.constant 0 : index
    %90 = vector.load %arg5[%c2, %c0_39, %c0_40] : memref<3x384x128xf32, #tpu.memory_space<vmem>>, vector<1x384x128xf32>
    %91 = vector.shape_cast %90 : vector<1x384x128xf32> to vector<384x128xf32>
    %cst_41 = arith.constant dense<0.000000e+00> : vector<256x128xf32>
    %92 = tpu.matmul %89, %91, %cst_41 {dimension_numbers = #tpu.dot_dimension_numbers<[1], [0], [0], [1], [0, 0, 1, 1], [], []>} : vector<256x384xf32>, vector<384x128xf32>, vector<256x128xf32> -> vector<256x128xf32>
    %93 = arith.addf %83, %92 : vector<256x128xf32>
    %c0_42 = arith.constant 0 : index
    %c0_43 = arith.constant 0 : index
    %94 = vector.load %arg6[%c0_42, %c0_43] : memref<1x128xf32, #tpu.memory_space<vmem>>, vector<1x128xf32>
    %95 = vector.broadcast %94 : vector<1x128xf32> to vector<256x128xf32>
    %96 = arith.addf %93, %95 : vector<256x128xf32>
    %97 = vector.shape_cast %96 : vector<256x128xf32> to vector<16x16x128xf32>
    %c0_44 = arith.constant 0 : index
    %c0_45 = arith.constant 0 : index
    %c0_46 = arith.constant 0 : index
    %c0_47 = arith.constant 0 : index
    %98 = vector.load %arg7[%c0_44, %c0_45, %c0_46, %c0_47] : memref<1x16x16x128xf32, #tpu.memory_space<vmem>>, vector<1x16x16x128xf32>
    %99 = vector.shape_cast %98 : vector<1x16x16x128xf32> to vector<16x16x128xf32>
    %100 = vector.shape_cast %97 : vector<16x16x128xf32> to vector<1x16x16x128xf32>
    tpu.vector_store %arg7[%c0_44, %c0_45, %c0_46, %c0_47], %100 {strides = array<i32>} : memref<1x16x16x128xf32, #tpu.memory_space<vmem>>, vector<1x16x16x128xf32>,
    %cst_48 = arith.constant dense<0.000000e+00> : vector<128xf32>
    %101 = vector.multi_reduction <add>, %96, %cst_48 [0] : vector<256x128xf32> to vector<128xf32>
    %102 = vector.shape_cast %101 : vector<128xf32> to vector<1x128xf32>
    %cst_49 = arith.constant 2.560000e+02 : f32
    %103 = vector.broadcast %cst_49 : f32 to vector<1x128xf32>
    %104 = arith.divf %102, %103 : vector<1x128xf32>
    %105 = vector.broadcast %104 : vector<1x128xf32> to vector<256x128xf32>
    %106 = arith.subf %96, %105 : vector<256x128xf32>
    %107 = arith.mulf %106, %106 : vector<256x128xf32>
    %cst_50 = arith.constant dense<0.000000e+00> : vector<128xf32>
    %108 = vector.multi_reduction <add>, %107, %cst_50 [0] : vector<256x128xf32> to vector<128xf32>
    %109 = vector.shape_cast %108 : vector<128xf32> to vector<1x128xf32>
    %110 = tpu.concatenate %102, %109 in 0 : vector<1x128xf32>, vector<1x128xf32> -> vector<2x128xf32>
    %c0_51 = arith.constant 0 : index
    %c0_52 = arith.constant 0 : index
    %c0_53 = arith.constant 0 : index
    %c0_54 = arith.constant 0 : index
    %111 = vector.load %arg8[%c0_51, %c0_52, %c0_53, %c0_54] : memref<1x1x2x128xf32, #tpu.memory_space<vmem>>, vector<1x1x2x128xf32>
    %112 = vector.shape_cast %111 : vector<1x1x2x128xf32> to vector<2x128xf32>
    %113 = vector.shape_cast %110 : vector<2x128xf32> to vector<1x1x2x128xf32>
    tpu.vector_store %arg8[%c0_51, %c0_52, %c0_53, %c0_54], %113 {strides = array<i32>} : memref<1x1x2x128xf32, #tpu.memory_space<vmem>>, vector<1x1x2x128xf32>,
    return
  }
  func.func @transform_1(%arg0: i32, %arg1: i32) -> (i32, i32) {
    %c0_i32 = arith.constant 0 : i32
    %c0_i32_0 = arith.constant 0 : i32
    %c0_i32_1 = arith.constant 0 : i32
    return %c0_i32, %c0_i32_0 : i32, i32
  }
  func.func @transform_2(%arg0: i32, %arg1: i32) -> (i32, i32) {
    %c0_i32 = arith.constant 0 : i32
    %c0_i32_0 = arith.constant 0 : i32
    %c0_i32_1 = arith.constant 0 : i32
    return %c0_i32, %c0_i32_0 : i32, i32
  }
  func.func @transform_3(%arg0: i32, %arg1: i32) -> (i32, i32, i32) {
    %c0_i32 = arith.constant 0 : i32
    %c0_i32_0 = arith.constant 0 : i32
    %c0_i32_1 = arith.constant 0 : i32
    %c0_i32_2 = arith.constant 0 : i32
    return %c0_i32, %c0_i32_0, %c0_i32_1 : i32, i32, i32
  }
  func.func @transform_4(%arg0: i32, %arg1: i32) -> (i32, i32) {
    %c0_i32 = arith.constant 0 : i32
    %c0_i32_0 = arith.constant 0 : i32
    %c0_i32_1 = arith.constant 0 : i32
    return %c0_i32, %c0_i32_0 : i32, i32
  }
  func.func @transform_5(%arg0: i32, %arg1: i32) -> (i32, i32, i32, i32) {
    %c0_i32 = arith.constant 0 : i32
    %c0_i32_0 = arith.constant 0 : i32
    %c0_i32_1 = arith.constant 0 : i32
    return %arg0, %arg1, %c0_i32, %c0_i32_0 : i32, i32, i32, i32
  }
  func.func @transform_6(%arg0: i32, %arg1: i32) -> (i32, i32, i32, i32) {
    %c0_i32 = arith.constant 0 : i32
    %c0_i32_0 = arith.constant 0 : i32
    %c0_i32_1 = arith.constant 0 : i32
    return %arg0, %arg1, %c0_i32, %c0_i32_0 : i32, i32, i32, i32
  }
}

</mosaic_0001>

<bundles_post_ra>
// kernel: decoder_forward.4
= control target key start
LH: loop header
LB: loop body
LE: loop exit
PB: predicated region body
PF: predicated region fallthrough
CT: control target
= control target key end

     0   :  { %s600_s9 = smov 0   ;;  %s602_s10 = smov 0   ;;  %s727_s0 = inlined_call_operand.vmem [shape: f32[2,8,8,128], index: 0, kind: input, shape index: {}]   ;;  %s728_s1 = inlined_call_operand.vmem [shape: s32[2,8,8,128], index: 1, kind: input, shape index: {}]   ;;  %s729_s2 = inlined_call_operand.vmem [shape: f32[2,8,2,8,256], index: 2, kind: output, shape index: {}]  }
   0x1   :  { %s604_s11 = smov 0  }
   0x2 LB: > { %s24_s12 = sadd.s32 1, %s579_s10  ;;  %p525_p0 = scmp.ge.s32.totalorder %s583_s11, 1  ;;  %s583_s11 = sphi %s604_s11, %s12_s11   ;;  %s579_s10 = sphi %s602_s10, %s731_s10   ;;  %s575_s9 = sphi %s600_s9, %s730_s9  }
   0x3   : > { %p26_p1 = scmp.ge.s32.totalorder %s24_s12, 2  ;;  %p150_p2 = scmp.lt.s32.totalorder %s583_s11, 3 }
   0x5   : > { %s733_s12 = smov (%p26_p1, %s24_s12), 0  ;;  %p151_p3 = pnand %p525_p0, %p150_p2 }
   0x6   : > { %p191_p4 = scmp.lt.s32.totalorder (!%p151_p3), %s575_s9, 1  ;;  %v230_v0 = vlaneseq (!%p151_p3) }
   0x7   : > { %154 = sbr.rel (%p151_p3) target bundleno = 39 (0x27), region = 28 }
   0x8   : > { %v231_v1 = vshrl.u32 (!%p151_p3), %v230_v0, 7 }
   0xa   : > { %v618_v2 = vmul.u32 (!%p151_p3), 2, %v231_v1 }
   0xc   : > { %v638_v5 = vadd.s32 (!%p151_p3), 1, %v618_v2  ;;  %v330_v6 = vadd.s32 (!%p151_p3), 16, %v618_v2  ;;  %v266_v7 = vadd.s32 (!%p151_p3), 32, %v618_v2  ;;  %v331_v10 = vadd.s32 (!%p151_p3), 48, %v618_v2 }
   0xd   : > { %v267_v11 = vadd.s32 (!%p151_p3), 64, %v618_v2  ;;  %v332_v12 = vadd.s32 (!%p151_p3), 80, %v618_v2  ;;  %v268_v31 = vadd.s32 (!%p151_p3), 96, %v618_v2  ;;  %v333_v34 = vadd.s32 (!%p151_p3), 112, %v618_v2 }
   0xe   : > { %s735_s9 = smov (!%p191_p4, %s575_s9), 1  ;;  %v354_v14 = vadd.s32 16, %v638_v5  ;;  %v291_v18 = vadd.s32 32, %v638_v5  ;;  %v355_v21 = vadd.s32 48, %v638_v5  ;;  %v292_v26 = vadd.s32 64, %v638_v5 }
   0xf   : > { %s534_s13 = sshll.u32 %s735_s9, 6  ;;  %s536_s14 = sshll.u32 %s735_s9, 8  ;;  %v356_v29 = vadd.s32 80, %v638_v5  ;;  %v293_v33 = vadd.s32 96, %v638_v5  ;;  %v357_v36 = vadd.s32 112, %v638_v5  ;;  %v269_v43 = vadd.s32 128, %v618_v2 }
  0x10   : > { %s623_s17 = scalar_lea.vmem %s727_s0, %s534_s13  ;;  %s628_s20 = scalar_lea.vmem %s728_s1, %s534_s13  ;;  %v294_v45 = vadd.s32 128, %v638_v5  ;;  %v334_v46 = vadd.s32 144, %v618_v2  ;;  %v358_v47 = vadd.s32 144, %v638_v5  ;;  %v270_v50 = vadd.s32 160, %v618_v2 }
  0x11   : > { %s633_s23 = scalar_lea.vmem %s729_s2, %s536_s14  ;;  %v232_v3 = vld [vmem:[%s623_s17] sm:$0xff]  ;;  %v233_v8 = vld [vmem:[%s623_s17 + $0x8] sm:$0xff]  ;;  %v242_v15 = vld [vmem:[%s628_s20 + $0x10] sm:$0xff]  ;;  %v295_v51 = vadd.s32 160, %v638_v5  ;;  %v335_v52 = vadd.s32 176, %v618_v2  ;;  %v359_v58 = vadd.s32 176, %v638_v5 }
  0x12   : > { %v240_v4 = vld [vmem:[%s628_s20] sm:$0xff]  ;;  %v241_v9 = vld [vmem:[%s628_s20 + $0x8] sm:$0xff]  ;;  %v234_v19 = vld [vmem:[%s623_s17 + $0x10] sm:$0xff]  ;;  %vm275_vm7 = vcmp.eq.s32.totalorder %v242_v15, %v267_v11  ;;  %vm340_vm9 = vcmp.eq.s32.totalorder %v242_v15, %v332_v12  ;;  %vm300_vm10 = vcmp.eq.s32.totalorder %v242_v15, %v292_v26  ;;  %vm364_vm11 = vcmp.eq.s32.totalorder %v242_v15, %v356_v29 }
  0x13   : > { %vm273_vm0 = vcmp.eq.s32.totalorder %v240_v4, %v618_v2  ;;  %vm298_vm1 = vcmp.eq.s32.totalorder %v240_v4, %v638_v5  ;;  %vm338_vm2 = vcmp.eq.s32.totalorder %v240_v4, %v330_v6  ;;  %vm274_vm3 = vcmp.eq.s32.totalorder %v241_v9, %v266_v7  ;;  %v243_v27 = vld [vmem:[%s628_s20 + $0x18] sm:$0xff]  ;;  %v244_v39 = vld [vmem:[%s628_s20 + $0x20] sm:$0xff]  ;;  %v245_v48 = vld [vmem:[%s628_s20 + $0x28] sm:$0xff] }
  0x14   : > { %v281_v13 = vsel %vm273_vm0, %v232_v3, 0.0  ;;  %v306_v16 = vsel %vm298_vm1, %v232_v3, 0.0  ;;  %v346_v17 = vsel %vm338_vm2, %v232_v3, 0.0  ;;  %vm362_vm4 = vcmp.eq.s32.totalorder %v240_v4, %v354_v14  ;;  %v235_v30 = vld [vmem:[%s623_s17 + $0x18] sm:$0xff]  ;;  %v236_v42 = vld [vmem:[%s623_s17 + $0x20] sm:$0xff]  ;;  %v237_v49 = vld [vmem:[%s623_s17 + $0x28] sm:$0xff] }
  0x15   : > { %378 = vst [vmem:[%s633_s23] sm:$0xff] %v281_v13  ;;  %379 = vst [vmem:[%s633_s23 + $0x8] sm:$0xff] %v306_v16  ;;  %v282_v20 = vsel %vm274_vm3, %v233_v8, 0.0  ;;  %vm339_vm5 = vcmp.eq.s32.totalorder %v241_v9, %v331_v10  ;;  %v370_v22 = vsel %vm362_vm4, %v232_v3, 0.0  ;;  %vm299_vm6 = vcmp.eq.s32.totalorder %v241_v9, %v291_v18  ;;  %v246_v59 = vld [vmem:[%s628_s20 + $0x30] sm:$0xff]  ;;  %v247_v4 = vld [vmem:[%s628_s20 + $0x38] sm:$0xff] }
  0x16   : > { %380 = vst [vmem:[%s633_s23 + $0x10] sm:$0xff] %v346_v17  ;;  %382 = vst [vmem:[%s633_s23 + $0x20] sm:$0xff] %v282_v20  ;;  %v347_v23 = vsel %vm339_vm5, %v233_v8, 0.0  ;;  %v307_v24 = vsel %vm299_vm6, %v233_v8, 0.0  ;;  %vm363_vm8 = vcmp.eq.s32.totalorder %v241_v9, %v355_v21  ;;  %v283_v25 = vsel %vm275_vm7, %v234_v19, 0.0  ;;  %v238_v62 = vld [vmem:[%s623_s17 + $0x30] sm:$0xff] }
  0x17   : > { %381 = vst [vmem:[%s633_s23 + $0x18] sm:$0xff] %v370_v22  ;;  %384 = vst [vmem:[%s633_s23 + $0x30] sm:$0xff] %v347_v23  ;;  %v371_v28 = vsel %vm363_vm8, %v233_v8, 0.0  ;;  %v348_v32 = vsel %vm340_vm9, %v234_v19, 0.0  ;;  %v308_v35 = vsel %vm300_vm10, %v234_v19, 0.0  ;;  %vm276_vm12 = vcmp.eq.s32.totalorder %v243_v27, %v268_v31  ;;  %v239_v8 = vld [vmem:[%s623_s17 + $0x38] sm:$0xff] }
  0x18   : > { %383 = vst [vmem:[%s633_s23 + $0x28] sm:$0xff] %v307_v24  ;;  %386 = vst [vmem:[%s633_s23 + $0x40] sm:$0xff] %v283_v25  ;;  %v372_v37 = vsel %vm364_vm11, %v234_v19, 0.0  ;;  %v284_v38 = vsel %vm276_vm12, %v235_v30, 0.0  ;;  %vm301_vm13 = vcmp.eq.s32.totalorder %v243_v27, %v293_v33  ;;  %vm341_vm14 = vcmp.eq.s32.totalorder %v243_v27, %v333_v34 }
  0x19   : > { %385 = vst [vmem:[%s633_s23 + $0x38] sm:$0xff] %v371_v28  ;;  %388 = vst [vmem:[%s633_s23 + $0x50] sm:$0xff] %v348_v32  ;;  %v309_v40 = vsel %vm301_vm13, %v235_v30, 0.0  ;;  %v349_v41 = vsel %vm341_vm14, %v235_v30, 0.0  ;;  %vm365_vm15 = vcmp.eq.s32.totalorder %v243_v27, %v357_v36  ;;  %vm277_vm0 = vcmp.eq.s32.totalorder %v244_v39, %v269_v43 }
  0x1a   : > { %387 = vst [vmem:[%s633_s23 + $0x48] sm:$0xff] %v308_v35  ;;  %389 = vst [vmem:[%s633_s23 + $0x58] sm:$0xff] %v372_v37  ;;  %v373_v44 = vsel %vm365_vm15, %v235_v30, 0.0  ;;  %v285_v53 = vsel %vm277_vm0, %v236_v42, 0.0  ;;  %vm302_vm1 = vcmp.eq.s32.totalorder %v244_v39, %v294_v45  ;;  %vm342_vm2 = vcmp.eq.s32.totalorder %v244_v39, %v334_v46 }
  0x1b   : > { %390 = vst [vmem:[%s633_s23 + $0x60] sm:$0xff] %v284_v38  ;;  %391 = vst [vmem:[%s633_s23 + $0x68] sm:$0xff] %v309_v40  ;;  %vm366_vm3 = vcmp.eq.s32.totalorder %v244_v39, %v358_v47  ;;  %v310_v54 = vsel %vm302_vm1, %v236_v42, 0.0  ;;  %v350_v55 = vsel %vm342_vm2, %v236_v42, 0.0  ;;  %vm278_vm4 = vcmp.eq.s32.totalorder %v245_v48, %v270_v50 }
  0x1c   : > { %392 = vst [vmem:[%s633_s23 + $0x70] sm:$0xff] %v349_v41  ;;  %393 = vst [vmem:[%s633_s23 + $0x78] sm:$0xff] %v373_v44  ;;  %v374_v56 = vsel %vm366_vm3, %v236_v42, 0.0  ;;  %v286_v57 = vsel %vm278_vm4, %v237_v49, 0.0  ;;  %vm303_vm5 = vcmp.eq.s32.totalorder %v245_v48, %v295_v51  ;;  %vm343_vm6 = vcmp.eq.s32.totalorder %v245_v48, %v335_v52 }
  0x1d   : > { %394 = vst [vmem:[%s633_s23 + $0x80] sm:$0xff] %v285_v53  ;;  %395 = vst [vmem:[%s633_s23 + $0x88] sm:$0xff] %v310_v54  ;;  %v311_v60 = vsel %vm303_vm5, %v237_v49, 0.0  ;;  %v351_v61 = vsel %vm343_vm6, %v237_v49, 0.0  ;;  %v271_v63 = vadd.s32 192, %v618_v2  ;;  %v296_v0 = vadd.s32 192, %v638_v5 }
  0x1e   : > { %396 = vst [vmem:[%s633_s23 + $0x90] sm:$0xff] %v350_v55  ;;  %397 = vst [vmem:[%s633_s23 + $0x98] sm:$0xff] %v374_v56  ;;  %vm367_vm7 = vcmp.eq.s32.totalorder %v245_v48, %v359_v58  ;;  %v336_v1 = vadd.s32 208, %v618_v2  ;;  %v360_v3 = vadd.s32 208, %v638_v5  ;;  %v272_v6 = vadd.s32 224, %v618_v2 }
  0x1f   : > { %398 = vst [vmem:[%s633_s23 + $0xa0] sm:$0xff] %v286_v57  ;;  %399 = vst [vmem:[%s633_s23 + $0xa8] sm:$0xff] %v311_v60  ;;  %v375_v7 = vsel %vm367_vm7, %v237_v49, 0.0  ;;  %vm279_vm8 = vcmp.eq.s32.totalorder %v246_v59, %v271_v63  ;;  %vm304_vm9 = vcmp.eq.s32.totalorder %v246_v59, %v296_v0  ;;  %v297_v9 = vadd.s32 224, %v638_v5 }
  0x20   : > { %400 = vst [vmem:[%s633_s23 + $0xb0] sm:$0xff] %v351_v61  ;;  %401 = vst [vmem:[%s633_s23 + $0xb8] sm:$0xff] %v375_v7  ;;  %v287_v10 = vsel %vm279_vm8, %v238_v62, 0.0  ;;  %v312_v11 = vsel %vm304_vm9, %v238_v62, 0.0  ;;  %vm344_vm10 = vcmp.eq.s32.totalorder %v246_v59, %v336_v1  ;;  %vm368_vm11 = vcmp.eq.s32.totalorder %v246_v59, %v360_v3 }
  0x21   : > { %402 = vst [vmem:[%s633_s23 + $0xc0] sm:$0xff] %v287_v10  ;;  %403 = vst [vmem:[%s633_s23 + $0xc8] sm:$0xff] %v312_v11  ;;  %v352_v12 = vsel %vm344_vm10, %v238_v62, 0.0  ;;  %v376_v13 = vsel %vm368_vm11, %v238_v62, 0.0  ;;  %vm280_vm12 = vcmp.eq.s32.totalorder %v247_v4, %v272_v6  ;;  %vm305_vm13 = vcmp.eq.s32.totalorder %v247_v4, %v297_v9 }
  0x22   : > { %404 = vst [vmem:[%s633_s23 + $0xd0] sm:$0xff] %v352_v12  ;;  %405 = vst [vmem:[%s633_s23 + $0xd8] sm:$0xff] %v376_v13  ;;  %v288_v14 = vsel %vm280_vm12, %v239_v8, 0.0  ;;  %v313_v15 = vsel %vm305_vm13, %v239_v8, 0.0  ;;  %v337_v16 = vadd.s32 240, %v618_v2  ;;  %v361_v17 = vadd.s32 240, %v638_v5 }
  0x23   : > { %406 = vst [vmem:[%s633_s23 + $0xe0] sm:$0xff] %v288_v14  ;;  %407 = vst [vmem:[%s633_s23 + $0xe8] sm:$0xff] %v313_v15 }
  0x24   : > { %vm345_vm14 = vcmp.eq.s32.totalorder %v247_v4, %v337_v16  ;;  %vm369_vm15 = vcmp.eq.s32.totalorder %v247_v4, %v361_v17 }
  0x25   : > { %v353_v18 = vsel %vm345_vm14, %v239_v8, 0.0  ;;  %v377_v19 = vsel %vm369_vm15, %v239_v8, 0.0 }
  0x26   : > { %408 = vst [vmem:[%s633_s23 + $0xf0] sm:$0xff] %v353_v18  ;;  %409 = vst [vmem:[%s633_s23 + $0xf8] sm:$0xff] %v377_v19 }
  0x27 PF: > { %s12_s11 = sadd.s32 1, %s583_s11   ;;  %s730_s9 = smov %s579_s10 }
  0x28   : > { %p9_p5 = scmp.ge.s32.totalorder %s12_s11, 4   ;;  %s731_s10 = smov %s733_s12 }
  0x2a   :  { %11 = sbr.rel (!%p9_p5) target bundleno = 2 (0x2), region = 61 }

// kernel: decoder_forward.7
= control target key start
LH: loop header
LB: loop body
LE: loop exit
PB: predicated region body
PF: predicated region fallthrough
CT: control target
= control target key end

     0   :  { %s588_s12 = smov 0   ;;  %s590_s13 = smov 0   ;;  %s733_s0 = inlined_call_operand.vmem [shape: f32[2,256,128], index: 0, kind: input, shape index: {}]   ;;  %s734_s1 = inlined_call_operand.vmem [shape: f32[1,128], index: 1, kind: input, shape index: {}]   ;;  %s735_s2 = inlined_call_operand.vmem [shape: f32[1,128], index: 2, kind: input, shape index: {}]   ;;  %s736_s3 = inlined_call_operand.vmem [shape: f32[2,8,256], index: 3, kind: output, shape index: {}]  }
   0x1   :  { %s592_s14 = smov 0  }
   0x2 LB: > { %s25_s15 = sadd.s32 1, %s562_s13  ;;  %p509_p0 = scmp.ge.s32.totalorder %s566_s14, 1  ;;  %s566_s14 = sphi %s592_s14, %s13_s14   ;;  %s562_s13 = sphi %s590_s13, %s738_s13   ;;  %s558_s12 = sphi %s588_s12, %s737_s12  }
   0x3   : > { %p27_p1 = scmp.ge.s32.totalorder %s25_s15, 2  ;;  %p158_p2 = scmp.lt.s32.totalorder %s566_s14, 3 }
   0x5   : > { %s740_s15 = smov (%p27_p1, %s25_s15), 0  ;;  %p159_p3 = pnand %p509_p0, %p158_p2 }
   0x6   : > { %p191_p4 = scmp.lt.s32.totalorder (!%p159_p3), %s558_s12, 1  ;;  %v612_v0 = vld [vmem:[%s734_s1] ss:$0 sm:$0xff] (!%p159_p3) }
   0x7   : > { %162 = sbr.rel (%p159_p3) target bundleno = 155 (0x9b), region = 32  ;;  %v622_v1 = vld [vmem:[%s735_s2] ss:$0 sm:$0xff] (!%p159_p3) }
   0xe   : > { %s742_s12 = smov (!%p191_p4, %s558_s12), 1 }
   0xf   : > { %s518_s16 = sshll.u32 %s742_s12, 8  ;;  %s519_s24 = sshll.u32 %s742_s12, 4 }
  0x10   : > { %s617_s21 = scalar_lea.vmem %s733_s0, %s518_s16  ;;  %s208_s27 = scalar_lea.vmem %s736_s3, %s519_s24 }
  0x11   : > { %v226_v2 = vld [vmem:[%s617_s21 + $0x80] sm:$0xff]  ;;  %v227_v4 = vld [vmem:[%s617_s21 + $0x88] sm:$0xff]  ;;  %v228_v9 = vld [vmem:[%s617_s21 + $0x90] sm:$0xff] }
  0x12   : > { %v210_v3 = vld [vmem:[%s617_s21] sm:$0xff]  ;;  %v265_v5 = vmul.f32 %v612_v0, %v226_v2  ;;  %v266_v7 = vmul.f32 %v612_v0, %v227_v4  ;;  %v211_v8 = vld [vmem:[%s617_s21 + $0x8] sm:$0xff]  ;;  %v212_v10 = vld [vmem:[%s617_s21 + $0x10] sm:$0xff]  ;;  %v267_v12 = vmul.f32 %v612_v0, %v228_v9 }
  0x13   : > { %v249_v6 = vmul.f32 %v612_v0, %v210_v3  ;;  %v250_v11 = vmul.f32 %v612_v0, %v211_v8  ;;  %v251_v16 = vmul.f32 %v612_v0, %v212_v10  ;;  %v229_v17 = vld [vmem:[%s617_s21 + $0x98] sm:$0xff]  ;;  %v230_v28 = vld [vmem:[%s617_s21 + $0xa0] sm:$0xff]  ;;  %v231_v36 = vld [vmem:[%s617_s21 + $0xa8] sm:$0xff] }
  0x14   : > { %v304_v13 = vadd.f32 %v622_v1, %v265_v5  ;;  %v305_v15 = vadd.f32 %v622_v1, %v266_v7  ;;  %v213_v19 = vld [vmem:[%s617_s21 + $0x18] sm:$0xff]  ;;  %v306_v22 = vadd.f32 %v622_v1, %v267_v12  ;;  %v268_v23 = vmul.f32 %v612_v0, %v229_v17  ;;  %v214_v29 = vld [vmem:[%s617_s21 + $0x20] sm:$0xff]  ;;  %v215_v37 = vld [vmem:[%s617_s21 + $0x28] sm:$0xff] }
  0x15   : > { %v288_v14 = vadd.f32 %v622_v1, %v249_v6  ;;  %v289_v18 = vadd.f32 %v622_v1, %v250_v11  ;;  %v290_v26 = vadd.f32 %v622_v1, %v251_v16  ;;  %v252_v27 = vmul.f32 %v612_v0, %v213_v19  ;;  %v232_v44 = vld [vmem:[%s617_s21 + $0xb0] sm:$0xff]  ;;  %v233_v52 = vld [vmem:[%s617_s21 + $0xb8] sm:$0xff]  ;;  %v234_v60 = vld [vmem:[%s617_s21 + $0xc0] sm:$0xff] }
  0x16   : > { %v336_v20 = vmax.f32 %v304_v13, 0.0  ;;  %v337_v24 = vmax.f32 %v305_v15, 0.0  ;;  %v338_v30 = vmax.f32 %v306_v22, 0.0  ;;  %v307_v31 = vadd.f32 %v622_v1, %v268_v23  ;;  %v216_v45 = vld [vmem:[%s617_s21 + $0x30] sm:$0xff]  ;;  %v217_v53 = vld [vmem:[%s617_s21 + $0x38] sm:$0xff]  ;;  %v218_v61 = vld [vmem:[%s617_s21 + $0x40] sm:$0xff] }
  0x17   : > { %v320_v21 = vmax.f32 %v288_v14, 0.0  ;;  %v321_v25 = vmax.f32 %v289_v18, 0.0  ;;  %v322_v32 = vmax.f32 %v290_v26, 0.0  ;;  %v291_v33 = vadd.f32 %v622_v1, %v252_v27  ;;  %v235_v6 = vld [vmem:[%s617_s21 + $0xc8] sm:$0xff]  ;;  %v236_v14 = vld [vmem:[%s617_s21 + $0xd0] sm:$0xff]  ;;  %v237_v22 = vld [vmem:[%s617_s21 + $0xd8] sm:$0xff] }
  0x18   : > { %384 = vxpose.xlu1.b32.start [1/16] (narrow) %v336_v20, 8  ;;  %v269_v34 = vmul.f32 %v612_v0, %v230_v28  ;;  %v253_v35 = vmul.f32 %v612_v0, %v214_v29  ;;  %v339_v38 = vmax.f32 %v307_v31, 0.0  ;;  %v270_v39 = vmul.f32 %v612_v0, %v231_v36  ;;  %v219_v7 = vld [vmem:[%s617_s21 + $0x48] sm:$0xff]  ;;  %v220_v15 = vld [vmem:[%s617_s21 + $0x50] sm:$0xff]  ;;  %v221_v23 = vld [vmem:[%s617_s21 + $0x58] sm:$0xff] }
  0x19   : > { %352 = vxpose.xlu0.b32.start [1/16] (narrow) %v320_v21, 8  ;;  %v323_v40 = vmax.f32 %v291_v33, 0.0  ;;  %v254_v43 = vmul.f32 %v612_v0, %v215_v37  ;;  %v271_v46 = vmul.f32 %v612_v0, %v232_v44  ;;  %v255_v47 = vmul.f32 %v612_v0, %v216_v45  ;;  %v222_v31 = vld [vmem:[%s617_s21 + $0x60] sm:$0xff] }
  0x1a   : > { %v308_v41 = vadd.f32 %v622_v1, %v269_v34  ;;  %v292_v42 = vadd.f32 %v622_v1, %v253_v35  ;;  %v309_v50 = vadd.f32 %v622_v1, %v270_v39  ;;  %v272_v55 = vmul.f32 %v612_v0, %v233_v52  ;;  %v223_v39 = vld [vmem:[%s617_s21 + $0x68] sm:$0xff] }
  0x1b   : > { %v293_v51 = vadd.f32 %v622_v1, %v254_v43  ;;  %v310_v54 = vadd.f32 %v622_v1, %v271_v46  ;;  %v294_v58 = vadd.f32 %v622_v1, %v255_v47  ;;  %v256_v59 = vmul.f32 %v612_v0, %v217_v53  ;;  %v240_v46 = vld [vmem:[%s617_s21 + $0xf0] sm:$0xff] }
  0x1c   : > { %385 = vxpose.xlu1.b32.cont [2/16] (narrow) %v337_v24, 8  ;;  %v340_v48 = vmax.f32 %v308_v41, 0.0  ;;  %v324_v49 = vmax.f32 %v292_v42, 0.0  ;;  %v341_v56 = vmax.f32 %v309_v50, 0.0  ;;  %v311_v63 = vadd.f32 %v622_v1, %v272_v55  ;;  %v224_v47 = vld [vmem:[%s617_s21 + $0x70] sm:$0xff]  ;;  %v225_v55 = vld [vmem:[%s617_s21 + $0x78] sm:$0xff] }
  0x1d   : > { %353 = vxpose.xlu0.b32.cont [2/16] (narrow) %v321_v25, 8  ;;  %v325_v57 = vmax.f32 %v293_v51, 0.0  ;;  %v342_v62 = vmax.f32 %v310_v54, 0.0  ;;  %v326_v2 = vmax.f32 %v294_v58, 0.0  ;;  %v295_v3 = vadd.f32 %v622_v1, %v256_v59  ;;  %v241_v54 = vld [vmem:[%s617_s21 + $0xf8] sm:$0xff] }
  0x1e   : > { %v273_v4 = vmul.f32 %v612_v0, %v234_v60  ;;  %v257_v5 = vmul.f32 %v612_v0, %v218_v61  ;;  %v343_v8 = vmax.f32 %v311_v63, 0.0  ;;  %v274_v9 = vmul.f32 %v612_v0, %v235_v6 }
  0x1f   : > { %v327_v10 = vmax.f32 %v295_v3, 0.0  ;;  %v258_v13 = vmul.f32 %v612_v0, %v219_v7  ;;  %v275_v16 = vmul.f32 %v612_v0, %v236_v14  ;;  %v259_v17 = vmul.f32 %v612_v0, %v220_v15 }
  0x20   : > { %386 = vxpose.xlu1.b32.cont [3/16] (narrow) %v338_v30, 8  ;;  %v312_v11 = vadd.f32 %v622_v1, %v273_v4  ;;  %v296_v12 = vadd.f32 %v622_v1, %v257_v5  ;;  %v313_v20 = vadd.f32 %v622_v1, %v274_v9  ;;  %v276_v25 = vmul.f32 %v612_v0, %v237_v22  ;;  %v238_v30 = vld [vmem:[%s617_s21 + $0xe0] sm:$0xff] }
  0x21   : > { %354 = vxpose.xlu0.b32.cont [3/16] (narrow) %v322_v32, 8  ;;  %v297_v21 = vadd.f32 %v622_v1, %v258_v13  ;;  %v314_v24 = vadd.f32 %v622_v1, %v275_v16  ;;  %v298_v28 = vadd.f32 %v622_v1, %v259_v17  ;;  %v260_v29 = vmul.f32 %v612_v0, %v221_v23 }
  0x22   : > { %v344_v18 = vmax.f32 %v312_v11, 0.0  ;;  %v328_v19 = vmax.f32 %v296_v12, 0.0  ;;  %v345_v26 = vmax.f32 %v313_v20, 0.0  ;;  %v315_v33 = vadd.f32 %v622_v1, %v276_v25 }
  0x23   : > { %v329_v27 = vmax.f32 %v297_v21, 0.0  ;;  %v346_v32 = vmax.f32 %v314_v24, 0.0  ;;  %v330_v34 = vmax.f32 %v298_v28, 0.0  ;;  %v299_v35 = vadd.f32 %v622_v1, %v260_v29 }
  0x24   : > { %387 = vxpose.xlu1.b32.cont [4/16] (narrow) %v339_v38, 8  ;;  %v277_v36 = vmul.f32 %v612_v0, %v238_v30  ;;  %v261_v37 = vmul.f32 %v612_v0, %v222_v31  ;;  %v239_v38 = vld [vmem:[%s617_s21 + $0xe8] sm:$0xff]  ;;  %v262_v45 = vmul.f32 %v612_v0, %v223_v39  ;;  %v264_v61 = vmul.f32 %v612_v0, %v225_v55 }
  0x25   : > { %355 = vxpose.xlu0.b32.cont [4/16] (narrow) %v323_v40, 8  ;;  %v347_v40 = vmax.f32 %v315_v33, 0.0  ;;  %v278_v41 = vmul.f32 %v612_v0, %v239_v38  ;;  %v331_v42 = vmax.f32 %v299_v35, 0.0 }
  0x26   : > { %v316_v43 = vadd.f32 %v622_v1, %v277_v36  ;;  %v300_v44 = vadd.f32 %v622_v1, %v261_v37  ;;  %v301_v53 = vadd.f32 %v622_v1, %v262_v45  ;;  %v303_v3 = vadd.f32 %v622_v1, %v264_v61 }
  0x27   : > { %v317_v52 = vadd.f32 %v622_v1, %v278_v41 }
  0x28   : > { %388 = vxpose.xlu1.b32.cont [5/16] (narrow) %v340_v48, 8  ;;  %v279_v48 = vmul.f32 %v612_v0, %v240_v46  ;;  %v348_v50 = vmax.f32 %v316_v43, 0.0  ;;  %v332_v51 = vmax.f32 %v300_v44, 0.0  ;;  %v333_v59 = vmax.f32 %v301_v53, 0.0 }
  0x29   : > { %356 = vxpose.xlu0.b32.cont [5/16] (narrow) %v324_v49, 8  ;;  %v263_v49 = vmul.f32 %v612_v0, %v224_v47  ;;  %v349_v58 = vmax.f32 %v317_v52, 0.0  ;;  %v335_v5 = vmax.f32 %v303_v3, 0.0 }
  0x2b   : > { %v302_v60 = vadd.f32 %v622_v1, %v263_v49 }
  0x2c   : > { %389 = vxpose.xlu1.b32.cont [6/16] (narrow) %v341_v56, 8  ;;  %v318_v56 = vadd.f32 %v622_v1, %v279_v48 }
  0x2d   : > { %357 = vxpose.xlu0.b32.cont [6/16] (narrow) %v325_v57, 8  ;;  %v280_v57 = vmul.f32 %v612_v0, %v241_v54  ;;  %v334_v63 = vmax.f32 %v302_v60, 0.0 }
  0x30   : > { %390 = vxpose.xlu1.b32.cont [7/16] (narrow) %v342_v62, 8  ;;  %v350_v62 = vmax.f32 %v318_v56, 0.0 }
  0x31   : > { %358 = vxpose.xlu0.b32.cont [7/16] (narrow) %v326_v2, 8  ;;  %v319_v2 = vadd.f32 %v622_v1, %v280_v57 }
  0x33   : > { %v351_v4 = vmax.f32 %v319_v2, 0.0 }
  0x34   : > { %391 = vxpose.xlu1.b32.cont [8/16] (narrow) %v343_v8, 8 }
  0x35   : > { %359 = vxpose.xlu0.b32.cont [8/16] (narrow) %v327_v10, 8 }
  0x38   : > { %392 = vxpose.xlu1.b32.cont [9/16] (narrow) %v344_v18, 8 }
  0x39   : > { %360 = vxpose.xlu0.b32.cont [9/16] (narrow) %v328_v19, 8 }
  0x3c   : > { %393 = vxpose.xlu1.b32.cont [10/16] (narrow) %v345_v26, 8 }
  0x3d   : > { %361 = vxpose.xlu0.b32.cont [10/16] (narrow) %v329_v27, 8 }
  0x40   : > { %394 = vxpose.xlu1.b32.cont [11/16] (narrow) %v346_v32, 8 }
  0x41   : > { %362 = vxpose.xlu0.b32.cont [11/16] (narrow) %v330_v34, 8 }
  0x44   : > { %395 = vxpose.xlu1.b32.cont [12/16] (narrow) %v347_v40, 8 }
  0x45   : > { %363 = vxpose.xlu0.b32.cont [12/16] (narrow) %v331_v42, 8 }
  0x48   : > { %396 = vxpose.xlu1.b32.cont [13/16] (narrow) %v348_v50, 8 }
  0x49   : > { %364 = vxpose.xlu0.b32.cont [13/16] (narrow) %v332_v51, 8 }
  0x4c   : > { %397 = vxpose.xlu1.b32.cont [14/16] (narrow) %v349_v58, 8 }
  0x4d   : > { %365 = vxpose.xlu0.b32.cont [14/16] (narrow) %v333_v59, 8 }
  0x50   : > { %398 = vxpose.xlu1.b32.cont [15/16] (narrow) %v350_v62, 8 }
  0x51   : > { %366 = vxpose.xlu0.b32.cont [15/16] (narrow) %v334_v63, 8 }
  0x54   : > { %399 = vxpose.xlu1.b32.end [16/16] (narrow) %v351_v4, 8 }
  0x55   : > { %367 = vxpose.xlu0.b32.end [16/16] (narrow) %v335_v5, 8 }
  0x98   : > { %v400_v0 = vpop.trf.xlu1 }
  0x99   : > { %v368_v6 = vpop.trf.xlu0  ;;  %417 = vst [vmem:[%s208_s27 + $0x8] sm:$0xff] %v400_v0 }
  0x9a   : > { %416 = vst [vmem:[%s208_s27] sm:$0xff] %v368_v6 }
  0x9b PF: > { %s13_s14 = sadd.s32 1, %s566_s14   ;;  %s737_s12 = smov %s562_s13 }
  0x9c   : > { %p10_p5 = scmp.ge.s32.totalorder %s13_s14, 4   ;;  %s738_s13 = smov %s740_s15 }
  0x9e   :  { %12 = sbr.rel (!%p10_p5) target bundleno = 2 (0x2), region = 62 }

// kernel: decoder_forward.5
= control target key start
LH: loop header
LB: loop body
LE: loop exit
PB: predicated region body
PF: predicated region fallthrough
CT: control target
= control target key end

     0   :  { %s4343_s21 = smov 0   ;;  %s4345_s22 = smov 0   ;;  %s6447_s0 = inlined_call_operand.vmem [shape: f32[2,16,16,128], index: 0, kind: input, shape index: {}]   ;;  %s6448_s1 = inlined_call_operand.vmem [shape: f32[1,128], index: 1, kind: input, shape index: {}]   ;;  %s6449_s2 = inlined_call_operand.vmem [shape: f32[1,128], index: 2, kind: input, shape index: {}]   ;;  %s6450_s3 = inlined_call_operand.vmem [shape: f32[3,384,128], index: 3, kind: input, shape index: {}]   ;;  %s6451_s4 = inlined_call_operand.vmem [shape: f32[1,128], index: 4, kind: input, shape index: {}]   ;;  %s6452_s5 = inlined_call_operand.vmem [shape: f32[2,16,16,128], index: 5, kind: output, shape index: {0}]   ;;  %s6453_s6 = inlined_call_operand.vmem [shape: f32[2,1,2,128], index: 6, kind: output, shape index: {1}]  }
   0x1   :  { %s4347_s1 = smov 0  }
   0x2 LB: > { %s29_s2 = sadd.s32 1, %s4300_s22  ;;  %p3270_p0 = scmp.ge.s32.totalorder %s4304_s1, 1  ;;  %s4304_s1 = sphi %s4347_s1, %s17_s1   ;;  %s4300_s22 = sphi %s4345_s22, %s6666_s22   ;;  %s4296_s21 = sphi %s4343_s21, %s6665_s21  }
   0x3   : > { %p31_p1 = scmp.ge.s32.totalorder %s29_s2, 2  ;;  %p197_p2 = scmp.lt.s32.totalorder %s4304_s1, 3 }
   0x5   : > { %s6668_s2 = smov (%p31_p1, %s29_s2), 0  ;;  %p198_p3 = pnand %p3270_p0, %p197_p2 }
   0x7   : > { %201 = sbr.rel (%p198_p3) target bundleno = 703 (0x2bf), region = 36 }
   0xe   : > { %p233_p4 = scmp.lt.s32.totalorder %s4296_s21, 1  ;;  %s3274_s23 = sshll.u32 %s4296_s21, 8 }
   0xf   : > { %s4364_s26 = scalar_lea.vmem %s6447_s0, %s3274_s23 }
  0x10   : > { %s6670_s21 = smov (!%p233_p4, %s4296_s21), 1  ;;  %v337_v0 = vld [vmem:[%s4364_s26] sm:$0xff]  ;;  %v339_v1 = vld [vmem:[%s4364_s26 + $0x8] sm:$0xff]  ;;  %v341_v2 = vld [vmem:[%s4364_s26 + $0x10] sm:$0xff] }
  0x11   : > { %3275 = vst [vmem:[#allocation2 + $0x19] sm:$0xff] %v337_v0  ;;  %3276 = vst [vmem:[#allocation2 + $0x21] sm:$0xff] %v339_v1  ;;  %v343_v3 = vld [vmem:[%s4364_s26 + $0x18] sm:$0xff]  ;;  %v345_v4 = vld [vmem:[%s4364_s26 + $0x20] sm:$0xff]  ;;  %s3597_s27 = sshll.u32 %s6670_s21, 8  ;;  %s3273_s28 = sshll.u32 %s6670_s21, 1 }
  0x12   : > { %3277 = vst [vmem:[#allocation2 + $0x31] sm:$0xff] %v341_v2  ;;  %v347_v5 = vld [vmem:[%s4364_s26 + $0x28] sm:$0xff]  ;;  %3278 = vst [vmem:[#allocation2 + $0x39] sm:$0xff] %v343_v3  ;;  %v349_v6 = vld [vmem:[%s4364_s26 + $0x30] sm:$0xff]  ;;  %s4378_s7 = scalar_lea.vmem %s6452_s5, %s3597_s27  ;;  %s4383_s10 = scalar_lea.vmem %s6453_s6, %s3273_s28 }
  0x13   : > { %3279 = vst [vmem:[#allocation2 + $0x49] sm:$0xff] %v345_v4  ;;  %3280 = vst [vmem:[#allocation2 + $0x51] sm:$0xff] %v347_v5  ;;  %v351_v7 = vld [vmem:[%s4364_s26 + $0x38] sm:$0xff]  ;;  %v353_v8 = vld [vmem:[%s4364_s26 + $0x40] sm:$0xff] }
  0x14   : > { %3281 = vst [vmem:[#allocation2 + $0x61] sm:$0xff] %v349_v6  ;;  %3282 = vst [vmem:[#allocation2 + $0x69] sm:$0xff] %v351_v7  ;;  %v355_v9 = vld [vmem:[%s4364_s26 + $0x48] sm:$0xff]  ;;  %v357_v10 = vld [vmem:[%s4364_s26 + $0x50] sm:$0xff] }
  0x15   : > { %3283 = vst [vmem:[#allocation2 + $0x79] sm:$0xff] %v353_v8  ;;  %v359_v11 = vld [vmem:[%s4364_s26 + $0x58] sm:$0xff]  ;;  %3284 = vst [vmem:[#allocation2 + $0x81] sm:$0xff] %v355_v9  ;;  %v361_v12 = vld [vmem:[%s4364_s26 + $0x60] sm:$0xff] }
  0x16   : > { %3285 = vst [vmem:[#allocation2 + $0x91] sm:$0xff] %v357_v10  ;;  %3286 = vst [vmem:[#allocation2 + $0x99] sm:$0xff] %v359_v11  ;;  %v363_v13 = vld [vmem:[%s4364_s26 + $0x68] sm:$0xff]  ;;  %v365_v14 = vld [vmem:[%s4364_s26 + $0x70] sm:$0xff] }
  0x17   : > { %3287 = vst [vmem:[#allocation2 + $0xa9] sm:$0xff] %v361_v12  ;;  %3288 = vst [vmem:[#allocation2 + $0xb1] sm:$0xff] %v363_v13  ;;  %v367_v15 = vld [vmem:[%s4364_s26 + $0x78] sm:$0xff]  ;;  %v369_v16 = vld [vmem:[%s4364_s26 + $0x80] sm:$0xff] }
  0x18   : > { %3289 = vst [vmem:[#allocation2 + $0xc1] sm:$0xff] %v365_v14  ;;  %v371_v17 = vld [vmem:[%s4364_s26 + $0x88] sm:$0xff]  ;;  %3290 = vst [vmem:[#allocation2 + $0xc9] sm:$0xff] %v367_v15  ;;  %v373_v18 = vld [vmem:[%s4364_s26 + $0x90] sm:$0xff] }
  0x19   : > { %3291 = vst [vmem:[#allocation2 + $0xd9] sm:$0xff] %v369_v16  ;;  %3292 = vst [vmem:[#allocation2 + $0xe1] sm:$0xff] %v371_v17  ;;  %v375_v19 = vld [vmem:[%s4364_s26 + $0x98] sm:$0xff]  ;;  %v377_v20 = vld [vmem:[%s4364_s26 + $0xa0] sm:$0xff] }
  0x1a   : > { %3293 = vst [vmem:[#allocation2 + $0xf1] sm:$0xff] %v373_v18  ;;  %3294 = vst [vmem:[#allocation2 + $0xf9] sm:$0xff] %v375_v19  ;;  %v379_v21 = vld [vmem:[%s4364_s26 + $0xa8] sm:$0xff]  ;;  %v381_v22 = vld [vmem:[%s4364_s26 + $0xb0] sm:$0xff] }
  0x1b   : > { %3295 = vst [vmem:[#allocation2 + $0x109] sm:$0xff] %v377_v20  ;;  %v383_v23 = vld [vmem:[%s4364_s26 + $0xb8] sm:$0xff]  ;;  %3296 = vst [vmem:[#allocation2 + $0x111] sm:$0xff] %v379_v21  ;;  %v385_v24 = vld [vmem:[%s4364_s26 + $0xc0] sm:$0xff] }
  0x1c   : > { %3297 = vst [vmem:[#allocation2 + $0x121] sm:$0xff] %v381_v22  ;;  %3298 = vst [vmem:[#allocation2 + $0x129] sm:$0xff] %v383_v23  ;;  %v387_v25 = vld [vmem:[%s4364_s26 + $0xc8] sm:$0xff]  ;;  %v389_v26 = vld [vmem:[%s4364_s26 + $0xd0] sm:$0xff] }
  0x1d   : > { %3299 = vst [vmem:[#allocation2 + $0x139] sm:$0xff] %v385_v24  ;;  %3300 = vst [vmem:[#allocation2 + $0x141] sm:$0xff] %v387_v25  ;;  %v391_v27 = vld [vmem:[%s4364_s26 + $0xd8] sm:$0xff]  ;;  %v393_v28 = vld [vmem:[%s4364_s26 + $0xe0] sm:$0xff] }
  0x1e   : > { %3301 = vst [vmem:[#allocation2 + $0x151] sm:$0xff] %v389_v26  ;;  %v395_v29 = vld [vmem:[%s4364_s26 + $0xe8] sm:$0xff]  ;;  %3302 = vst [vmem:[#allocation2 + $0x159] sm:$0xff] %v391_v27  ;;  %v397_v30 = vld [vmem:[%s4364_s26 + $0xf0] sm:$0xff] }
  0x1f   : > { %3303 = vst [vmem:[#allocation2 + $0x169] sm:$0xff] %v393_v28  ;;  %3304 = vst [vmem:[#allocation2 + $0x171] sm:$0xff] %v395_v29  ;;  %v399_v31 = vld [vmem:[%s4364_s26 + $0xf8] sm:$0xff] }
  0x20   : > { %3305 = vst [vmem:[#allocation2 + $0x181] sm:$0xff] %v397_v30  ;;  %3306 = vst [vmem:[#allocation2 + $0x189] sm:$0xff] %v399_v31 }
  0x21   : > { %408 = vsyncadd [#allocation3], 4096 }
  0x22   : > { %4292 = dma.done.wait [#allocation3], 4096 }
  0x23   : > { %4293 = vsyncadd [#allocation3], 4294963200  ;;  %v6456_v32 = vmov 0.0|0.0   ;;  %v3446_v33 = vld [vmem:[%s6450_s3 + $0x180] sm:$0xff]  ;;  %v3447_v34 = vld [vmem:[%s6450_s3 + $0x188] sm:$0xff]  ;;  %v863_v36 = vlaneseq  ;;  %vm1109_vm1 = vcmask 1045504  }
  0x24   : > { %3982 = vmatprep.subr.bf16.mxu0 %v6456_v32  ;;  %v3478_v35 = vld [vmem:[%s6450_s3 + $0x280] sm:$0xff]  ;;  %v3983_v37 = vpack.c.bf16 %v3447_v34, %v3446_v33  ;;  %v3479_v38 = vld [vmem:[%s6450_s3 + $0x288] sm:$0xff]  ;;  %v3448_v39 = vld [vmem:[%s6450_s3 + $0x190] sm:$0xff]  ;;  %vm996_vm2 = vcmask 1046528   ;;  %vm2995_vm4 = vcmask 1040384  }
  0x25   : > { %v3449_v40 = vld [vmem:[%s6450_s3 + $0x198] sm:$0xff]  ;;  %v4030_v41 = vpack.c.bf16 %v3479_v38, %v3478_v35  ;;  %v3480_v42 = vld [vmem:[%s6450_s3 + $0x290] sm:$0xff]  ;;  %v3482_v46 = vld [vmem:[%s6450_s3 + $0x2a0] sm:$0xff]  ;;  %v4446_v50 = vshrl.u32 %v863_v36, 7 }
  0x26   : > { %v3481_v43 = vld [vmem:[%s6450_s3 + $0x298] sm:$0xff]  ;;  %3984 = vmatpush1.bf16.msra.mxu0 %v3983_v37  ;;  %v3986_v44 = vpack.c.bf16 %v3449_v40, %v3448_v39  ;;  %v3483_v47 = vld [vmem:[%s6450_s3 + $0x2a8] sm:$0xff]  ;;  %v3450_v48 = vld [vmem:[%s6450_s3 + $0x1a0] sm:$0xff] }
  0x27   : > { %v4034_v45 = vpack.c.bf16 %v3481_v43, %v3480_v42  ;;  %4031 = vmatprep.subr.bf16.mxu1 %v4030_v41  ;;  %3985 = vmatprep.subr.bf16.mxu0 %v6456_v32  ;;  %v3451_v49 = vld [vmem:[%s6450_s3 + $0x1a8] sm:$0xff]  ;;  %v4038_v51 = vpack.c.bf16 %v3483_v47, %v3482_v46  ;;  %v3484_v53 = vld [vmem:[%s6450_s3 + $0x2b0] sm:$0xff]  ;;  %v3485_v54 = vld [vmem:[%s6450_s3 + $0x2b8] sm:$0xff]  ;;  %vm867_vm0 = vcmp.ge.s32.totalorder %v4446_v50, 1  ;;  %v4516_v18 = vadd.s32 16, %v4446_v50 }
  0x28   : > { %4033 = vmatpush3.bf16.msra.mxu1 %v4030_v41  ;;  %v3989_v52 = vpack.c.bf16 %v3451_v49, %v3450_v48  ;;  %v3452_v55 = vld [vmem:[%s6450_s3 + $0x1b0] sm:$0xff]  ;;  %v3453_v56 = vld [vmem:[%s6450_s3 + $0x1b8] sm:$0xff]  ;;  %v4042_v57 = vpack.c.bf16 %v3485_v54, %v3484_v53  ;;  %v3486_v60 = vld [vmem:[%s6450_s3 + $0x2c0] sm:$0xff] }
  0x29   : > { %4035 = vmatprep.subr.bf16.mxu1 %v4034_v45  ;;  %v4462_v58 = vld [vmem:[#allocation2 + $0x18] sm:$0xff]  ;;  %v3992_v59 = vpack.c.bf16 %v3453_v56, %v3452_v55  ;;  %v3487_v61 = vld [vmem:[%s6450_s3 + $0x2c8] sm:$0xff]  ;;  %v4470_v62 = vld [vmem:[#allocation2 + $0x20] sm:$0xff]  ;;  %vm872_vm3 = vcmp.le.s32.totalorder %v4516_v18, 16 }
  0x2a   : > { %3987 = vmatpush1.bf16.msra.mxu0 %v3986_v44  ;;  %v897_v63 = vsel %vm867_vm0, %v4462_v58, 0.0  ;;  %v3454_v0 = vld [vmem:[%s6450_s3 + $0x1c0] sm:$0xff]  ;;  %v3455_v1 = vld [vmem:[%s6450_s3 + $0x1c8] sm:$0xff]  ;;  %v1116_v3 = vrot.slane %v4470_v62, 2  ;;  %v1003_v5 = vrot.slane %v4470_v62, 1  ;;  %v4046_v6 = vpack.c.bf16 %v3487_v61, %v3486_v60  ;;  %v3488_v9 = vld [vmem:[%s6450_s3 + $0x2d0] sm:$0xff] }
  0x2b   : > { %3988 = vmatprep.subr.bf16.mxu0 %v6456_v32  ;;  %v1115_v2 = vrot.slane %v897_v63, 2  ;;  %v1002_v4 = vrot.slane %v897_v63, 1  ;;  %v3995_v8 = vpack.c.bf16 %v3455_v1, %v3454_v0  ;;  %v3489_v10 = vld [vmem:[%s6450_s3 + $0x2d8] sm:$0xff]  ;;  %v3456_v12 = vld [vmem:[%s6450_s3 + $0x1d0] sm:$0xff]  ;;  %v3490_v16 = vld [vmem:[%s6450_s3 + $0x2e0] sm:$0xff] }
  0x2c   : > { %4037 = vmatpush3.bf16.msra.mxu1 %v4034_v45  ;;  %v3457_v13 = vld [vmem:[%s6450_s3 + $0x1d8] sm:$0xff]  ;;  %v4050_v14 = vpack.c.bf16 %v3489_v10, %v3488_v9  ;;  %v3491_v17 = vld [vmem:[%s6450_s3 + $0x2e8] sm:$0xff]  ;;  %v3458_v19 = vld [vmem:[%s6450_s3 + $0x1e0] sm:$0xff] }
  0x2d   : > { %4039 = vmatprep.subr.bf16.mxu1 %v4038_v51  ;;  %v4487_v7 = vsel %vm1109_vm1, %v1115_v2, %v1116_v3  ;;  %v4499_v11 = vsel %vm996_vm2, %v1002_v4, %v1003_v5  ;;  %v3998_v15 = vpack.c.bf16 %v3457_v13, %v3456_v12  ;;  %v3459_v20 = vld [vmem:[%s6450_s3 + $0x1e8] sm:$0xff]  ;;  %v4054_v21 = vpack.c.bf16 %v3491_v17, %v3490_v16  ;;  %v3492_v23 = vld [vmem:[%s6450_s3 + $0x2f0] sm:$0xff]  ;;  %v3493_v24 = vld [vmem:[%s6450_s3 + $0x2f8] sm:$0xff] }
  0x2e   : > { %3990 = vmatpush1.bf16.msra.mxu0 %v3989_v52  ;;  %6544 = vst [vmem:[#allocation11_spill] sm:$0xff] %v4487_v7  ;;  %3774 = vmatprep.mubr.f32.mxu1 %v4487_v7  ;;  %6545 = vst [vmem:[#allocation12_spill] sm:$0xff] %v4499_v11  ;;  %v4001_v22 = vpack.c.bf16 %v3459_v20, %v3458_v19  ;;  %v814_v25 = vld [vmem:[#allocation2 + $0x28] sm:$0x3]  ;;  %v3460_v26 = vld [vmem:[%s6450_s3 + $0x1f0] sm:$0xff]  ;;  %v4058_v29 = vpack.c.bf16 %v3493_v24, %v3492_v23 }
  0x2f   : > { %3991 = vmatprep.subr.bf16.mxu0 %v6456_v32  ;;  %1400 = vmatprep.mubr.f32.mxu0 %v4499_v11  ;;  %v3461_v27 = vld [vmem:[%s6450_s3 + $0x1f8] sm:$0xff]  ;;  %v4539_v28 = vld [vmem:[#allocation2 + $0x30] sm:$0xff]  ;;  %v4543_v30 = vsel %vm872_vm3, %v814_v25, 0.0  ;;  %v817_v35 = vld [vmem:[#allocation2 + $0x40] sm:$0x3] }
  0x30   : > { %4041 = vmatpush3.bf16.msra.mxu1 %v4038_v51  ;;  %v4004_v31 = vpack.c.bf16 %v3461_v27, %v3460_v26  ;;  %v4545_v33 = vld [vmem:[#allocation2 + $0x38] sm:$0xff]  ;;  %v4550_v34 = vsel %vm867_vm0, %v4539_v28, 0.0  ;;  %v3462_v36 = vld [vmem:[%s6450_s3 + $0x200] sm:$0xff]  ;;  %v3463_v37 = vld [vmem:[%s6450_s3 + $0x208] sm:$0xff]  ;;  %v1118_v39 = vrot.slane %v4543_v30, 2  ;;  %v4572_v44 = vsel %vm872_vm3, %v817_v35, 0.0 }
  0x31   : > { %4043 = vmatprep.subr.bf16.mxu1 %v4042_v57  ;;  %v4559_v38 = vld [vmem:[#allocation2 + $0x48] sm:$0xff]  ;;  %v1222_v40 = vld [vmem:[%s6450_s3] sm:$0xff]  ;;  %v1120_v42 = vrot.slane %v4550_v34, 2  ;;  %v1121_v43 = vrot.slane %v4545_v33, 2  ;;  %v4007_v45 = vpack.c.bf16 %v3463_v37, %v3462_v36  ;;  %v4574_v46 = vld [vmem:[#allocation2 + $0x50] sm:$0xff]  ;;  %v1123_v55 = vrot.slane %v4572_v44, 2 }
  0x32   : > { %3993 = vmatpush1.bf16.msra.mxu0 %v3992_v59  ;;  %v1223_v41 = vld [vmem:[%s6450_s3 + $0x8] sm:$0xff]  ;;  %v4579_v47 = vsel %vm867_vm0, %v4559_v38, 0.0  ;;  %v820_v48 = vld [vmem:[#allocation2 + $0x58] sm:$0x3]  ;;  %v3464_v49 = vld [vmem:[%s6450_s3 + $0x210] sm:$0xff]  ;;  %v4593_v53 = vsel %vm1109_vm1, %v1116_v3, %v1118_v39  ;;  %v1126_v61 = vrot.slane %v4574_v46, 2 }
  0x33   : > { %3994 = vmatprep.subr.bf16.mxu0 %v6456_v32  ;;  %v3465_v51 = vld [vmem:[%s6450_s3 + $0x218] sm:$0xff]  ;;  %v4588_v52 = vld [vmem:[#allocation2 + $0x60] sm:$0xff]  ;;  %6546 = vst [vmem:[#allocation13_spill] sm:$0xff] %v4593_v53  ;;  %v4063_v54 = vpack.c.bf16 %v1223_v41, %v1222_v40  ;;  %v4598_v56 = vsel %vm1109_vm1, %v1120_v42, %v1121_v43  ;;  %v1125_v60 = vrot.slane %v4579_v47, 2  ;;  %v4610_v63 = vsel %vm872_vm3, %v820_v48, 0.0  ;;  %v4612_v1 = vld [vmem:[#allocation2 + $0x68] sm:$0xff] }
  0x34   : > { %4045 = vmatpush3.bf16.msra.mxu1 %v4042_v57  ;;  %6547 = vst [vmem:[#allocation14_spill] sm:$0xff] %v4598_v56  ;;  %v1224_v57 = vld [vmem:[%s6450_s3 + $0x10] sm:$0xff]  ;;  %v1225_v59 = vld [vmem:[%s6450_s3 + $0x18] sm:$0xff]  ;;  %v4010_v0 = vpack.c.bf16 %v3465_v51, %v3464_v49  ;;  %v4617_v2 = vsel %vm867_vm0, %v4588_v52, 0.0  ;;  %v3466_v4 = vld [vmem:[%s6450_s3 + $0x220] sm:$0xff]  ;;  %v4631_v9 = vsel %vm1109_vm1, %v1121_v43, %v1123_v55  ;;  %v1128_v12 = vrot.slane %v4610_v63, 2 }
  0x35   : > { %4047 = vmatprep.subr.bf16.mxu1 %v4046_v6  ;;  %v823_v3 = vld [vmem:[#allocation2 + $0x70] sm:$0x3]  ;;  %6548 = vst [vmem:[#allocation15_spill] sm:$0xff] %v4631_v9  ;;  %v4066_v10 = vpack.c.bf16 %v1225_v59, %v1224_v57  ;;  %v826_v13 = vld [vmem:[#allocation2 + $0x88] sm:$0x3]  ;;  %v1130_v17 = vrot.slane %v4617_v2, 2 }
  0x36   : > { %3996 = vmatpush1.bf16.msra.mxu0 %v3995_v8  ;;  %v4627_v8 = vld [vmem:[#allocation2 + $0x78] sm:$0xff]  ;;  %v1227_v16 = vld [vmem:[%s6450_s3 + $0x28] sm:$0xff]  ;;  %v1131_v19 = vrot.slane %v4612_v1, 2  ;;  %v4648_v20 = vsel %vm872_vm3, %v823_v3, 0.0  ;;  %v4653_v23 = vld [vmem:[#allocation2 + $0x80] sm:$0xff]  ;;  %v1005_v35 = vrot.slane %v4543_v30, 1  ;;  %v4684_v36 = vsel %vm1109_vm1, %v1126_v61, %v1128_v12 }
  0x37   : > { %3997 = vmatprep.subr.bf16.mxu0 %v6456_v32  ;;  %v4658_v24 = vsel %vm867_vm0, %v4627_v8, 0.0  ;;  %v4660_v25 = vld [vmem:[#allocation2 + $0x90] sm:$0xff]  ;;  %v3469_v26 = vld [vmem:[%s6450_s3 + $0x238] sm:$0xff]  ;;  %6551 = vst [vmem:[#allocation18_spill] sm:$0xff] %v4684_v36  ;;  %v1133_v39 = vrot.slane %v4648_v20, 2  ;;  %v4690_v40 = vld [vmem:[%s6450_s3 + $0x240] sm:$0xff] }
  0x38   : > { %4049 = vmatpush3.bf16.msra.mxu1 %v4046_v6  ;;  %v3467_v6 = vld [vmem:[%s6450_s3 + $0x228] sm:$0xff]  ;;  %6550 = vst [vmem:[#allocation17_spill] sm:$0xff] %v4660_v25  ;;  %v4670_v27 = vld [vmem:[%s6450_s3 + $0x30] sm:$0xff]  ;;  %v4692_v41 = vld [vmem:[#allocation2 + $0x98] sm:$0xff]  ;;  %v4696_v30 = vsel %vm1109_vm1, %v1130_v17, %v1131_v19  ;;  %v1135_v43 = vrot.slane %v4658_v24, 2  ;;  %v4713_v51 = vsel %vm867_vm0, %v4660_v25, 0.0 }
  0x39   : > { %4051 = vmatprep.subr.bf16.mxu1 %v4050_v14  ;;  %v829_v42 = vld [vmem:[#allocation2 + $0xa0] sm:$0x3]  ;;  %6552 = vst [vmem:[#allocation19_spill] sm:$0xff] %v4696_v30  ;;  %v4703_v48 = vld [vmem:[%s6450_s3 + $0x248] sm:$0xff]  ;;  %v1141_v3 = vrot.slane %v4692_v41, 2  ;;  %v1140_v17 = vrot.slane %v4713_v51, 2 }
  0x3a   : > { %3999 = vmatpush1.bf16.msra.mxu0 %v3998_v15  ;;  %v1226_v15 = vld [vmem:[%s6450_s3 + $0x20] sm:$0xff]  ;;  %v4721_v59 = vld [vmem:[%s6450_s3 + $0x48] sm:$0xff]  ;;  %v832_v12 = vld [vmem:[#allocation2 + $0xb8] sm:$0x3] }
  0x3b   : > { %4000 = vmatprep.subr.bf16.mxu0 %v6456_v32  ;;  %v4069_v37 = vpack.c.bf16 %v1227_v16, %v1226_v15  ;;  %v4708_v49 = vld [vmem:[%s6450_s3 + $0x40] sm:$0xff]  ;;  %v4759_v15 = vsel %vm1109_vm1, %v1131_v19, %v1133_v39  ;;  %v4019_v16 = vpack.c.bf16 %v4703_v48, %v4690_v40  ;;  %v838_v39 = vld [vmem:[#allocation2 + $0xe8] sm:$0x3]  ;;  %v1007_v40 = vrot.slane %v4550_v34, 1 }
  0x3c   : > { %4053 = vmatpush3.bf16.msra.mxu1 %v4050_v14  ;;  %v4636_v14 = vsel %vm1109_vm1, %v1125_v60, %v1126_v61  ;;  %v4726_v60 = vld [vmem:[%s6450_s3 + $0x250] sm:$0xff]  ;;  %v4731_v61 = vld [vmem:[%s6450_s3 + $0x258] sm:$0xff]  ;;  %6555 = vst [vmem:[#allocation22_spill] sm:$0xff] %v4759_v15  ;;  %v4796_v48 = vld [vmem:[%s6450_s3 + $0x268] sm:$0xff]  ;;  %v4823_v34 = vsel %vm1109_vm1, %v1140_v17, %v1141_v3  ;;  %v4845_v17 = vsel %vm872_vm3, %v838_v39, 0.0 }
  0x3d   : > { %4055 = vmatprep.subr.bf16.mxu1 %v4054_v21  ;;  %6549 = vst [vmem:[#allocation16_spill] sm:$0xff] %v4636_v14  ;;  %6567 = vst [vmem:[#allocation34_spill] sm:$0xff] %v4823_v34 }
  0x3e   : > { %4002 = vmatpush1.bf16.msra.mxu0 %v4001_v22  ;;  %v3468_v22 = vld [vmem:[%s6450_s3 + $0x230] sm:$0xff]  ;;  %6570 = vst [vmem:[#allocation37_spill] sm:$0xff] %v4845_v17 }
  0x3f   : > { %4003 = vmatprep.subr.bf16.mxu0 %v6456_v32  ;;  %v4016_v55 = vpack.c.bf16 %v3469_v26, %v3468_v22  ;;  %v835_v26 = vld [vmem:[#allocation2 + $0xd0] sm:$0x3] }
  0x40   : > { %4057 = vmatpush3.bf16.msra.mxu1 %v4054_v21  ;;  %v4013_v21 = vpack.c.bf16 %v3467_v6, %v3466_v4  ;;  %v4740_v4 = vsel %vm872_vm3, %v829_v42, 0.0  ;;  %v4745_v6 = vld [vmem:[%s6450_s3 + $0x50] sm:$0xff] }
  0x41   : > { %4059 = vmatprep.subr.bf16.mxu1 %v4058_v29  ;;  %6554 = vst [vmem:[#allocation21_spill] sm:$0xff] %v4740_v4 }
  0x42   : > { %4005 = vmatpush1.bf16.msra.mxu0 %v4004_v31  ;;  %v4679_v31 = vsel %vm872_vm3, %v826_v13, 0.0  ;;  %v4755_v13 = vsel %vm996_vm2, %v1003_v5, %v1005_v35  ;;  %v4771_v5 = vld [vmem:[#allocation2 + $0xc0] sm:$0xff] }
  0x43   : > { %4006 = vmatprep.subr.bf16.mxu0 %v6456_v32  ;;  %v1138_v57 = vrot.slane %v4679_v31, 2  ;;  %6558 = vst [vmem:[#allocation25_spill] sm:$0xff] %v4771_v5  ;;  %v4784_v35 = vld [vmem:[%s6450_s3 + $0x260] sm:$0xff] }
  0x44   : > { %4061 = vmatpush3.bf16.msra.mxu1 %v4058_v29  ;;  %v4675_v29 = vld [vmem:[%s6450_s3 + $0x38] sm:$0xff] }
  0x45   : > { %4062 = vmatprep.subr.bf16.mxu1 %v6456_v32 }
  0x46   : > { %4008 = vmatpush1.bf16.msra.mxu0 %v4007_v45  ;;  %v1136_v45 = vrot.slane %v4653_v23, 2 }
  0x47   : > { %3775 = vmatmul.mubr.f32.vlgmr.msra.gmra.mrb[0].mxu1 %v4593_v53  ;;  %4009 = vmatprep.subr.bf16.mxu0 %v6456_v32  ;;  %v4857_v53 = vld [vmem:[#allocation2 + $0xf8] sm:$0xff] }
  0x48   : > { %4064 = vmatpush1.bf16.msra.mxu1 %v4063_v54  ;;  %3777 = vmatprep.mubr.f32.mxu1 %v4598_v56  ;;  %v4715_v54 = vld [vmem:[#allocation2 + $0xa8] sm:$0xff]  ;;  %v4775_v19 = vsel %vm1109_vm1, %v1135_v43, %v1136_v45  ;;  %v4790_v42 = vsel %vm1109_vm1, %v1136_v45, %v1138_v57  ;;  %v1143_v43 = vrot.slane %v4740_v4, 2  ;;  %v4815_v57 = vsel %vm867_vm0, %v4771_v5, 0.0  ;;  %v4855_v56 = vld [vmem:[%s6450_s3 + $0x270] sm:$0xff]  ;;  %6572 = vst [vmem:[#allocation38_spill] sm:$0xff] %v4857_v53 }
  0x49   : > { %4065 = vmatprep.subr.bf16.mxu1 %v6456_v32  ;;  %6553 = vst [vmem:[#allocation20_spill] sm:$0xff] %v4715_v54  ;;  %v4769_v22 = vsel %vm867_vm0, %v4715_v54, 0.0  ;;  %6559 = vst [vmem:[#allocation26_spill] sm:$0xff] %v4775_v19  ;;  %v4877_v54 = vld [vmem:[%s6450_s3 + $0x70] sm:$0xff]  ;;  %v844_v4 = vld [vmem:[#allocation2 + $0x118] sm:$0x3] }
  0x4a   : > { %4011 = vmatpush1.bf16.msra.mxu0 %v4010_v0  ;;  %v4072_v0 = vpack.c.bf16 %v4675_v29, %v4670_v27  ;;  %6557 = vst [vmem:[#allocation24_spill] sm:$0xff] %v4769_v22  ;;  %v4075_v27 = vpack.c.bf16 %v4721_v59, %v4708_v49  ;;  %6561 = vst [vmem:[#allocation28_spill] sm:$0xff] %v4790_v42  ;;  %v4800_v49 = vsel %vm872_vm3, %v832_v12, 0.0  ;;  %v4802_v59 = vld [vmem:[#allocation2 + $0xc8] sm:$0xff]  ;;  %v4804_v29 = vld [vmem:[#allocation2 + $0xf0] sm:$0xff]  ;;  %v4819_v12 = vsel %vm872_vm3, %v835_v26, 0.0 }
  0x4b   : > { %3778 = vmatmul.mubr.f32.gmra.mrb[2].mxu1 %v4631_v9  ;;  %4012 = vmatprep.subr.bf16.mxu0 %v6456_v32  ;;  %6562 = vst [vmem:[#allocation29_spill] sm:$0xff] %v4800_v49  ;;  %6563 = vst [vmem:[#allocation30_spill] sm:$0xff] %v4802_v59  ;;  %v4836_v26 = vld [vmem:[#allocation2 + $0xe0] sm:$0xff]  ;;  %v1151_v9 = vrot.slane %v4802_v59, 2  ;;  %v4862_v39 = vsel %vm867_vm0, %v4804_v29, 0.0  ;;  %v4865_v7 = vsel %vm1109_vm1, %v1141_v3, %v1143_v43  ;;  %v1153_v5 = vrot.slane %v4819_v12, 2 }
  0x4c   : > { %4067 = vmatpush1.bf16.msra.mxu1 %v4066_v10  ;;  %3780 = vmatprep.mubr.f32.mxu1 %v4636_v14  ;;  %v4750_v10 = vld [vmem:[%s6450_s3 + $0x58] sm:$0xff]  ;;  %6564 = vst [vmem:[#allocation31_spill] sm:$0xff] %v4804_v29  ;;  %6565 = vst [vmem:[#allocation32_spill] sm:$0xff] %v4815_v57  ;;  %v1148_v14 = vrot.slane %v4800_v49, 2  ;;  %v4883_v3 = vld [vmem:[#allocation2 + $0x108] sm:$0xff]  ;;  %v1156_v59 = vrot.slane %v4836_v26, 2 }
  0x4d   : > { %4068 = vmatprep.subr.bf16.mxu1 %v6456_v32  ;;  %6566 = vst [vmem:[#allocation33_spill] sm:$0xff] %v4819_v12  ;;  %6568 = vst [vmem:[#allocation35_spill] sm:$0xff] %v4836_v26  ;;  %v4892_v29 = vld [vmem:[%s6450_s3 + $0x78] sm:$0xff]  ;;  %v4905_v43 = vld [vmem:[%s6450_s3 + $0x88] sm:$0xff]  ;;  %v1160_v26 = vrot.slane %v4862_v39, 2 }
  0x4e   : > { %4014 = vmatpush1.bf16.msra.mxu0 %v4013_v21  ;;  %v4764_v21 = vld [vmem:[#allocation2 + $0xb0] sm:$0xff]  ;;  %6573 = vst [vmem:[#allocation39_spill] sm:$0xff] %v4865_v7  ;;  %6574 = vst [vmem:[#allocation40_spill] sm:$0xff] %v4883_v3  ;;  %v4921_v49 = vld [vmem:[%s6450_s3 + $0x98] sm:$0xff] }
  0x4f   : > { %3781 = vmatmul.mubr.f32.gmra.mrb[4].mxu1 %v4684_v36  ;;  %4015 = vmatprep.subr.bf16.mxu0 %v6456_v32  ;;  %6556 = vst [vmem:[#allocation23_spill] sm:$0xff] %v4764_v21  ;;  %v1146_v45 = vrot.slane %v4764_v21, 2  ;;  %v1150_v36 = vrot.slane %v4815_v57, 2  ;;  %v4935_v21 = vld [vmem:[#allocation2 + $0x110] sm:$0xff] }
  0x50   : > { %4070 = vmatpush1.bf16.msra.mxu1 %v4069_v37  ;;  %3783 = vmatprep.mubr.f32.mxu1 %v4696_v30  ;;  %v4786_v37 = vld [vmem:[#allocation2 + $0xd8] sm:$0xff]  ;;  %v841_v30 = vld [vmem:[#allocation2 + $0x100] sm:$0x3] }
  0x51   : > { %4071 = vmatprep.subr.bf16.mxu1 %v6456_v32  ;;  %6560 = vst [vmem:[#allocation27_spill] sm:$0xff] %v4786_v37 }
  0x52   : > { %4017 = vmatpush1.bf16.msra.mxu0 %v4016_v55  ;;  %v1145_v55 = vrot.slane %v4769_v22, 2  ;;  %v4940_v22 = vsel %vm867_vm0, %v4883_v3, 0.0  ;;  %v847_v3 = vld [vmem:[#allocation2 + $0x130] sm:$0x3] }
  0x53   : > { %3784 = vmatmul.mubr.f32.gmra.mrb[6].mxu1 %v4759_v15  ;;  %4018 = vmatprep.subr.bf16.mxu0 %v6456_v32  ;;  %v4829_v32 = vld [vmem:[%s6450_s3 + $0x60] sm:$0xff]  ;;  %v4834_v15 = vld [vmem:[%s6450_s3 + $0x68] sm:$0xff] }
  0x54   : > { %4073 = vmatpush1.bf16.msra.mxu1 %v4072_v0  ;;  %3786 = vmatprep.mubr.f32.mxu1 %v4775_v19  ;;  %v4841_v0 = vsel %vm867_vm0, %v4786_v37, 0.0  ;;  %v6571_v19 = vmov 0.0|0.0   ;;  %v4871_v37 = vld [vmem:[%s6450_s3 + $0x278] sm:$0xff]  ;;  %v4909_v57 = vsel %vm1109_vm1, %v1145_v55, %v1146_v45  ;;  %v4930_v55 = vsel %vm1109_vm1, %v1146_v45, %v1148_v14 }
  0x55   : > { %6569 = vst [vmem:[#allocation36_spill] sm:$0xff] %v4841_v0  ;;  %4074 = vmatprep.subr.bf16.mxu1 %v6571_v19  ;;  %v1155_v12 = vrot.slane %v4841_v0, 2  ;;  %6575 = vst [vmem:[#allocation41_spill] sm:$0xff] %v4909_v57  ;;  %v4916_v0 = vld [vmem:[%s6450_s3 + $0x90] sm:$0xff]  ;;  %v4028_v25 = vpack.c.bf16 %v4871_v37, %v4855_v56  ;;  %v4946_v14 = vsel %vm1109_vm1, %v1150_v36, %v1151_v9 }
  0x56   : > { %4020 = vmatpush1.bf16.msra.mxu0 %v4019_v16  ;;  %v4881_v16 = vsel %vm872_vm3, %v841_v30, 0.0  ;;  %v1158_v30 = vrot.slane %v4845_v17, 2  ;;  %v1161_v17 = vrot.slane %v4857_v53, 2  ;;  %6577 = vst [vmem:[#allocation42_spill] sm:$0xff] %v4930_v55  ;;  %6579 = vst [vmem:[#allocation43_spill] sm:$0xff] %v4946_v14  ;;  %v4949_v45 = vsel %vm1109_vm1, %v1151_v9, %v1153_v5  ;;  %v4968_v5 = vld [vmem:[#allocation2 + $0x138] sm:$0xff] }
  0x57   : > { %3787 = vmatmul.mubr.f32.gmra.mrb[8].mxu1 %v4790_v42  ;;  %4021 = vmatprep.subr.bf16.mxu0 %v6571_v19  ;;  %v4900_v42 = vld [vmem:[%s6450_s3 + $0x80] sm:$0xff]  ;;  %v1163_v11 = vrot.slane %v4881_v16, 2  ;;  %6580 = vst [vmem:[#allocation44_spill] sm:$0xff] %v4949_v45  ;;  %6584 = vst [vmem:[#allocation48_spill] sm:$0xff] %v4968_v5  ;;  %v6585_v37 = vpack.c.bf16 %v4750_v10, %v4745_v6  ;;  %v4981_v9 = vsel %vm872_vm3, %v844_v4, 0.0  ;;  %v1255_v10 = vld [vmem:[%s6450_s3 + $0x108] sm:$0xff] }
  0x58   : > { %4076 = vmatpush1.bf16.msra.mxu1 %v4075_v27  ;;  %3789 = vmatprep.mubr.f32.mxu1 %v4823_v34  ;;  %v6576_v27 = vrot.slane %v4545_v33, 1  ;;  %v4963_v36 = vsel %vm1109_vm1, %v1156_v59, %v1158_v30  ;;  %v1254_v6 = vld [vmem:[%s6450_s3 + $0x100] sm:$0xff]  ;;  %v1047_v30 = vrot.slane %v4862_v39, 1  ;;  %v6588_v56 = vpack.c.bf16 %v4796_v48, %v4784_v35  ;;  %v856_v48 = vld [vmem:[#allocation2 + $0x178] sm:$0x3] }
  0x59   : > { %4077 = vmatprep.subr.bf16.mxu1 %v6571_v19  ;;  %6583 = vst [vmem:[#allocation47_spill] sm:$0xff] %v4963_v36  ;;  %v4110_v39 = vpack.c.bf16 %v1255_v10, %v1254_v6  ;;  %v1256_v6 = vld [vmem:[%s6450_s3 + $0x110] sm:$0xff]  ;;  %v1257_v10 = vld [vmem:[%s6450_s3 + $0x118] sm:$0xff] }
  0x5a   : > { %v4926_v34 = vsel %vm996_vm2, %v1007_v40, %v6576_v27  ;;  %v6578_v40 = vpack.c.bf16 %v4731_v61, %v4726_v60  ;;  %v4955_v27 = vld [vmem:[#allocation2 + $0x120] sm:$0xff]  ;;  %v4960_v60 = vsel %vm1109_vm1, %v1155_v12, %v1156_v59  ;;  %v4975_v12 = vsel %vm1109_vm1, %v1160_v26, %v1161_v17  ;;  %v4983_v61 = vld [vmem:[#allocation2 + $0x150] sm:$0xff] }
  0x5b   : > { %6581 = vst [vmem:[#allocation45_spill] sm:$0xff] %v4955_v27  ;;  %3790 = vmatmul.mubr.f32.gmra.mrb[10].mxu1 %v4865_v7  ;;  %6582 = vst [vmem:[#allocation46_spill] sm:$0xff] %v4960_v60  ;;  %v4993_v26 = vsel %vm1109_vm1, %v1161_v17, %v1163_v11  ;;  %v4998_v4 = vsel %vm867_vm0, %v4955_v27, 0.0  ;;  %v853_v59 = vld [vmem:[#allocation2 + $0x160] sm:$0x3]  ;;  %v5011_v11 = vsel %vm867_vm0, %v4968_v5, 0.0  ;;  %v6590_v5 = vpack.c.bf16 %v4834_v15, %v4829_v32 }
  0x5c   : > { %4023 = vmatpush1.bf16.msra.mxu0 %v6578_v40  ;;  %v850_v40 = vld [vmem:[#allocation2 + $0x148] sm:$0x3]  ;;  %4079 = vmatpush1.bf16.msra.mxu1 %v6585_v37  ;;  %6586 = vst [vmem:[#allocation49_spill] sm:$0xff] %v4975_v12  ;;  %6587 = vst [vmem:[#allocation50_spill] sm:$0xff] %v4983_v61  ;;  %v5002_v37 = vsel %vm872_vm3, %v847_v3, 0.0  ;;  %v1048_v3 = vrot.slane %v4857_v53, 1 }
  0x5d   : > { %4024 = vmatprep.subr.bf16.mxu0 %v6571_v19  ;;  %3792 = vmatprep.mubr.f32.mxu1 %v4909_v57  ;;  %v5015_v17 = vsel %vm872_vm3, %v850_v40, 0.0  ;;  %v5017_v57 = vld [vmem:[#allocation2 + $0x168] sm:$0xff]  ;;  %v1050_v7 = vrot.slane %v4881_v16, 1  ;;  %v5026_v35 = vsel %vm867_vm0, %v4983_v61, 0.0  ;;  %v1053_v40 = vrot.slane %v4935_v21, 1 }
  0x5e   : > { %4080 = vmatprep.subr.bf16.mxu1 %v6571_v19  ;;  %6589 = vst [vmem:[#allocation51_spill] sm:$0xff] %v5017_v57  ;;  %v5034_v16 = vld [vmem:[#allocation2 + $0x128] sm:$0xff]  ;;  %v5047_v61 = vsel %vm996_vm2, %v1047_v30, %v1048_v3  ;;  %v1055_v15 = vrot.slane %v4981_v9, 1  ;;  %v1057_v30 = vrot.slane %v4998_v4, 1  ;;  %v859_v53 = vld [vmem:[#allocation2 + $0x190] sm:$0x3] }
  0x5f   : > { %3793 = vmatmul.mubr.f32.gmra.mrb[12].mxu1 %v4930_v55  ;;  %v5038_v55 = vsel %vm872_vm3, %v853_v59, 0.0  ;;  %6591 = vst [vmem:[#allocation52_spill] sm:$0xff] %v5047_v61  ;;  %v5050_v32 = vsel %vm996_vm2, %v1048_v3, %v1050_v7  ;;  %v5059_v59 = vld [vmem:[#allocation2 + $0x180] sm:$0xff]  ;;  %v1058_v27 = vrot.slane %v5034_v16, 1  ;;  %v5070_v3 = vsel %vm872_vm3, %v856_v48, 0.0  ;;  %v1259_v48 = vld [vmem:[%s6450_s3 + $0x128] sm:$0xff] }
  0x60   : > { %4026 = vmatpush1.bf16.msra.mxu0 %v6588_v56  ;;  %v1052_v56 = vrot.slane %v4940_v22, 1  ;;  %4082 = vmatpush1.bf16.msra.mxu1 %v6590_v5  ;;  %6592 = vst [vmem:[#allocation53_spill] sm:$0xff] %v5050_v32  ;;  %v5057_v5 = vsel %vm867_vm0, %v5017_v57, 0.0  ;;  %6593 = vst [vmem:[#allocation54_spill] sm:$0xff] %v5059_v59  ;;  %v5066_v7 = vld [vmem:[#allocation2 + $0x140] sm:$0xff]  ;;  %v5073_v57 = vsel %vm996_vm2, %v1053_v40, %v1055_v15  ;;  %v1060_v32 = vrot.slane %v5002_v37, 1 }
  0x61   : > { %4027 = vmatprep.subr.bf16.mxu0 %v6571_v19  ;;  %3795 = vmatprep.mubr.f32.mxu1 %v4946_v14  ;;  %6595 = vst [vmem:[#allocation56_spill] sm:$0xff] %v5073_v57  ;;  %v1258_v61 = vld [vmem:[%s6450_s3 + $0x120] sm:$0xff]  ;;  %v1063_v15 = vrot.slane %v5066_v7, 1  ;;  %v1065_v57 = vrot.slane %v5015_v17, 1  ;;  %v1072_v18 = vrot.slane %v5057_v5, 1 }
  0x62   : > { %4083 = vmatprep.subr.bf16.mxu1 %v6571_v19  ;;  %v5062_v14 = vsel %vm996_vm2, %v1052_v56, %v1053_v40  ;;  %v1062_v56 = vrot.slane %v5011_v11, 1  ;;  %v5087_v40 = vsel %vm996_vm2, %v1057_v30, %v1058_v27  ;;  %v1067_v30 = vrot.slane %v5026_v35, 1 }
  0x63   : > { %6594 = vst [vmem:[#allocation55_spill] sm:$0xff] %v5062_v14  ;;  %3796 = vmatmul.mubr.f32.gmra.mrb[14].mxu1 %v4949_v45  ;;  %v5078_v14 = vld [vmem:[#allocation2 + $0x158] sm:$0xff]  ;;  %6596 = vst [vmem:[#allocation57_spill] sm:$0xff] %v5087_v40  ;;  %v6597_v45 = vpack.c.bf16 %v4892_v29, %v4877_v54  ;;  %v5109_v54 = vld [vmem:[#allocation2 + $0x170] sm:$0xff]  ;;  %v5113_v29 = vsel %vm872_vm3, %v859_v53, 0.0 }
  0x64   : > { %4029 = vmatpush1.bf16.msra.mxu0 %v4028_v25  ;;  %v4114_v25 = vpack.c.bf16 %v1257_v10, %v1256_v6  ;;  %3798 = vmatprep.mubr.f32.mxu1 %v4960_v60  ;;  %v5098_v6 = vsel %vm867_vm0, %v5059_v59, 0.0  ;;  %v5101_v10 = vsel %vm996_vm2, %v1058_v27, %v1060_v32  ;;  %v1068_v40 = vrot.slane %v5078_v14, 1  ;;  %v5123_v60 = vld [vmem:[#allocation2 + $0x188] sm:$0xff] }
  0x65   : > { %4111 = vmatprep.subr.bf16.mxu0 %v4110_v39  ;;  %4085 = vmatpush1.bf16.msra.mxu1 %v6597_v45  ;;  %v5116_v45 = vsel %vm996_vm2, %v1062_v56, %v1063_v15  ;;  %v5119_v27 = vsel %vm996_vm2, %v1063_v15, %v1065_v57  ;;  %v1070_v32 = vrot.slane %v5038_v55, 1  ;;  %v1073_v53 = vrot.slane %v5109_v54, 1 }
  0x66   : > { %4086 = vmatprep.subr.bf16.mxu1 %v6571_v19  ;;  %v5126_v59 = vsel %vm996_vm2, %v1067_v30, %v1068_v40  ;;  %v1075_v56 = vrot.slane %v5070_v3, 1  ;;  %v1273_v15 = vrot.slane %v5098_v6, 1  ;;  %v6601_v30 = vrot.slane %v4940_v22, 2  ;;  %v1242_v22 = vld [vmem:[%s6450_s3 + $0xa0] sm:$0xff] }
  0x67   : > { %3494 = vmatmul.mubr.msk.f32.vlgmr.msra.gmra.mrb[0].mxu0 %vm867_vm0, %v4462_v58  ;;  %v4118_v58 = vpack.c.bf16 %v1259_v48, %v1258_v61  ;;  %3799 = vmatmul.mubr.f32.gmra.mrb[16].mxu1 %v4963_v36  ;;  %v5132_v57 = vsel %vm996_vm2, %v1068_v40, %v1070_v32  ;;  %v6599_v61 = vpack.c.bf16 %v4905_v43, %v4900_v42  ;;  %v6600_v48 = vrot.slane %v4935_v21, 2  ;;  %v1260_v32 = vld [vmem:[%s6450_s3 + $0x130] sm:$0xff]  ;;  %v1261_v42 = vld [vmem:[%s6450_s3 + $0x138] sm:$0xff] }
  0x68   : > { %1405 = vmatprep.mubr.f32.mxu0 %v4755_v13  ;;  %4113 = vmatpush3.bf16.msra.mxu0 %v4110_v39  ;;  %6598 = vst [vmem:[#allocation58_spill] sm:$0xff] %v5132_v57  ;;  %v1274_v39 = vrot.slane %v5123_v60, 1  ;;  %v1168_v40 = vrot.slane %v4981_v9, 2  ;;  %v5156_v43 = vsel %vm996_vm2, %v1072_v18, %v1073_v53  ;;  %v1243_v9 = vld [vmem:[%s6450_s3 + $0xa8] sm:$0xff]  ;;  %v5170_v18 = vsel %vm996_vm2, %v1073_v53, %v1075_v56 }
  0x69   : > { %4115 = vmatprep.subr.bf16.mxu0 %v4114_v25  ;;  %4088 = vmatpush1.bf16.msra.mxu1 %v6599_v61  ;;  %v5146_v36 = vsel %vm1109_vm1, %v6601_v30, %v6600_v48  ;;  %6602 = vst [vmem:[#allocation59_spill] sm:$0xff] %v5156_v43  ;;  %v1276_v61 = vrot.slane %v5113_v29, 1  ;;  %v1170_v48 = vrot.slane %v4998_v4, 2  ;;  %v1171_v30 = vrot.slane %v5034_v16, 2 }
  0x6a   : > { %3801 = vmatprep.mubr.f32.mxu1 %v4975_v12  ;;  %4089 = vmatprep.subr.bf16.mxu1 %v6571_v19  ;;  %v5173_v12 = vsel %vm996_vm2, %v1273_v15, %v1274_v39  ;;  %v6603_v43 = vrot.slane %v4572_v44, 1  ;;  %v6604_v4 = vrot.slane %v4545_v33, 1  ;;  %v1012_v53 = vrot.slane %v4579_v47, 1  ;;  %v1262_v47 = vld [vmem:[%s6450_s3 + $0x140] sm:$0xff] }
  0x6b   : > { %1406 = vmatmul.mubr.f32.gmra.mrb[2].mxu0 %v4470_v62  ;;  %v5177_v62 = vsel %vm996_vm2, %v1274_v39, %v1276_v61  ;;  %3802 = vmatmul.mubr.f32.gmra.mrb[18].mxu1 %v4993_v26  ;;  %v1013_v56 = vrot.slane %v4574_v46, 1  ;;  %v4122_v15 = vpack.c.bf16 %v1261_v42, %v1260_v32  ;;  %v6606_v39 = vrot.slane %v4935_v21, 2  ;;  %v1263_v32 = vld [vmem:[%s6450_s3 + $0x148] sm:$0xff] }
  0x6c   : > { %1410 = vmatprep.mubr.f32.mxu0 %v4926_v34  ;;  %4117 = vmatpush3.bf16.msra.mxu0 %v4114_v25  ;;  %v5185_v57 = vsel %vm996_vm2, %v6604_v4, %v6603_v43  ;;  %v6605_v25 = vpack.c.bf16 %v4921_v49, %v4916_v0  ;;  %v4093_v61 = vpack.c.bf16 %v1243_v9, %v1242_v22  ;;  %v1173_v43 = vrot.slane %v5002_v37, 2  ;;  %v1244_v0 = vld [vmem:[%s6450_s3 + $0xb0] sm:$0xff]  ;;  %v1245_v37 = vld [vmem:[%s6450_s3 + $0xb8] sm:$0xff] }
  0x6d   : > { %4119 = vmatprep.subr.bf16.mxu0 %v4118_v58  ;;  %3804 = vmatprep.mubr.f32.mxu1 %v5146_v36  ;;  %v5196_v44 = vsel %vm1109_vm1, %v6606_v39, %v1168_v40  ;;  %v5210_v49 = vsel %vm1109_vm1, %v1170_v48, %v1171_v30  ;;  %v1175_v40 = vrot.slane %v5011_v11, 2  ;;  %v1176_v42 = vrot.slane %v5066_v7, 2 }
  0x6e   : > { %4091 = vmatpush1.bf16.msra.mxu1 %v6605_v25  ;;  %v5223_v22 = vsel %vm996_vm2, %v1012_v53, %v1013_v56  ;;  %v1015_v9 = vrot.slane %v4610_v63, 1  ;;  %v4126_v48 = vpack.c.bf16 %v1263_v32, %v1262_v47  ;;  %v5228_v4 = vsel %vm1109_vm1, %v1171_v30, %v1173_v43  ;;  %v1265_v53 = vld [vmem:[%s6450_s3 + $0x158] sm:$0xff]  ;;  %v1246_v30 = vld [vmem:[%s6450_s3 + $0xc0] sm:$0xff] }
  0x6f   : > { %3495 = vmatmul.mubr.msk.f32.gmra.mrb[4].mxu0 %vm867_vm0, %v4539_v28  ;;  %4092 = vmatprep.subr.bf16.mxu1 %v6571_v19  ;;  %v4096_v11 = vpack.c.bf16 %v1245_v37, %v1244_v0  ;;  %v1178_v25 = vrot.slane %v5015_v17, 2  ;;  %v5240_v63 = vsel %vm1109_vm1, %v1175_v40, %v1176_v42  ;;  %v1247_v17 = vld [vmem:[%s6450_s3 + $0xc8] sm:$0xff]  ;;  %v1180_v39 = vrot.slane %v5026_v35, 2 }
  0x70   : > { %1415 = vmatprep.mubr.f32.mxu0 %v5185_v57  ;;  %4121 = vmatpush3.bf16.msra.mxu0 %v4118_v58  ;;  %v1264_v58 = vld [vmem:[%s6450_s3 + $0x150] sm:$0xff]  ;;  %v5253_v43 = vsel %vm996_vm2, %v1013_v56, %v1015_v9  ;;  %v1017_v47 = vrot.slane %v4617_v2, 1  ;;  %v1018_v32 = vrot.slane %v4612_v1, 1  ;;  %v4099_v37 = vpack.c.bf16 %v1247_v17, %v1246_v30  ;;  %v1266_v56 = vld [vmem:[%s6450_s3 + $0x160] sm:$0xff]  ;;  %v1267_v2 = vld [vmem:[%s6450_s3 + $0x168] sm:$0xff] }
  0x71   : > { %3805 = vmatmul.mubr.f32.gmra.mrb[20].mxu1 %v5196_v44  ;;  %4123 = vmatprep.subr.bf16.mxu0 %v4122_v15  ;;  %v4130_v0 = vpack.c.bf16 %v1265_v53, %v1264_v58  ;;  %v5259_v35 = vsel %vm1109_vm1, %v1176_v42, %v1178_v25  ;;  %v1249_v42 = vld [vmem:[%s6450_s3 + $0xd8] sm:$0xff]  ;;  %v1185_v9 = vrot.slane %v5057_v5, 2  ;;  %v1020_v58 = vrot.slane %v4648_v20, 1 }
  0x72   : > { %4094 = vmatpush1.bf16.msra.mxu1 %v4093_v61  ;;  %3807 = vmatprep.mubr.f32.mxu1 %v5210_v49  ;;  %v1181_v61 = vrot.slane %v5078_v14, 2  ;;  %v5286_v25 = vsel %vm996_vm2, %v1017_v47, %v1018_v32  ;;  %v4134_v53 = vpack.c.bf16 %v1267_v2, %v1266_v56  ;;  %v1188_v17 = vrot.slane %v5070_v3, 2  ;;  %v1251_v3 = vld [vmem:[%s6450_s3 + $0xe8] sm:$0xff] }
  0x73   : > { %1416 = vmatmul.mubr.f32.gmra.mrb[6].mxu0 %v4545_v33  ;;  %4095 = vmatprep.subr.bf16.mxu1 %v6571_v19  ;;  %v1280_v47 = vrot.slane %v5098_v6, 2  ;;  %v1022_v56 = vrot.slane %v4658_v24, 1  ;;  %v1023_v2 = vrot.slane %v4653_v23, 1 }
  0x74   : > { %1420 = vmatprep.mubr.f32.mxu0 %v5223_v22  ;;  %4125 = vmatpush3.bf16.msra.mxu0 %v4122_v15  ;;  %v1183_v15 = vrot.slane %v5038_v55, 2  ;;  %v5273_v40 = vsel %vm1109_vm1, %v1180_v39, %v1181_v61  ;;  %v1248_v55 = vld [vmem:[%s6450_s3 + $0xd0] sm:$0xff]  ;;  %v1269_v39 = vld [vmem:[%s6450_s3 + $0x178] sm:$0xff] }
  0x75   : > { %3808 = vmatmul.mubr.f32.gmra.mrb[22].mxu1 %v5228_v4  ;;  %4127 = vmatprep.subr.bf16.mxu0 %v4126_v48  ;;  %v4102_v5 = vpack.c.bf16 %v1249_v42, %v1248_v55 }
  0x76   : > { %4097 = vmatpush1.bf16.msra.mxu1 %v4096_v11  ;;  %3810 = vmatprep.mubr.f32.mxu1 %v5240_v63  ;;  %v1186_v11 = vrot.slane %v5109_v54, 2  ;;  %v5291_v30 = vsel %vm1109_vm1, %v1181_v61, %v1183_v15  ;;  %v1250_v61 = vld [vmem:[%s6450_s3 + $0xe0] sm:$0xff]  ;;  %v5316_v15 = vsel %vm996_vm2, %v1018_v32, %v1020_v58  ;;  %v1252_v32 = vld [vmem:[%s6450_s3 + $0xf0] sm:$0xff] }
  0x77   : > { %3496 = vmatmul.mubr.msk.f32.gmra.mrb[8].mxu0 %vm867_vm0, %v4559_v38  ;;  %4098 = vmatprep.subr.bf16.mxu1 %v6571_v19  ;;  %v4105_v42 = vpack.c.bf16 %v1251_v3, %v1250_v61  ;;  %v1027_v61 = vrot.slane %v4713_v51, 1  ;;  %v1028_v3 = vrot.slane %v4692_v41, 1  ;;  %v3527_v51 = vld [vmem:[%s6450_s3 + $0x310] sm:$0xff] }
  0x78   : > { %1425 = vmatprep.mubr.f32.mxu0 %v5253_v43  ;;  %4129 = vmatpush3.bf16.msra.mxu0 %v4126_v48  ;;  %v1268_v48 = vld [vmem:[%s6450_s3 + $0x170] sm:$0xff]  ;;  %v5303_v20 = vsel %vm1109_vm1, %v1185_v9, %v1186_v11  ;;  %v5322_v6 = vsel %vm1109_vm1, %v1186_v11, %v1188_v17  ;;  %v1253_v9 = vld [vmem:[%s6450_s3 + $0xf8] sm:$0xff]  ;;  %v1025_v11 = vrot.slane %v4679_v31, 1  ;;  %v6536_v17 = vmov 0.0   ;;  %v3525_v31 = vld [vmem:[%s6450_s3 + $0x300] sm:$0xff] }
  0x79   : > { %3811 = vmatmul.mubr.f32.gmra.mrb[24].mxu1 %v5259_v35  ;;  %4131 = vmatprep.subr.bf16.mxu0 %v4130_v0  ;;  %v4138_v55 = vpack.c.bf16 %v1269_v39, %v1268_v48  ;;  %6607 = vst [vmem:[#allocation60_spill] sm:$0xff] %v5322_v6  ;;  %v5349_v48 = vrot.slane %v6536_v17, 1 }
  0x7a   : > { %4100 = vmatpush1.bf16.msra.mxu1 %v4099_v37  ;;  %3813 = vmatprep.mubr.f32.mxu1 %v5273_v40  ;;  %v1281_v37 = vrot.slane %v5123_v60, 2  ;;  %v5362_v39 = vsel %vm996_vm2, %v1023_v2, %v1025_v11  ;;  %v3529_v11 = vld [vmem:[%s6450_s3 + $0x320] sm:$0xff] }
  0x7b   : > { %1426 = vmatmul.mubr.f32.gmra.mrb[10].mxu0 %v4574_v46  ;;  %4101 = vmatprep.subr.bf16.mxu1 %v6571_v19  ;;  %6610 = vst [vmem:[#allocation63_spill] sm:$0xff] %v5349_v48 }
  0x7c   : > { %1430 = vmatprep.mubr.f32.mxu0 %v5286_v25  ;;  %4133 = vmatpush3.bf16.msra.mxu0 %v4130_v0  ;;  %v1283_v0 = vrot.slane %v5113_v29, 2  ;;  %v5330_v24 = vsel %vm1109_vm1, %v1280_v47, %v1281_v37  ;;  %v5341_v29 = vsel %vm996_vm2, %v1022_v56, %v1023_v2  ;;  %v3557_v47 = vld [vmem:[%s6450_s3 + $0x400] sm:$0xff]  ;;  %v3528_v2 = vld [vmem:[%s6450_s3 + $0x318] sm:$0xff] }
  0x7d   : > { %3814 = vmatmul.mubr.f32.gmra.mrb[26].mxu1 %v5291_v30  ;;  %4135 = vmatprep.subr.bf16.mxu0 %v4134_v53  ;;  %6608 = vst [vmem:[#allocation61_spill] sm:$0xff] %v5330_v24 }
  0x7e   : > { %4103 = vmatpush1.bf16.msra.mxu1 %v4102_v5  ;;  %3816 = vmatprep.mubr.f32.mxu1 %v5303_v20  ;;  %v5346_v58 = vsel %vm1109_vm1, %v1281_v37, %v1283_v0  ;;  %v4108_v5 = vpack.c.bf16 %v1253_v9, %v1252_v32  ;;  %v3558_v37 = vld [vmem:[%s6450_s3 + $0x408] sm:$0xff]  ;;  %v6611_v0 = vld [vmem:[#allocation21_spill] sm:$0xff]  ;;  %v4146_v9 = vpack.c.bf16 %v3528_v2, %v3527_v51 }
  0x7f   : > { %3497 = vmatmul.mubr.msk.f32.gmra.mrb[12].mxu0 %vm867_vm0, %v4588_v52  ;;  %4104 = vmatprep.subr.bf16.mxu1 %v6571_v19  ;;  %6609 = vst [vmem:[#allocation62_spill] sm:$0xff] %v5346_v58  ;;  %v1030_v32 = vrot.slane %v6611_v0, 1  ;;  %v6615_v2 = vld [vmem:[#allocation17_spill] sm:$0xff] }
  0x80   : > { %1435 = vmatprep.mubr.f32.mxu0 %v5316_v15  ;;  %4137 = vmatpush3.bf16.msra.mxu0 %v4134_v53  ;;  %v3526_v53 = vld [vmem:[%s6450_s3 + $0x308] sm:$0xff]  ;;  %v3531_v0 = vld [vmem:[%s6450_s3 + $0x330] sm:$0xff] }
  0x81   : > { %3817 = vmatmul.mubr.f32.gmra.mrb[28].mxu1 %v5322_v6  ;;  %4139 = vmatprep.subr.bf16.mxu0 %v4138_v55  ;;  %v4143_v56 = vpack.c.bf16 %v3526_v53, %v3525_v31  ;;  %v5404_v31 = vsel %vm996_vm2, %v1028_v3, %v1030_v32  ;;  %v6612_v53 = vld [vmem:[#allocation24_spill] sm:$0xff]  ;;  %v4248_v32 = vld [vmem:[#allocation2 + $0x18] sm:$0xff] }
  0x82   : > { %4106 = vmatpush1.bf16.msra.mxu1 %v4105_v42  ;;  %3819 = vmatprep.mubr.f32.mxu1 %v5330_v24  ;;  %v5389_v42 = vsel %vm996_vm2, %v1027_v61, %v1028_v3  ;;  %v1032_v61 = vrot.slane %v6612_v53, 1  ;;  %v3532_v3 = vld [vmem:[%s6450_s3 + $0x338] sm:$0xff]  ;;  %v6623_v24 = vld [vmem:[#allocation25_spill] sm:$0xff]  ;;  %v6632_v6 = vld [vmem:[#allocation56_spill] sm:$0xff] }
  0x83   : > { %1436 = vmatmul.mubr.f32.gmra.mrb[14].mxu0 %v4612_v1  ;;  %4107 = vmatprep.subr.bf16.mxu1 %v6571_v19  ;;  %v4152_v53 = vpack.c.bf16 %v3532_v3, %v3531_v0  ;;  %v6618_v3 = vld [vmem:[#allocation30_spill] sm:$0xff] }
  0x84   : > { %1440 = vmatprep.mubr.f32.mxu0 %v5341_v29  ;;  %4141 = vmatpush3.bf16.msra.mxu0 %v4138_v55  ;;  %v5373_v55 = vpack.c.bf16 %v3558_v37, %v3557_v47  ;;  %v6613_v47 = vld [vmem:[#allocation23_spill] sm:$0xff] }
  0x85   : > { %3820 = vmatmul.mubr.f32.gmra.mrb[30].mxu1 %v5346_v58  ;;  %v1033_v37 = vrot.slane %v6613_v47, 1 }
  0x86   : > { %4109 = vmatpush1.bf16.msra.mxu1 %v4108_v5  ;;  %1850 = vmatprep.mubr.f32.mxu1 %v5349_v48  ;;  %v3530_v5 = vld [vmem:[%s6450_s3 + $0x328] sm:$0xff] }
  0x87   : > { %3498 = vmatmul.mubr.msk.f32.gmra.mrb[16].mxu0 %vm867_vm0, %v4627_v8  ;;  %4142 = vmatprep.subr.bf16.mxu1 %v6571_v19  ;;  %v4149_v51 = vpack.c.bf16 %v3530_v5, %v3529_v11  ;;  %v6616_v11 = vld [vmem:[#allocation29_spill] sm:$0xff] }
  0x88   : > { %1445 = vmatprep.mubr.f32.mxu0 %v5362_v39  ;;  %4191 = vmatprep.subr.bf16.mxu0 %v5373_v55  ;;  %v1035_v5 = vrot.slane %v6616_v11, 1  ;;  %v1038_v11 = vrot.slane %v6618_v3, 1 }
  0x89   : > { %1851 = vmatmul.mubr.f32.vlgmr.msra.gmra.mrb[32].mxu1 %v6536_v17 }
  0x8a   : > { %4144 = vmatpush1.bf16.msra.mxu1 %v4143_v56  ;;  %1855 = vmatprep.mubr.f32.mxu1 %v5349_v48  ;;  %v6614_v56 = vld [vmem:[#allocation12_spill] sm:$0xff] }
  0x8b   : > { %1446 = vmatmul.mubr.f32.gmra.mrb[18].mxu0 %v4653_v23  ;;  %4145 = vmatprep.subr.bf16.mxu1 %v6571_v19  ;;  %v6619_v48 = vld [vmem:[#allocation20_spill] sm:$0xff] }
  0x8c   : > { %1450 = vmatprep.mubr.f32.mxu0 %v5389_v42 }
  0x8d   : > { %1856 = vmatmul.mubr.f32.gmra.mrb[34].mxu1 %v6536_v17 }
  0x8e   : > { %1860 = vmatprep.mubr.f32.mxu1 %v6614_v56  ;;  %4147 = vmatpush1.bf16.msra.mxu1 %v4146_v9  ;;  %v5423_v9 = vsel %vm996_vm2, %v1032_v61, %v1033_v37  ;;  %v3533_v56 = vld [vmem:[%s6450_s3 + $0x340] sm:$0xff] }
  0x8f   : > { %3499 = vmatmul.mubr.msk.f32.gmra.mrb[20].mxu0 %vm867_vm0, %v6615_v2  ;;  %4148 = vmatprep.subr.bf16.mxu1 %v6571_v19  ;;  %v4249_v61 = vld [vmem:[#allocation2 + $0x20] sm:$0xff] }
  0x90   : > { %1455 = vmatprep.mubr.f32.mxu0 %v5404_v31 }
  0x91   : > { %3510 = vmatmul.mubr.msk.f32.gmra.mrb[36].mxu1 %vm867_vm0, %v4248_v32  ;;  %v3534_v32 = vld [vmem:[%s6450_s3 + $0x348] sm:$0xff] }
  0x92   : > { %1865 = vmatprep.mubr.f32.mxu1 %v4755_v13  ;;  %4150 = vmatpush1.bf16.msra.mxu1 %v4149_v51  ;;  %v5437_v13 = vsel %vm996_vm2, %v1033_v37, %v1035_v5  ;;  %v6617_v51 = vld [vmem:[#allocation32_spill] sm:$0xff]  ;;  %v4155_v17 = vpack.c.bf16 %v3534_v32, %v3533_v56  ;;  %v3536_v37 = vld [vmem:[%s6450_s3 + $0x358] sm:$0xff] }
  0x93   : > { %1456 = vmatmul.mubr.f32.gmra.mrb[22].mxu0 %v4692_v41  ;;  %4151 = vmatprep.subr.bf16.mxu1 %v6571_v19  ;;  %v1037_v0 = vrot.slane %v6617_v51, 1  ;;  %v3537_v51 = vld [vmem:[%s6450_s3 + $0x360] sm:$0xff] }
  0x94   : > { %1460 = vmatprep.mubr.f32.mxu0 %v5423_v9 }
  0x95   : > { %1866 = vmatmul.mubr.f32.gmra.mrb[38].mxu1 %v4249_v61  ;;  %v3535_v61 = vld [vmem:[%s6450_s3 + $0x350] sm:$0xff]  ;;  %v5457_v5 = vsel %vm996_vm2, %v1037_v0, %v1038_v11 }
  0x96   : > { %1870 = vmatprep.mubr.f32.mxu1 %v4926_v34  ;;  %4153 = vmatpush1.bf16.msra.mxu1 %v4152_v53  ;;  %v6620_v53 = vld [vmem:[#allocation33_spill] sm:$0xff]  ;;  %v4158_v32 = vpack.c.bf16 %v3536_v37, %v3535_v61  ;;  %v6622_v37 = vld [vmem:[#allocation35_spill] sm:$0xff] }
  0x97   : > { %3500 = vmatmul.mubr.msk.f32.gmra.mrb[24].mxu0 %vm867_vm0, %v6619_v48  ;;  %4154 = vmatprep.subr.bf16.mxu1 %v6571_v19  ;;  %v1040_v56 = vrot.slane %v6620_v53, 1  ;;  %v1043_v53 = vrot.slane %v6622_v37, 1 }
  0x98   : > { %1465 = vmatprep.mubr.f32.mxu0 %v5437_v13 }
  0x99   : > { %3511 = vmatmul.mubr.msk.f32.gmra.mrb[40].mxu1 %vm867_vm0, %v4539_v28  ;;  %v3538_v28 = vld [vmem:[%s6450_s3 + $0x368] sm:$0xff]  ;;  %v5472_v0 = vsel %vm996_vm2, %v1038_v11, %v1040_v56  ;;  %v3540_v11 = vld [vmem:[%s6450_s3 + $0x378] sm:$0xff] }
  0x9a   : > { %1875 = vmatprep.mubr.f32.mxu1 %v5185_v57  ;;  %4156 = vmatpush1.bf16.msra.mxu1 %v4155_v17  ;;  %v6621_v17 = vld [vmem:[#allocation36_spill] sm:$0xff]  ;;  %v4161_v58 = vpack.c.bf16 %v3538_v28, %v3537_v51 }
  0x9b   : > { %1466 = vmatmul.mubr.f32.gmra.mrb[26].mxu0 %v6613_v47  ;;  %4157 = vmatprep.subr.bf16.mxu1 %v6571_v19  ;;  %v1042_v61 = vrot.slane %v6621_v17, 1  ;;  %v3541_v17 = vld [vmem:[%s6450_s3 + $0x380] sm:$0xff] }
  0x9c   : > { %1470 = vmatprep.mubr.f32.mxu0 %v5457_v5 }
  0x9d   : > { %1876 = vmatmul.mubr.f32.gmra.mrb[42].mxu1 %v4545_v33  ;;  %v3539_v33 = vld [vmem:[%s6450_s3 + $0x370] sm:$0xff]  ;;  %v5492_v56 = vsel %vm996_vm2, %v1042_v61, %v1043_v53 }
  0x9e   : > { %1880 = vmatprep.mubr.f32.mxu1 %v5223_v22  ;;  %4159 = vmatpush1.bf16.msra.mxu1 %v4158_v32  ;;  %v6624_v32 = vld [vmem:[#allocation37_spill] sm:$0xff]  ;;  %v4164_v28 = vpack.c.bf16 %v3540_v11, %v3539_v33  ;;  %v6625_v33 = vld [vmem:[#allocation27_spill] sm:$0xff] }
  0x9f   : > { %3501 = vmatmul.mubr.msk.f32.gmra.mrb[28].mxu0 %vm867_vm0, %v6623_v24  ;;  %4160 = vmatprep.subr.bf16.mxu1 %v6571_v19  ;;  %v1045_v51 = vrot.slane %v6624_v32, 1  ;;  %v3543_v11 = vld [vmem:[%s6450_s3 + $0x390] sm:$0xff]  ;;  %v3545_v32 = vld [vmem:[%s6450_s3 + $0x3a0] sm:$0xff] }
  0xa0   : > { %1475 = vmatprep.mubr.f32.mxu0 %v5472_v0 }
  0xa1   : > { %3512 = vmatmul.mubr.msk.f32.gmra.mrb[44].mxu1 %vm867_vm0, %v4559_v38  ;;  %v3542_v38 = vld [vmem:[%s6450_s3 + $0x388] sm:$0xff]  ;;  %v5507_v61 = vsel %vm996_vm2, %v1043_v53, %v1045_v51 }
  0xa2   : > { %1885 = vmatprep.mubr.f32.mxu1 %v5253_v43  ;;  %4162 = vmatpush1.bf16.msra.mxu1 %v4161_v58  ;;  %v4167_v58 = vpack.c.bf16 %v3542_v38, %v3541_v17  ;;  %v3546_v51 = vld [vmem:[%s6450_s3 + $0x3a8] sm:$0xff]  ;;  %v6627_v17 = vld [vmem:[#allocation31_spill] sm:$0xff]  ;;  %v3547_v38 = vld [vmem:[%s6450_s3 + $0x3b0] sm:$0xff] }
  0xa3   : > { %1476 = vmatmul.mubr.f32.gmra.mrb[30].mxu0 %v6618_v3  ;;  %4163 = vmatprep.subr.bf16.mxu1 %v6571_v19 }
  0xa4   : > { %1480 = vmatprep.mubr.f32.mxu0 %v5492_v56 }
  0xa5   : > { %1886 = vmatmul.mubr.f32.gmra.mrb[46].mxu1 %v4574_v46  ;;  %v3544_v46 = vld [vmem:[%s6450_s3 + $0x398] sm:$0xff] }
  0xa6   : > { %1890 = vmatprep.mubr.f32.mxu1 %v5286_v25  ;;  %4165 = vmatpush1.bf16.msra.mxu1 %v4164_v28  ;;  %v4170_v53 = vpack.c.bf16 %v3544_v46, %v3543_v11  ;;  %v6626_v28 = vld [vmem:[#allocation52_spill] sm:$0xff]  ;;  %v6628_v11 = vld [vmem:[#allocation53_spill] sm:$0xff]  ;;  %v6629_v46 = vld [vmem:[#allocation38_spill] sm:$0xff] }
  0xa7   : > { %3502 = vmatmul.mubr.msk.f32.gmra.mrb[32].mxu0 %vm867_vm0, %v6625_v33  ;;  %4166 = vmatprep.subr.bf16.mxu1 %v6571_v19 }
  0xa8   : > { %1485 = vmatprep.mubr.f32.mxu0 %v5507_v61 }
  0xa9   : > { %3513 = vmatmul.mubr.msk.f32.gmra.mrb[48].mxu1 %vm867_vm0, %v4588_v52  ;;  %v4173_v52 = vpack.c.bf16 %v3546_v51, %v3545_v32  ;;  %v3550_v32 = vld [vmem:[%s6450_s3 + $0x3c8] sm:$0xff]  ;;  %v6630_v51 = vld [vmem:[#allocation55_spill] sm:$0xff] }
  0xaa   : > { %1895 = vmatprep.mubr.f32.mxu1 %v5316_v15  ;;  %4168 = vmatpush1.bf16.msra.mxu1 %v4167_v58  ;;  %v3548_v58 = vld [vmem:[%s6450_s3 + $0x3b8] sm:$0xff] }
  0xab   : > { %1486 = vmatmul.mubr.f32.gmra.mrb[34].mxu0 %v6622_v37  ;;  %4169 = vmatprep.subr.bf16.mxu1 %v6571_v19 }
  0xac   : > { %1490 = vmatprep.mubr.f32.mxu0 %v6626_v28 }
  0xad   : > { %1896 = vmatmul.mubr.f32.gmra.mrb[50].mxu1 %v4612_v1  ;;  %v4176_v1 = vpack.c.bf16 %v3548_v58, %v3547_v38  ;;  %v3551_v38 = vld [vmem:[%s6450_s3 + $0x3d0] sm:$0xff]  ;;  %v3552_v58 = vld [vmem:[%s6450_s3 + $0x3d8] sm:$0xff] }
  0xae   : > { %1900 = vmatprep.mubr.f32.mxu1 %v5341_v29  ;;  %4171 = vmatpush1.bf16.msra.mxu1 %v4170_v53  ;;  %v3549_v53 = vld [vmem:[%s6450_s3 + $0x3c0] sm:$0xff] }
  0xaf   : > { %3503 = vmatmul.mubr.msk.f32.gmra.mrb[36].mxu0 %vm867_vm0, %v6627_v17  ;;  %4172 = vmatprep.subr.bf16.mxu1 %v6571_v19 }
  0xb0   : > { %1495 = vmatprep.mubr.f32.mxu0 %v6628_v11 }
  0xb1   : > { %3514 = vmatmul.mubr.msk.f32.gmra.mrb[52].mxu1 %vm867_vm0, %v4627_v8  ;;  %v4179_v8 = vpack.c.bf16 %v3550_v32, %v3549_v53  ;;  %v3554_v53 = vld [vmem:[%s6450_s3 + $0x3e8] sm:$0xff]  ;;  %v6633_v32 = vld [vmem:[#allocation57_spill] sm:$0xff] }
  0xb2   : > { %1905 = vmatprep.mubr.f32.mxu1 %v5362_v39  ;;  %4174 = vmatpush1.bf16.msra.mxu1 %v4173_v52  ;;  %v6631_v52 = vld [vmem:[#allocation40_spill] sm:$0xff] }
  0xb3   : > { %1496 = vmatmul.mubr.f32.gmra.mrb[38].mxu0 %v6629_v46  ;;  %4175 = vmatprep.subr.bf16.mxu1 %v6571_v19 }
  0xb4   : > { %1500 = vmatprep.mubr.f32.mxu0 %v6630_v51 }
  0xb5   : > { %1906 = vmatmul.mubr.f32.gmra.mrb[54].mxu1 %v4653_v23  ;;  %v4182_v23 = vpack.c.bf16 %v3552_v58, %v3551_v38  ;;  %v3555_v38 = vld [vmem:[%s6450_s3 + $0x3f0] sm:$0xff]  ;;  %v3556_v58 = vld [vmem:[%s6450_s3 + $0x3f8] sm:$0xff] }
  0xb6   : > { %1910 = vmatprep.mubr.f32.mxu1 %v5389_v42  ;;  %4177 = vmatpush1.bf16.msra.mxu1 %v4176_v1  ;;  %v3553_v1 = vld [vmem:[%s6450_s3 + $0x3e0] sm:$0xff] }
  0xb7   : > { %3504 = vmatmul.mubr.msk.f32.gmra.mrb[40].mxu0 %vm867_vm0, %v6631_v52  ;;  %4178 = vmatprep.subr.bf16.mxu1 %v6571_v19 }
  0xb8   : > { %1505 = vmatprep.mubr.f32.mxu0 %v6632_v6 }
  0xb9   : > { %3515 = vmatmul.mubr.msk.f32.gmra.mrb[56].mxu1 %vm867_vm0, %v6615_v2  ;;  %v4185_v2 = vpack.c.bf16 %v3554_v53, %v3553_v1  ;;  %v3562_v53 = vld [vmem:[%s6450_s3 + $0x428] sm:$0xff] }
  0xba   : > { %1915 = vmatprep.mubr.f32.mxu1 %v5404_v31  ;;  %4180 = vmatpush1.bf16.msra.mxu1 %v4179_v8  ;;  %v6634_v8 = vld [vmem:[#allocation45_spill] sm:$0xff] }
  0xbb   : > { %1506 = vmatmul.mubr.f32.gmra.mrb[42].mxu0 %v4935_v21  ;;  %4181 = vmatprep.subr.bf16.mxu1 %v6571_v19 }
  0xbc   : > { %1510 = vmatprep.mubr.f32.mxu0 %v6633_v32 }
  0xbd   : > { %1916 = vmatmul.mubr.f32.gmra.mrb[58].mxu1 %v4692_v41  ;;  %v4188_v41 = vpack.c.bf16 %v3556_v58, %v3555_v38  ;;  %v3564_v38 = vld [vmem:[%s6450_s3 + $0x438] sm:$0xff]  ;;  %v6643_v58 = vld [vmem:[#allocation13_spill] sm:$0xff] }
  0xbe   : > { %1920 = vmatprep.mubr.f32.mxu1 %v5423_v9  ;;  %4183 = vmatpush1.bf16.msra.mxu1 %v4182_v23  ;;  %v6635_v23 = vld [vmem:[#allocation48_spill] sm:$0xff] }
  0xbf   : > { %3505 = vmatmul.mubr.msk.f32.gmra.mrb[44].mxu0 %vm867_vm0, %v6634_v8  ;;  %4184 = vmatprep.subr.bf16.mxu1 %v6571_v19 }
  0xc0   : > { %1515 = vmatprep.mubr.f32.mxu0 %v5101_v10 }
  0xc1   : > { %3516 = vmatmul.mubr.msk.f32.gmra.mrb[60].mxu1 %vm867_vm0, %v6619_v48  ;;  %v6637_v48 = vld [vmem:[#allocation58_spill] sm:$0xff] }
  0xc2   : > { %1925 = vmatprep.mubr.f32.mxu1 %v5437_v13  ;;  %4186 = vmatpush1.bf16.msra.mxu1 %v4185_v2  ;;  %v6642_v2 = vld [vmem:[#allocation11_spill] sm:$0xff] }
  0xc3   : > { %1516 = vmatmul.mubr.f32.gmra.mrb[46].mxu0 %v5034_v16  ;;  %4187 = vmatprep.subr.bf16.mxu1 %v6571_v19  ;;  %v6636_v19 = vld [vmem:[#allocation50_spill] sm:$0xff] }
  0xc4   : > { %1520 = vmatprep.mubr.f32.mxu0 %v5116_v45 }
  0xc5   : > { %1926 = vmatmul.mubr.f32.gmra.mrb[62].mxu1 %v6613_v47  ;;  %v6639_v47 = vld [vmem:[#allocation51_spill] sm:$0xff] }
  0xc6   : > { %1930 = vmatprep.mubr.f32.mxu1 %v5457_v5  ;;  %4189 = vmatpush1.bf16.msra.mxu1 %v4188_v41  ;;  %v6644_v41 = vld [vmem:[#allocation14_spill] sm:$0xff] }
  0xc7   : > { %3506 = vmatmul.mubr.msk.f32.gmra.mrb[48].mxu0 %vm867_vm0, %v6635_v23 }
  0xc8   : > { %1525 = vmatprep.mubr.f32.mxu0 %v5119_v27 }
  0xc9   : > { %3517 = vmatmul.mubr.msk.f32.gmra.mrb[64].mxu1 %vm867_vm0, %v6623_v24  ;;  %v6638_v24 = vld [vmem:[#allocation59_spill] sm:$0xff] }
  0xca   : > { %1935 = vmatprep.mubr.f32.mxu1 %v5472_v0 }
  0xcb   : > { %1526 = vmatmul.mubr.f32.gmra.mrb[50].mxu0 %v5066_v7 }
  0xcc   : > { %1530 = vmatprep.mubr.f32.mxu0 %v5126_v59 }
  0xcd   : > { %1936 = vmatmul.mubr.f32.gmra.mrb[66].mxu1 %v6618_v3  ;;  %v6640_v3 = vld [vmem:[#allocation54_spill] sm:$0xff] }
  0xce   : > { %1940 = vmatprep.mubr.f32.mxu1 %v5492_v56 }
  0xcf   : > { %3507 = vmatmul.mubr.msk.f32.gmra.mrb[52].mxu0 %vm867_vm0, %v6636_v19 }
  0xd0   : > { %1535 = vmatprep.mubr.f32.mxu0 %v6637_v48 }
  0xd1   : > { %3518 = vmatmul.mubr.msk.f32.gmra.mrb[68].mxu1 %vm867_vm0, %v6625_v33 }
  0xd2   : > { %1945 = vmatprep.mubr.f32.mxu1 %v5507_v61 }
  0xd3   : > { %1536 = vmatmul.mubr.f32.gmra.mrb[54].mxu0 %v5078_v14 }
  0xd4   : > { %1540 = vmatprep.mubr.f32.mxu0 %v6638_v24 }
  0xd5   : > { %1946 = vmatmul.mubr.f32.gmra.mrb[70].mxu1 %v6622_v37  ;;  %v6641_v37 = vmov 0.0  }
  0xd6   : > { %1950 = vmatprep.mubr.f32.mxu1 %v6626_v28  ;;  %v5649_v33 = vrot.slane %v6641_v37, 2 }
  0xd7   : > { %3508 = vmatmul.mubr.msk.f32.gmra.mrb[56].mxu0 %vm867_vm0, %v6639_v47 }
  0xd8   : > { %1545 = vmatprep.mubr.f32.mxu0 %v5170_v18 }
  0xd9   : > { %3519 = vmatmul.mubr.msk.f32.gmra.mrb[72].mxu1 %vm867_vm0, %v6627_v17  ;;  %v3559_v17 = vld [vmem:[%s6450_s3 + $0x410] sm:$0xff] }
  0xda   : > { %1955 = vmatprep.mubr.f32.mxu1 %v6628_v11 }
  0xdb   : > { %1546 = vmatmul.mubr.f32.gmra.mrb[58].mxu0 %v5109_v54 }
  0xdc   : > { %1550 = vmatprep.mubr.f32.mxu0 %v5173_v12 }
  0xdd   : > { %1956 = vmatmul.mubr.f32.gmra.mrb[74].mxu1 %v6629_v46  ;;  %v3560_v46 = vld [vmem:[%s6450_s3 + $0x418] sm:$0xff] }
  0xde   : > { %1960 = vmatprep.mubr.f32.mxu1 %v6630_v51  ;;  %v4194_v1 = vpack.c.bf16 %v3560_v46, %v3559_v17  ;;  %v6645_v17 = vld [vmem:[#allocation15_spill] sm:$0xff]  ;;  %v6646_v46 = vld [vmem:[#allocation16_spill] sm:$0xff] }
  0xdf   : > { %3509 = vmatmul.mubr.msk.f32.gmra.mrb[60].mxu0 %vm867_vm0, %v6640_v3  ;;  %v3566_v3 = vld [vmem:[%s6450_s3 + $0x448] sm:$0xff] }
  0xe0   : > { %1555 = vmatprep.mubr.f32.mxu0 %v5177_v62 }
  0xe1   : > { %3520 = vmatmul.mubr.msk.f32.gmra.mrb[76].mxu1 %vm867_vm0, %v6631_v52  ;;  %v3561_v52 = vld [vmem:[%s6450_s3 + $0x420] sm:$0xff] }
  0xe2   : > { %1965 = vmatprep.mubr.f32.mxu1 %v6632_v6 }
  0xe3   : > { %1556 = vmatmul.mubr.f32.gmra.mrb[62].mxu0 %v5123_v60  ;;  %v3563_v60 = vld [vmem:[%s6450_s3 + $0x430] sm:$0xff] }
  0xe4   : > { %3854 = vmatprep.mubr.f32.mxu0 %v5649_v33 }
  0xe5   : > { %1966 = vmatmul.mubr.f32.gmra.mrb[78].mxu1 %v4935_v21  ;;  %v4198_v21 = vpack.c.bf16 %v3562_v53, %v3561_v52  ;;  %v3568_v52 = vld [vmem:[%s6450_s3 + $0x458] sm:$0xff] }
  0xe6   : > { %1970 = vmatprep.mubr.f32.mxu1 %v6633_v32  ;;  %v6647_v53 = vld [vmem:[#allocation18_spill] sm:$0xff] }
  0xe7   : > { %3855 = vmatmul.mubr.f32.vlgmr.msra.gmra.mrb[64].mxu0 %v5649_v33 }
  0xe8   : > { %3857 = vmatprep.mubr.f32.mxu0 %v6642_v2  ;;  %4193 = vmatpush3.bf16.msra.mxu0 %v5373_v55  ;;  %v4202_v55 = vpack.c.bf16 %v3564_v38, %v3563_v60  ;;  %v6648_v2 = vld [vmem:[#allocation19_spill] sm:$0xff]  ;;  %v3570_v60 = vld [vmem:[%s6450_s3 + $0x468] sm:$0xff]  ;;  %v6649_v38 = vld [vmem:[#allocation22_spill] sm:$0xff] }
  0xe9   : > { %3521 = vmatmul.mubr.msk.f32.gmra.mrb[80].mxu1 %vm867_vm0, %v6634_v8  ;;  %4195 = vmatprep.subr.bf16.mxu0 %v4194_v1  ;;  %v3565_v8 = vld [vmem:[%s6450_s3 + $0x440] sm:$0xff] }
  0xea   : > { %1975 = vmatprep.mubr.f32.mxu1 %v5101_v10 }
  0xeb   : > { %3858 = vmatmul.mubr.f32.gmra.mrb[66].mxu0 %v6643_v58  ;;  %v6650_v58 = vld [vmem:[#allocation26_spill] sm:$0xff] }
  0xec   : > { %3860 = vmatprep.mubr.f32.mxu0 %v6644_v41  ;;  %4197 = vmatpush3.bf16.msra.mxu0 %v4194_v1  ;;  %v3567_v1 = vld [vmem:[%s6450_s3 + $0x450] sm:$0xff] }
  0xed   : > { %1976 = vmatmul.mubr.f32.gmra.mrb[82].mxu1 %v5034_v16  ;;  %4199 = vmatprep.subr.bf16.mxu0 %v4198_v21  ;;  %v4206_v16 = vpack.c.bf16 %v3566_v3, %v3565_v8  ;;  %v3572_v8 = vld [vmem:[%s6450_s3 + $0x478] sm:$0xff]  ;;  %v6651_v3 = vld [vmem:[#allocation28_spill] sm:$0xff] }
  0xee   : > { %1980 = vmatprep.mubr.f32.mxu1 %v5116_v45 }
  0xef   : > { %3861 = vmatmul.mubr.f32.gmra.mrb[68].mxu0 %v6645_v17 }
  0xf0   : > { %3863 = vmatprep.mubr.f32.mxu0 %v6646_v46  ;;  %4201 = vmatpush3.bf16.msra.mxu0 %v4198_v21  ;;  %v3569_v21 = vld [vmem:[%s6450_s3 + $0x460] sm:$0xff] }
  0xf1   : > { %3522 = vmatmul.mubr.msk.f32.gmra.mrb[84].mxu1 %vm867_vm0, %v6635_v23  ;;  %4203 = vmatprep.subr.bf16.mxu0 %v4202_v55  ;;  %v4210_v23 = vpack.c.bf16 %v3568_v52, %v3567_v1  ;;  %v6652_v1 = vld [vmem:[#allocation34_spill] sm:$0xff]  ;;  %v6654_v52 = vld [vmem:[#allocation41_spill] sm:$0xff] }
  0xf2   : > { %1985 = vmatprep.mubr.f32.mxu1 %v5119_v27 }
  0xf3   : > { %3864 = vmatmul.mubr.f32.gmra.mrb[70].mxu0 %v6647_v53 }
  0xf4   : > { %3866 = vmatprep.mubr.f32.mxu0 %v6648_v2  ;;  %4205 = vmatpush3.bf16.msra.mxu0 %v4202_v55  ;;  %v3571_v55 = vld [vmem:[%s6450_s3 + $0x470] sm:$0xff] }
  0xf5   : > { %1986 = vmatmul.mubr.f32.gmra.mrb[86].mxu1 %v5066_v7  ;;  %4207 = vmatprep.subr.bf16.mxu0 %v4206_v16  ;;  %v4214_v7 = vpack.c.bf16 %v3570_v60, %v3569_v21  ;;  %v6655_v21 = vld [vmem:[#allocation42_spill] sm:$0xff] }
  0xf6   : > { %1990 = vmatprep.mubr.f32.mxu1 %v5126_v59  ;;  %v6658_v60 = vld [vmem:[#allocation46_spill] sm:$0xff] }
  0xf7   : > { %3867 = vmatmul.mubr.f32.gmra.mrb[72].mxu0 %v6649_v38 }
  0xf8   : > { %3869 = vmatprep.mubr.f32.mxu0 %v6650_v58  ;;  %4209 = vmatpush3.bf16.msra.mxu0 %v4206_v16  ;;  %v6653_v16 = vld [vmem:[#allocation39_spill] sm:$0xff] }
  0xf9   : > { %3523 = vmatmul.mubr.msk.f32.gmra.mrb[88].mxu1 %vm867_vm0, %v6636_v19  ;;  %4211 = vmatprep.subr.bf16.mxu0 %v4210_v23  ;;  %v4218_v19 = vpack.c.bf16 %v3572_v8, %v3571_v55  ;;  %v6660_v55 = vld [vmem:[#allocation49_spill] sm:$0xff]  ;;  %v4251_v8 = vld [vmem:[#allocation2 + $0x38] sm:$0xff] }
  0xfa   : > { %1995 = vmatprep.mubr.f32.mxu1 %v6637_v48 }
  0xfb   : > { %3870 = vmatmul.mubr.f32.gmra.mrb[74].mxu0 %v6651_v3 }
  0xfc   : > { %3872 = vmatprep.mubr.f32.mxu0 %v6652_v1  ;;  %4213 = vmatpush3.bf16.msra.mxu0 %v4210_v23  ;;  %v6656_v23 = vld [vmem:[#allocation43_spill] sm:$0xff] }
  0xfd   : > { %1996 = vmatmul.mubr.f32.gmra.mrb[90].mxu1 %v5078_v14  ;;  %4215 = vmatprep.subr.bf16.mxu0 %v4214_v7  ;;  %v6657_v14 = vld [vmem:[#allocation44_spill] sm:$0xff] }
  0xfe   : > { %2000 = vmatprep.mubr.f32.mxu1 %v6638_v24 }
  0xff   : > { %3873 = vmatmul.mubr.f32.gmra.mrb[76].mxu0 %v6653_v16 }
 0x100   : > { %3875 = vmatprep.mubr.f32.mxu0 %v6654_v52  ;;  %4217 = vmatpush3.bf16.msra.mxu0 %v4214_v7  ;;  %v4250_v7 = vld [vmem:[#allocation2 + $0x30] sm:$0xff] }
 0x101   : > { %3524 = vmatmul.mubr.msk.f32.gmra.mrb[92].mxu1 %vm867_vm0, %v6639_v47  ;;  %4219 = vmatprep.subr.bf16.mxu0 %v4218_v19  ;;  %v6659_v47 = vld [vmem:[#allocation47_spill] sm:$0xff] }
 0x102   : > { %2005 = vmatprep.mubr.f32.mxu1 %v5170_v18 }
 0x103   : > { %3876 = vmatmul.mubr.f32.gmra.mrb[78].mxu0 %v6655_v21 }
 0x104   : > { %3878 = vmatprep.mubr.f32.mxu0 %v6656_v23  ;;  %4221 = vmatpush3.bf16.msra.mxu0 %v4218_v19  ;;  %v4255_v19 = vld [vmem:[#allocation2 + $0x68] sm:$0xff] }
 0x105   : > { %2006 = vmatmul.mubr.f32.gmra.mrb[94].mxu1 %v5109_v54  ;;  %v4253_v54 = vld [vmem:[#allocation2 + $0x50] sm:$0xff] }
 0x106   : > { %2366 = vmatprep.mubr.f32.mxu1 %v4926_v34  ;;  %v4252_v34 = vld [vmem:[#allocation2 + $0x48] sm:$0xff] }
 0x107   : > { %3879 = vmatmul.mubr.f32.gmra.mrb[80].mxu0 %v6657_v14 }
 0x108   : > { %3881 = vmatprep.mubr.f32.mxu0 %v6658_v60 }
 0x109   : > { %3573 = vmatmul.mubr.msk.f32.vlgmr.msra.gmra.mrb[96].mxu1 %vm867_vm0, %v4250_v7 }
 0x10a   : > { %2371 = vmatprep.mubr.f32.mxu1 %v5185_v57  ;;  %v4254_v57 = vld [vmem:[#allocation2 + $0x60] sm:$0xff] }
 0x10b   : > { %3882 = vmatmul.mubr.f32.gmra.mrb[82].mxu0 %v6659_v47 }
 0x10c   : > { %3884 = vmatprep.mubr.f32.mxu0 %v6660_v55 }
 0x10d   : > { %2372 = vmatmul.mubr.f32.gmra.mrb[98].mxu1 %v4251_v8  ;;  %v6661_v8 = vld [vmem:[#allocation60_spill] sm:$0xff] }
 0x10e   : > { %2376 = vmatprep.mubr.f32.mxu1 %v5223_v22 }
 0x10f   : > { %3885 = vmatmul.mubr.f32.gmra.mrb[84].mxu0 %v4993_v26 }
 0x110   : > { %3887 = vmatprep.mubr.f32.mxu0 %v5146_v36 }
 0x111   : > { %3574 = vmatmul.mubr.msk.f32.gmra.mrb[100].mxu1 %vm867_vm0, %v4252_v34 }
 0x112   : > { %2381 = vmatprep.mubr.f32.mxu1 %v5253_v43 }
 0x113   : > { %3888 = vmatmul.mubr.f32.gmra.mrb[86].mxu0 %v5196_v44 }
 0x114   : > { %3890 = vmatprep.mubr.f32.mxu0 %v5210_v49 }
 0x115   : > { %2382 = vmatmul.mubr.f32.gmra.mrb[102].mxu1 %v4253_v54  ;;  %v4257_v54 = vld [vmem:[#allocation2 + $0x80] sm:$0xff] }
 0x116   : > { %2386 = vmatprep.mubr.f32.mxu1 %v5286_v25 }
 0x117   : > { %3891 = vmatmul.mubr.f32.gmra.mrb[88].mxu0 %v5228_v4 }
 0x118   : > { %3893 = vmatprep.mubr.f32.mxu0 %v5240_v63 }
 0x119   : > { %3575 = vmatmul.mubr.msk.f32.gmra.mrb[104].mxu1 %vm867_vm0, %v4254_v57 }
 0x11a   : > { %2391 = vmatprep.mubr.f32.mxu1 %v5316_v15  ;;  %v5764_v22 = vpop.f32.mrb[0].mxu1  ;;  %v4256_v15 = vld [vmem:[#allocation2 + $0x78] sm:$0xff] }
 0x11b   : > { %3894 = vmatmul.mubr.f32.gmra.mrb[90].mxu0 %v5259_v35  ;;  %v1627_v43 = vpop.f32.mrb[1].mxu1 }
 0x11c   : > { %3896 = vmatprep.mubr.f32.mxu0 %v5273_v40 }
 0x11d   : > { %2392 = vmatmul.mubr.f32.gmra.mrb[106].mxu1 %v4255_v19 }
 0x11e   : > { %2396 = vmatprep.mubr.f32.mxu1 %v5341_v29  ;;  %v5769_v25 = vpop.f32.mrb[2].mxu1 }
 0x11f   : > { %3897 = vmatmul.mubr.f32.gmra.mrb[92].mxu0 %v5291_v30  ;;  %v5772_v7 = vpop.f32.mrb[3].mxu1 }
 0x120   : > { %3899 = vmatprep.mubr.f32.mxu0 %v5303_v20 }
 0x121   : > { %3576 = vmatmul.mubr.msk.f32.gmra.mrb[108].mxu1 %vm867_vm0, %v4256_v15 }
 0x122   : > { %2401 = vmatprep.mubr.f32.mxu1 %v5362_v39  ;;  %v5778_v34 = vpop.f32.mrb[4].mxu1  ;;  %v4258_v39 = vld [vmem:[#allocation2 + $0x90] sm:$0xff] }
 0x123   : > { %3900 = vmatmul.mubr.f32.gmra.mrb[94].mxu0 %v6661_v8  ;;  %v5781_v29 = vpop.f32.mrb[5].mxu1 }
 0x124   : > { %3934 = vmatprep.mubr.f32.mxu0 %v6644_v41 }
 0x125   : > { %2402 = vmatmul.mubr.f32.gmra.mrb[110].mxu1 %v4257_v54 }
 0x126   : > { %2406 = vmatprep.mubr.f32.mxu1 %v5389_v42  ;;  %v5785_v57 = vpop.f32.mrb[6].mxu1 }
 0x127   : > { %3935 = vmatmul.mubr.f32.vlgmr.msra.gmra.mrb[96].mxu0 %v6645_v17  ;;  %v5788_v19 = vpop.f32.mrb[7].mxu1  ;;  %v4259_v17 = vld [vmem:[#allocation2 + $0x98] sm:$0xff] }
 0x128   : > { %3937 = vmatprep.mubr.f32.mxu0 %v6646_v46 }
 0x129   : > { %3577 = vmatmul.mubr.msk.f32.gmra.mrb[112].mxu1 %vm867_vm0, %v4258_v39 }
 0x12a   : > { %2411 = vmatprep.mubr.f32.mxu1 %v5404_v31  ;;  %v5794_v41 = vpop.f32.mrb[8].mxu1  ;;  %v4260_v31 = vld [vmem:[#allocation2 + $0xa8] sm:$0xff] }
 0x12b   : > { %3938 = vmatmul.mubr.f32.gmra.mrb[98].mxu0 %v6647_v53  ;;  %v5797_v42 = vpop.f32.mrb[9].mxu1 }
 0x12c   : > { %3940 = vmatprep.mubr.f32.mxu0 %v6648_v2  ;;  %v4261_v2 = vld [vmem:[#allocation2 + $0xb0] sm:$0xff] }
 0x12d   : > { %2412 = vmatmul.mubr.f32.gmra.mrb[114].mxu1 %v4259_v17 }
 0x12e   : > { %2416 = vmatprep.mubr.f32.mxu1 %v5423_v9  ;;  %v5801_v46 = vpop.f32.mrb[10].mxu1 }
 0x12f   : > { %3941 = vmatmul.mubr.f32.gmra.mrb[100].mxu0 %v6649_v38  ;;  %v5804_v15 = vpop.f32.mrb[11].mxu1 }
 0x130   : > { %3943 = vmatprep.mubr.f32.mxu0 %v6650_v58 }
 0x131   : > { %3578 = vmatmul.mubr.msk.f32.gmra.mrb[116].mxu1 %vm867_vm0, %v4260_v31 }
 0x132   : > { %2421 = vmatprep.mubr.f32.mxu1 %v5437_v13  ;;  %v5810_v53 = vpop.f32.mrb[12].mxu1  ;;  %v4262_v13 = vld [vmem:[#allocation2 + $0xc0] sm:$0xff] }
 0x133   : > { %3944 = vmatmul.mubr.f32.gmra.mrb[102].mxu0 %v6651_v3  ;;  %v5813_v9 = vpop.f32.mrb[13].mxu1 }
 0x134   : > { %3946 = vmatprep.mubr.f32.mxu0 %v6652_v1 }
 0x135   : > { %2422 = vmatmul.mubr.f32.gmra.mrb[118].mxu1 %v4261_v2  ;;  %v4265_v2 = vld [vmem:[#allocation2 + $0xe0] sm:$0xff] }
 0x136   : > { %2426 = vmatprep.mubr.f32.mxu1 %v5457_v5  ;;  %v5817_v38 = vpop.f32.mrb[14].mxu1 }
 0x137   : > { %3947 = vmatmul.mubr.f32.gmra.mrb[104].mxu0 %v6653_v16  ;;  %v5820_v58 = vpop.f32.mrb[15].mxu1 }
 0x138   : > { %3949 = vmatprep.mubr.f32.mxu0 %v6654_v52  ;;  %v4263_v52 = vld [vmem:[#allocation2 + $0xc8] sm:$0xff] }
 0x139   : > { %3579 = vmatmul.mubr.msk.f32.gmra.mrb[120].mxu1 %vm867_vm0, %v4262_v13 }
 0x13a   : > { %v1402_v3 = vpop.f32.mrb[0].mxu0  ;;  %2431 = vmatprep.mubr.f32.mxu1 %v5472_v0  ;;  %v5828_v54 = vpop.f32.mrb[16].mxu1 }
 0x13b   : > { %v5825_v1 = vadd.f32 %v1627_v43, %v1402_v3  ;;  %3950 = vmatmul.mubr.f32.gmra.mrb[106].mxu0 %v6655_v21  ;;  %v1404_v5 = vpop.f32.mrb[1].mxu0  ;;  %v5831_v16 = vpop.f32.mrb[17].mxu1 }
 0x13c   : > { %3952 = vmatprep.mubr.f32.mxu0 %v6656_v23  ;;  %v4264_v23 = vld [vmem:[#allocation2 + $0xd8] sm:$0xff] }
 0x13d   : > { %2432 = vmatmul.mubr.f32.gmra.mrb[122].mxu1 %v4263_v52  ;;  %v4267_v52 = vld [vmem:[#allocation2 + $0xf8] sm:$0xff] }
 0x13e   : > { %v1407_v39 = vpop.f32.mrb[2].mxu0  ;;  %2436 = vmatprep.mubr.f32.mxu1 %v5492_v56  ;;  %v5838_v43 = vpop.f32.mrb[18].mxu1 }
 0x13f   : > { %v5835_v17 = vadd.f32 %v5764_v22, %v1407_v39  ;;  %3953 = vmatmul.mubr.f32.gmra.mrb[108].mxu0 %v6657_v14  ;;  %v1409_v0 = vpop.f32.mrb[3].mxu0  ;;  %v5841_v21 = vpop.f32.mrb[19].mxu1 }
 0x140   : > { %3955 = vmatprep.mubr.f32.mxu0 %v6658_v60 }
 0x141   : > { %3580 = vmatmul.mubr.msk.f32.gmra.mrb[124].mxu1 %vm867_vm0, %v4264_v23 }
 0x142   : > { %v1412_v31 = vpop.f32.mrb[4].mxu0  ;;  %2441 = vmatprep.mubr.f32.mxu1 %v5507_v61 }
 0x143   : > { %v5847_v56 = vadd.f32 %v5772_v7, %v1412_v31  ;;  %3956 = vmatmul.mubr.f32.gmra.mrb[110].mxu0 %v6659_v47  ;;  %v1414_v14 = vpop.f32.mrb[5].mxu0  ;;  %v4269_v31 = vld [vmem:[#allocation2 + $0x110] sm:$0xff] }
 0x144   : > { %v5850_v22 = vpop.f32.mrb[20].mxu1  ;;  %3958 = vmatprep.mubr.f32.mxu0 %v6660_v55  ;;  %v4266_v55 = vld [vmem:[#allocation2 + $0xf0] sm:$0xff] }
 0x145   : > { %v5853_v60 = vpop.f32.mrb[21].mxu1  ;;  %2442 = vmatmul.mubr.f32.gmra.mrb[126].mxu1 %v4265_v2 }
 0x146   : > { %v1417_v13 = vpop.f32.mrb[6].mxu0  ;;  %2446 = vmatprep.mubr.f32.mxu1 %v6626_v28 }
 0x147   : > { %v5857_v3 = vadd.f32 %v5769_v25, %v1417_v13  ;;  %3959 = vmatmul.mubr.f32.gmra.mrb[112].mxu0 %v4993_v26  ;;  %v1419_v61 = vpop.f32.mrb[7].mxu0 }
 0x148   : > { %v5860_v7 = vpop.f32.mrb[22].mxu1  ;;  %3961 = vmatprep.mubr.f32.mxu0 %v5146_v36  ;;  %v6662_v61 = vld [vmem:[#allocation61_spill] sm:$0xff] }
 0x149   : > { %v5863_v47 = vpop.f32.mrb[23].mxu1  ;;  %3581 = vmatmul.mubr.msk.f32.gmra.mrb[128].mxu1 %vm867_vm0, %v4266_v55 }
 0x14a   : > { %v1422_v5 = vpop.f32.mrb[8].mxu0  ;;  %2451 = vmatprep.mubr.f32.mxu1 %v6628_v11 }
 0x14b   : > { %v5869_v28 = vadd.f32 %v5781_v29, %v1422_v5  ;;  %v1424_v25 = vpop.f32.mrb[9].mxu0  ;;  %3962 = vmatmul.mubr.f32.gmra.mrb[114].mxu0 %v5196_v44  ;;  %v4271_v5 = vld [vmem:[#allocation2 + $0x128] sm:$0xff] }
 0x14c   : > { %v5872_v26 = vpop.f32.mrb[24].mxu1  ;;  %3964 = vmatprep.mubr.f32.mxu0 %v5210_v49  ;;  %v4268_v49 = vld [vmem:[#allocation2 + $0x108] sm:$0xff] }
 0x14d   : > { %v5875_v36 = vpop.f32.mrb[25].mxu1  ;;  %2452 = vmatmul.mubr.f32.gmra.mrb[130].mxu1 %v4267_v52  ;;  %v6663_v52 = vld [vmem:[#allocation62_spill] sm:$0xff] }
 0x14e   : > { %v1427_v39 = vpop.f32.mrb[10].mxu0  ;;  %2456 = vmatprep.mubr.f32.mxu1 %v6630_v51 }
 0x14f   : > { %v5879_v0 = vadd.f32 %v5778_v34, %v1427_v39  ;;  %v1429_v11 = vpop.f32.mrb[11].mxu0  ;;  %3965 = vmatmul.mubr.f32.gmra.mrb[116].mxu0 %v5228_v4 }
 0x150   : > { %v5882_v29 = vpop.f32.mrb[26].mxu1  ;;  %3967 = vmatprep.mubr.f32.mxu0 %v5240_v63  ;;  %v4272_v11 = vld [vmem:[#allocation2 + $0x138] sm:$0xff] }
 0x151   : > { %v5885_v44 = vpop.f32.mrb[27].mxu1  ;;  %3582 = vmatmul.mubr.msk.f32.gmra.mrb[132].mxu1 %vm867_vm0, %v4268_v49 }
 0x152   : > { %v1432_v23 = vpop.f32.mrb[12].mxu0  ;;  %2461 = vmatprep.mubr.f32.mxu1 %v6632_v6 }
 0x153   : > { %v5891_v51 = vadd.f32 %v5788_v19, %v1432_v23  ;;  %v1434_v34 = vpop.f32.mrb[13].mxu0  ;;  %3968 = vmatmul.mubr.f32.gmra.mrb[118].mxu0 %v5259_v35 }
 0x154   : > { %v5894_v4 = vpop.f32.mrb[28].mxu1  ;;  %3970 = vmatprep.mubr.f32.mxu0 %v5273_v40  ;;  %v4270_v40 = vld [vmem:[#allocation2 + $0x120] sm:$0xff] }
 0x155   : > { %v5897_v63 = vpop.f32.mrb[29].mxu1  ;;  %2462 = vmatmul.mubr.f32.gmra.mrb[134].mxu1 %v4269_v31  ;;  %v4273_v31 = vld [vmem:[#allocation2 + $0x140] sm:$0xff] }
 0x156   : > { %v1437_v14 = vpop.f32.mrb[14].mxu0  ;;  %2466 = vmatprep.mubr.f32.mxu1 %v6633_v32 }
 0x157   : > { %v5901_v2 = vadd.f32 %v5785_v57, %v1437_v14  ;;  %v1439_v6 = vpop.f32.mrb[15].mxu0  ;;  %3971 = vmatmul.mubr.f32.gmra.mrb[120].mxu0 %v5291_v30 }
 0x158   : > { %v5904_v19 = vpop.f32.mrb[30].mxu1  ;;  %3973 = vmatprep.mubr.f32.mxu0 %v5303_v20 }
 0x159   : > { %v5907_v35 = vpop.f32.mrb[31].mxu1  ;;  %3583 = vmatmul.mubr.msk.f32.gmra.mrb[136].mxu1 %vm867_vm0, %v4270_v40 }
 0x15a   : > { %v1442_v13 = vpop.f32.mrb[16].mxu0  ;;  %2471 = vmatprep.mubr.f32.mxu1 %v5101_v10 }
 0x15b   : > { %v5913_v32 = vadd.f32 %v5797_v42, %v1442_v13  ;;  %v1444_v57 = vpop.f32.mrb[17].mxu0  ;;  %3974 = vmatmul.mubr.f32.gmra.mrb[122].mxu0 %v6661_v8 }
 0x15c   : > { %v1852_v30 = vpop.f32.mrb[32].mxu1  ;;  %3976 = vmatprep.mubr.f32.mxu0 %v6662_v61 }
 0x15d   : > { %v5918_v20 = vadd.f32 %v1852_v30, %v5825_v1  ;;  %v1854_v55 = vpop.f32.mrb[33].mxu1  ;;  %2472 = vmatmul.mubr.f32.gmra.mrb[138].mxu1 %v4271_v5 }
 0x15e   : > { %v1447_v25 = vpop.f32.mrb[18].mxu0  ;;  %2476 = vmatprep.mubr.f32.mxu1 %v5116_v45  ;;  %v4275_v55 = vld [vmem:[#allocation2 + $0x158] sm:$0xff] }
 0x15f   : > { %v5922_v10 = vadd.f32 %v5794_v41, %v1447_v25  ;;  %v1449_v42 = vpop.f32.mrb[19].mxu0  ;;  %3977 = vmatmul.mubr.f32.gmra.mrb[124].mxu0 %v6663_v52  ;;  %v4276_v52 = vld [vmem:[#allocation2 + $0x168] sm:$0xff] }
 0x160   : > { %v1857_v39 = vpop.f32.mrb[34].mxu1  ;;  %3979 = vmatprep.mubr.f32.mxu0 %v5649_v33 }
 0x161   : > { %v5927_v8 = vadd.f32 %v1857_v39, %v5835_v17  ;;  %v1859_v1 = vpop.f32.mrb[35].mxu1  ;;  %3584 = vmatmul.mubr.msk.f32.gmra.mrb[140].mxu1 %vm867_vm0, %v4272_v11 }
 0x162   : > { %v1452_v49 = vpop.f32.mrb[20].mxu0  ;;  %2481 = vmatprep.mubr.f32.mxu1 %v5119_v27 }
 0x163   : > { %v5933_v45 = vadd.f32 %v5804_v15, %v1452_v49  ;;  %v1454_v41 = vpop.f32.mrb[21].mxu0  ;;  %3980 = vmatmul.mubr.f32.gmra.mrb[126].mxu0 %v5649_v33  ;;  %v4274_v33 = vld [vmem:[#allocation2 + $0x150] sm:$0xff] }
 0x164   : > { %v1862_v23 = vpop.f32.mrb[36].mxu1  ;;  %v4277_v49 = vld [vmem:[#allocation2 + $0x170] sm:$0xff] }
 0x165   : > { %v5937_v34 = vadd.f32 %v1862_v23, %v5847_v56  ;;  %v1864_v17 = vpop.f32.mrb[37].mxu1  ;;  %2482 = vmatmul.mubr.f32.gmra.mrb[142].mxu1 %v4273_v31  ;;  %v4278_v31 = vld [vmem:[#allocation2 + $0x180] sm:$0xff] }
 0x166   : > { %v1457_v14 = vpop.f32.mrb[22].mxu0  ;;  %2486 = vmatprep.mubr.f32.mxu1 %v5126_v59 }
 0x167   : > { %v5941_v6 = vadd.f32 %v5801_v46, %v1457_v14  ;;  %v1459_v27 = vpop.f32.mrb[23].mxu0 }
 0x168   : > { %v1867_v40 = vpop.f32.mrb[38].mxu1 }
 0x169   : > { %v5944_v15 = vadd.f32 %v1867_v40, %v5857_v3  ;;  %v1869_v13 = vpop.f32.mrb[39].mxu1  ;;  %3585 = vmatmul.mubr.msk.f32.gmra.mrb[144].mxu1 %vm867_vm0, %v4274_v33  ;;  %v6664_v33 = vld [vmem:[#allocation63_spill] sm:$0xff] }
 0x16a   : > { %v1462_v56 = vpop.f32.mrb[24].mxu0  ;;  %2491 = vmatprep.mubr.f32.mxu1 %v6637_v48  ;;  %v4279_v13 = vld [vmem:[#allocation2 + $0x188] sm:$0xff] }
 0x16b   : > { %v5950_v57 = vadd.f32 %v5813_v9, %v1462_v56  ;;  %v1464_v59 = vpop.f32.mrb[25].mxu0 }
 0x16c   : > { %v1872_v30 = vpop.f32.mrb[40].mxu1 }
 0x16d   : > { %v5953_v46 = vadd.f32 %v1872_v30, %v5869_v28  ;;  %v1874_v61 = vpop.f32.mrb[41].mxu1  ;;  %2492 = vmatmul.mubr.f32.gmra.mrb[146].mxu1 %v4275_v55 }
 0x16e   : > { %v1467_v3 = vpop.f32.mrb[26].mxu0  ;;  %2496 = vmatprep.mubr.f32.mxu1 %v6638_v24 }
 0x16f   : > { %v5957_v5 = vadd.f32 %v5810_v53, %v1467_v3  ;;  %v1469_v25 = vpop.f32.mrb[27].mxu0 }
 0x170   : > { %v1877_v42 = vpop.f32.mrb[42].mxu1 }
 0x171   : > { %v5960_v48 = vadd.f32 %v1877_v42, %v5879_v0  ;;  %v1879_v9 = vpop.f32.mrb[43].mxu1  ;;  %3586 = vmatmul.mubr.msk.f32.gmra.mrb[148].mxu1 %vm867_vm0, %v4276_v52 }
 0x172   : > { %v1472_v28 = vpop.f32.mrb[28].mxu0  ;;  %2501 = vmatprep.mubr.f32.mxu1 %v5170_v18 }
 0x173   : > { %v5966_v39 = vadd.f32 %v5820_v58, %v1472_v28  ;;  %v1474_v24 = vpop.f32.mrb[29].mxu0 }
 0x174   : > { %v1882_v1 = vpop.f32.mrb[44].mxu1 }
 0x175   : > { %v5969_v53 = vadd.f32 %v1882_v1, %v5891_v51  ;;  %v1884_v11 = vpop.f32.mrb[45].mxu1  ;;  %2502 = vmatmul.mubr.f32.gmra.mrb[150].mxu1 %v4277_v49 }
 0x176   : > { %v1477_v0 = vpop.f32.mrb[30].mxu0  ;;  %2506 = vmatprep.mubr.f32.mxu1 %v5173_v12 }
 0x177   : > { %v1703_v41 = vadd.f32 %v5817_v38, %v1477_v0  ;;  %v1479_v23 = vpop.f32.mrb[31].mxu0 }
 0x178   : > { %v1887_v17 = vpop.f32.mrb[46].mxu1 }
 0x179   : > { %v5974_v18 = vadd.f32 %v1887_v17, %v5901_v2  ;;  %v1889_v58 = vpop.f32.mrb[47].mxu1  ;;  %3587 = vmatmul.mubr.msk.f32.gmra.mrb[152].mxu1 %vm867_vm0, %v4278_v31 }
 0x17a   : > { %v1482_v51 = vpop.f32.mrb[32].mxu0  ;;  %2511 = vmatprep.mubr.f32.mxu1 %v5177_v62 }
 0x17b   : > { %v1708_v14 = vadd.f32 %v5831_v16, %v1482_v51  ;;  %v1484_v27 = vpop.f32.mrb[33].mxu0 }
 0x17c   : > { %v1892_v40 = vpop.f32.mrb[48].mxu1 }
 0x17d   : > { %v5981_v12 = vadd.f32 %v1892_v40, %v5913_v32  ;;  %v1894_v38 = vpop.f32.mrb[49].mxu1  ;;  %2512 = vmatmul.mubr.f32.gmra.mrb[154].mxu1 %v4279_v13 }
 0x17e   : > { %v1487_v2 = vpop.f32.mrb[34].mxu0  ;;  %2516 = vmatprep.mubr.f32.mxu1 %v6664_v33 }
 0x17f   : > { %v1713_v56 = vadd.f32 %v5828_v54, %v1487_v2  ;;  %v1489_v50 = vpop.f32.mrb[35].mxu0 }
 0x180   : > { %v1897_v59 = vpop.f32.mrb[50].mxu1 }
 0x181   : > { %v5986_v30 = vadd.f32 %v1897_v59, %v5922_v10  ;;  %v1899_v62 = vpop.f32.mrb[51].mxu1  ;;  %2517 = vmatmul.mubr.f32.gmra.mrb[156].mxu1 %v6641_v37 }
 0x182   : > { %v1492_v16 = vpop.f32.mrb[36].mxu0  ;;  %2521 = vmatprep.mubr.f32.mxu1 %v6664_v33 }
 0x183   : > { %v1718_v32 = vadd.f32 %v5841_v21, %v1492_v16  ;;  %v1494_v61 = vpop.f32.mrb[37].mxu0 }
 0x184   : > { %v1902_v55 = vpop.f32.mrb[52].mxu1 }
 0x185   : > { %v5992_v3 = vadd.f32 %v1902_v55, %v5933_v45  ;;  %v1904_v25 = vpop.f32.mrb[53].mxu1  ;;  %2522 = vmatmul.mubr.f32.gmra.mrb[158].mxu1 %v6641_v37 }
 0x186   : > { %v1497_v54 = vpop.f32.mrb[38].mxu0 }
 0x187   : > { %v1723_v10 = vadd.f32 %v5838_v43, %v1497_v54  ;;  %v1499_v42 = vpop.f32.mrb[39].mxu0 }
 0x188   : > { %v1907_v9 = vpop.f32.mrb[54].mxu1 }
 0x189   : > { %v5997_v52 = vadd.f32 %v1907_v9, %v5941_v6  ;;  %v1909_v28 = vpop.f32.mrb[55].mxu1 }
 0x18a   : > { %v1502_v24 = vpop.f32.mrb[40].mxu0 }
 0x18b   : > { %v1728_v21 = vadd.f32 %v5853_v60, %v1502_v24  ;;  %v1504_v1 = vpop.f32.mrb[41].mxu0 }
 0x18c   : > { %v1912_v11 = vpop.f32.mrb[56].mxu1 }
 0x18d   : > { %v6001_v45 = vadd.f32 %v1912_v11, %v5950_v57  ;;  %v1914_v49 = vpop.f32.mrb[57].mxu1 }
 0x18e   : > { %v1507_v0 = vpop.f32.mrb[42].mxu0 }
 0x18f   : > { %v1733_v37 = vadd.f32 %v5850_v22, %v1507_v0  ;;  %v1509_v23 = vpop.f32.mrb[43].mxu0 }
 0x190   : > { %v1917_v43 = vpop.f32.mrb[58].mxu1 }
 0x191   : > { %v6005_v17 = vadd.f32 %v1917_v43, %v5957_v5  ;;  %v1919_v6 = vpop.f32.mrb[59].mxu1 }
 0x192   : > { %v1512_v58 = vpop.f32.mrb[44].mxu0 }
 0x193   : > { %v1738_v31 = vadd.f32 %v5863_v47, %v1512_v58  ;;  %v1514_v51 = vpop.f32.mrb[45].mxu0 }
 0x194   : > { %v1922_v60 = vpop.f32.mrb[60].mxu1 }
 0x195   : > { %v6009_v27 = vadd.f32 %v1922_v60, %v5966_v39  ;;  %v1924_v57 = vpop.f32.mrb[61].mxu1 }
 0x196   : > { %v1517_v40 = vpop.f32.mrb[46].mxu0 }
 0x197   : > { %v1743_v38 = vadd.f32 %v5860_v7, %v1517_v40  ;;  %v1519_v13 = vpop.f32.mrb[47].mxu0 }
 0x198   : > { %v1927_v22 = vpop.f32.mrb[62].mxu1 }
 0x199   : > { %v6012_v2 = vadd.f32 %v1927_v22, %v1703_v41  ;;  %v1929_v33 = vpop.f32.mrb[63].mxu1 }
 0x19a   : > { %v1522_v5 = vpop.f32.mrb[48].mxu0 }
 0x19b   : > { %v1748_v50 = vadd.f32 %v5875_v36, %v1522_v5  ;;  %v1524_v59 = vpop.f32.mrb[49].mxu0 }
 0x19c   : > { %v1932_v62 = vpop.f32.mrb[64].mxu1 }
 0x19d   : > { %v6015_v47 = vadd.f32 %v1932_v62, %v1708_v14  ;;  %v1934_v16 = vpop.f32.mrb[65].mxu1 }
 0x19e   : > { %v1527_v61 = vpop.f32.mrb[50].mxu0 }
 0x19f   : > { %v1753_v39 = vadd.f32 %v5872_v26, %v1527_v61  ;;  %v1529_v55 = vpop.f32.mrb[51].mxu0 }
 0x1a0   : > { %v1937_v25 = vpop.f32.mrb[66].mxu1 }
 0x1a1   : > { %v6018_v54 = vadd.f32 %v1937_v25, %v1713_v56  ;;  %v1939_v7 = vpop.f32.mrb[67].mxu1 }
 0x1a2   : > { %v1532_v42 = vpop.f32.mrb[52].mxu0 }
 0x1a3   : > { %v1758_v41 = vadd.f32 %v5885_v44, %v1532_v42  ;;  %v1534_v9 = vpop.f32.mrb[53].mxu0 }
 0x1a4   : > { %v1942_v28 = vpop.f32.mrb[68].mxu1 }
 0x1a5   : > { %v6021_v24 = vadd.f32 %v1942_v28, %v1718_v32  ;;  %v1944_v36 = vpop.f32.mrb[69].mxu1 }
 0x1a6   : > { %v1537_v1 = vpop.f32.mrb[54].mxu0 }
 0x1a7   : > { %v1763_v14 = vadd.f32 %v5882_v29, %v1537_v1  ;;  %v1539_v11 = vpop.f32.mrb[55].mxu0 }
 0x1a8   : > { %v1947_v49 = vpop.f32.mrb[70].mxu1 }
 0x1a9   : > { %v6024_v0 = vadd.f32 %v1947_v49, %v1723_v10  ;;  %v1949_v26 = vpop.f32.mrb[71].mxu1 }
 0x1aa   : > { %v1542_v23 = vpop.f32.mrb[56].mxu0 }
 0x1ab   : > { %v1768_v56 = vadd.f32 %v5897_v63, %v1542_v23  ;;  %v1544_v43 = vpop.f32.mrb[57].mxu0 }
 0x1ac   : > { %v1952_v6 = vpop.f32.mrb[72].mxu1 }
 0x1ad   : > { %v6027_v58 = vadd.f32 %v1952_v6, %v1728_v21  ;;  %v1954_v44 = vpop.f32.mrb[73].mxu1 }
 0x1ae   : > { %v1547_v51 = vpop.f32.mrb[58].mxu0 }
 0x1af   : > { %v1773_v32 = vadd.f32 %v5894_v4, %v1547_v51  ;;  %v1549_v60 = vpop.f32.mrb[59].mxu0 }
 0x1b0   : > { %v1957_v57 = vpop.f32.mrb[74].mxu1 }
 0x1b1   : > { %v6030_v40 = vadd.f32 %v1957_v57, %v1733_v37  ;;  %v1959_v29 = vpop.f32.mrb[75].mxu1 }
 0x1b2   : > { %v1552_v13 = vpop.f32.mrb[60].mxu0 }
 0x1b3   : > { %v1778_v10 = vadd.f32 %v5907_v35, %v1552_v13  ;;  %v1554_v22 = vpop.f32.mrb[61].mxu0 }
 0x1b4   : > { %v1962_v33 = vpop.f32.mrb[76].mxu1 }
 0x1b5   : > { %v6033_v5 = vadd.f32 %v1962_v33, %v1738_v31  ;;  %v1964_v63 = vpop.f32.mrb[77].mxu1 }
 0x1b6   : > { %v1557_v59 = vpop.f32.mrb[62].mxu0 }
 0x1b7   : > { %v1783_v21 = vadd.f32 %v5904_v19, %v1557_v59  ;;  %v1559_v62 = vpop.f32.mrb[63].mxu0 }
 0x1b8   : > { %v1967_v16 = vpop.f32.mrb[78].mxu1 }
 0x1b9   : > { %v6036_v61 = vadd.f32 %v1967_v16, %v1743_v38  ;;  %v1969_v4 = vpop.f32.mrb[79].mxu1 }
 0x1ba   : > { %v3856_v55 = vpop.f32.mrb[64].mxu0 }
 0x1bb   : > { %v6039_v37 = vadd.f32 %v3856_v55, %v5927_v8  ;;  %v2077_v25 = vpop.f32.mrb[65].mxu0 }
 0x1bc   : > { %v1972_v7 = vpop.f32.mrb[80].mxu1  ;;  %v6042_v35 = vadd.f32 %v2077_v25, %v5918_v20 }
 0x1bd   : > { %v6044_v31 = vadd.f32 %v1972_v7, %v1748_v50  ;;  %v1974_v42 = vpop.f32.mrb[81].mxu1 }
 0x1be   : > { %v3859_v9 = vpop.f32.mrb[66].mxu0 }
 0x1bf   : > { %v6047_v19 = vadd.f32 %v3859_v9, %v5944_v15  ;;  %v2087_v28 = vpop.f32.mrb[67].mxu0 }
 0x1c0   : > { %v1977_v38 = vpop.f32.mrb[82].mxu1  ;;  %v6050_v36 = vadd.f32 %v2087_v28, %v5937_v34 }
 0x1c1   : > { %v6052_v1 = vadd.f32 %v1977_v38, %v1753_v39  ;;  %v1979_v8 = vpop.f32.mrb[83].mxu1 }
 0x1c2   : > { %v3862_v11 = vpop.f32.mrb[68].mxu0 }
 0x1c3   : > { %v6055_v49 = vadd.f32 %v3862_v11, %v5960_v48  ;;  %v2097_v20 = vpop.f32.mrb[69].mxu0 }
 0x1c4   : > { %v1982_v50 = vpop.f32.mrb[84].mxu1  ;;  %v6058_v26 = vadd.f32 %v2097_v20, %v5953_v46 }
 0x1c5   : > { %v6060_v23 = vadd.f32 %v1982_v50, %v1758_v41  ;;  %v1984_v15 = vpop.f32.mrb[85].mxu1 }
 0x1c6   : > { %v3865_v43 = vpop.f32.mrb[70].mxu0 }
 0x1c7   : > { %v6063_v6 = vadd.f32 %v3865_v43, %v5974_v18  ;;  %v2107_v34 = vpop.f32.mrb[71].mxu0 }
 0x1c8   : > { %v1987_v39 = vpop.f32.mrb[86].mxu1  ;;  %v6066_v44 = vadd.f32 %v2107_v34, %v5969_v53 }
 0x1c9   : > { %v1988_v51 = vadd.f32 %v1987_v39, %v1763_v14  ;;  %v1989_v48 = vpop.f32.mrb[87].mxu1 }
 0x1ca   : > { %v3868_v60 = vpop.f32.mrb[72].mxu0 }
 0x1cb   : > { %v6069_v57 = vadd.f32 %v3868_v60, %v5986_v30  ;;  %v2117_v46 = vpop.f32.mrb[73].mxu0 }
 0x1cc   : > { %v1992_v29 = vpop.f32.mrb[88].mxu1  ;;  %v6072_v41 = vadd.f32 %v2117_v46, %v5981_v12 }
 0x1cd   : > { %v1993_v13 = vadd.f32 %v1992_v29, %v1768_v56  ;;  %v1994_v22 = vpop.f32.mrb[89].mxu1 }
 0x1ce   : > { %v3871_v18 = vpop.f32.mrb[74].mxu0 }
 0x1cf   : > { %v6075_v33 = vadd.f32 %v3871_v18, %v5997_v52  ;;  %v2127_v63 = vpop.f32.mrb[75].mxu0 }
 0x1d0   : > { %v1997_v53 = vpop.f32.mrb[90].mxu1  ;;  %v6078_v14 = vadd.f32 %v2127_v63, %v5992_v3 }
 0x1d1   : > { %v1998_v59 = vadd.f32 %v1997_v53, %v1773_v32  ;;  %v1999_v62 = vpop.f32.mrb[91].mxu1 }
 0x1d2   : > { %v3874_v30 = vpop.f32.mrb[76].mxu0 }
 0x1d3   : > { %v6081_v16 = vadd.f32 %v3874_v30, %v6005_v17  ;;  %v2137_v4 = vpop.f32.mrb[77].mxu0 }
 0x1d4   : > { %v2002_v12 = vpop.f32.mrb[92].mxu1  ;;  %v6084_v56 = vadd.f32 %v2137_v4, %v6001_v45 }
 0x1d5   : > { %v2003_v55 = vadd.f32 %v2002_v12, %v1778_v10  ;;  %v2004_v25 = vpop.f32.mrb[93].mxu1 }
 0x1d6   : > { %v3877_v52 = vpop.f32.mrb[78].mxu0 }
 0x1d7   : > { %v6087_v7 = vadd.f32 %v3877_v52, %v6012_v2  ;;  %v2147_v42 = vpop.f32.mrb[79].mxu0 }
 0x1d8   : > { %v2007_v3 = vpop.f32.mrb[94].mxu1  ;;  %v6090_v32 = vadd.f32 %v2147_v42, %v6009_v27 }
 0x1d9   : > { %v2008_v9 = vadd.f32 %v2007_v3, %v1783_v21  ;;  %v2009_v28 = vpop.f32.mrb[95].mxu1 }
 0x1da   : > { %v3880_v17 = vpop.f32.mrb[80].mxu0 }
 0x1db   : > { %v6093_v38 = vadd.f32 %v3880_v17, %v6018_v54  ;;  %v2157_v8 = vpop.f32.mrb[81].mxu0 }
 0x1dc   : > { %v6096_v45 = vadd.f32 %v2157_v8, %v6015_v47  ;;  %v2368_v10 = vpop.f32.mrb[96].mxu1 }
 0x1dd   : > { %v2370_v11 = vpop.f32.mrb[97].mxu1 }
 0x1de   : > { %v3883_v20 = vpop.f32.mrb[82].mxu0 }
 0x1df   : > { %v6099_v2 = vadd.f32 %v3883_v20, %v6024_v0  ;;  %v2167_v50 = vpop.f32.mrb[83].mxu0 }
 0x1e0   : > { %v6102_v27 = vadd.f32 %v2167_v50, %v6021_v24  ;;  %v2373_v21 = vpop.f32.mrb[98].mxu1 }
 0x1e1   : > { %v2375_v15 = vpop.f32.mrb[99].mxu1 }
 0x1e2   : > { %v3886_v43 = vpop.f32.mrb[84].mxu0 }
 0x1e3   : > { %v6105_v54 = vadd.f32 %v3886_v43, %v6030_v40  ;;  %v2177_v34 = vpop.f32.mrb[85].mxu0 }
 0x1e4   : > { %v6108_v47 = vadd.f32 %v2177_v34, %v6027_v58  ;;  %v2378_v39 = vpop.f32.mrb[100].mxu1 }
 0x1e5   : > { %v2380_v48 = vpop.f32.mrb[101].mxu1 }
 0x1e6   : > { %v3889_v60 = vpop.f32.mrb[86].mxu0 }
 0x1e7   : > { %v6111_v0 = vadd.f32 %v3889_v60, %v6036_v61  ;;  %v2187_v46 = vpop.f32.mrb[87].mxu0 }
 0x1e8   : > { %v6114_v24 = vadd.f32 %v2187_v46, %v6033_v5  ;;  %v2383_v29 = vpop.f32.mrb[102].mxu1 }
 0x1e9   : > { %v2385_v22 = vpop.f32.mrb[103].mxu1 }
 0x1ea   : > { %v3892_v18 = vpop.f32.mrb[88].mxu0 }
 0x1eb   : > { %v6117_v40 = vadd.f32 %v3892_v18, %v6052_v1  ;;  %v2197_v63 = vpop.f32.mrb[89].mxu0 }
 0x1ec   : > { %v6120_v58 = vadd.f32 %v2197_v63, %v6044_v31  ;;  %v2388_v53 = vpop.f32.mrb[104].mxu1 }
 0x1ed   : > { %v2390_v62 = vpop.f32.mrb[105].mxu1 }
 0x1ee   : > { %v3895_v30 = vpop.f32.mrb[90].mxu0 }
 0x1ef   : > { %v6122_v4 = vadd.f32 %v3895_v30, %v1988_v51  ;;  %v2207_v61 = vpop.f32.mrb[91].mxu0 }
 0x1f0   : > { %v6125_v12 = vadd.f32 %v2207_v61, %v6060_v23  ;;  %v2393_v5 = vpop.f32.mrb[106].mxu1 }
 0x1f1   : > { %v2395_v25 = vpop.f32.mrb[107].mxu1 }
 0x1f2   : > { %v3898_v52 = vpop.f32.mrb[92].mxu0 }
 0x1f3   : > { %v6127_v42 = vadd.f32 %v3898_v52, %v1998_v59  ;;  %v2217_v1 = vpop.f32.mrb[93].mxu0  ;;  %v6138_v59 = vld [vmem:[%s6451_s4] ss:$0 sm:$0xff] }
 0x1f4   : > { %v6129_v3 = vadd.f32 %v2217_v1, %v1993_v13  ;;  %v2398_v28 = vpop.f32.mrb[108].mxu1 }
 0x1f5   : > { %v2400_v31 = vpop.f32.mrb[109].mxu1 }
 0x1f6   : > { %v3901_v17 = vpop.f32.mrb[94].mxu0 }
 0x1f7   : > { %v6131_v8 = vadd.f32 %v3901_v17, %v2008_v9  ;;  %v2227_v11 = vpop.f32.mrb[95].mxu0 }
 0x1f8   : > { %v6133_v51 = vadd.f32 %v2227_v11, %v2003_v55  ;;  %v2403_v20 = vpop.f32.mrb[110].mxu1 }
 0x1f9   : > { %v2405_v50 = vpop.f32.mrb[111].mxu1 }
 0x1fa   : > { %v3936_v23 = vpop.f32.mrb[96].mxu0 }
 0x1fb   : > { %v2599_v15 = vadd.f32 %v3936_v23, %v2373_v21  ;;  %v2593_v43 = vpop.f32.mrb[97].mxu0 }
 0x1fc   : > { %v2408_v13 = vpop.f32.mrb[112].mxu1  ;;  %v2594_v34 = vadd.f32 %v2593_v43, %v2368_v10 }
 0x1fd   : > { %v2753_v9 = vadd.f32 %v2599_v15, %v6039_v37  ;;  %v2410_v48 = vpop.f32.mrb[113].mxu1 }
 0x1fe   : > { %v2752_v55 = vadd.f32 %v2594_v34, %v6042_v35  ;;  %v3939_v60 = vpop.f32.mrb[98].mxu0 }
 0x1ff   : > { %v6143_v46 = vadd.f32 %v6138_v59, %v2753_v9  ;;  %v2609_v22 = vadd.f32 %v3939_v60, %v2383_v29  ;;  %v2603_v21 = vpop.f32.mrb[99].mxu0 }
 0x200   : > { %v6146_v18 = vadd.f32 %v6138_v59, %v2752_v55  ;;  %v2413_v63 = vpop.f32.mrb[114].mxu1  ;;  %v2604_v62 = vadd.f32 %v2603_v21, %v2378_v39 }
 0x201   : > { %2824 = vst [vmem:[%s4378_s7 + $0x8] sm:$0xff] %v6143_v46  ;;  %v2755_v37 = vadd.f32 %v2609_v22, %v6047_v19  ;;  %v2415_v10 = vpop.f32.mrb[115].mxu1 }
 0x202   : > { %2823 = vst [vmem:[%s4378_s7] sm:$0xff] %v6146_v18  ;;  %v2754_v35 = vadd.f32 %v2604_v62, %v6050_v36  ;;  %v3942_v30 = vpop.f32.mrb[100].mxu0  ;;  %v2855_v52 = vadd.f32 %v6143_v46, %v6146_v18 }
 0x203   : > { %v6155_v29 = vadd.f32 %v6138_v59, %v2755_v37  ;;  %v2619_v61 = vadd.f32 %v3942_v30, %v2393_v5  ;;  %v2613_v25 = vpop.f32.mrb[101].mxu0 }
 0x204   : > { %v6160_v39 = vadd.f32 %v6138_v59, %v2754_v35  ;;  %v2418_v1 = vpop.f32.mrb[116].mxu1  ;;  %v2614_v19 = vadd.f32 %v2613_v25, %v2388_v53 }
 0x205   : > { %2826 = vst [vmem:[%s4378_s7 + $0x18] sm:$0xff] %v6155_v29  ;;  %v2757_v31 = vadd.f32 %v2619_v61, %v6055_v49  ;;  %v2420_v36 = vpop.f32.mrb[117].mxu1 }
 0x206   : > { %2825 = vst [vmem:[%s4378_s7 + $0x10] sm:$0xff] %v6160_v39  ;;  %v2856_v5 = vadd.f32 %v2855_v52, %v6160_v39  ;;  %v2756_v17 = vadd.f32 %v2614_v19, %v6058_v26  ;;  %v3945_v11 = vpop.f32.mrb[102].mxu0 }
 0x207   : > { %v6170_v50 = vadd.f32 %v6138_v59, %v2757_v31  ;;  %v2629_v23 = vadd.f32 %v3945_v11, %v2403_v20  ;;  %v2623_v15 = vpop.f32.mrb[103].mxu0 }
 0x208   : > { %v6173_v53 = vadd.f32 %v6138_v59, %v2756_v17  ;;  %v2857_v43 = vadd.f32 %v2856_v5, %v6155_v29  ;;  %v2423_v49 = vpop.f32.mrb[118].mxu1  ;;  %v2624_v34 = vadd.f32 %v2623_v15, %v2398_v28 }
 0x209   : > { %2828 = vst [vmem:[%s4378_s7 + $0x28] sm:$0xff] %v6170_v50  ;;  %v2759_v9 = vadd.f32 %v2629_v23, %v6063_v6  ;;  %v2425_v26 = vpop.f32.mrb[119].mxu1 }
 0x20a   : > { %2827 = vst [vmem:[%s4378_s7 + $0x20] sm:$0xff] %v6173_v53  ;;  %v2858_v48 = vadd.f32 %v2857_v43, %v6173_v53  ;;  %v2758_v20 = vadd.f32 %v2624_v34, %v6066_v44  ;;  %v3948_v55 = vpop.f32.mrb[104].mxu0 }
 0x20b   : > { %v6184_v60 = vadd.f32 %v6138_v59, %v2759_v9  ;;  %v2639_v22 = vadd.f32 %v3948_v55, %v2413_v63  ;;  %v2633_v21 = vpop.f32.mrb[105].mxu0 }
 0x20c   : > { %v6187_v28 = vadd.f32 %v6138_v59, %v2758_v20  ;;  %v2859_v62 = vadd.f32 %v2858_v48, %v6170_v50  ;;  %v2428_v6 = vpop.f32.mrb[120].mxu1  ;;  %v2634_v37 = vadd.f32 %v2633_v21, %v2408_v13 }
 0x20d   : > { %2830 = vst [vmem:[%s4378_s7 + $0x38] sm:$0xff] %v6184_v60  ;;  %v2761_v10 = vadd.f32 %v2639_v22, %v6069_v57  ;;  %v2430_v44 = vpop.f32.mrb[121].mxu1 }
 0x20e   : > { %2829 = vst [vmem:[%s4378_s7 + $0x30] sm:$0xff] %v6187_v28  ;;  %v2860_v35 = vadd.f32 %v2859_v62, %v6187_v28  ;;  %v2760_v63 = vadd.f32 %v2634_v37, %v6072_v41  ;;  %v3951_v30 = vpop.f32.mrb[106].mxu0 }
 0x20f   : > { %v6198_v61 = vadd.f32 %v6138_v59, %v2761_v10  ;;  %v2649_v25 = vadd.f32 %v3951_v30, %v2423_v49  ;;  %v2643_v52 = vpop.f32.mrb[107].mxu0 }
 0x210   : > { %v6201_v13 = vadd.f32 %v6138_v59, %v2760_v63  ;;  %v2861_v19 = vadd.f32 %v2860_v35, %v6184_v60  ;;  %v2433_v57 = vpop.f32.mrb[122].mxu1  ;;  %v2644_v31 = vadd.f32 %v2643_v52, %v2418_v1 }
 0x211   : > { %2832 = vst [vmem:[%s4378_s7 + $0x48] sm:$0xff] %v6198_v61  ;;  %v2763_v36 = vadd.f32 %v2649_v25, %v6075_v33  ;;  %v2435_v41 = vpop.f32.mrb[123].mxu1 }
 0x212   : > { %2831 = vst [vmem:[%s4378_s7 + $0x40] sm:$0xff] %v6201_v13  ;;  %v2862_v5 = vadd.f32 %v2861_v19, %v6201_v13  ;;  %v2762_v17 = vadd.f32 %v2644_v31, %v6078_v14  ;;  %v3954_v11 = vpop.f32.mrb[108].mxu0 }
 0x213   : > { %v6212_v23 = vadd.f32 %v6138_v59, %v2763_v36  ;;  %v2659_v15 = vadd.f32 %v3954_v11, %v2433_v57  ;;  %v2653_v43 = vpop.f32.mrb[109].mxu0 }
 0x214   : > { %v6215_v1 = vadd.f32 %v6138_v59, %v2762_v17  ;;  %v2863_v33 = vadd.f32 %v2862_v5, %v6198_v61  ;;  %v2438_v49 = vpop.f32.mrb[124].mxu1  ;;  %v2654_v34 = vadd.f32 %v2653_v43, %v2428_v6 }
 0x215   : > { %2834 = vst [vmem:[%s4378_s7 + $0x58] sm:$0xff] %v6212_v23  ;;  %v2765_v9 = vadd.f32 %v2659_v15, %v6081_v16  ;;  %v2440_v14 = vpop.f32.mrb[125].mxu1 }
 0x216   : > { %2833 = vst [vmem:[%s4378_s7 + $0x50] sm:$0xff] %v6215_v1  ;;  %v2764_v26 = vadd.f32 %v2654_v34, %v6084_v56  ;;  %v3957_v48 = vpop.f32.mrb[110].mxu0  ;;  %v2864_v20 = vadd.f32 %v2863_v33, %v6215_v1 }
 0x217   : > { %v6226_v55 = vadd.f32 %v6138_v59, %v2765_v9  ;;  %v2663_v22 = vpop.f32.mrb[111].mxu0 }
 0x218   : > { %v6229_v21 = vadd.f32 %v6138_v59, %v2764_v26  ;;  %v2443_v62 = vpop.f32.mrb[126].mxu1  ;;  %v2664_v6 = vadd.f32 %v2663_v22, %v2438_v49  ;;  %v2865_v44 = vadd.f32 %v2864_v20, %v6212_v23 }
 0x219   : > { %2836 = vst [vmem:[%s4378_s7 + $0x68] sm:$0xff] %v6226_v55  ;;  %v2669_v16 = vadd.f32 %v3957_v48, %v2443_v62  ;;  %v2445_v37 = vpop.f32.mrb[127].mxu1 }
 0x21a   : > { %2835 = vst [vmem:[%s4378_s7 + $0x60] sm:$0xff] %v6229_v21  ;;  %v2766_v56 = vadd.f32 %v2664_v6, %v6090_v32  ;;  %v3960_v10 = vpop.f32.mrb[112].mxu0  ;;  %v2866_v32 = vadd.f32 %v2865_v44, %v6229_v21 }
 0x21b   : > { %v2767_v35 = vadd.f32 %v2669_v16, %v6087_v7  ;;  %v2673_v63 = vpop.f32.mrb[113].mxu0 }
 0x21c   : > { %v6239_v30 = vadd.f32 %v6138_v59, %v2766_v56  ;;  %v2448_v25 = vpop.f32.mrb[128].mxu1  ;;  %v2867_v43 = vadd.f32 %v2866_v32, %v6226_v55 }
 0x21d   : > { %v6242_v52 = vadd.f32 %v6138_v59, %v2767_v35  ;;  %v2674_v19 = vadd.f32 %v2673_v63, %v2448_v25  ;;  %v2450_v57 = vpop.f32.mrb[129].mxu1 }
 0x21e   : > { %2837 = vst [vmem:[%s4378_s7 + $0x70] sm:$0xff] %v6239_v30  ;;  %v3963_v31 = vpop.f32.mrb[114].mxu0  ;;  %v2868_v48 = vadd.f32 %v2867_v43, %v6239_v30 }
 0x21f   : > { %2838 = vst [vmem:[%s4378_s7 + $0x78] sm:$0xff] %v6242_v52  ;;  %v2768_v7 = vadd.f32 %v2674_v19, %v6096_v45  ;;  %v2683_v36 = vpop.f32.mrb[115].mxu0 }
 0x220   : > { %v2453_v41 = vpop.f32.mrb[130].mxu1  ;;  %v2869_v56 = vadd.f32 %v2868_v48, %v6242_v52 }
 0x221   : > { %v6251_v5 = vadd.f32 %v6138_v59, %v2768_v7  ;;  %v2679_v17 = vadd.f32 %v3960_v10, %v2453_v41  ;;  %v2455_v11 = vpop.f32.mrb[131].mxu1 }
 0x222   : > { %v3966_v15 = vpop.f32.mrb[116].mxu0 }
 0x223   : > { %2839 = vst [vmem:[%s4378_s7 + $0x80] sm:$0xff] %v6251_v5  ;;  %v2769_v33 = vadd.f32 %v2679_v17, %v6093_v38  ;;  %v2693_v49 = vpop.f32.mrb[117].mxu0  ;;  %v2870_v57 = vadd.f32 %v2869_v56, %v6251_v5 }
 0x224   : > { %v2458_v34 = vpop.f32.mrb[132].mxu1 }
 0x225   : > { %v6258_v45 = vadd.f32 %v6138_v59, %v2769_v33  ;;  %v2684_v9 = vadd.f32 %v2683_v36, %v2458_v34  ;;  %v2460_v14 = vpop.f32.mrb[133].mxu1 }
 0x226   : > { %v3969_v26 = vpop.f32.mrb[118].mxu0 }
 0x227   : > { %2840 = vst [vmem:[%s4378_s7 + $0x88] sm:$0xff] %v6258_v45  ;;  %v2770_v20 = vadd.f32 %v2684_v9, %v6102_v27  ;;  %v2703_v22 = vpop.f32.mrb[119].mxu0  ;;  %v2871_v36 = vadd.f32 %v2870_v57, %v6258_v45 }
 0x228   : > { %v2463_v62 = vpop.f32.mrb[134].mxu1 }
 0x229   : > { %v6265_v38 = vadd.f32 %v6138_v59, %v2770_v20  ;;  %v2689_v6 = vadd.f32 %v3963_v31, %v2463_v62  ;;  %v2465_v16 = vpop.f32.mrb[135].mxu1 }
 0x22a   : > { %v3972_v37 = vpop.f32.mrb[120].mxu0 }
 0x22b   : > { %2841 = vst [vmem:[%s4378_s7 + $0x90] sm:$0xff] %v6265_v38  ;;  %v2771_v10 = vadd.f32 %v2689_v6, %v6099_v2  ;;  %v2713_v44 = vpop.f32.mrb[121].mxu0  ;;  %v2872_v43 = vadd.f32 %v2871_v36, %v6265_v38 }
 0x22c   : > { %v2468_v35 = vpop.f32.mrb[136].mxu1 }
 0x22d   : > { %v6272_v27 = vadd.f32 %v6138_v59, %v2771_v10  ;;  %v2694_v63 = vadd.f32 %v2693_v49, %v2468_v35  ;;  %v2470_v25 = vpop.f32.mrb[137].mxu1 }
 0x22e   : > { %v3975_v19 = vpop.f32.mrb[122].mxu0 }
 0x22f   : > { %2842 = vst [vmem:[%s4378_s7 + $0x98] sm:$0xff] %v6272_v27  ;;  %v2772_v31 = vadd.f32 %v2694_v63, %v6108_v47  ;;  %v2723_v32 = vpop.f32.mrb[123].mxu0  ;;  %v2873_v34 = vadd.f32 %v2872_v43, %v6272_v27 }
 0x230   : > { %v2473_v7 = vpop.f32.mrb[138].mxu1 }
 0x231   : > { %v6280_v2 = vadd.f32 %v6138_v59, %v2772_v31  ;;  %v2699_v41 = vadd.f32 %v3966_v15, %v2473_v7  ;;  %v2475_v17 = vpop.f32.mrb[139].mxu1 }
 0x232   : > { %v3978_v11 = vpop.f32.mrb[124].mxu0 }
 0x233   : > { %2843 = vst [vmem:[%s4378_s7 + $0xa0] sm:$0xff] %v6280_v2  ;;  %v2773_v33 = vadd.f32 %v2699_v41, %v6105_v54  ;;  %v2733_v49 = vpop.f32.mrb[125].mxu0  ;;  %v2874_v15 = vadd.f32 %v2873_v34, %v6280_v2 }
 0x234   : > { %v2478_v47 = vpop.f32.mrb[140].mxu1 }
 0x235   : > { %v6288_v9 = vadd.f32 %v6138_v59, %v2773_v33  ;;  %v2704_v14 = vadd.f32 %v2703_v22, %v2478_v47  ;;  %v2480_v48 = vpop.f32.mrb[141].mxu1 }
 0x236   : > { %v6290_v20 = vpop.f32.mrb[126].mxu0 }
 0x237   : > { %2844 = vst [vmem:[%s4378_s7 + $0xa8] sm:$0xff] %v6288_v9  ;;  %v2774_v62 = vadd.f32 %v2704_v14, %v6114_v24  ;;  %v2743_v54 = vpop.f32.mrb[127].mxu0  ;;  %v2875_v16 = vadd.f32 %v2874_v15, %v6288_v9 }
 0x238   : > { %v2483_v6 = vpop.f32.mrb[142].mxu1 }
 0x239   : > { %v6298_v56 = vadd.f32 %v6138_v59, %v2774_v62  ;;  %v2709_v10 = vadd.f32 %v3969_v26, %v2483_v6  ;;  %v2485_v22 = vpop.f32.mrb[143].mxu1 }
 0x23b   : > { %2845 = vst [vmem:[%s4378_s7 + $0xb0] sm:$0xff] %v6298_v56  ;;  %v2876_v35 = vadd.f32 %v2875_v16, %v6298_v56  ;;  %v2775_v63 = vadd.f32 %v2709_v10, %v6111_v0 }
 0x23c   : > { %v2488_v25 = vpop.f32.mrb[144].mxu1 }
 0x23d   : > { %v6305_v57 = vadd.f32 %v6138_v59, %v2775_v63  ;;  %v2714_v24 = vadd.f32 %v2713_v44, %v2488_v25  ;;  %v2490_v31 = vpop.f32.mrb[145].mxu1 }
 0x23f   : > { %2846 = vst [vmem:[%s4378_s7 + $0xb8] sm:$0xff] %v6305_v57  ;;  %v2877_v7 = vadd.f32 %v2876_v35, %v6305_v57  ;;  %v2776_v26 = vadd.f32 %v2714_v24, %v6120_v58 }
 0x240   : > { %v2493_v36 = vpop.f32.mrb[146].mxu1 }
 0x241   : > { %v6312_v41 = vadd.f32 %v6138_v59, %v2776_v26  ;;  %v2719_v17 = vadd.f32 %v3972_v37, %v2493_v36  ;;  %v2495_v0 = vpop.f32.mrb[147].mxu1 }
 0x243   : > { %2847 = vst [vmem:[%s4378_s7 + $0xc0] sm:$0xff] %v6312_v41  ;;  %v2878_v43 = vadd.f32 %v2877_v7, %v6312_v41  ;;  %v2777_v44 = vadd.f32 %v2719_v17, %v6117_v40 }
 0x244   : > { %v2498_v33 = vpop.f32.mrb[148].mxu1 }
 0x245   : > { %v6319_v47 = vadd.f32 %v6138_v59, %v2777_v44  ;;  %v2724_v34 = vadd.f32 %v2723_v32, %v2498_v33  ;;  %v2500_v58 = vpop.f32.mrb[149].mxu1 }
 0x247   : > { %2848 = vst [vmem:[%s4378_s7 + $0xc8] sm:$0xff] %v6319_v47  ;;  %v2879_v14 = vadd.f32 %v2878_v43, %v6319_v47  ;;  %v2778_v37 = vadd.f32 %v2724_v34, %v6125_v12 }
 0x248   : > { %v2503_v48 = vpop.f32.mrb[150].mxu1 }
 0x249   : > { %v6326_v15 = vadd.f32 %v6138_v59, %v2778_v37  ;;  %v2729_v62 = vadd.f32 %v3975_v19, %v2503_v48  ;;  %v2505_v40 = vpop.f32.mrb[151].mxu1 }
 0x24b   : > { %2849 = vst [vmem:[%s4378_s7 + $0xd0] sm:$0xff] %v6326_v15  ;;  %v2880_v6 = vadd.f32 %v2879_v14, %v6326_v15  ;;  %v2779_v32 = vadd.f32 %v2729_v62, %v6122_v4 }
 0x24c   : > { %v2508_v16 = vpop.f32.mrb[152].mxu1 }
 0x24d   : > { %v6333_v10 = vadd.f32 %v6138_v59, %v2779_v32  ;;  %v2734_v22 = vadd.f32 %v2733_v49, %v2508_v16  ;;  %v2510_v12 = vpop.f32.mrb[153].mxu1 }
 0x24f   : > { %2850 = vst [vmem:[%s4378_s7 + $0xd8] sm:$0xff] %v6333_v10  ;;  %v2881_v35 = vadd.f32 %v2880_v6, %v6333_v10  ;;  %v2780_v19 = vadd.f32 %v2734_v22, %v6129_v3 }
 0x250   : > { %v2513_v63 = vpop.f32.mrb[154].mxu1 }
 0x251   : > { %v6340_v25 = vadd.f32 %v6138_v59, %v2780_v19  ;;  %v2739_v24 = vadd.f32 %v3978_v11, %v2513_v63  ;;  %v2515_v4 = vpop.f32.mrb[155].mxu1 }
 0x253   : > { %2851 = vst [vmem:[%s4378_s7 + $0xe0] sm:$0xff] %v6340_v25  ;;  %v2882_v31 = vadd.f32 %v2881_v35, %v6340_v25  ;;  %v2781_v49 = vadd.f32 %v2739_v24, %v6127_v42 }
 0x254   : > { %v2518_v7 = vpop.f32.mrb[156].mxu1 }
 0x255   : > { %v6347_v26 = vadd.f32 %v6138_v59, %v2781_v49  ;;  %v2744_v36 = vadd.f32 %v2743_v54, %v2518_v7  ;;  %v2520_v3 = vpop.f32.mrb[157].mxu1 }
 0x257   : > { %2852 = vst [vmem:[%s4378_s7 + $0xe8] sm:$0xff] %v6347_v26  ;;  %v2883_v17 = vadd.f32 %v2882_v31, %v6347_v26  ;;  %v2782_v11 = vadd.f32 %v2744_v36, %v6133_v51 }
 0x258   : > { %v2523_v0 = vpop.f32.mrb[158].mxu1 }
 0x259   : > { %v6354_v43 = vadd.f32 %v6138_v59, %v2782_v11  ;;  %v2749_v44 = vadd.f32 %v6290_v20, %v2523_v0  ;;  %v2525_v42 = vpop.f32.mrb[159].mxu1 }
 0x25b   : > { %2853 = vst [vmem:[%s4378_s7 + $0xf0] sm:$0xff] %v6354_v43  ;;  %v2884_v33 = vadd.f32 %v2883_v17, %v6354_v43  ;;  %v2783_v54 = vadd.f32 %v2749_v44, %v6131_v8 }
 0x25d   : > { %v6362_v34 = vadd.f32 %v6138_v59, %v2783_v54 }
 0x25f   : > { %2854 = vst [vmem:[%s4378_s7 + $0xf8] sm:$0xff] %v6362_v34  ;;  %v2885_v51 = vadd.f32 %v2884_v33, %v6362_v34 }
 0x261   : > { %v2886_v58 = vrot.slane %v2885_v51, 4 }
 0x263   : > { %v2887_v14 = vadd.f32 %v2886_v58, %v2885_v51 }
 0x265   : > { %v2888_v37 = vrot.slane %v2887_v14, 2 }
 0x267   : > { %v2889_v48 = vadd.f32 %v2888_v37, %v2887_v14 }
 0x269   : > { %v2890_v62 = vrot.slane %v2889_v48, 1 }
 0x26b   : > { %v6367_v20 = vadd.f32 %v2890_v62, %v2889_v48 }
 0x26d   : > { %v6370_v40 = vmul.f32 0.00390625, %v6367_v20 }
 0x26f   : > { %v2894_v8 = vsub.f32 %v6146_v18, %v6370_v40  ;;  %v2895_v59 = vsub.f32 %v6143_v46, %v6370_v40  ;;  %v2896_v6 = vsub.f32 %v6160_v39, %v6370_v40  ;;  %v2897_v22 = vsub.f32 %v6155_v29, %v6370_v40 }
 0x270   : > { %v2898_v12 = vsub.f32 %v6173_v53, %v6370_v40  ;;  %v2899_v63 = vsub.f32 %v6170_v50, %v6370_v40  ;;  %v2900_v46 = vsub.f32 %v6187_v28, %v6370_v40  ;;  %v2901_v31 = vsub.f32 %v6184_v60, %v6370_v40 }
 0x271   : > { %v2926_v32 = vmul.f32 %v2894_v8, %v2894_v8  ;;  %v2927_v16 = vmul.f32 %v2895_v59, %v2895_v59  ;;  %v2928_v35 = vmul.f32 %v2896_v6, %v2896_v6  ;;  %v2929_v18 = vmul.f32 %v2897_v22, %v2897_v22 }
 0x272   : > { %v2930_v4 = vmul.f32 %v2898_v12, %v2898_v12  ;;  %v2931_v49 = vmul.f32 %v2899_v63, %v2899_v63  ;;  %v2902_v53 = vsub.f32 %v6201_v13, %v6370_v40  ;;  %v2932_v7 = vmul.f32 %v2900_v46, %v2900_v46 }
 0x273   : > { %v2958_v19 = vadd.f32 %v2927_v16, %v2926_v32  ;;  %v2903_v50 = vsub.f32 %v6198_v61, %v6370_v40  ;;  %v2933_v3 = vmul.f32 %v2901_v31, %v2901_v31  ;;  %v2904_v28 = vsub.f32 %v6215_v1, %v6370_v40 }
 0x274   : > { %v2934_v11 = vmul.f32 %v2902_v53, %v2902_v53  ;;  %v2905_v60 = vsub.f32 %v6212_v23, %v6370_v40  ;;  %v2906_v13 = vsub.f32 %v6229_v21, %v6370_v40  ;;  %v2907_v61 = vsub.f32 %v6226_v55, %v6370_v40 }
 0x275   : > { %v2959_v24 = vadd.f32 %v2958_v19, %v2928_v35  ;;  %v2935_v44 = vmul.f32 %v2903_v50, %v2903_v50  ;;  %v2936_v33 = vmul.f32 %v2904_v28, %v2904_v28  ;;  %v2908_v1 = vsub.f32 %v6239_v30, %v6370_v40 }
 0x276   : > { %v2937_v51 = vmul.f32 %v2905_v60, %v2905_v60  ;;  %v2938_v14 = vmul.f32 %v2906_v13, %v2906_v13  ;;  %v2909_v23 = vsub.f32 %v6242_v52, %v6370_v40  ;;  %v2939_v48 = vmul.f32 %v2907_v61, %v2907_v61 }
 0x277   : > { %v2960_v39 = vadd.f32 %v2959_v24, %v2929_v18  ;;  %v2910_v21 = vsub.f32 %v6251_v5, %v6370_v40  ;;  %v2940_v8 = vmul.f32 %v2908_v1, %v2908_v1  ;;  %v2911_v55 = vsub.f32 %v6258_v45, %v6370_v40 }
 0x278   : > { %v2941_v6 = vmul.f32 %v2909_v23, %v2909_v23  ;;  %v2912_v30 = vsub.f32 %v6265_v38, %v6370_v40  ;;  %v2913_v52 = vsub.f32 %v6272_v27, %v6370_v40  ;;  %v2914_v5 = vsub.f32 %v6280_v2, %v6370_v40 }
 0x279   : > { %v2961_v29 = vadd.f32 %v2960_v39, %v2930_v4  ;;  %v2942_v16 = vmul.f32 %v2910_v21, %v2910_v21  ;;  %v2943_v12 = vmul.f32 %v2911_v55, %v2911_v55  ;;  %v2915_v45 = vsub.f32 %v6288_v9, %v6370_v40 }
 0x27a   : > { %v2944_v19 = vmul.f32 %v2912_v30, %v2912_v30  ;;  %v2945_v18 = vmul.f32 %v2913_v52, %v2913_v52  ;;  %v2916_v38 = vsub.f32 %v6298_v56, %v6370_v40  ;;  %v2946_v46 = vmul.f32 %v2914_v5, %v2914_v5 }
 0x27b   : > { %v2962_v36 = vadd.f32 %v2961_v29, %v2931_v49  ;;  %v2917_v27 = vsub.f32 %v6305_v57, %v6370_v40  ;;  %v2947_v39 = vmul.f32 %v2915_v45, %v2915_v45  ;;  %v2918_v2 = vsub.f32 %v6312_v41, %v6370_v40 }
 0x27c   : > { %v2948_v49 = vmul.f32 %v2916_v38, %v2916_v38  ;;  %v2919_v9 = vsub.f32 %v6319_v47, %v6370_v40  ;;  %v2920_v56 = vsub.f32 %v6326_v15, %v6370_v40  ;;  %v2921_v57 = vsub.f32 %v6333_v10, %v6370_v40 }
 0x27d   : > { %v2963_v17 = vadd.f32 %v2962_v36, %v2932_v7  ;;  %v2949_v53 = vmul.f32 %v2917_v27, %v2917_v27  ;;  %v2950_v36 = vmul.f32 %v2918_v2, %v2918_v2  ;;  %v2922_v41 = vsub.f32 %v6340_v25, %v6370_v40 }
 0x27e   : > { %v2952_v28 = vmul.f32 %v2920_v56, %v2920_v56  ;;  %v2923_v47 = vsub.f32 %v6347_v26, %v6370_v40  ;;  %v2924_v15 = vsub.f32 %v6354_v43, %v6370_v40  ;;  %v2925_v10 = vsub.f32 %v6362_v34, %v6370_v40 }
 0x27f   : > { %v2964_v0 = vadd.f32 %v2963_v17, %v2933_v3  ;;  %v2951_v3 = vmul.f32 %v2919_v9, %v2919_v9 }
 0x280   : > { %v2955_v13 = vmul.f32 %v2923_v47, %v2923_v47  ;;  %v2957_v61 = vmul.f32 %v2925_v10, %v2925_v10 }
 0x281   : > { %v2965_v42 = vadd.f32 %v2964_v0, %v2934_v11  ;;  %v2953_v0 = vmul.f32 %v2921_v57, %v2921_v57 }
 0x283   : > { %v2966_v54 = vadd.f32 %v2965_v42, %v2935_v44  ;;  %v2954_v44 = vmul.f32 %v2922_v41, %v2922_v41 }
 0x285   : > { %v2967_v58 = vadd.f32 %v2966_v54, %v2936_v33  ;;  %v2956_v54 = vmul.f32 %v2924_v15, %v2924_v15 }
 0x287   : > { %v2968_v37 = vadd.f32 %v2967_v58, %v2937_v51 }
 0x289   : > { %v2969_v62 = vadd.f32 %v2968_v37, %v2938_v14 }
 0x28b   : > { %v2970_v59 = vadd.f32 %v2969_v62, %v2939_v48 }
 0x28d   : > { %v2971_v32 = vadd.f32 %v2970_v59, %v2940_v8 }
 0x28f   : > { %v2972_v22 = vadd.f32 %v2971_v32, %v2941_v6 }
 0x291   : > { %v2973_v35 = vadd.f32 %v2972_v22, %v2942_v16 }
 0x293   : > { %v2974_v63 = vadd.f32 %v2973_v35, %v2943_v12 }
 0x295   : > { %v2975_v24 = vadd.f32 %v2974_v63, %v2944_v19 }
 0x297   : > { %v2976_v4 = vadd.f32 %v2975_v24, %v2945_v18 }
 0x299   : > { %v2977_v31 = vadd.f32 %v2976_v4, %v2946_v46 }
 0x29b   : > { %v2978_v29 = vadd.f32 %v2977_v31, %v2947_v39 }
 0x29d   : > { %v2979_v7 = vadd.f32 %v2978_v29, %v2948_v49 }
 0x29f   : > { %v2980_v50 = vadd.f32 %v2979_v7, %v2949_v53 }
 0x2a1   : > { %v2981_v17 = vadd.f32 %v2980_v50, %v2950_v36 }
 0x2a3   : > { %v2982_v11 = vadd.f32 %v2981_v17, %v2951_v3 }
 0x2a5   : > { %v2983_v60 = vadd.f32 %v2982_v11, %v2952_v28 }
 0x2a7   : > { %v2984_v42 = vadd.f32 %v2983_v60, %v2953_v0 }
 0x2a9   : > { %v2985_v33 = vadd.f32 %v2984_v42, %v2954_v44 }
 0x2ab   : > { %v2986_v25 = vadd.f32 %v2985_v33, %v2955_v13 }
 0x2ad   : > { %v2987_v51 = vadd.f32 %v2986_v25, %v2956_v54 }
 0x2af   : > { %v2988_v58 = vadd.f32 %v2987_v51, %v2957_v61 }
 0x2b1   : > { %v2989_v1 = vrot.slane %v2988_v58, 4 }
 0x2b3   : > { %v2990_v26 = vadd.f32 %v2989_v1, %v2988_v58 }
 0x2b5   : > { %v2991_v14 = vrot.slane %v2990_v26, 2 }
 0x2b7   : > { %v2992_v37 = vadd.f32 %v2991_v14, %v2990_v26 }
 0x2b9   : > { %v2993_v23 = vrot.slane %v2992_v37, 1 }
 0x2bb   : > { %v2994_v43 = vadd.f32 %v2993_v23, %v2992_v37 }
 0x2bd   : > { %v2996_v48 = vsel %vm2995_vm4, %v6367_v20, %v2994_v43 }
 0x2be   : > { %2997 = vst [vmem:[%s4383_s10] sm:$0x3] %v2996_v48 }
 0x2bf PF: > { %s17_s1 = sadd.s32 1, %s4304_s1   ;;  %s6665_s21 = smov %s4300_s22 }
 0x2c0   : > { %p14_p5 = scmp.ge.s32.totalorder %s17_s1, 4   ;;  %s6666_s22 = smov %s6668_s2 }
 0x2c2   :  { %16 = sbr.rel (!%p14_p5) target bundleno = 2 (0x2), region = 388 }
 0x2c9   :  { %3050 = vsyncmov [#allocation3] }
 0x2cc   :  { %s3051_s7 = vpop.sfrf %3050 }
 0x2cd   :  { %p3591_p6 = scmp.ne.s32.totalorder %s3051_s7, 0 }
 0x2cf   :  { %3055 = shalt.err (%p3591_p6)  }
 0x2d0   :  { %3057 = vsyncmov [#allocation3 + $0x1] }
 0x2d3   :  { %s3058_s29 = vpop.sfrf %3057 }
 0x2d4   :  { %p3592_p7 = scmp.ne.s32.totalorder %s3058_s29, 0 }
 0x2d6   :  { %3062 = shalt.err (%p3592_p7)  }
 0x2d7   :  { %3064 = vsyncmov [#allocation3 + $0x2] }
 0x2da   :  { %s3065_s10 = vpop.sfrf %3064 }
 0x2db   :  { %p3593_p8 = scmp.ne.s32.totalorder %s3065_s10, 0 }
 0x2dd   :  { %3069 = shalt.err (%p3593_p8)  }
 0x2de   :  { %3071 = vsyncmov [#allocation3 + $0x3] }
 0x2e1   :  { %s3072_s30 = vpop.sfrf %3071 }
 0x2e2   :  { %p3594_p9 = scmp.ne.s32.totalorder %s3072_s30, 0 }
 0x2e4   :  { %3076 = shalt.err (%p3594_p9)  }
 0x2e5   :  { %3078 = vsyncmov [#allocation3 + $0x4] }
 0x2e8   :  { %s3079_s2 = vpop.sfrf %3078 }
 0x2e9   :  { %p3595_p10 = scmp.ne.s32.totalorder %s3079_s2, 0 }
 0x2eb   :  { %3083 = shalt.err (%p3595_p10)  }
 0x2ec   :  { %3085 = vsyncmov [#allocation3 + $0x5] }
 0x2ef   :  { %s3086_s0 = vpop.sfrf %3085 }
 0x2f0   :  { %p3596_p11 = scmp.ne.s32.totalorder %s3086_s0, 0 }
 0x2f2   :  { %3090 = shalt.err (%p3596_p11)  }

// kernel: decoder_forward.6
= control target key start
LH: loop header
LB: loop body
LE: loop exit
PB: predicated region body
PF: predicated region fallthrough
CT: control target
= control target key end

     0   :  { %s4489_s21 = smov 0   ;;  %s4491_s22 = smov 0   ;;  %s6878_s0 = inlined_call_operand.vmem [shape: f32[2,16,16,128], index: 0, kind: input, shape index: {}]   ;;  %s6879_s1 = inlined_call_operand.vmem [shape: f32[1,128], index: 1, kind: input, shape index: {}]   ;;  %s6880_s2 = inlined_call_operand.vmem [shape: f32[1,128], index: 2, kind: input, shape index: {}]   ;;  %s6881_s3 = inlined_call_operand.vmem [shape: f32[3,384,128], index: 3, kind: input, shape index: {}]   ;;  %s6882_s4 = inlined_call_operand.vmem [shape: f32[1,128], index: 4, kind: input, shape index: {}]   ;;  %s6883_s5 = inlined_call_operand.vmem [shape: f32[2,16,16,128], index: 5, kind: output, shape index: {0}]   ;;  %s6884_s6 = inlined_call_operand.vmem [shape: f32[2,1,2,128], index: 6, kind: output, shape index: {1}]  }
   0x1   :  { %s4493_s23 = smov 0  }
   0x2 LB: > { %s29_s24 = sadd.s32 1, %s4446_s22  ;;  %p3446_p0 = scmp.ge.s32.totalorder %s4450_s23, 1  ;;  %s4450_s23 = sphi %s4493_s23, %s17_s23   ;;  %s4446_s22 = sphi %s4491_s22, %s7211_s22   ;;  %s4442_s21 = sphi %s4489_s21, %s7210_s21  }
   0x3   : > { %p31_p1 = scmp.ge.s32.totalorder %s29_s24, 2  ;;  %p197_p2 = scmp.lt.s32.totalorder %s4450_s23, 3 }
   0x5   : > { %s7213_s24 = smov (%p31_p1, %s29_s24), 0  ;;  %p198_p3 = pnand %p3446_p0, %p197_p2 }
   0x7   : > { %201 = sbr.rel (%p198_p3) target bundleno = 706 (0x2c2), region = 36 }
   0xe   : > { %p233_p4 = scmp.lt.s32.totalorder %s4442_s21, 1  ;;  %s3450_s25 = sshll.u32 %s4442_s21, 8 }
   0xf   : > { %s4510_s28 = scalar_lea.vmem %s6878_s0, %s3450_s25 }
  0x10   : > { %s7215_s21 = smov (!%p233_p4, %s4442_s21), 1  ;;  %v337_v0 = vld [vmem:[%s4510_s28] sm:$0xff]  ;;  %v339_v1 = vld [vmem:[%s4510_s28 + $0x8] sm:$0xff]  ;;  %v341_v2 = vld [vmem:[%s4510_s28 + $0x10] sm:$0xff] }
  0x11   : > { %3451 = vst [vmem:[#allocation2 + $0x19] sm:$0xff] %v337_v0  ;;  %3452 = vst [vmem:[#allocation2 + $0x21] sm:$0xff] %v339_v1  ;;  %v343_v3 = vld [vmem:[%s4510_s28 + $0x18] sm:$0xff]  ;;  %v345_v4 = vld [vmem:[%s4510_s28 + $0x20] sm:$0xff]  ;;  %s3775_s29 = sshll.u32 %s7215_s21, 8  ;;  %s3449_s30 = sshll.u32 %s7215_s21, 1 }
  0x12   : > { %3453 = vst [vmem:[#allocation2 + $0x31] sm:$0xff] %v341_v2  ;;  %v347_v5 = vld [vmem:[%s4510_s28 + $0x28] sm:$0xff]  ;;  %3454 = vst [vmem:[#allocation2 + $0x39] sm:$0xff] %v343_v3  ;;  %v349_v6 = vld [vmem:[%s4510_s28 + $0x30] sm:$0xff]  ;;  %s4524_s9 = scalar_lea.vmem %s6883_s5, %s3775_s29  ;;  %s4529_s12 = scalar_lea.vmem %s6884_s6, %s3449_s30 }
  0x13   : > { %3455 = vst [vmem:[#allocation2 + $0x49] sm:$0xff] %v345_v4  ;;  %3456 = vst [vmem:[#allocation2 + $0x51] sm:$0xff] %v347_v5  ;;  %v351_v7 = vld [vmem:[%s4510_s28 + $0x38] sm:$0xff]  ;;  %v353_v8 = vld [vmem:[%s4510_s28 + $0x40] sm:$0xff] }
  0x14   : > { %3457 = vst [vmem:[#allocation2 + $0x61] sm:$0xff] %v349_v6  ;;  %3458 = vst [vmem:[#allocation2 + $0x69] sm:$0xff] %v351_v7  ;;  %v355_v9 = vld [vmem:[%s4510_s28 + $0x48] sm:$0xff]  ;;  %v357_v10 = vld [vmem:[%s4510_s28 + $0x50] sm:$0xff] }
  0x15   : > { %3459 = vst [vmem:[#allocation2 + $0x79] sm:$0xff] %v353_v8  ;;  %v359_v11 = vld [vmem:[%s4510_s28 + $0x58] sm:$0xff]  ;;  %3460 = vst [vmem:[#allocation2 + $0x81] sm:$0xff] %v355_v9  ;;  %v361_v12 = vld [vmem:[%s4510_s28 + $0x60] sm:$0xff] }
  0x16   : > { %3461 = vst [vmem:[#allocation2 + $0x91] sm:$0xff] %v357_v10  ;;  %3462 = vst [vmem:[#allocation2 + $0x99] sm:$0xff] %v359_v11  ;;  %v363_v13 = vld [vmem:[%s4510_s28 + $0x68] sm:$0xff]  ;;  %v365_v14 = vld [vmem:[%s4510_s28 + $0x70] sm:$0xff] }
  0x17   : > { %3463 = vst [vmem:[#allocation2 + $0xa9] sm:$0xff] %v361_v12  ;;  %3464 = vst [vmem:[#allocation2 + $0xb1] sm:$0xff] %v363_v13  ;;  %v367_v15 = vld [vmem:[%s4510_s28 + $0x78] sm:$0xff]  ;;  %v369_v16 = vld [vmem:[%s4510_s28 + $0x80] sm:$0xff] }
  0x18   : > { %3465 = vst [vmem:[#allocation2 + $0xc1] sm:$0xff] %v365_v14  ;;  %v371_v17 = vld [vmem:[%s4510_s28 + $0x88] sm:$0xff]  ;;  %3466 = vst [vmem:[#allocation2 + $0xc9] sm:$0xff] %v367_v15  ;;  %v373_v18 = vld [vmem:[%s4510_s28 + $0x90] sm:$0xff] }
  0x19   : > { %3467 = vst [vmem:[#allocation2 + $0xd9] sm:$0xff] %v369_v16  ;;  %3468 = vst [vmem:[#allocation2 + $0xe1] sm:$0xff] %v371_v17  ;;  %v375_v19 = vld [vmem:[%s4510_s28 + $0x98] sm:$0xff]  ;;  %v377_v20 = vld [vmem:[%s4510_s28 + $0xa0] sm:$0xff] }
  0x1a   : > { %3469 = vst [vmem:[#allocation2 + $0xf1] sm:$0xff] %v373_v18  ;;  %3470 = vst [vmem:[#allocation2 + $0xf9] sm:$0xff] %v375_v19  ;;  %v379_v21 = vld [vmem:[%s4510_s28 + $0xa8] sm:$0xff]  ;;  %v381_v22 = vld [vmem:[%s4510_s28 + $0xb0] sm:$0xff] }
  0x1b   : > { %3471 = vst [vmem:[#allocation2 + $0x109] sm:$0xff] %v377_v20  ;;  %v383_v23 = vld [vmem:[%s4510_s28 + $0xb8] sm:$0xff]  ;;  %3472 = vst [vmem:[#allocation2 + $0x111] sm:$0xff] %v379_v21  ;;  %v385_v24 = vld [vmem:[%s4510_s28 + $0xc0] sm:$0xff] }
  0x1c   : > { %3473 = vst [vmem:[#allocation2 + $0x121] sm:$0xff] %v381_v22  ;;  %3474 = vst [vmem:[#allocation2 + $0x129] sm:$0xff] %v383_v23  ;;  %v387_v25 = vld [vmem:[%s4510_s28 + $0xc8] sm:$0xff]  ;;  %v389_v26 = vld [vmem:[%s4510_s28 + $0xd0] sm:$0xff] }
  0x1d   : > { %3475 = vst [vmem:[#allocation2 + $0x139] sm:$0xff] %v385_v24  ;;  %3476 = vst [vmem:[#allocation2 + $0x141] sm:$0xff] %v387_v25  ;;  %v391_v27 = vld [vmem:[%s4510_s28 + $0xd8] sm:$0xff]  ;;  %v393_v28 = vld [vmem:[%s4510_s28 + $0xe0] sm:$0xff] }
  0x1e   : > { %3477 = vst [vmem:[#allocation2 + $0x151] sm:$0xff] %v389_v26  ;;  %v395_v29 = vld [vmem:[%s4510_s28 + $0xe8] sm:$0xff]  ;;  %3478 = vst [vmem:[#allocation2 + $0x159] sm:$0xff] %v391_v27  ;;  %v397_v30 = vld [vmem:[%s4510_s28 + $0xf0] sm:$0xff] }
  0x1f   : > { %3479 = vst [vmem:[#allocation2 + $0x169] sm:$0xff] %v393_v28  ;;  %3480 = vst [vmem:[#allocation2 + $0x171] sm:$0xff] %v395_v29  ;;  %v399_v31 = vld [vmem:[%s4510_s28 + $0xf8] sm:$0xff] }
  0x20   : > { %3481 = vst [vmem:[#allocation2 + $0x181] sm:$0xff] %v397_v30  ;;  %3482 = vst [vmem:[#allocation2 + $0x189] sm:$0xff] %v399_v31 }
  0x21   : > { %408 = vsyncadd [#allocation3], 4096 }
  0x22   : > { %4438 = dma.done.wait [#allocation3], 4096 }
  0x23   : > { %4439 = vsyncadd [#allocation3], 4294963200  ;;  %v6888_v32 = vmov 0.0|0.0   ;;  %v1039_v33 = vlaneseq  ;;  %v3624_v34 = vld [vmem:[%s6881_s3 + $0x180] sm:$0xff]  ;;  %v3625_v35 = vld [vmem:[%s6881_s3 + $0x188] sm:$0xff]  ;;  %vm1285_vm1 = vcmask 1045504  }
  0x24   : > { %4160 = vmatprep.subr.bf16.mxu0 %v6888_v32  ;;  %v3656_v36 = vld [vmem:[%s6881_s3 + $0x280] sm:$0xff]  ;;  %v4161_v37 = vpack.c.bf16 %v3625_v35, %v3624_v34  ;;  %v3657_v38 = vld [vmem:[%s6881_s3 + $0x288] sm:$0xff]  ;;  %v3626_v39 = vld [vmem:[%s6881_s3 + $0x190] sm:$0xff]  ;;  %vm1172_vm3 = vcmask 1046528   ;;  %vm3171_vm4 = vcmask 1040384  }
  0x25   : > { %v3627_v40 = vld [vmem:[%s6881_s3 + $0x198] sm:$0xff]  ;;  %v4208_v41 = vpack.c.bf16 %v3657_v38, %v3656_v36  ;;  %v3658_v42 = vld [vmem:[%s6881_s3 + $0x290] sm:$0xff]  ;;  %v3660_v46 = vld [vmem:[%s6881_s3 + $0x2a0] sm:$0xff]  ;;  %v4585_v48 = vshrl.u32 %v1039_v33, 7 }
  0x26   : > { %v3659_v43 = vld [vmem:[%s6881_s3 + $0x298] sm:$0xff]  ;;  %4162 = vmatpush1.bf16.msra.mxu0 %v4161_v37  ;;  %v4164_v44 = vpack.c.bf16 %v3627_v40, %v3626_v39  ;;  %v3661_v47 = vld [vmem:[%s6881_s3 + $0x2a8] sm:$0xff]  ;;  %v3628_v49 = vld [vmem:[%s6881_s3 + $0x1a0] sm:$0xff] }
  0x27   : > { %v4212_v45 = vpack.c.bf16 %v3659_v43, %v3658_v42  ;;  %4209 = vmatprep.subr.bf16.mxu1 %v4208_v41  ;;  %4163 = vmatprep.subr.bf16.mxu0 %v6888_v32  ;;  %v3629_v50 = vld [vmem:[%s6881_s3 + $0x1a8] sm:$0xff]  ;;  %v3662_v51 = vld [vmem:[%s6881_s3 + $0x2b0] sm:$0xff]  ;;  %v3663_v52 = vld [vmem:[%s6881_s3 + $0x2b8] sm:$0xff]  ;;  %v4216_v53 = vpack.c.bf16 %v3661_v47, %v3660_v46  ;;  %v4639_v1 = vadd.s32 16, %v4585_v48  ;;  %vm1043_vm0 = vcmp.ge.s32.totalorder %v4585_v48, 1 }
  0x28   : > { %4211 = vmatpush3.bf16.msra.mxu1 %v4208_v41  ;;  %v3630_v54 = vld [vmem:[%s6881_s3 + $0x1b0] sm:$0xff]  ;;  %v3631_v55 = vld [vmem:[%s6881_s3 + $0x1b8] sm:$0xff]  ;;  %v4609_v56 = vld [vmem:[%s6881_s3 + $0x1c0] sm:$0xff]  ;;  %v4167_v60 = vpack.c.bf16 %v3629_v50, %v3628_v49  ;;  %v4220_v8 = vpack.c.bf16 %v3663_v52, %v3662_v51 }
  0x29   : > { %4213 = vmatprep.subr.bf16.mxu1 %v4212_v45  ;;  %v4614_v57 = vld [vmem:[%s6881_s3 + $0x1c8] sm:$0xff]  ;;  %v3664_v58 = vld [vmem:[%s6881_s3 + $0x2c0] sm:$0xff]  ;;  %v4625_v61 = vld [vmem:[%s6881_s3 + $0x1d0] sm:$0xff]  ;;  %v4170_v12 = vpack.c.bf16 %v3631_v55, %v3630_v54  ;;  %vm1048_vm2 = vcmp.le.s32.totalorder %v4639_v1, 16 }
  0x2a   : > { %v3665_v59 = vld [vmem:[%s6881_s3 + $0x2c8] sm:$0xff]  ;;  %4165 = vmatpush1.bf16.msra.mxu0 %v4164_v44  ;;  %v4630_v62 = vld [vmem:[%s6881_s3 + $0x1d8] sm:$0xff]  ;;  %v3666_v63 = vld [vmem:[%s6881_s3 + $0x2d0] sm:$0xff]  ;;  %v4173_v13 = vpack.c.bf16 %v4614_v57, %v4609_v56 }
  0x2b   : > { %v3667_v0 = vld [vmem:[%s6881_s3 + $0x2d8] sm:$0xff]  ;;  %4166 = vmatprep.subr.bf16.mxu0 %v6888_v32  ;;  %v4645_v2 = vld [vmem:[%s6881_s3 + $0x1e0] sm:$0xff]  ;;  %v4650_v3 = vld [vmem:[%s6881_s3 + $0x1e8] sm:$0xff]  ;;  %v4677_v14 = vpack.c.bf16 %v3665_v59, %v3664_v58  ;;  %v4176_v18 = vpack.c.bf16 %v4630_v62, %v4625_v61 }
  0x2c   : > { %v3668_v4 = vld [vmem:[%s6881_s3 + $0x2e0] sm:$0xff]  ;;  %4215 = vmatpush3.bf16.msra.mxu1 %v4212_v45  ;;  %v3669_v5 = vld [vmem:[%s6881_s3 + $0x2e8] sm:$0xff]  ;;  %v4661_v6 = vld [vmem:[%s6881_s3 + $0x1f0] sm:$0xff]  ;;  %v4693_v19 = vpack.c.bf16 %v3667_v0, %v3666_v63  ;;  %v4179_v25 = vpack.c.bf16 %v4650_v3, %v4645_v2 }
  0x2d   : > { %v4666_v7 = vld [vmem:[%s6881_s3 + $0x1f8] sm:$0xff]  ;;  %4217 = vmatprep.subr.bf16.mxu1 %v4216_v53  ;;  %v3670_v9 = vld [vmem:[%s6881_s3 + $0x2f0] sm:$0xff]  ;;  %v813_v15 = vld [vmem:[#allocation2 + $0x20] sm:$0xff]  ;;  %v4709_v26 = vpack.c.bf16 %v3669_v5, %v3668_v4 }
  0x2e   : > { %v3671_v10 = vld [vmem:[%s6881_s3 + $0x2f8] sm:$0xff]  ;;  %4168 = vmatpush1.bf16.msra.mxu0 %v4167_v60  ;;  %v4682_v16 = vld [vmem:[%s6879_s1] ss:$0 sm:$0xff]  ;;  %v4705_v23 = vld [vmem:[%s6881_s3 + $0x208] sm:$0xff]  ;;  %v4182_v27 = vpack.c.bf16 %v4666_v7, %v4661_v6 }
  0x2f   : > { %v812_v11 = vld [vmem:[#allocation2 + $0x18] sm:$0xff]  ;;  %v4687_v17 = vld [vmem:[%s6880_s2] ss:$0 sm:$0xff]  ;;  %4169 = vmatprep.subr.bf16.mxu0 %v6888_v32  ;;  %v874_v21 = vmul.f32 %v4682_v16, %v813_v15  ;;  %v814_v24 = vld [vmem:[#allocation2 + $0x28] sm:$0x3]  ;;  %v4724_v33 = vpack.c.bf16 %v3671_v10, %v3670_v9 }
  0x30   : > { %v873_v20 = vmul.f32 %v4682_v16, %v812_v11  ;;  %v4700_v22 = vld [vmem:[%s6881_s3 + $0x200] sm:$0xff]  ;;  %4219 = vmatpush3.bf16.msra.mxu1 %v4216_v53  ;;  %v875_v28 = vmul.f32 %v4682_v16, %v814_v24  ;;  %v4722_v30 = vld [vmem:[%s6881_s3 + $0x8] sm:$0xff]  ;;  %v815_v31 = vld [vmem:[#allocation2 + $0x30] sm:$0xff] }
  0x31   : > { %v4717_v29 = vld [vmem:[%s6881_s3] sm:$0xff]  ;;  %4221 = vmatprep.subr.bf16.mxu1 %v4220_v8  ;;  %v935_v35 = vadd.f32 %v4687_v17, %v874_v21  ;;  %v816_v36 = vld [vmem:[#allocation2 + $0x38] sm:$0xff]  ;;  %v876_v37 = vmul.f32 %v4682_v16, %v815_v31  ;;  %v4732_v38 = vld [vmem:[%s6881_s3 + $0x210] sm:$0xff] }
  0x32   : > { %v934_v34 = vadd.f32 %v4687_v17, %v873_v20  ;;  %v4737_v39 = vld [vmem:[%s6881_s3 + $0x218] sm:$0xff]  ;;  %4171 = vmatpush1.bf16.msra.mxu0 %v4170_v12  ;;  %v936_v41 = vadd.f32 %v4687_v17, %v875_v28  ;;  %v877_v43 = vmul.f32 %v4682_v16, %v816_v36  ;;  %v817_v44 = vld [vmem:[#allocation2 + $0x40] sm:$0x3]  ;;  %v818_v50 = vld [vmem:[#allocation2 + $0x48] sm:$0xff] }
  0x33   : > { %4172 = vmatprep.subr.bf16.mxu0 %v6888_v32  ;;  %v4748_v46 = vmax.f32 %v935_v35, 0.0  ;;  %v937_v47 = vadd.f32 %v4687_v17, %v876_v37  ;;  %v878_v49 = vmul.f32 %v4682_v16, %v817_v44  ;;  %v819_v51 = vld [vmem:[#allocation2 + $0x50] sm:$0xff]  ;;  %v879_v55 = vmul.f32 %v4682_v16, %v818_v50  ;;  %v4781_v5 = vld [vmem:[%s6881_s3 + $0x18] sm:$0xff]  ;;  %v4787_v9 = vld [vmem:[%s6881_s3 + $0x220] sm:$0xff] }
  0x34   : > { %v4746_v45 = vmax.f32 %v934_v34, 0.0  ;;  %4223 = vmatpush3.bf16.msra.mxu1 %v4220_v8  ;;  %v990_v52 = vmax.f32 %v936_v41, 0.0  ;;  %v938_v53 = vadd.f32 %v4687_v17, %v877_v43  ;;  %v4776_v4 = vld [vmem:[%s6881_s3 + $0x10] sm:$0xff]  ;;  %v880_v8 = vmul.f32 %v4682_v16, %v819_v51  ;;  %v4800_v15 = vld [vmem:[%s6881_s3 + $0x228] sm:$0xff]  ;;  %v820_v20 = vld [vmem:[#allocation2 + $0x58] sm:$0x3] }
  0x35   : > { %4225 = vmatprep.subr.bf16.mxu1 %v4677_v14  ;;  %v1292_v57 = vrot.slane %v4748_v46, 2  ;;  %v4763_v58 = vmax.f32 %v937_v47, 0.0  ;;  %v939_v59 = vadd.f32 %v4687_v17, %v878_v49  ;;  %v821_v34 = vld [vmem:[#allocation2 + $0x60] sm:$0xff]  ;;  %v822_v35 = vld [vmem:[#allocation2 + $0x68] sm:$0xff]  ;;  %v881_v51 = vmul.f32 %v4682_v16, %v820_v20  ;;  %v828_v54 = vld [vmem:[#allocation2 + $0x98] sm:$0xff] }
  0x36   : > { %v4760_v56 = vsel %vm1043_vm0, %v4746_v45, 0.0  ;;  %4174 = vmatpush1.bf16.msra.mxu0 %v4173_v13  ;;  %v4769_v63 = vsel %vm1048_vm2, %v990_v52, 0.0  ;;  %v4771_v0 = vmax.f32 %v938_v53, 0.0  ;;  %v940_v13 = vadd.f32 %v4687_v17, %v879_v55  ;;  %v4825_v43 = vld [vmem:[%s6881_s3 + $0x20] sm:$0xff]  ;;  %v4830_v44 = vld [vmem:[%s6881_s3 + $0x28] sm:$0xff]  ;;  %v4855_v55 = vld [vmem:[%s6881_s3 + $0x230] sm:$0xff] }
  0x37   : > { %v1291_v60 = vrot.slane %v4760_v56, 2  ;;  %4175 = vmatprep.subr.bf16.mxu0 %v6888_v32  ;;  %v1294_v10 = vrot.slane %v4769_v63, 2  ;;  %v4794_v11 = vsel %vm1043_vm0, %v4763_v58, 0.0  ;;  %v993_v12 = vmax.f32 %v939_v59, 0.0  ;;  %v823_v52 = vld [vmem:[#allocation2 + $0x70] sm:$0x3] }
  0x38   : > { %7023 = vst [vmem:[#allocation11_spill] sm:$0xff] %v4771_v0  ;;  %4227 = vmatpush3.bf16.msra.mxu1 %v4677_v14  ;;  %v1296_v24 = vrot.slane %v4794_v11, 2  ;;  %v1297_v28 = vrot.slane %v4771_v0, 2  ;;  %v941_v31 = vadd.f32 %v4687_v17, %v880_v8  ;;  %v4820_v41 = vmax.f32 %v940_v13, 0.0  ;;  %v824_v59 = vld [vmem:[#allocation2 + $0x78] sm:$0xff]  ;;  %v825_v13 = vld [vmem:[#allocation2 + $0x80] sm:$0xff] }
  0x39   : > { %v4804_v21 = vsel %vm1285_vm1, %v1291_v60, %v1292_v57  ;;  %4229 = vmatprep.subr.bf16.mxu1 %v4693_v19  ;;  %v4812_v36 = vsel %vm1285_vm1, %v1292_v57, %v1294_v10  ;;  %v4816_v14 = vsel %vm1048_vm2, %v993_v12, 0.0  ;;  %v882_v62 = vmul.f32 %v4682_v16, %v821_v34  ;;  %v4860_v57 = vld [vmem:[%s6881_s3 + $0x238] sm:$0xff]  ;;  %v4878_v34 = vld [vmem:[%s6881_s3 + $0x30] sm:$0xff] }
  0x3a   : > { %7024 = vst [vmem:[#allocation12_spill] sm:$0xff] %v4804_v21  ;;  %3952 = vmatprep.mubr.f32.mxu1 %v4804_v21  ;;  %7025 = vst [vmem:[#allocation13_spill] sm:$0xff] %v4812_v36  ;;  %4177 = vmatpush1.bf16.msra.mxu0 %v4176_v18  ;;  %v1299_v47 = vrot.slane %v4816_v14, 2  ;;  %v4836_v49 = vmax.f32 %v941_v31, 0.0  ;;  %v4843_v53 = vsel %vm1285_vm1, %v1296_v24, %v1297_v28  ;;  %v4848_v61 = vsel %vm1043_vm0, %v4820_v41, 0.0  ;;  %v4987_v6 = vld [vmem:[%s6881_s3 + $0x50] sm:$0xff] }
  0x3b   : > { %7026 = vst [vmem:[#allocation14_spill] sm:$0xff] %v4820_v41  ;;  %4178 = vmatprep.subr.bf16.mxu0 %v6888_v32  ;;  %7027 = vst [vmem:[#allocation15_spill] sm:$0xff] %v4843_v53  ;;  %v883_v18 = vmul.f32 %v4682_v16, %v822_v35  ;;  %v1301_v60 = vrot.slane %v4848_v61, 2  ;;  %v942_v10 = vadd.f32 %v4687_v17, %v881_v51  ;;  %v4883_v35 = vld [vmem:[%s6881_s3 + $0x38] sm:$0xff]  ;;  %v826_v51 = vld [vmem:[#allocation2 + $0x88] sm:$0x3] }
  0x3c   : > { %4231 = vmatpush3.bf16.msra.mxu1 %v4693_v19  ;;  %v1302_v8 = vrot.slane %v4836_v49, 2  ;;  %v4870_v20 = vsel %vm1285_vm1, %v1297_v28, %v1299_v47  ;;  %v943_v24 = vadd.f32 %v4687_v17, %v882_v62  ;;  %v884_v19 = vmul.f32 %v4682_v16, %v823_v52  ;;  %v4992_v21 = vld [vmem:[%s6881_s3 + $0x58] sm:$0xff] }
  0x3d   : > { %4233 = vmatprep.subr.bf16.mxu1 %v4709_v26  ;;  %7028 = vst [vmem:[#allocation16_spill] sm:$0xff] %v4870_v20  ;;  %v944_v31 = vadd.f32 %v4687_v17, %v883_v18  ;;  %v996_v47 = vmax.f32 %v942_v10, 0.0  ;;  %v885_v62 = vmul.f32 %v4682_v16, %v824_v59  ;;  %v886_v2 = vmul.f32 %v4682_v16, %v825_v13  ;;  %v4917_v10 = vld [vmem:[%s6881_s3 + $0x248] sm:$0xff]  ;;  %v827_v13 = vld [vmem:[#allocation2 + $0x90] sm:$0xff]  ;;  %v1429_v1 = vld [vmem:[%s6881_s3 + $0xf8] sm:$0xff] }
  0x3e   : > { %4180 = vmatpush1.bf16.msra.mxu0 %v4179_v25  ;;  %v4889_v28 = vsel %vm1285_vm1, %v1301_v60, %v1302_v8  ;;  %v4895_v18 = vmax.f32 %v943_v24, 0.0  ;;  %v945_v50 = vadd.f32 %v4687_v17, %v884_v19  ;;  %v4912_v60 = vld [vmem:[%s6881_s3 + $0x240] sm:$0xff]  ;;  %v888_v7 = vmul.f32 %v4682_v16, %v827_v13 }
  0x3f   : > { %7029 = vst [vmem:[#allocation17_spill] sm:$0xff] %v4889_v28  ;;  %4181 = vmatprep.subr.bf16.mxu0 %v6888_v32  ;;  %v4897_v12 = vmax.f32 %v944_v31, 0.0  ;;  %v4904_v3 = vsel %vm1048_vm2, %v996_v47, 0.0  ;;  %v946_v59 = vadd.f32 %v4687_v17, %v885_v62  ;;  %v4931_v62 = vld [vmem:[%s6881_s3 + $0x40] sm:$0xff]  ;;  %v947_v52 = vadd.f32 %v4687_v17, %v886_v2 }
  0x40   : > { %7030 = vst [vmem:[#allocation18_spill] sm:$0xff] %v4895_v18  ;;  %4235 = vmatpush3.bf16.msra.mxu1 %v4709_v26  ;;  %v887_v26 = vmul.f32 %v4682_v16, %v826_v51  ;;  %v1304_v24 = vrot.slane %v4904_v3, 2  ;;  %v4925_v31 = vsel %vm1043_vm0, %v4895_v18, 0.0  ;;  %v999_v47 = vmax.f32 %v945_v50, 0.0  ;;  %v4936_v51 = vld [vmem:[%s6881_s3 + $0x48] sm:$0xff]  ;;  %v831_v18 = vld [vmem:[#allocation2 + $0xb0] sm:$0xff] }
  0x41   : > { %7031 = vst [vmem:[#allocation19_spill] sm:$0xff] %v4897_v12  ;;  %4237 = vmatprep.subr.bf16.mxu1 %v4724_v33  ;;  %v1307_v19 = vrot.slane %v4897_v12, 2  ;;  %v1306_v25 = vrot.slane %v4925_v31, 2  ;;  %v4943_v37 = vmax.f32 %v946_v59, 0.0  ;;  %v4959_v59 = vmax.f32 %v947_v52, 0.0 }
  0x42   : > { %4183 = vmatpush1.bf16.msra.mxu0 %v4182_v27  ;;  %v948_v50 = vadd.f32 %v4687_v17, %v887_v26  ;;  %v4948_v42 = vsel %vm1285_vm1, %v1302_v8, %v1304_v24  ;;  %v4952_v40 = vsel %vm1048_vm2, %v999_v47, 0.0  ;;  %v829_v27 = vld [vmem:[#allocation2 + $0xa0] sm:$0x3]  ;;  %v4971_v24 = vld [vmem:[%s6881_s3 + $0x250] sm:$0xff]  ;;  %v889_v47 = vmul.f32 %v4682_v16, %v828_v54 }
  0x43   : > { %7032 = vst [vmem:[#allocation20_spill] sm:$0xff] %v4943_v37  ;;  %4184 = vmatprep.subr.bf16.mxu0 %v6888_v32  ;;  %7033 = vst [vmem:[#allocation21_spill] sm:$0xff] %v4948_v42  ;;  %v1309_v2 = vrot.slane %v4952_v40, 2  ;;  %v4964_v8 = vsel %vm1043_vm0, %v4943_v37, 0.0  ;;  %v4980_v52 = vsel %vm1285_vm1, %v1306_v25, %v1307_v19  ;;  %v949_v26 = vadd.f32 %v4687_v17, %v888_v7  ;;  %v830_v37 = vld [vmem:[#allocation2 + $0xa8] sm:$0xff] }
  0x44   : > { %7034 = vst [vmem:[#allocation22_spill] sm:$0xff] %v4952_v40  ;;  %4239 = vmatpush3.bf16.msra.mxu1 %v4724_v33  ;;  %7035 = vst [vmem:[#allocation23_spill] sm:$0xff] %v4959_v59  ;;  %v4976_v33 = vld [vmem:[%s6881_s3 + $0x258] sm:$0xff]  ;;  %v1002_v13 = vmax.f32 %v948_v50, 0.0  ;;  %v7037_v25 = vpack.c.bf16 %v4705_v23, %v4700_v22  ;;  %v1311_v54 = vrot.slane %v4964_v8, 2  ;;  %v1312_v7 = vrot.slane %v4959_v59, 2 }
  0x45   : > { %4240 = vmatprep.subr.bf16.mxu1 %v6888_v32  ;;  %7036 = vst [vmem:[#allocation24_spill] sm:$0xff] %v4980_v52  ;;  %v4998_v50 = vsel %vm1285_vm1, %v1307_v19, %v1309_v2  ;;  %v890_v32 = vmul.f32 %v4682_v16, %v829_v27  ;;  %v7039_v40 = vmov 0.0|0.0   ;;  %v950_v22 = vadd.f32 %v4687_v17, %v889_v47  ;;  %v5017_v27 = vld [vmem:[%s6881_s3 + $0x260] sm:$0xff]  ;;  %v5022_v2 = vld [vmem:[%s6881_s3 + $0x268] sm:$0xff]  ;;  %v832_v19 = vld [vmem:[#allocation2 + $0xb8] sm:$0x3] }
  0x46   : > { %4186 = vmatpush1.bf16.msra.mxu0 %v7037_v25  ;;  %7038 = vst [vmem:[#allocation25_spill] sm:$0xff] %v4998_v50  ;;  %v5007_v41 = vsel %vm1048_vm2, %v1002_v13, 0.0  ;;  %v5010_v23 = vmax.f32 %v949_v26, 0.0  ;;  %v7042_v13 = vpack.c.bf16 %v4722_v30, %v4717_v29  ;;  %v891_v25 = vmul.f32 %v4682_v16, %v830_v37  ;;  %v833_v30 = vld [vmem:[#allocation2 + $0xc0] sm:$0xff] }
  0x47   : > { %3953 = vmatmul.mubr.f32.vlgmr.msra.gmra.mrb[0].mxu1 %v4812_v36  ;;  %4187 = vmatprep.subr.bf16.mxu0 %v7039_v40  ;;  %7040 = vst [vmem:[#allocation26_spill] sm:$0xff] %v5007_v41  ;;  %v951_v26 = vadd.f32 %v4687_v17, %v890_v32  ;;  %v1314_v36 = vrot.slane %v5007_v41, 2  ;;  %v5034_v59 = vmax.f32 %v950_v22, 0.0  ;;  %v892_v32 = vmul.f32 %v4682_v16, %v831_v18 }
  0x48   : > { %7041 = vst [vmem:[#allocation27_spill] sm:$0xff] %v5010_v23  ;;  %4242 = vmatpush1.bf16.msra.mxu1 %v7042_v13  ;;  %3955 = vmatprep.mubr.f32.mxu1 %v4843_v53  ;;  %v5039_v29 = vsel %vm1043_vm0, %v5010_v23, 0.0  ;;  %v834_v13 = vld [vmem:[#allocation2 + $0xc8] sm:$0xff]  ;;  %v7043_v37 = vpack.c.bf16 %v4737_v39, %v4732_v38  ;;  %v5046_v47 = vsel %vm1285_vm1, %v1311_v54, %v1312_v7  ;;  %v5060_v54 = vld [vmem:[%s6881_s3 + $0x60] sm:$0xff] }
  0x49   : > { %4243 = vmatprep.subr.bf16.mxu1 %v7039_v40  ;;  %7044 = vst [vmem:[#allocation28_spill] sm:$0xff] %v5046_v47  ;;  %v1005_v53 = vmax.f32 %v951_v26, 0.0  ;;  %v952_v22 = vadd.f32 %v4687_v17, %v891_v25  ;;  %v1316_v18 = vrot.slane %v5039_v29, 2  ;;  %v1317_v23 = vrot.slane %v5034_v59, 2  ;;  %v5065_v26 = vld [vmem:[%s6881_s3 + $0x68] sm:$0xff] }
  0x4a   : > { %4189 = vmatpush1.bf16.msra.mxu0 %v7043_v37  ;;  %v953_v38 = vadd.f32 %v4687_v17, %v892_v32  ;;  %v893_v39 = vmul.f32 %v4682_v16, %v832_v19  ;;  %v7045_v25 = vpack.c.bf16 %v4781_v5, %v4776_v4  ;;  %v894_v37 = vmul.f32 %v4682_v16, %v833_v30  ;;  %v5087_v4 = vld [vmem:[%s6881_s3 + $0x278] sm:$0xff] }
  0x4b   : > { %3956 = vmatmul.mubr.f32.gmra.mrb[2].mxu1 %v4870_v20  ;;  %4190 = vmatprep.subr.bf16.mxu0 %v7039_v40  ;;  %v5073_v32 = vsel %vm1048_vm2, %v1005_v53, 0.0  ;;  %v5075_v19 = vmax.f32 %v952_v22, 0.0  ;;  %v895_v41 = vmul.f32 %v4682_v16, %v834_v13  ;;  %v5082_v20 = vld [vmem:[%s6881_s3 + $0x270] sm:$0xff]  ;;  %v5091_v5 = vsel %vm1285_vm1, %v1312_v7, %v1314_v36 }
  0x4c   : > { %4245 = vmatpush1.bf16.msra.mxu1 %v7045_v25  ;;  %3958 = vmatprep.mubr.f32.mxu1 %v4889_v28  ;;  %7046 = vst [vmem:[#allocation29_spill] sm:$0xff] %v5073_v32  ;;  %7048 = vst [vmem:[#allocation31_spill] sm:$0xff] %v5091_v5  ;;  %v1319_v53 = vrot.slane %v5073_v32, 2  ;;  %v5094_v30 = vmax.f32 %v953_v38, 0.0  ;;  %v954_v13 = vadd.f32 %v4687_v17, %v893_v39  ;;  %v835_v22 = vld [vmem:[#allocation2 + $0xd0] sm:$0x3] }
  0x4d   : > { %7047 = vst [vmem:[#allocation30_spill] sm:$0xff] %v5075_v19  ;;  %4246 = vmatprep.subr.bf16.mxu1 %v7039_v40  ;;  %v7049_v25 = vpack.c.bf16 %v4800_v15, %v4787_v9  ;;  %v5103_v28 = vsel %vm1043_vm0, %v5075_v19, 0.0  ;;  %v955_v7 = vadd.f32 %v4687_v17, %v894_v37  ;;  %v956_v38 = vadd.f32 %v4687_v17, %v895_v41  ;;  %v5120_v36 = vld [vmem:[%s6881_s3 + $0x70] sm:$0xff]  ;;  %v5125_v41 = vld [vmem:[%s6881_s3 + $0x78] sm:$0xff] }
  0x4e   : > { %7050 = vst [vmem:[#allocation32_spill] sm:$0xff] %v5103_v28  ;;  %v5112_v39 = vsel %vm1285_vm1, %v1316_v18, %v1317_v23  ;;  %v1321_v9 = vrot.slane %v5103_v28, 2  ;;  %v1008_v15 = vmax.f32 %v954_v13, 0.0  ;;  %v7052_v18 = vpack.c.bf16 %v4830_v44, %v4825_v43  ;;  %v836_v19 = vld [vmem:[#allocation2 + $0xd8] sm:$0xff]  ;;  %v837_v28 = vld [vmem:[#allocation2 + $0xe0] sm:$0xff] }
  0x4f   : > { %4192 = vmatpush1.bf16.msra.mxu0 %v7049_v25  ;;  %3959 = vmatmul.mubr.f32.gmra.mrb[4].mxu1 %v4948_v42  ;;  %7051 = vst [vmem:[#allocation33_spill] sm:$0xff] %v5112_v39  ;;  %v1322_v37 = vrot.slane %v5094_v30, 2  ;;  %v5132_v13 = vmax.f32 %v955_v7, 0.0  ;;  %v5134_v25 = vmax.f32 %v956_v38, 0.0  ;;  %v896_v42 = vmul.f32 %v4682_v16, %v835_v22 }
  0x50   : > { %4193 = vmatprep.subr.bf16.mxu0 %v7039_v40  ;;  %4248 = vmatpush1.bf16.msra.mxu1 %v7052_v18  ;;  %v5139_v32 = vsel %vm1285_vm1, %v1317_v23, %v1319_v53  ;;  %v5143_v43 = vsel %vm1048_vm2, %v1008_v15, 0.0  ;;  %v1178_v44 = vrot.slane %v4760_v56, 1  ;;  %v6919_v7 = vrot.slane %v4748_v46, 1  ;;  %v838_v18 = vld [vmem:[#allocation2 + $0xe8] sm:$0x3] }
  0x51   : > { %3961 = vmatprep.mubr.f32.mxu1 %v4980_v52  ;;  %7053 = vst [vmem:[#allocation34_spill] sm:$0xff] %v5132_v13  ;;  %4249 = vmatprep.subr.bf16.mxu1 %v7039_v40  ;;  %7054 = vst [vmem:[#allocation35_spill] sm:$0xff] %v5139_v32  ;;  %v7055_v38 = vpack.c.bf16 %v4860_v57, %v4855_v55  ;;  %v1324_v22 = vrot.slane %v5143_v43, 2  ;;  %v5154_v23 = vsel %vm1043_vm0, %v5132_v13, 0.0  ;;  %v840_v52 = vld [vmem:[#allocation2 + $0xf8] sm:$0xff] }
  0x52   : > { %v957_v53 = vadd.f32 %v4687_v17, %v896_v42  ;;  %v5164_v56 = vsel %vm1172_vm3, %v1178_v44, %v6919_v7  ;;  %v897_v55 = vmul.f32 %v4682_v16, %v836_v19  ;;  %v898_v57 = vmul.f32 %v4682_v16, %v837_v28 }
  0x53   : > { %4195 = vmatpush1.bf16.msra.mxu0 %v7055_v38  ;;  %3962 = vmatmul.mubr.f32.gmra.mrb[6].mxu1 %v4998_v50  ;;  %v839_v38 = vld [vmem:[#allocation2 + $0xf0] sm:$0xff]  ;;  %v7056_v42 = vpack.c.bf16 %v4883_v35, %v4878_v34  ;;  %v5173_v15 = vsel %vm1285_vm1, %v1321_v9, %v1322_v37  ;;  %v1327_v50 = vrot.slane %v5134_v25, 2  ;;  %v899_v44 = vmul.f32 %v4682_v16, %v838_v18  ;;  %v841_v9 = vld [vmem:[#allocation2 + $0x100] sm:$0x3] }
  0x54   : > { %4196 = vmatprep.subr.bf16.mxu0 %v7039_v40  ;;  %3964 = vmatprep.mubr.f32.mxu1 %v5046_v47  ;;  %7057 = vst [vmem:[#allocation36_spill] sm:$0xff] %v5173_v15  ;;  %v1011_v13 = vmax.f32 %v957_v53, 0.0  ;;  %v5179_v28 = vsel %vm1285_vm1, %v1322_v37, %v1324_v22  ;;  %v1326_v19 = vrot.slane %v5154_v23, 2  ;;  %v958_v34 = vadd.f32 %v4687_v17, %v897_v55  ;;  %v5196_v22 = vld [vmem:[%s6881_s3 + $0x80] sm:$0xff]  ;;  %v5201_v53 = vld [vmem:[%s6881_s3 + $0x88] sm:$0xff] }
  0x55   : > { %4251 = vmatpush1.bf16.msra.mxu1 %v7056_v42  ;;  %7058 = vst [vmem:[#allocation37_spill] sm:$0xff] %v5179_v28  ;;  %1576 = vmatprep.mubr.f32.mxu0 %v5164_v56  ;;  %v959_v35 = vadd.f32 %v4687_v17, %v898_v57  ;;  %v7059_v42 = vpack.c.bf16 %v4917_v10, %v4912_v60  ;;  %v7070_v47 = vrot.slane %v4748_v46, 1 }
  0x56   : > { %4252 = vmatprep.subr.bf16.mxu1 %v7039_v40  ;;  %v5190_v18 = vsel %vm1048_vm2, %v1011_v13, 0.0  ;;  %v960_v37 = vadd.f32 %v4687_v17, %v899_v44  ;;  %v900_v55 = vmul.f32 %v4682_v16, %v839_v38  ;;  %v901_v60 = vmul.f32 %v4682_v16, %v840_v52 }
  0x57   : > { %4198 = vmatpush1.bf16.msra.mxu0 %v7059_v42  ;;  %3965 = vmatmul.mubr.f32.gmra.mrb[8].mxu1 %v5091_v5  ;;  %v1329_v10 = vrot.slane %v5190_v18, 2  ;;  %v5208_v13 = vmax.f32 %v958_v34, 0.0  ;;  %v5210_v57 = vmax.f32 %v959_v35, 0.0  ;;  %v1181_v44 = vrot.slane %v4769_v63, 1  ;;  %v842_v35 = vld [vmem:[#allocation2 + $0x108] sm:$0xff] }
  0x58   : > { %4199 = vmatprep.subr.bf16.mxu0 %v7039_v40  ;;  %v7062_v42 = vpack.c.bf16 %v4936_v51, %v4931_v62  ;;  %3967 = vmatprep.mubr.f32.mxu1 %v5112_v39  ;;  %v1014_v38 = vmax.f32 %v960_v37, 0.0  ;;  %v961_v52 = vadd.f32 %v4687_v17, %v900_v55  ;;  %v962_v7 = vadd.f32 %v4687_v17, %v901_v60  ;;  %v844_v51 = vld [vmem:[#allocation2 + $0x118] sm:$0x3] }
  0x59   : > { %7060 = vst [vmem:[#allocation38_spill] sm:$0xff] %v5208_v13  ;;  %7061 = vst [vmem:[#allocation39_spill] sm:$0xff] %v5210_v57  ;;  %v902_v5 = vmul.f32 %v4682_v16, %v841_v9  ;;  %v5222_v34 = vsel %vm1285_vm1, %v1326_v19, %v1327_v50  ;;  %v5227_v63 = vsel %vm1043_vm0, %v5208_v13, 0.0  ;;  %v1332_v62 = vrot.slane %v5210_v57, 2 }
  0x5a   : > { %4254 = vmatpush1.bf16.msra.mxu1 %v7062_v42  ;;  %7063 = vst [vmem:[#allocation40_spill] sm:$0xff] %v5222_v34  ;;  %7064 = vst [vmem:[#allocation41_spill] sm:$0xff] %v5227_v63  ;;  %v7065_v37 = vpack.c.bf16 %v4976_v33, %v4971_v24  ;;  %v1331_v9 = vrot.slane %v5227_v63, 2  ;;  %v5238_v19 = vsel %vm1048_vm2, %v1014_v38, 0.0  ;;  %v5240_v55 = vmax.f32 %v961_v52, 0.0  ;;  %v5247_v42 = vld [vmem:[%s6881_s3 + $0x90] sm:$0xff] }
  0x5b   : > { %4255 = vmatprep.subr.bf16.mxu1 %v7039_v40  ;;  %7066 = vst [vmem:[#allocation42_spill] sm:$0xff] %v5238_v19  ;;  %v5242_v60 = vmax.f32 %v962_v7, 0.0  ;;  %v5252_v24 = vld [vmem:[%s6881_s3 + $0x98] sm:$0xff]  ;;  %3968 = vmatmul.mubr.f32.gmra.mrb[10].mxu1 %v5139_v32  ;;  %v1334_v33 = vrot.slane %v5238_v19, 2  ;;  %v963_v38 = vadd.f32 %v4687_v17, %v902_v5  ;;  %v1183_v7 = vrot.slane %v4794_v11, 1  ;;  %v845_v19 = vld [vmem:[#allocation2 + $0x120] sm:$0xff] }
  0x5c   : > { %4201 = vmatpush1.bf16.msra.mxu0 %v7065_v37  ;;  %7067 = vst [vmem:[#allocation43_spill] sm:$0xff] %v5240_v55  ;;  %v1184_v52 = vrot.slane %v4771_v0, 1  ;;  %v843_v37 = vld [vmem:[#allocation2 + $0x110] sm:$0xff]  ;;  %v7068_v39 = vpack.c.bf16 %v4992_v21, %v4987_v6  ;;  %3970 = vmatprep.mubr.f32.mxu1 %v5173_v15  ;;  %v5265_v32 = vsel %vm1285_vm1, %v1327_v50, %v1329_v10  ;;  %v5275_v11 = vsel %vm1043_vm0, %v5240_v55, 0.0  ;;  %v846_v15 = vld [vmem:[#allocation2 + $0x128] sm:$0xff] }
  0x5d   : > { %4202 = vmatprep.subr.bf16.mxu0 %v7039_v40  ;;  %7069 = vst [vmem:[#allocation44_spill] sm:$0xff] %v5265_v32  ;;  %v5270_v13 = vsel %vm1172_vm3, %v7070_v47, %v1181_v44  ;;  %v903_v5 = vmul.f32 %v4682_v16, %v842_v35  ;;  %v5280_v21 = vsel %vm1285_vm1, %v1331_v9, %v1332_v62  ;;  %v1337_v6 = vrot.slane %v5242_v60, 2  ;;  %v5302_v47 = vld [vmem:[%s6881_s3 + $0xa8] sm:$0xff]  ;;  %v847_v55 = vld [vmem:[#allocation2 + $0x130] sm:$0x3] }
  0x5e   : > { %4257 = vmatpush1.bf16.msra.mxu1 %v7068_v39  ;;  %7071 = vst [vmem:[#allocation45_spill] sm:$0xff] %v5280_v21  ;;  %v1017_v50 = vmax.f32 %v963_v38, 0.0  ;;  %v5288_v39 = vld [vmem:[%s6881_s3 + $0xa0] sm:$0xff]  ;;  %v7072_v10 = vpack.c.bf16 %v5022_v2, %v5017_v27  ;;  %v5294_v44 = vsel %vm1285_vm1, %v1332_v62, %v1334_v33  ;;  %v904_v35 = vmul.f32 %v4682_v16, %v843_v37 }
  0x5f   : > { %4258 = vmatprep.subr.bf16.mxu1 %v7039_v40  ;;  %7073 = vst [vmem:[#allocation46_spill] sm:$0xff] %v5294_v44  ;;  %v964_v9 = vadd.f32 %v4687_v17, %v903_v5  ;;  %v905_v38 = vmul.f32 %v4682_v16, %v844_v51  ;;  %3971 = vmatmul.mubr.f32.gmra.mrb[12].mxu1 %v5179_v28  ;;  %v1336_v27 = vrot.slane %v5275_v11, 2 }
  0x60   : > { %4204 = vmatpush1.bf16.msra.mxu0 %v7072_v10  ;;  %v5309_v2 = vsel %vm1048_vm2, %v1017_v50, 0.0  ;;  %v5312_v62 = vsel %vm1172_vm3, %v1183_v7, %v1184_v52  ;;  %v906_v51 = vmul.f32 %v4682_v16, %v845_v19  ;;  %v7074_v33 = vpack.c.bf16 %v5065_v26, %v5060_v54  ;;  %3973 = vmatprep.mubr.f32.mxu1 %v5222_v34 }
  0x61   : > { %4205 = vmatprep.subr.bf16.mxu0 %v7039_v40  ;;  %v965_v37 = vadd.f32 %v4687_v17, %v904_v35  ;;  %v5320_v5 = vmax.f32 %v964_v9, 0.0  ;;  %v966_v10 = vadd.f32 %v4687_v17, %v905_v38  ;;  %v1186_v50 = vrot.slane %v4816_v14, 1 }
  0x62   : > { %4260 = vmatpush1.bf16.msra.mxu1 %v7074_v33  ;;  %v907_v19 = vmul.f32 %v4682_v16, %v846_v15  ;;  %v967_v54 = vadd.f32 %v4687_v17, %v906_v51  ;;  %v908_v26 = vmul.f32 %v4682_v16, %v847_v55  ;;  %v7076_v35 = vpack.c.bf16 %v5087_v4, %v5082_v20  ;;  %v848_v4 = vld [vmem:[#allocation2 + $0x138] sm:$0xff] }
  0x63   : > { %7075 = vst [vmem:[#allocation47_spill] sm:$0xff] %v5320_v5  ;;  %4261 = vmatprep.subr.bf16.mxu1 %v7039_v40  ;;  %v1339_v9 = vrot.slane %v5309_v2, 2  ;;  %v5334_v38 = vmax.f32 %v965_v37, 0.0  ;;  %v5339_v14 = vsel %vm1043_vm0, %v5320_v5, 0.0  ;;  %v1020_v33 = vmax.f32 %v966_v10, 0.0  ;;  %3974 = vmatmul.mubr.f32.gmra.mrb[14].mxu1 %v5265_v32 }
  0x64   : > { %4207 = vmatpush1.bf16.msra.mxu0 %v7076_v35  ;;  %v5343_v15 = vsel %vm1285_vm1, %v1336_v27, %v1337_v6  ;;  %v968_v55 = vadd.f32 %v4687_v17, %v907_v19  ;;  %v5346_v51 = vmax.f32 %v967_v54, 0.0  ;;  %v969_v20 = vadd.f32 %v4687_v17, %v908_v26  ;;  %3976 = vmatprep.mubr.f32.mxu1 %v5280_v21  ;;  %v5365_v54 = vld [vmem:[%s6881_s3 + $0xb0] sm:$0xff]  ;;  %v853_v5 = vld [vmem:[#allocation2 + $0x160] sm:$0x3] }
  0x65   : > { %7077 = vst [vmem:[#allocation48_spill] sm:$0xff] %v5343_v15  ;;  %v7079_v37 = vpack.c.bf16 %v5125_v41, %v5120_v36  ;;  %v1341_v10 = vrot.slane %v5339_v14, 2  ;;  %v1342_v35 = vrot.slane %v5334_v38, 2  ;;  %v5357_v27 = vsel %vm1048_vm2, %v1020_v33, 0.0  ;;  %v5370_v36 = vld [vmem:[%s6881_s3 + $0xb8] sm:$0xff]  ;;  %v849_v41 = vld [vmem:[#allocation2 + $0x140] sm:$0xff] }
  0x66   : > { %7078 = vst [vmem:[#allocation49_spill] sm:$0xff] %v5346_v51  ;;  %v5360_v19 = vsel %vm1172_vm3, %v1184_v52, %v1186_v50  ;;  %v1344_v52 = vrot.slane %v5357_v27, 2  ;;  %v5377_v50 = vmax.f32 %v968_v55, 0.0  ;;  %v5382_v26 = vsel %vm1043_vm0, %v5346_v51, 0.0 }
  0x67   : > { %4263 = vmatpush1.bf16.msra.mxu1 %v7079_v37  ;;  %3672 = vmatmul.mubr.msk.f32.vlgmr.msra.gmra.mrb[0].mxu0 %vm1043_vm0, %v4746_v45  ;;  %v1023_v33 = vmax.f32 %v969_v20, 0.0  ;;  %v850_v37 = vld [vmem:[#allocation2 + $0x148] sm:$0x3]  ;;  %v5386_v7 = vsel %vm1285_vm1, %v1337_v6, %v1339_v9  ;;  %v1188_v21 = vrot.slane %v4848_v61, 1  ;;  %v909_v34 = vmul.f32 %v4682_v16, %v848_v4  ;;  %v851_v6 = vld [vmem:[#allocation2 + $0x150] sm:$0xff] }
  0x68   : > { %4264 = vmatprep.subr.bf16.mxu1 %v7039_v40  ;;  %7080 = vst [vmem:[#allocation50_spill] sm:$0xff] %v5377_v50  ;;  %1581 = vmatprep.mubr.f32.mxu0 %v5270_v13  ;;  %7081 = vst [vmem:[#allocation51_spill] sm:$0xff] %v5386_v7  ;;  %v1346_v55 = vrot.slane %v5382_v26, 2  ;;  %v1347_v28 = vrot.slane %v5377_v50, 2  ;;  %v910_v51 = vmul.f32 %v4682_v16, %v849_v41 }
  0x69   : > { %3977 = vmatmul.mubr.f32.gmra.mrb[16].mxu1 %v5294_v44  ;;  %v5396_v20 = vsel %vm1048_vm2, %v1023_v33, 0.0  ;;  %v7082_v61 = vpack.c.bf16 %v5201_v53, %v5196_v22  ;;  %v970_v4 = vadd.f32 %v4687_v17, %v909_v34  ;;  %v911_v32 = vmul.f32 %v4682_v16, %v850_v37  ;;  %v852_v44 = vld [vmem:[#allocation2 + $0x158] sm:$0xff]  ;;  %v5420_v34 = vld [vmem:[%s6881_s3 + $0xc0] sm:$0xff]  ;;  %v5425_v37 = vld [vmem:[%s6881_s3 + $0xc8] sm:$0xff] }
  0x6a   : > { %3979 = vmatprep.mubr.f32.mxu1 %v5343_v15  ;;  %v5410_v41 = vsel %vm1285_vm1, %v1341_v10, %v1342_v35  ;;  %v5413_v22 = vsel %vm1285_vm1, %v1342_v35, %v1344_v52  ;;  %v1349_v53 = vrot.slane %v5396_v20, 2  ;;  %v971_v33 = vadd.f32 %v4687_v17, %v910_v51 }
  0x6b   : > { %4266 = vmatpush1.bf16.msra.mxu1 %v7082_v61  ;;  %1582 = vmatmul.mubr.f32.gmra.mrb[2].mxu0 %v4748_v46  ;;  %7083 = vst [vmem:[#allocation52_spill] sm:$0xff] %v5410_v41  ;;  %7084 = vst [vmem:[#allocation53_spill] sm:$0xff] %v5413_v22  ;;  %v7085_v10 = vrot.slane %v4836_v49, 1  ;;  %v5433_v52 = vmax.f32 %v970_v4, 0.0  ;;  %v972_v51 = vadd.f32 %v4687_v17, %v911_v32 }
  0x6c   : > { %4267 = vmatprep.subr.bf16.mxu1 %v7039_v40  ;;  %1586 = vmatprep.mubr.f32.mxu0 %v5312_v62  ;;  %v912_v61 = vmul.f32 %v4682_v16, %v851_v6  ;;  %v5439_v9 = vsel %vm1285_vm1, %v1346_v55, %v1347_v28  ;;  %v5441_v15 = vmax.f32 %v971_v33, 0.0  ;;  %v913_v57 = vmul.f32 %v4682_v16, %v852_v44  ;;  %v854_v33 = vld [vmem:[#allocation2 + $0x168] sm:$0xff] }
  0x6d   : > { %v5431_v35 = vsel %vm1172_vm3, %v1188_v21, %v7085_v10  ;;  %7087 = vst [vmem:[#allocation55_spill] sm:$0xff] %v5433_v52  ;;  %3980 = vmatmul.mubr.f32.gmra.mrb[18].mxu1 %v5386_v7  ;;  %7088 = vst [vmem:[#allocation56_spill] sm:$0xff] %v5439_v9  ;;  %v914_v63 = vmul.f32 %v4682_v16, %v853_v5  ;;  %v7090_v21 = vpack.c.bf16 %v5252_v24, %v5247_v42  ;;  %v855_v10 = vld [vmem:[#allocation2 + $0x170] sm:$0xff] }
  0x6e   : > { %7086 = vst [vmem:[#allocation54_spill] sm:$0xff] %v5431_v35  ;;  %7089 = vst [vmem:[#allocation57_spill] sm:$0xff] %v5441_v15  ;;  %3982 = vmatprep.mubr.f32.mxu1 %v5410_v41  ;;  %v5452_v32 = vsel %vm1043_vm0, %v5433_v52, 0.0  ;;  %v1026_v6 = vmax.f32 %v972_v51, 0.0  ;;  %v973_v4 = vadd.f32 %v4687_v17, %v912_v61  ;;  %v1352_v24 = vrot.slane %v5441_v15, 2 }
  0x6f   : > { %4269 = vmatpush1.bf16.msra.mxu1 %v7090_v21  ;;  %3673 = vmatmul.mubr.msk.f32.gmra.mrb[4].mxu0 %vm1043_vm0, %v4763_v58  ;;  %v1351_v42 = vrot.slane %v5452_v32, 2  ;;  %v974_v44 = vadd.f32 %v4687_v17, %v913_v57  ;;  %v975_v5 = vadd.f32 %v4687_v17, %v914_v63  ;;  %v1191_v61 = vrot.slane %v4904_v3, 1  ;;  %v856_v52 = vld [vmem:[#allocation2 + $0x178] sm:$0x3] }
  0x70   : > { %4270 = vmatprep.subr.bf16.mxu1 %v7039_v40  ;;  %1591 = vmatprep.mubr.f32.mxu0 %v5360_v19  ;;  %v5468_v51 = vsel %vm1048_vm2, %v1026_v6, 0.0  ;;  %v5471_v21 = vmax.f32 %v973_v4, 0.0  ;;  %v1193_v55 = vrot.slane %v4925_v31, 1  ;;  %v7093_v6 = vpack.c.bf16 %v5302_v47, %v5288_v39  ;;  %v5494_v4 = vld [vmem:[%s6881_s3 + $0xd0] sm:$0xff]  ;;  %v5499_v47 = vld [vmem:[%s6881_s3 + $0xd8] sm:$0xff] }
  0x71   : > { %3983 = vmatmul.mubr.f32.gmra.mrb[20].mxu1 %v5413_v22  ;;  %v1354_v57 = vrot.slane %v5468_v51, 2  ;;  %v5476_v41 = vmax.f32 %v974_v44, 0.0  ;;  %v1029_v63 = vmax.f32 %v975_v5, 0.0  ;;  %v5484_v3 = vsel %vm1285_vm1, %v1347_v28, %v1349_v53  ;;  %v857_v53 = vld [vmem:[#allocation2 + $0x180] sm:$0xff] }
  0x72   : > { %7091 = vst [vmem:[#allocation58_spill] sm:$0xff] %v5471_v21  ;;  %3985 = vmatprep.mubr.f32.mxu1 %v5439_v9  ;;  %7094 = vst [vmem:[#allocation60_spill] sm:$0xff] %v5484_v3  ;;  %v5489_v31 = vsel %vm1043_vm0, %v5471_v21, 0.0  ;;  %v915_v39 = vmul.f32 %v4682_v16, %v854_v33  ;;  %v916_v28 = vmul.f32 %v4682_v16, %v855_v10  ;;  %v7096_v33 = vrot.slane %v4836_v49, 1  ;;  %v858_v21 = vld [vmem:[#allocation2 + $0x188] sm:$0xff] }
  0x73   : > { %7092 = vst [vmem:[#allocation59_spill] sm:$0xff] %v5476_v41  ;;  %4272 = vmatpush1.bf16.msra.mxu1 %v7093_v6  ;;  %1592 = vmatmul.mubr.f32.gmra.mrb[6].mxu0 %v4771_v0  ;;  %v5506_v44 = vsel %vm1285_vm1, %v1351_v42, %v1352_v24  ;;  %v1356_v5 = vrot.slane %v5489_v31, 2  ;;  %v1357_v6 = vrot.slane %v5476_v41, 2  ;;  %v5512_v7 = vsel %vm1048_vm2, %v1029_v63, 0.0 }
  0x74   : > { %4273 = vmatprep.subr.bf16.mxu1 %v7039_v40  ;;  %7095 = vst [vmem:[#allocation61_spill] sm:$0xff] %v5506_v44  ;;  %1596 = vmatprep.mubr.f32.mxu0 %v5431_v35  ;;  %v5518_v10 = vsel %vm1172_vm3, %v7096_v33, %v1191_v61  ;;  %v976_v9 = vadd.f32 %v4687_v17, %v915_v39  ;;  %v7099_v35 = vrot.slane %v4897_v12, 1  ;;  %v859_v33 = vld [vmem:[#allocation2 + $0x190] sm:$0x3] }
  0x75   : > { %7097 = vst [vmem:[#allocation62_spill] sm:$0xff] %v5518_v10  ;;  %v977_v42 = vadd.f32 %v4687_v17, %v916_v28  ;;  %v917_v22 = vmul.f32 %v4682_v16, %v856_v52  ;;  %3986 = vmatmul.mubr.f32.gmra.mrb[22].mxu1 %v5484_v3  ;;  %v5525_v0 = vsel %vm1285_vm1, %v1352_v24, %v1354_v57  ;;  %v1359_v24 = vrot.slane %v5512_v7, 2 }
  0x76   : > { %7098 = vst [vmem:[#allocation63_spill] sm:$0xff] %v5525_v0  ;;  %v4280_v63 = vpack.c.bf16 %v5499_v47, %v5494_v4  ;;  %v5532_v61 = vsel %vm1172_vm3, %v1193_v55, %v7099_v35  ;;  %v918_v39 = vmul.f32 %v4682_v16, %v857_v53  ;;  %v7100_v52 = vpack.c.bf16 %v5370_v36, %v5365_v54  ;;  %v7103_v47 = vld [vmem:[#allocation14_spill] sm:$0xff] }
  0x77   : > { %3988 = vmatprep.mubr.f32.mxu1 %v5506_v44  ;;  %v5540_v57 = vmax.f32 %v976_v9, 0.0  ;;  %v5542_v28 = vmax.f32 %v977_v42, 0.0  ;;  %v978_v4 = vadd.f32 %v4687_v17, %v917_v22  ;;  %3674 = vmatmul.mubr.msk.f32.gmra.mrb[8].mxu0 %vm1043_vm0, %v7103_v47  ;;  %v5550_v35 = vsel %vm1285_vm1, %v1356_v5, %v1357_v6  ;;  %v1430_v9 = vld [vmem:[%s6881_s3 + $0x100] sm:$0xff]  ;;  %v1431_v22 = vld [vmem:[%s6881_s3 + $0x108] sm:$0xff] }
  0x78   : > { %4275 = vmatpush1.bf16.msra.mxu1 %v7100_v52  ;;  %7104 = vst [vmem:[#allocation14_spill] sm:$0xff] %v5550_v35  ;;  %v919_v54 = vmul.f32 %v4682_v16, %v858_v21  ;;  %v979_v36 = vadd.f32 %v4687_v17, %v918_v39  ;;  %1601 = vmatprep.mubr.f32.mxu0 %v5518_v10  ;;  %v7105_v39 = vld [vmem:[#allocation22_spill] sm:$0xff] }
  0x79   : > { %7101 = vst [vmem:[#allocation64_spill] sm:$0xff] %v5540_v57  ;;  %7102 = vst [vmem:[#allocation65_spill] sm:$0xff] %v5542_v28  ;;  %4276 = vmatprep.subr.bf16.mxu1 %v7039_v40  ;;  %v5564_v55 = vsel %vm1043_vm0, %v5540_v57, 0.0  ;;  %v1362_v53 = vrot.slane %v5542_v28, 2  ;;  %v1032_v21 = vmax.f32 %v978_v4, 0.0  ;;  %v920_v5 = vmul.f32 %v4682_v16, %v859_v33  ;;  %3989 = vmatmul.mubr.f32.gmra.mrb[24].mxu1 %v5525_v0 }
  0x7a   : > { %v1361_v42 = vrot.slane %v5564_v55, 2  ;;  %v1196_v52 = vrot.slane %v7105_v39, 1  ;;  %v980_v44 = vadd.f32 %v4687_v17, %v919_v54  ;;  %v5572_v3 = vmax.f32 %v979_v36, 0.0  ;;  %3991 = vmatprep.mubr.f32.mxu1 %v5550_v35 }
  0x7b   : > { %v7107_v10 = vpack.c.bf16 %v5425_v37, %v5420_v34  ;;  %v5579_v4 = vsel %vm1285_vm1, %v1357_v6, %v1359_v24  ;;  %v5583_v16 = vsel %vm1048_vm2, %v1032_v21, 0.0  ;;  %v981_v33 = vadd.f32 %v4687_v17, %v920_v5  ;;  %1602 = vmatmul.mubr.f32.gmra.mrb[10].mxu0 %v4836_v49  ;;  %v1426_v37 = vld [vmem:[%s6881_s3 + $0xe0] sm:$0xff]  ;;  %v1427_v6 = vld [vmem:[%s6881_s3 + $0xe8] sm:$0xff] }
  0x7c   : > { %7106 = vst [vmem:[#allocation22_spill] sm:$0xff] %v5572_v3  ;;  %7108 = vst [vmem:[#allocation66_spill] sm:$0xff] %v5579_v4  ;;  %v4288_v39 = vpack.c.bf16 %v1431_v22, %v1430_v9  ;;  %v5589_v54 = vsel %vm1285_vm1, %v1361_v42, %v1362_v53  ;;  %v1364_v34 = vrot.slane %v5583_v16, 2  ;;  %v5603_v17 = vsel %vm1043_vm0, %v5572_v3, 0.0  ;;  %1606 = vmatprep.mubr.f32.mxu0 %v5532_v61  ;;  %v1432_v9 = vld [vmem:[%s6881_s3 + $0x110] sm:$0xff] }
  0x7d   : > { %4278 = vmatpush1.bf16.msra.mxu1 %v7107_v10  ;;  %7109 = vst [vmem:[#allocation67_spill] sm:$0xff] %v5589_v54  ;;  %v5598_v10 = vmax.f32 %v980_v44, 0.0  ;;  %v1456_v24 = vrot.slane %v5603_v17, 2  ;;  %v1035_v36 = vmax.f32 %v981_v33, 0.0  ;;  %v1433_v44 = vld [vmem:[%s6881_s3 + $0x118] sm:$0xff]  ;;  %v7111_v22 = vrot.slane %v4897_v12, 1 }
  0x7e   : > { %4279 = vmatprep.subr.bf16.mxu1 %v7039_v40  ;;  %4289 = vmatprep.subr.bf16.mxu0 %v4288_v39  ;;  %v1198_v42 = vrot.slane %v4964_v8, 1  ;;  %v7112_v33 = vld [vmem:[#allocation23_spill] sm:$0xff]  ;;  %v5624_v0 = vsel %vm1285_vm1, %v1362_v53, %v1364_v34  ;;  %v4283_v3 = vpack.c.bf16 %v1427_v6, %v1426_v37  ;;  %v1428_v53 = vld [vmem:[%s6881_s3 + $0xf0] sm:$0xff]  ;;  %v1435_v37 = vld [vmem:[%s6881_s3 + $0x128] sm:$0xff] }
  0x7f   : > { %7110 = vst [vmem:[#allocation68_spill] sm:$0xff] %v5598_v10  ;;  %3992 = vmatmul.mubr.f32.gmra.mrb[26].mxu1 %v5579_v4  ;;  %v5617_v21 = vsel %vm1172_vm3, %v7111_v22, %v1196_v52  ;;  %v1457_v5 = vrot.slane %v5598_v10, 2  ;;  %v1199_v35 = vrot.slane %v7112_v33, 1  ;;  %4291 = vmatpush3.bf16.msra.mxu0 %v4288_v39  ;;  %7113 = vst [vmem:[#allocation23_spill] sm:$0xff] %v5624_v0  ;;  %v5628_v4 = vsel %vm1048_vm2, %v1035_v36, 0.0  ;;  %v7114_v52 = vld [vmem:[#allocation18_spill] sm:$0xff] }
  0x80   : > { %3994 = vmatprep.mubr.f32.mxu1 %v5589_v54  ;;  %3675 = vmatmul.mubr.msk.f32.gmra.mrb[12].mxu0 %vm1043_vm0, %v7114_v52  ;;  %v4292_v39 = vpack.c.bf16 %v1433_v44, %v1432_v9  ;;  %v1434_v34 = vld [vmem:[%s6881_s3 + $0x120] sm:$0xff]  ;;  %v4286_v44 = vpack.c.bf16 %v1429_v1, %v1428_v53  ;;  %v6988_v22 = vmov 0.0   ;;  %v5681_v53 = vld [vmem:[%s6881_s3 + $0x318] sm:$0xff] }
  0x81   : > { %4281 = vmatpush1.bf16.msra.mxu1 %v4280_v63  ;;  %v5635_v8 = vsel %vm1285_vm1, %v1456_v24, %v1457_v5  ;;  %v1459_v63 = vrot.slane %v5628_v4, 2  ;;  %1611 = vmatprep.mubr.f32.mxu0 %v5617_v21  ;;  %v5653_v6 = vsel %vm1172_vm3, %v1198_v42, %v1199_v35  ;;  %v7117_v24 = vld [vmem:[#allocation26_spill] sm:$0xff]  ;;  %v5661_v54 = vrot.slane %v6988_v22, 1  ;;  %v3704_v42 = vld [vmem:[%s6881_s3 + $0x308] sm:$0xff] }
  0x82   : > { %4282 = vmatprep.subr.bf16.mxu1 %v7039_v40  ;;  %7115 = vst [vmem:[#allocation18_spill] sm:$0xff] %v5635_v8  ;;  %7116 = vst [vmem:[#allocation69_spill] sm:$0xff] %v5653_v6  ;;  %v1201_v36 = vrot.slane %v7117_v24, 1  ;;  %4293 = vmatprep.subr.bf16.mxu0 %v4292_v39  ;;  %v4296_v1 = vpack.c.bf16 %v1435_v37, %v1434_v34  ;;  %v1436_v24 = vld [vmem:[%s6881_s3 + $0x130] sm:$0xff]  ;;  %v1437_v22 = vld [vmem:[%s6881_s3 + $0x138] sm:$0xff]  ;;  %v1223_v34 = vrot.slane %v5275_v11, 1 }
  0x83   : > { %3995 = vmatmul.mubr.f32.gmra.mrb[28].mxu1 %v5624_v0  ;;  %v5658_v9 = vsel %vm1285_vm1, %v1457_v5, %v1459_v63  ;;  %7119 = vst [vmem:[#allocation70_spill] sm:$0xff] %v5661_v54  ;;  %v3703_v0 = vld [vmem:[%s6881_s3 + $0x300] sm:$0xff]  ;;  %v1203_v5 = vrot.slane %v5039_v29, 1  ;;  %v1204_v63 = vrot.slane %v5034_v59, 1  ;;  %4295 = vmatpush3.bf16.msra.mxu0 %v4292_v39  ;;  %v1224_v37 = vrot.slane %v5242_v60, 1  ;;  %v1439_v11 = vld [vmem:[%s6881_s3 + $0x148] sm:$0xff] }
  0x84   : > { %3997 = vmatprep.mubr.f32.mxu1 %v5635_v8  ;;  %7118 = vst [vmem:[#allocation26_spill] sm:$0xff] %v5658_v9  ;;  %1612 = vmatmul.mubr.f32.gmra.mrb[14].mxu0 %v4897_v12  ;;  %v7120_v8 = vld [vmem:[#allocation29_spill] sm:$0xff]  ;;  %v4321_v57 = vpack.c.bf16 %v3704_v42, %v3703_v0  ;;  %v5693_v12 = vsel %vm1172_vm3, %v1199_v35, %v1201_v36  ;;  %v1438_v0 = vld [vmem:[%s6881_s3 + $0x140] sm:$0xff]  ;;  %v7121_v35 = vld [vmem:[#allocation20_spill] sm:$0xff] }
  0x85   : > { %4284 = vmatpush1.bf16.msra.mxu1 %v4283_v3  ;;  %v5672_v3 = vld [vmem:[%s6881_s3 + $0x310] sm:$0xff]  ;;  %1616 = vmatprep.mubr.f32.mxu0 %v5653_v6  ;;  %v1206_v29 = vrot.slane %v7120_v8, 1  ;;  %v1226_v8 = vrot.slane %v5309_v2, 1  ;;  %v4300_v39 = vpack.c.bf16 %v1437_v22, %v1436_v24  ;;  %v5713_v36 = vsel %vm1172_vm3, %v1203_v5, %v1204_v63 }
  0x86   : > { %4285 = vmatprep.subr.bf16.mxu1 %v7039_v40  ;;  %4297 = vmatprep.subr.bf16.mxu0 %v4296_v1  ;;  %v4324_v6 = vpack.c.bf16 %v5681_v53, %v5672_v3  ;;  %v5716_v2 = vsel %vm1172_vm3, %v1223_v34, %v1224_v37  ;;  %v1233_v3 = vrot.slane %v5382_v26, 1  ;;  %v1234_v5 = vrot.slane %v5377_v50, 1  ;;  %v1441_v26 = vld [vmem:[%s6881_s3 + $0x158] sm:$0xff]  ;;  %v7125_v34 = vld [vmem:[#allocation32_spill] sm:$0xff] }
  0x87   : > { %3998 = vmatmul.mubr.f32.gmra.mrb[30].mxu1 %v5658_v9  ;;  %v1228_v9 = vrot.slane %v5339_v14, 1  ;;  %v1229_v14 = vrot.slane %v5334_v38, 1  ;;  %v5722_v22 = vsel %vm1172_vm3, %v1204_v63, %v1206_v29  ;;  %4299 = vmatpush3.bf16.msra.mxu0 %v4296_v1  ;;  %v5725_v42 = vsel %vm1172_vm3, %v1224_v37, %v1226_v8  ;;  %v1440_v1 = vld [vmem:[%s6881_s3 + $0x150] sm:$0xff] }
  0x88   : > { %2026 = vmatprep.mubr.f32.mxu1 %v5661_v54  ;;  %3676 = vmatmul.mubr.msk.f32.gmra.mrb[16].mxu0 %vm1043_vm0, %v7121_v35  ;;  %7122 = vst [vmem:[#allocation29_spill] sm:$0xff] %v5722_v22  ;;  %v7123_v53 = vmov 0.0   ;;  %v1236_v63 = vrot.slane %v5396_v20, 1  ;;  %v4304_v29 = vpack.c.bf16 %v1439_v11, %v1438_v0  ;;  %v5746_v37 = vsel %vm1172_vm3, %v1233_v3, %v1234_v5  ;;  %v3707_v0 = vld [vmem:[%s6881_s3 + $0x320] sm:$0xff] }
  0x89   : > { %4287 = vmatpush1.bf16.msra.mxu1 %v4286_v44  ;;  %v1231_v44 = vrot.slane %v5357_v27, 1  ;;  %1621 = vmatprep.mubr.f32.mxu0 %v5693_v12  ;;  %v5731_v24 = vsel %vm1172_vm3, %v1228_v9, %v1229_v14  ;;  %v1208_v9 = vrot.slane %v7125_v34, 1  ;;  %v1238_v8 = vrot.slane %v5452_v32, 1 }
  0x8a   : > { %4320 = vmatprep.subr.bf16.mxu1 %v7039_v40  ;;  %4301 = vmatprep.subr.bf16.mxu0 %v4300_v39  ;;  %v1239_v20 = vrot.slane %v5441_v15, 1  ;;  %v5759_v11 = vsel %vm1172_vm3, %v1234_v5, %v1236_v63  ;;  %v1243_v32 = vrot.slane %v5489_v31, 1  ;;  %v1209_v3 = vrot.slane %v5094_v30, 1 }
  0x8b   : > { %v5734_v27 = vsel %vm1172_vm3, %v1229_v14, %v1231_v44  ;;  %7126 = vst [vmem:[#allocation32_spill] sm:$0xff] %v5759_v11  ;;  %v1241_v14 = vrot.slane %v5468_v51, 1  ;;  %v1244_v44 = vrot.slane %v5476_v41, 1  ;;  %4303 = vmatpush3.bf16.msra.mxu0 %v4300_v39  ;;  %v4308_v15 = vpack.c.bf16 %v1441_v26, %v1440_v1 }
  0x8c   : > { %2027 = vmatmul.mubr.f32.vlgmr.msra.gmra.mrb[32].mxu1 %v7123_v53  ;;  %7124 = vst [vmem:[#allocation20_spill] sm:$0xff] %v5734_v27  ;;  %1622 = vmatmul.mubr.f32.gmra.mrb[18].mxu0 %v7112_v33  ;;  %v5767_v34 = vsel %vm1172_vm3, %v1238_v8, %v1239_v20  ;;  %v1248_v5 = vrot.slane %v5564_v55, 1  ;;  %v1249_v63 = vrot.slane %v5542_v28, 1  ;;  %v1251_v1 = vrot.slane %v5583_v16, 1  ;;  %v1442_v8 = vld [vmem:[%s6881_s3 + $0x160] sm:$0xff]  ;;  %v1443_v55 = vld [vmem:[%s6881_s3 + $0x168] sm:$0xff] }
  0x8d   : > { %4322 = vmatpush1.bf16.msra.mxu1 %v4321_v57  ;;  %2031 = vmatprep.mubr.f32.mxu1 %v5661_v54  ;;  %v3708_v57 = vld [vmem:[%s6881_s3 + $0x328] sm:$0xff]  ;;  %7127 = vst [vmem:[#allocation71_spill] sm:$0xff] %v5767_v34  ;;  %v1246_v54 = vrot.slane %v5512_v7, 1  ;;  %v5772_v51 = vsel %vm1172_vm3, %v1239_v20, %v1241_v14  ;;  %v5775_v31 = vsel %vm1172_vm3, %v1243_v32, %v1244_v44  ;;  %v1449_v26 = vrot.slane %v5603_v17, 1  ;;  %v7131_v20 = vld [vmem:[#allocation27_spill] sm:$0xff]  ;;  %v3710_v16 = vld [vmem:[%s6881_s3 + $0x338] sm:$0xff] }
  0x8e   : > { %4323 = vmatprep.subr.bf16.mxu1 %v7039_v40  ;;  %1626 = vmatprep.mubr.f32.mxu0 %v5713_v36  ;;  %7128 = vst [vmem:[#allocation72_spill] sm:$0xff] %v5772_v51  ;;  %7129 = vst [vmem:[#allocation73_spill] sm:$0xff] %v5775_v31  ;;  %v4327_v39 = vpack.c.bf16 %v3708_v57, %v3707_v0  ;;  %v1450_v17 = vrot.slane %v5598_v10, 1  ;;  %v1452_v0 = vrot.slane %v5628_v4, 1  ;;  %v1211_v14 = vrot.slane %v5143_v43, 1  ;;  %v1445_v43 = vld [vmem:[%s6881_s3 + $0x178] sm:$0xff] }
  0x8f   : > { %4305 = vmatprep.subr.bf16.mxu0 %v4304_v29  ;;  %v5781_v7 = vsel %vm1172_vm3, %v1244_v44, %v1246_v54  ;;  %v5802_v54 = vsel %vm1172_vm3, %v1248_v5, %v1249_v63  ;;  %v5814_v57 = vsel %vm1172_vm3, %v1208_v9, %v1209_v3  ;;  %v4312_v44 = vpack.c.bf16 %v1443_v55, %v1442_v8  ;;  %v3712_v9 = vld [vmem:[%s6881_s3 + $0x348] sm:$0xff]  ;;  %v3735_v8 = vld [vmem:[%s6881_s3 + $0x400] sm:$0xff] }
  0x90   : > { %2032 = vmatmul.mubr.f32.gmra.mrb[34].mxu1 %v7123_v53  ;;  %7130 = vst [vmem:[#allocation74_spill] sm:$0xff] %v5781_v7  ;;  %3677 = vmatmul.mubr.msk.f32.gmra.mrb[20].mxu0 %vm1043_vm0, %v7131_v20  ;;  %7132 = vst [vmem:[#allocation27_spill] sm:$0xff] %v5802_v54  ;;  %v5818_v32 = vsel %vm1172_vm3, %v1449_v26, %v1450_v17  ;;  %v5822_v4 = vsel %vm1172_vm3, %v1450_v17, %v1452_v0  ;;  %v3715_v0 = vld [vmem:[%s6881_s3 + $0x360] sm:$0xff] }
  0x91   : > { %2036 = vmatprep.mubr.f32.mxu1 %v5164_v56  ;;  %4325 = vmatpush1.bf16.msra.mxu1 %v4324_v6  ;;  %v3709_v56 = vld [vmem:[%s6881_s3 + $0x330] sm:$0xff]  ;;  %v5807_v6 = vsel %vm1172_vm3, %v1249_v63, %v1251_v1  ;;  %7134 = vst [vmem:[#allocation76_spill] sm:$0xff] %v5818_v32  ;;  %7135 = vst [vmem:[#allocation77_spill] sm:$0xff] %v5822_v4  ;;  %v5841_v5 = vsel %vm1172_vm3, %v1209_v3, %v1211_v14  ;;  %v1213_v63 = vrot.slane %v5154_v23, 1  ;;  %v3714_v3 = vld [vmem:[%s6881_s3 + $0x358] sm:$0xff] }
  0x92   : > { %4326 = vmatprep.subr.bf16.mxu1 %v7039_v40  ;;  %1631 = vmatprep.mubr.f32.mxu0 %v5722_v22  ;;  %7133 = vst [vmem:[#allocation75_spill] sm:$0xff] %v5807_v6  ;;  %v3713_v23 = vld [vmem:[%s6881_s3 + $0x350] sm:$0xff]  ;;  %v3716_v14 = vld [vmem:[%s6881_s3 + $0x368] sm:$0xff] }
  0x93   : > { %4307 = vmatpush3.bf16.msra.mxu0 %v4304_v29  ;;  %v4330_v29 = vpack.c.bf16 %v3710_v16, %v3709_v56  ;;  %v1216_v56 = vrot.slane %v5190_v18, 1  ;;  %v4336_v17 = vpack.c.bf16 %v3714_v3, %v3713_v23  ;;  %v7137_v18 = vld [vmem:[#allocation11_spill] sm:$0xff]  ;;  %v7143_v3 = vld [vmem:[#allocation62_spill] sm:$0xff] }
  0x94   : > { %3688 = vmatmul.mubr.msk.f32.gmra.mrb[36].mxu1 %vm1043_vm0, %v4746_v45  ;;  %4309 = vmatprep.subr.bf16.mxu0 %v4308_v15  ;;  %v1444_v45 = vld [vmem:[%s6881_s3 + $0x170] sm:$0xff] }
  0x95   : > { %2041 = vmatprep.mubr.f32.mxu1 %v5270_v13  ;;  %4328 = vmatpush1.bf16.msra.mxu1 %v4327_v39  ;;  %v3711_v13 = vld [vmem:[%s6881_s3 + $0x340] sm:$0xff]  ;;  %v1214_v39 = vrot.slane %v5134_v25, 1  ;;  %v4316_v1 = vpack.c.bf16 %v1445_v43, %v1444_v45 }
  0x96   : > { %1632 = vmatmul.mubr.f32.gmra.mrb[22].mxu0 %v5034_v59  ;;  %4329 = vmatprep.subr.bf16.mxu1 %v7039_v40  ;;  %v4333_v26 = vpack.c.bf16 %v3712_v9, %v3711_v13  ;;  %v7139_v43 = vld [vmem:[#allocation39_spill] sm:$0xff]  ;;  %v7140_v9 = vld [vmem:[#allocation54_spill] sm:$0xff] }
  0x97   : > { %1636 = vmatprep.mubr.f32.mxu0 %v5814_v57  ;;  %4311 = vmatpush3.bf16.msra.mxu0 %v4308_v15  ;;  %v7136_v15 = vld [vmem:[#allocation30_spill] sm:$0xff]  ;;  %v5867_v55 = vsel %vm1172_vm3, %v1213_v63, %v1214_v39  ;;  %v1219_v13 = vrot.slane %v7139_v43, 1  ;;  %v4339_v63 = vpack.c.bf16 %v3716_v14, %v3715_v0  ;;  %v3720_v0 = vld [vmem:[%s6881_s3 + $0x388] sm:$0xff] }
  0x98   : > { %2042 = vmatmul.mubr.f32.gmra.mrb[38].mxu1 %v4748_v46  ;;  %4313 = vmatprep.subr.bf16.mxu0 %v4312_v44  ;;  %v3736_v46 = vld [vmem:[%s6881_s3 + $0x408] sm:$0xff] }
  0x99   : > { %2046 = vmatprep.mubr.f32.mxu1 %v5312_v62  ;;  %4331 = vmatpush1.bf16.msra.mxu1 %v4330_v29  ;;  %v5870_v16 = vpack.c.bf16 %v3736_v46, %v3735_v8  ;;  %v7138_v29 = vld [vmem:[#allocation41_spill] sm:$0xff]  ;;  %v7142_v46 = vld [vmem:[#allocation42_spill] sm:$0xff] }
  0x9a   : > { %3678 = vmatmul.mubr.msk.f32.gmra.mrb[24].mxu0 %vm1043_vm0, %v7136_v15  ;;  %4332 = vmatprep.subr.bf16.mxu1 %v7039_v40  ;;  %v1218_v45 = vrot.slane %v7138_v29, 1  ;;  %v1221_v23 = vrot.slane %v7142_v46, 1  ;;  %v3724_v46 = vld [vmem:[%s6881_s3 + $0x3a8] sm:$0xff] }
  0x9b   : > { %1641 = vmatprep.mubr.f32.mxu0 %v5841_v5  ;;  %4315 = vmatpush3.bf16.msra.mxu0 %v4312_v44  ;;  %v5884_v44 = vsel %vm1172_vm3, %v1214_v39, %v1216_v56  ;;  %v3717_v39 = vld [vmem:[%s6881_s3 + $0x370] sm:$0xff] }
  0x9c   : > { %3689 = vmatmul.mubr.msk.f32.gmra.mrb[40].mxu1 %vm1043_vm0, %v4763_v58  ;;  %4317 = vmatprep.subr.bf16.mxu0 %v4316_v1  ;;  %v5905_v8 = vsel %vm1172_vm3, %v1218_v45, %v1219_v13  ;;  %v5920_v14 = vsel %vm1172_vm3, %v1219_v13, %v1221_v23  ;;  %v7144_v45 = vld [vmem:[#allocation38_spill] sm:$0xff]  ;;  %v7145_v23 = vld [vmem:[#allocation19_spill] sm:$0xff] }
  0x9d   : > { %2051 = vmatprep.mubr.f32.mxu1 %v5360_v19  ;;  %4334 = vmatpush1.bf16.msra.mxu1 %v4333_v26  ;;  %v7141_v26 = vld [vmem:[#allocation34_spill] sm:$0xff] }
  0x9e   : > { %1642 = vmatmul.mubr.f32.gmra.mrb[26].mxu0 %v5094_v30  ;;  %4335 = vmatprep.subr.bf16.mxu1 %v7039_v40 }
  0x9f   : > { %1646 = vmatprep.mubr.f32.mxu0 %v5867_v55  ;;  %4319 = vmatpush3.bf16.msra.mxu0 %v4316_v1  ;;  %v3718_v1 = vld [vmem:[%s6881_s3 + $0x378] sm:$0xff] }
  0xa0   : > { %2052 = vmatmul.mubr.f32.gmra.mrb[42].mxu1 %v7137_v18  ;;  %4369 = vmatprep.subr.bf16.mxu0 %v5870_v16  ;;  %v4342_v56 = vpack.c.bf16 %v3718_v1, %v3717_v39  ;;  %v3722_v39 = vld [vmem:[%s6881_s3 + $0x398] sm:$0xff]  ;;  %v3723_v1 = vld [vmem:[%s6881_s3 + $0x3a0] sm:$0xff] }
  0xa1   : > { %2056 = vmatprep.mubr.f32.mxu1 %v7140_v9  ;;  %4337 = vmatpush1.bf16.msra.mxu1 %v4336_v17  ;;  %v3719_v17 = vld [vmem:[%s6881_s3 + $0x380] sm:$0xff] }
  0xa2   : > { %3679 = vmatmul.mubr.msk.f32.gmra.mrb[28].mxu0 %vm1043_vm0, %v7141_v26  ;;  %4338 = vmatprep.subr.bf16.mxu1 %v7039_v40  ;;  %v4345_v29 = vpack.c.bf16 %v3720_v0, %v3719_v17  ;;  %v4351_v17 = vpack.c.bf16 %v3724_v46, %v3723_v1  ;;  %v7147_v0 = vld [vmem:[#allocation43_spill] sm:$0xff]  ;;  %v3728_v1 = vld [vmem:[%s6881_s3 + $0x3c8] sm:$0xff] }
  0xa3   : > { %1651 = vmatprep.mubr.f32.mxu0 %v5884_v44 }
  0xa4   : > { %3690 = vmatmul.mubr.msk.f32.gmra.mrb[44].mxu1 %vm1043_vm0, %v7103_v47 }
  0xa5   : > { %2061 = vmatprep.mubr.f32.mxu1 %v7143_v3  ;;  %4340 = vmatpush1.bf16.msra.mxu1 %v4339_v63  ;;  %v3721_v63 = vld [vmem:[%s6881_s3 + $0x390] sm:$0xff] }
  0xa6   : > { %1652 = vmatmul.mubr.f32.gmra.mrb[30].mxu0 %v5134_v25  ;;  %4341 = vmatprep.subr.bf16.mxu1 %v7039_v40  ;;  %v4348_v13 = vpack.c.bf16 %v3722_v39, %v3721_v63  ;;  %v3726_v63 = vld [vmem:[%s6881_s3 + $0x3b8] sm:$0xff] }
  0xa7   : > { %1656 = vmatprep.mubr.f32.mxu0 %v5905_v8 }
  0xa8   : > { %2062 = vmatmul.mubr.f32.gmra.mrb[46].mxu1 %v4836_v49 }
  0xa9   : > { %2066 = vmatprep.mubr.f32.mxu1 %v5532_v61  ;;  %4343 = vmatpush1.bf16.msra.mxu1 %v4342_v56  ;;  %v7146_v56 = vld [vmem:[#allocation69_spill] sm:$0xff] }
  0xaa   : > { %3680 = vmatmul.mubr.msk.f32.gmra.mrb[32].mxu0 %vm1043_vm0, %v7144_v45  ;;  %4344 = vmatprep.subr.bf16.mxu1 %v7039_v40 }
  0xab   : > { %1661 = vmatprep.mubr.f32.mxu0 %v5920_v14 }
  0xac   : > { %3691 = vmatmul.mubr.msk.f32.gmra.mrb[48].mxu1 %vm1043_vm0, %v7114_v52 }
  0xad   : > { %2071 = vmatprep.mubr.f32.mxu1 %v5617_v21  ;;  %4346 = vmatpush1.bf16.msra.mxu1 %v4345_v29  ;;  %v3725_v29 = vld [vmem:[%s6881_s3 + $0x3b0] sm:$0xff] }
  0xae   : > { %1662 = vmatmul.mubr.f32.gmra.mrb[34].mxu0 %v7139_v43  ;;  %4347 = vmatprep.subr.bf16.mxu1 %v7039_v40  ;;  %v4354_v39 = vpack.c.bf16 %v3726_v63, %v3725_v29  ;;  %v3729_v29 = vld [vmem:[%s6881_s3 + $0x3d0] sm:$0xff]  ;;  %v3730_v63 = vld [vmem:[%s6881_s3 + $0x3d8] sm:$0xff] }
  0xaf   : > { %1666 = vmatprep.mubr.f32.mxu0 %v5716_v2 }
  0xb0   : > { %2072 = vmatmul.mubr.f32.gmra.mrb[50].mxu1 %v7145_v23 }
  0xb1   : > { %2076 = vmatprep.mubr.f32.mxu1 %v7146_v56  ;;  %4349 = vmatpush1.bf16.msra.mxu1 %v4348_v13  ;;  %v3727_v13 = vld [vmem:[%s6881_s3 + $0x3c0] sm:$0xff] }
  0xb2   : > { %3681 = vmatmul.mubr.msk.f32.gmra.mrb[36].mxu0 %vm1043_vm0, %v7147_v0  ;;  %4350 = vmatprep.subr.bf16.mxu1 %v7039_v40  ;;  %v4357_v46 = vpack.c.bf16 %v3728_v1, %v3727_v13  ;;  %v3731_v13 = vld [vmem:[%s6881_s3 + $0x3e0] sm:$0xff]  ;;  %v3732_v1 = vld [vmem:[%s6881_s3 + $0x3e8] sm:$0xff] }
  0xb3   : > { %1671 = vmatprep.mubr.f32.mxu0 %v5725_v42 }
  0xb4   : > { %3692 = vmatmul.mubr.msk.f32.gmra.mrb[52].mxu1 %vm1043_vm0, %v7121_v35 }
  0xb5   : > { %2081 = vmatprep.mubr.f32.mxu1 %v5693_v12  ;;  %4352 = vmatpush1.bf16.msra.mxu1 %v4351_v17  ;;  %v7148_v17 = vld [vmem:[#allocation47_spill] sm:$0xff] }
  0xb6   : > { %1672 = vmatmul.mubr.f32.gmra.mrb[38].mxu0 %v5242_v60  ;;  %4353 = vmatprep.subr.bf16.mxu1 %v7039_v40 }
  0xb7   : > { %1676 = vmatprep.mubr.f32.mxu0 %v5731_v24 }
  0xb8   : > { %2082 = vmatmul.mubr.f32.gmra.mrb[54].mxu1 %v7112_v33 }
  0xb9   : > { %2086 = vmatprep.mubr.f32.mxu1 %v5713_v36  ;;  %4355 = vmatpush1.bf16.msra.mxu1 %v4354_v39  ;;  %v4360_v39 = vpack.c.bf16 %v3730_v63, %v3729_v29  ;;  %v7149_v29 = vld [vmem:[#allocation49_spill] sm:$0xff] }
  0xba   : > { %3682 = vmatmul.mubr.msk.f32.gmra.mrb[40].mxu0 %vm1043_vm0, %v7148_v17  ;;  %4356 = vmatprep.subr.bf16.mxu1 %v7039_v40  ;;  %v3733_v63 = vld [vmem:[%s6881_s3 + $0x3f0] sm:$0xff] }
  0xbb   : > { %1681 = vmatprep.mubr.f32.mxu0 %v5734_v27 }
  0xbc   : > { %3693 = vmatmul.mubr.msk.f32.gmra.mrb[56].mxu1 %vm1043_vm0, %v7131_v20 }
  0xbd   : > { %2091 = vmatprep.mubr.f32.mxu1 %v5722_v22  ;;  %4358 = vmatpush1.bf16.msra.mxu1 %v4357_v46  ;;  %v4363_v46 = vpack.c.bf16 %v3732_v1, %v3731_v13  ;;  %v3734_v22 = vld [vmem:[%s6881_s3 + $0x3f8] sm:$0xff]  ;;  %v7150_v13 = vld [vmem:[#allocation55_spill] sm:$0xff]  ;;  %v7153_v1 = vld [vmem:[#allocation64_spill] sm:$0xff] }
  0xbe   : > { %1682 = vmatmul.mubr.f32.gmra.mrb[42].mxu0 %v5334_v38  ;;  %4359 = vmatprep.subr.bf16.mxu1 %v7039_v40 }
  0xbf   : > { %1686 = vmatprep.mubr.f32.mxu0 %v5746_v37 }
  0xc0   : > { %2092 = vmatmul.mubr.f32.gmra.mrb[58].mxu1 %v5034_v59 }
  0xc1   : > { %2096 = vmatprep.mubr.f32.mxu1 %v5814_v57  ;;  %4361 = vmatpush1.bf16.msra.mxu1 %v4360_v39  ;;  %v4366_v39 = vpack.c.bf16 %v3734_v22, %v3733_v63  ;;  %v7152_v22 = vld [vmem:[#allocation58_spill] sm:$0xff]  ;;  %v6062_v63 = vrot.slane %v7123_v53, 2 }
  0xc2   : > { %3683 = vmatmul.mubr.msk.f32.gmra.mrb[44].mxu0 %vm1043_vm0, %v7149_v29  ;;  %4362 = vmatprep.subr.bf16.mxu1 %v7039_v40 }
  0xc3   : > { %1691 = vmatprep.mubr.f32.mxu0 %v5759_v11  ;;  %7155 = vst [vmem:[#allocation30_spill] sm:$0xff] %v6062_v63 }
  0xc4   : > { %3694 = vmatmul.mubr.msk.f32.gmra.mrb[60].mxu1 %vm1043_vm0, %v7136_v15 }
  0xc5   : > { %2101 = vmatprep.mubr.f32.mxu1 %v5841_v5  ;;  %4364 = vmatpush1.bf16.msra.mxu1 %v4363_v46  ;;  %v7154_v46 = vld [vmem:[#allocation22_spill] sm:$0xff] }
  0xc6   : > { %1692 = vmatmul.mubr.f32.gmra.mrb[46].mxu0 %v5377_v50  ;;  %4365 = vmatprep.subr.bf16.mxu1 %v7039_v40  ;;  %v7151_v40 = vld [vmem:[#allocation57_spill] sm:$0xff] }
  0xc7   : > { %1696 = vmatprep.mubr.f32.mxu0 %v5767_v34 }
  0xc8   : > { %2102 = vmatmul.mubr.f32.gmra.mrb[62].mxu1 %v5094_v30 }
  0xc9   : > { %2106 = vmatprep.mubr.f32.mxu1 %v5867_v55  ;;  %4367 = vmatpush1.bf16.msra.mxu1 %v4366_v39  ;;  %v3737_v39 = vld [vmem:[%s6881_s3 + $0x410] sm:$0xff] }
  0xca   : > { %3684 = vmatmul.mubr.msk.f32.gmra.mrb[48].mxu0 %vm1043_vm0, %v7150_v13 }
  0xcb   : > { %1701 = vmatprep.mubr.f32.mxu0 %v5772_v51 }
  0xcc   : > { %3695 = vmatmul.mubr.msk.f32.gmra.mrb[64].mxu1 %vm1043_vm0, %v7141_v26 }
  0xcd   : > { %2111 = vmatprep.mubr.f32.mxu1 %v5884_v44 }
  0xce   : > { %1702 = vmatmul.mubr.f32.gmra.mrb[50].mxu0 %v7151_v40 }
  0xcf   : > { %1706 = vmatprep.mubr.f32.mxu0 %v5775_v31 }
  0xd0   : > { %2112 = vmatmul.mubr.f32.gmra.mrb[66].mxu1 %v5134_v25 }
  0xd1   : > { %2116 = vmatprep.mubr.f32.mxu1 %v5905_v8 }
  0xd2   : > { %3685 = vmatmul.mubr.msk.f32.gmra.mrb[52].mxu0 %vm1043_vm0, %v7152_v22 }
  0xd3   : > { %1711 = vmatprep.mubr.f32.mxu0 %v5781_v7 }
  0xd4   : > { %3696 = vmatmul.mubr.msk.f32.gmra.mrb[68].mxu1 %vm1043_vm0, %v7144_v45 }
  0xd5   : > { %2121 = vmatprep.mubr.f32.mxu1 %v5920_v14 }
  0xd6   : > { %1712 = vmatmul.mubr.f32.gmra.mrb[54].mxu0 %v5476_v41 }
  0xd7   : > { %1716 = vmatprep.mubr.f32.mxu0 %v5802_v54 }
  0xd8   : > { %2122 = vmatmul.mubr.f32.gmra.mrb[70].mxu1 %v7139_v43 }
  0xd9   : > { %2126 = vmatprep.mubr.f32.mxu1 %v5716_v2 }
  0xda   : > { %3686 = vmatmul.mubr.msk.f32.gmra.mrb[56].mxu0 %vm1043_vm0, %v7153_v1 }
  0xdb   : > { %1721 = vmatprep.mubr.f32.mxu0 %v5807_v6 }
  0xdc   : > { %3697 = vmatmul.mubr.msk.f32.gmra.mrb[72].mxu1 %vm1043_vm0, %v7147_v0 }
  0xdd   : > { %2131 = vmatprep.mubr.f32.mxu1 %v5725_v42 }
  0xde   : > { %1722 = vmatmul.mubr.f32.gmra.mrb[58].mxu0 %v5542_v28 }
  0xdf   : > { %1726 = vmatprep.mubr.f32.mxu0 %v5818_v32  ;;  %v3738_v32 = vld [vmem:[%s6881_s3 + $0x418] sm:$0xff] }
  0xe0   : > { %2132 = vmatmul.mubr.f32.gmra.mrb[74].mxu1 %v5242_v60  ;;  %v4372_v53 = vpack.c.bf16 %v3738_v32, %v3737_v39  ;;  %v3741_v39 = vld [vmem:[%s6881_s3 + $0x430] sm:$0xff] }
  0xe1   : > { %2136 = vmatprep.mubr.f32.mxu1 %v5731_v24 }
  0xe2   : > { %3687 = vmatmul.mubr.msk.f32.gmra.mrb[60].mxu0 %vm1043_vm0, %v7154_v46  ;;  %v3740_v46 = vld [vmem:[%s6881_s3 + $0x428] sm:$0xff] }
  0xe3   : > { %1731 = vmatprep.mubr.f32.mxu0 %v5822_v4  ;;  %v3739_v4 = vld [vmem:[%s6881_s3 + $0x420] sm:$0xff] }
  0xe4   : > { %3698 = vmatmul.mubr.msk.f32.gmra.mrb[76].mxu1 %vm1043_vm0, %v7148_v17  ;;  %v4376_v32 = vpack.c.bf16 %v3740_v46, %v3739_v4  ;;  %v3743_v4 = vld [vmem:[%s6881_s3 + $0x440] sm:$0xff]  ;;  %v3744_v46 = vld [vmem:[%s6881_s3 + $0x448] sm:$0xff] }
  0xe5   : > { %2141 = vmatprep.mubr.f32.mxu1 %v5734_v27  ;;  %v7156_v27 = vld [vmem:[#allocation12_spill] sm:$0xff] }
  0xe6   : > { %1732 = vmatmul.mubr.f32.gmra.mrb[62].mxu0 %v5598_v10  ;;  %v3742_v10 = vld [vmem:[%s6881_s3 + $0x438] sm:$0xff] }
  0xe7   : > { %4032 = vmatprep.mubr.f32.mxu0 %v6062_v63 }
  0xe8   : > { %2142 = vmatmul.mubr.f32.gmra.mrb[78].mxu1 %v5334_v38 }
  0xe9   : > { %2146 = vmatprep.mubr.f32.mxu1 %v5746_v37 }
  0xea   : > { %4033 = vmatmul.mubr.f32.vlgmr.msra.gmra.mrb[64].mxu0 %v6062_v63  ;;  %v7157_v63 = vld [vmem:[#allocation13_spill] sm:$0xff] }
  0xeb   : > { %4035 = vmatprep.mubr.f32.mxu0 %v7156_v27  ;;  %4371 = vmatpush3.bf16.msra.mxu0 %v5870_v16  ;;  %v7158_v27 = vld [vmem:[#allocation15_spill] sm:$0xff]  ;;  %v4380_v16 = vpack.c.bf16 %v3742_v10, %v3741_v39  ;;  %v4384_v10 = vpack.c.bf16 %v3744_v46, %v3743_v4  ;;  %v3746_v39 = vld [vmem:[%s6881_s3 + $0x458] sm:$0xff]  ;;  %v3748_v46 = vld [vmem:[%s6881_s3 + $0x468] sm:$0xff] }
  0xec   : > { %3699 = vmatmul.mubr.msk.f32.gmra.mrb[80].mxu1 %vm1043_vm0, %v7149_v29  ;;  %4373 = vmatprep.subr.bf16.mxu0 %v4372_v53  ;;  %v3747_v4 = vld [vmem:[%s6881_s3 + $0x460] sm:$0xff] }
  0xed   : > { %2151 = vmatprep.mubr.f32.mxu1 %v5759_v11  ;;  %v7159_v11 = vld [vmem:[#allocation16_spill] sm:$0xff] }
  0xee   : > { %4036 = vmatmul.mubr.f32.gmra.mrb[66].mxu0 %v7157_v63  ;;  %v7160_v63 = vld [vmem:[#allocation17_spill] sm:$0xff] }
  0xef   : > { %4038 = vmatprep.mubr.f32.mxu0 %v7158_v27  ;;  %4375 = vmatpush3.bf16.msra.mxu0 %v4372_v53  ;;  %v3745_v53 = vld [vmem:[%s6881_s3 + $0x450] sm:$0xff] }
  0xf0   : > { %2152 = vmatmul.mubr.f32.gmra.mrb[82].mxu1 %v5377_v50  ;;  %4377 = vmatprep.subr.bf16.mxu0 %v4376_v32  ;;  %v7162_v50 = vld [vmem:[#allocation24_spill] sm:$0xff] }
  0xf1   : > { %2156 = vmatprep.mubr.f32.mxu1 %v5767_v34  ;;  %v7161_v34 = vld [vmem:[#allocation21_spill] sm:$0xff] }
  0xf2   : > { %4039 = vmatmul.mubr.f32.gmra.mrb[68].mxu0 %v7159_v11 }
  0xf3   : > { %4041 = vmatprep.mubr.f32.mxu0 %v7160_v63  ;;  %4379 = vmatpush3.bf16.msra.mxu0 %v4376_v32  ;;  %v4388_v32 = vpack.c.bf16 %v3746_v39, %v3745_v53  ;;  %v3749_v53 = vld [vmem:[%s6881_s3 + $0x470] sm:$0xff]  ;;  %v3750_v39 = vld [vmem:[%s6881_s3 + $0x478] sm:$0xff] }
  0xf4   : > { %3700 = vmatmul.mubr.msk.f32.gmra.mrb[84].mxu1 %vm1043_vm0, %v7150_v13  ;;  %4381 = vmatprep.subr.bf16.mxu0 %v4380_v16  ;;  %v7164_v13 = vld [vmem:[#allocation28_spill] sm:$0xff] }
  0xf5   : > { %2161 = vmatprep.mubr.f32.mxu1 %v5772_v51  ;;  %v7163_v51 = vld [vmem:[#allocation25_spill] sm:$0xff] }
  0xf6   : > { %4042 = vmatmul.mubr.f32.gmra.mrb[70].mxu0 %v7161_v34 }
  0xf7   : > { %4044 = vmatprep.mubr.f32.mxu0 %v7162_v50  ;;  %4383 = vmatpush3.bf16.msra.mxu0 %v4380_v16  ;;  %v4392_v16 = vpack.c.bf16 %v3748_v46, %v3747_v4  ;;  %v7167_v4 = vld [vmem:[#allocation35_spill] sm:$0xff]  ;;  %v7168_v46 = vld [vmem:[#allocation36_spill] sm:$0xff] }
  0xf8   : > { %2162 = vmatmul.mubr.f32.gmra.mrb[86].mxu1 %v7151_v40  ;;  %4385 = vmatprep.subr.bf16.mxu0 %v4384_v10  ;;  %v7166_v40 = vld [vmem:[#allocation33_spill] sm:$0xff] }
  0xf9   : > { %2166 = vmatprep.mubr.f32.mxu1 %v5775_v31  ;;  %v7165_v31 = vld [vmem:[#allocation31_spill] sm:$0xff] }
  0xfa   : > { %4045 = vmatmul.mubr.f32.gmra.mrb[72].mxu0 %v7163_v51 }
  0xfb   : > { %4047 = vmatprep.mubr.f32.mxu0 %v7164_v13  ;;  %4387 = vmatpush3.bf16.msra.mxu0 %v4384_v10  ;;  %v4396_v10 = vpack.c.bf16 %v3750_v39, %v3749_v53  ;;  %v7171_v53 = vld [vmem:[#allocation44_spill] sm:$0xff]  ;;  %v7172_v39 = vld [vmem:[#allocation45_spill] sm:$0xff] }
  0xfc   : > { %3701 = vmatmul.mubr.msk.f32.gmra.mrb[88].mxu1 %vm1043_vm0, %v7152_v22  ;;  %4389 = vmatprep.subr.bf16.mxu0 %v4388_v32 }
  0xfd   : > { %2171 = vmatprep.mubr.f32.mxu1 %v5781_v7  ;;  %v7169_v7 = vld [vmem:[#allocation37_spill] sm:$0xff] }
  0xfe   : > { %4048 = vmatmul.mubr.f32.gmra.mrb[74].mxu0 %v7165_v31 }
  0xff   : > { %4050 = vmatprep.mubr.f32.mxu0 %v7166_v40  ;;  %4391 = vmatpush3.bf16.msra.mxu0 %v4388_v32  ;;  %v7170_v32 = vld [vmem:[#allocation40_spill] sm:$0xff] }
 0x100   : > { %2172 = vmatmul.mubr.f32.gmra.mrb[90].mxu1 %v5476_v41  ;;  %4393 = vmatprep.subr.bf16.mxu0 %v4392_v16 }
 0x101   : > { %2176 = vmatprep.mubr.f32.mxu1 %v5802_v54  ;;  %v7184_v54 = vld [vmem:[#allocation67_spill] sm:$0xff] }
 0x102   : > { %4051 = vmatmul.mubr.f32.gmra.mrb[76].mxu0 %v7167_v4 }
 0x103   : > { %4053 = vmatprep.mubr.f32.mxu0 %v7168_v46  ;;  %4395 = vmatpush3.bf16.msra.mxu0 %v4392_v16  ;;  %v7173_v16 = vld [vmem:[#allocation46_spill] sm:$0xff] }
 0x104   : > { %3702 = vmatmul.mubr.msk.f32.gmra.mrb[92].mxu1 %vm1043_vm0, %v7153_v1  ;;  %4397 = vmatprep.subr.bf16.mxu0 %v4396_v10 }
 0x105   : > { %2181 = vmatprep.mubr.f32.mxu1 %v5807_v6  ;;  %v7174_v6 = vld [vmem:[#allocation48_spill] sm:$0xff] }
 0x106   : > { %4054 = vmatmul.mubr.f32.gmra.mrb[78].mxu0 %v7169_v7 }
 0x107   : > { %4056 = vmatprep.mubr.f32.mxu0 %v7170_v32  ;;  %4399 = vmatpush3.bf16.msra.mxu0 %v4396_v10  ;;  %v7175_v10 = vld [vmem:[#allocation51_spill] sm:$0xff] }
 0x108   : > { %2182 = vmatmul.mubr.f32.gmra.mrb[94].mxu1 %v5542_v28  ;;  %v7182_v28 = vld [vmem:[#allocation14_spill] sm:$0xff] }
 0x109   : > { %2542 = vmatprep.mubr.f32.mxu1 %v5312_v62  ;;  %v7176_v62 = vld [vmem:[#allocation52_spill] sm:$0xff] }
 0x10a   : > { %4057 = vmatmul.mubr.f32.gmra.mrb[80].mxu0 %v7171_v53 }
 0x10b   : > { %4059 = vmatprep.mubr.f32.mxu0 %v7172_v39 }
 0x10c   : > { %3751 = vmatmul.mubr.msk.f32.vlgmr.msra.gmra.mrb[96].mxu1 %vm1043_vm0, %v4763_v58  ;;  %v7177_v58 = vld [vmem:[#allocation53_spill] sm:$0xff] }
 0x10d   : > { %2547 = vmatprep.mubr.f32.mxu1 %v5360_v19  ;;  %v7178_v19 = vld [vmem:[#allocation56_spill] sm:$0xff] }
 0x10e   : > { %4060 = vmatmul.mubr.f32.gmra.mrb[82].mxu0 %v7173_v16 }
 0x10f   : > { %4062 = vmatprep.mubr.f32.mxu0 %v7174_v6 }
 0x110   : > { %2548 = vmatmul.mubr.f32.gmra.mrb[98].mxu1 %v7137_v18  ;;  %v7179_v18 = vld [vmem:[#allocation60_spill] sm:$0xff] }
 0x111   : > { %2552 = vmatprep.mubr.f32.mxu1 %v7140_v9  ;;  %v7180_v9 = vld [vmem:[#allocation61_spill] sm:$0xff] }
 0x112   : > { %4063 = vmatmul.mubr.f32.gmra.mrb[84].mxu0 %v7175_v10 }
 0x113   : > { %4065 = vmatprep.mubr.f32.mxu0 %v7176_v62 }
 0x114   : > { %3752 = vmatmul.mubr.msk.f32.gmra.mrb[100].mxu1 %vm1043_vm0, %v7103_v47  ;;  %v7181_v47 = vld [vmem:[#allocation63_spill] sm:$0xff] }
 0x115   : > { %2557 = vmatprep.mubr.f32.mxu1 %v7143_v3 }
 0x116   : > { %4066 = vmatmul.mubr.f32.gmra.mrb[86].mxu0 %v7177_v58 }
 0x117   : > { %4068 = vmatprep.mubr.f32.mxu0 %v7178_v19 }
 0x118   : > { %2558 = vmatmul.mubr.f32.gmra.mrb[102].mxu1 %v4836_v49  ;;  %v7183_v49 = vld [vmem:[#allocation66_spill] sm:$0xff] }
 0x119   : > { %2562 = vmatprep.mubr.f32.mxu1 %v5532_v61 }
 0x11a   : > { %4069 = vmatmul.mubr.f32.gmra.mrb[88].mxu0 %v7179_v18  ;;  %v3954_v3 = vpop.f32.mrb[0].mxu1 }
 0x11b   : > { %4071 = vmatprep.mubr.f32.mxu0 %v7180_v9  ;;  %v1803_v1 = vpop.f32.mrb[1].mxu1 }
 0x11c   : > { %3753 = vmatmul.mubr.msk.f32.gmra.mrb[104].mxu1 %vm1043_vm0, %v7114_v52 }
 0x11d   : > { %2567 = vmatprep.mubr.f32.mxu1 %v5617_v21  ;;  %v7185_v21 = vld [vmem:[#allocation23_spill] sm:$0xff] }
 0x11e   : > { %4072 = vmatmul.mubr.f32.gmra.mrb[90].mxu0 %v7181_v47  ;;  %v6186_v61 = vpop.f32.mrb[2].mxu1 }
 0x11f   : > { %4074 = vmatprep.mubr.f32.mxu0 %v7182_v28  ;;  %v1813_v41 = vpop.f32.mrb[3].mxu1 }
 0x120   : > { %2568 = vmatmul.mubr.f32.gmra.mrb[106].mxu1 %v7145_v23 }
 0x121   : > { %2572 = vmatprep.mubr.f32.mxu1 %v7146_v56 }
 0x122   : > { %4075 = vmatmul.mubr.f32.gmra.mrb[92].mxu0 %v7183_v49  ;;  %v6194_v52 = vpop.f32.mrb[4].mxu1 }
 0x123   : > { %4077 = vmatprep.mubr.f32.mxu0 %v7184_v54  ;;  %v6197_v23 = vpop.f32.mrb[5].mxu1 }
 0x124   : > { %3754 = vmatmul.mubr.msk.f32.gmra.mrb[108].mxu1 %vm1043_vm0, %v7121_v35 }
 0x125   : > { %2577 = vmatprep.mubr.f32.mxu1 %v5693_v12  ;;  %v7186_v12 = vld [vmem:[#allocation29_spill] sm:$0xff] }
 0x126   : > { %4078 = vmatmul.mubr.f32.gmra.mrb[94].mxu0 %v7185_v21  ;;  %v6202_v56 = vpop.f32.mrb[6].mxu1 }
 0x127   : > { %4112 = vmatprep.mubr.f32.mxu0 %v7158_v27  ;;  %v6205_v35 = vpop.f32.mrb[7].mxu1 }
 0x128   : > { %2578 = vmatmul.mubr.f32.gmra.mrb[110].mxu1 %v7112_v33 }
 0x129   : > { %2582 = vmatprep.mubr.f32.mxu1 %v5713_v36 }
 0x12a   : > { %4113 = vmatmul.mubr.f32.vlgmr.msra.gmra.mrb[96].mxu0 %v7159_v11  ;;  %v6212_v27 = vpop.f32.mrb[8].mxu1 }
 0x12b   : > { %4115 = vmatprep.mubr.f32.mxu0 %v7160_v63  ;;  %v6215_v33 = vpop.f32.mrb[9].mxu1 }
 0x12c   : > { %3755 = vmatmul.mubr.msk.f32.gmra.mrb[112].mxu1 %vm1043_vm0, %v7131_v20 }
 0x12d   : > { %2587 = vmatprep.mubr.f32.mxu1 %v7186_v12 }
 0x12e   : > { %4116 = vmatmul.mubr.f32.gmra.mrb[98].mxu0 %v7161_v34  ;;  %v6220_v36 = vpop.f32.mrb[10].mxu1 }
 0x12f   : > { %4118 = vmatprep.mubr.f32.mxu0 %v7162_v50  ;;  %v6223_v11 = vpop.f32.mrb[11].mxu1 }
 0x130   : > { %2588 = vmatmul.mubr.f32.gmra.mrb[114].mxu1 %v5034_v59 }
 0x131   : > { %2592 = vmatprep.mubr.f32.mxu1 %v5814_v57 }
 0x132   : > { %4119 = vmatmul.mubr.f32.gmra.mrb[100].mxu0 %v7163_v51  ;;  %v6230_v50 = vpop.f32.mrb[12].mxu1 }
 0x133   : > { %4121 = vmatprep.mubr.f32.mxu0 %v7164_v13  ;;  %v6233_v59 = vpop.f32.mrb[13].mxu1 }
 0x134   : > { %3756 = vmatmul.mubr.msk.f32.gmra.mrb[116].mxu1 %vm1043_vm0, %v7136_v15 }
 0x135   : > { %2597 = vmatprep.mubr.f32.mxu1 %v5841_v5 }
 0x136   : > { %4122 = vmatmul.mubr.f32.gmra.mrb[102].mxu0 %v7165_v31  ;;  %v6238_v34 = vpop.f32.mrb[14].mxu1 }
 0x137   : > { %4124 = vmatprep.mubr.f32.mxu0 %v7166_v40  ;;  %v6241_v51 = vpop.f32.mrb[15].mxu1 }
 0x138   : > { %2598 = vmatmul.mubr.f32.gmra.mrb[118].mxu1 %v5094_v30 }
 0x139   : > { %2602 = vmatprep.mubr.f32.mxu1 %v5867_v55 }
 0x13a   : > { %4125 = vmatmul.mubr.f32.gmra.mrb[104].mxu0 %v7167_v4  ;;  %v1578_v31 = vpop.f32.mrb[0].mxu0 }
 0x13b   : > { %4127 = vmatprep.mubr.f32.mxu0 %v7168_v46  ;;  %v6247_v20 = vadd.f32 %v1803_v1, %v1578_v31  ;;  %v1580_v30 = vpop.f32.mrb[1].mxu0  ;;  %v7192_v31 = vld [vmem:[#allocation26_spill] sm:$0xff] }
 0x13c   : > { %3757 = vmatmul.mubr.msk.f32.gmra.mrb[120].mxu1 %vm1043_vm0, %v7141_v26  ;;  %v6250_v57 = vpop.f32.mrb[16].mxu1 }
 0x13d   : > { %2607 = vmatprep.mubr.f32.mxu1 %v5884_v44  ;;  %v6253_v5 = vpop.f32.mrb[17].mxu1 }
 0x13e   : > { %4128 = vmatmul.mubr.f32.gmra.mrb[106].mxu0 %v7169_v7  ;;  %v1583_v15 = vpop.f32.mrb[2].mxu0 }
 0x13f   : > { %4130 = vmatprep.mubr.f32.mxu0 %v7170_v32  ;;  %v6257_v55 = vadd.f32 %v3954_v3, %v1583_v15  ;;  %v1585_v44 = vpop.f32.mrb[3].mxu0 }
 0x140   : > { %2608 = vmatmul.mubr.f32.gmra.mrb[122].mxu1 %v5134_v25  ;;  %v6260_v26 = vpop.f32.mrb[18].mxu1  ;;  %v7194_v44 = vld [vmem:[#allocation55_spill] sm:$0xff] }
 0x141   : > { %2612 = vmatprep.mubr.f32.mxu1 %v5905_v8  ;;  %v6263_v7 = vpop.f32.mrb[19].mxu1 }
 0x142   : > { %4131 = vmatmul.mubr.f32.gmra.mrb[108].mxu0 %v7171_v53  ;;  %v1588_v13 = vpop.f32.mrb[4].mxu0 }
 0x143   : > { %4133 = vmatprep.mubr.f32.mxu0 %v7172_v39  ;;  %v6269_v25 = vadd.f32 %v1813_v41, %v1588_v13  ;;  %v1590_v8 = vpop.f32.mrb[5].mxu0 }
 0x144   : > { %3758 = vmatmul.mubr.msk.f32.gmra.mrb[124].mxu1 %vm1043_vm0, %v7144_v45  ;;  %v6272_v40 = vpop.f32.mrb[20].mxu1  ;;  %v7195_v8 = vld [vmem:[#allocation72_spill] sm:$0xff] }
 0x145   : > { %2617 = vmatprep.mubr.f32.mxu1 %v5920_v14  ;;  %v6275_v1 = vpop.f32.mrb[21].mxu1 }
 0x146   : > { %4134 = vmatmul.mubr.f32.gmra.mrb[110].mxu0 %v7173_v16  ;;  %v1593_v63 = vpop.f32.mrb[6].mxu0 }
 0x147   : > { %4136 = vmatprep.mubr.f32.mxu0 %v7174_v6  ;;  %v6280_v45 = vadd.f32 %v6186_v61, %v1593_v63  ;;  %v1595_v41 = vpop.f32.mrb[7].mxu0 }
 0x148   : > { %2618 = vmatmul.mubr.f32.gmra.mrb[126].mxu1 %v7139_v43  ;;  %v6283_v14 = vpop.f32.mrb[22].mxu1 }
 0x149   : > { %2622 = vmatprep.mubr.f32.mxu1 %v5716_v2  ;;  %v6286_v4 = vpop.f32.mrb[23].mxu1 }
 0x14a   : > { %4137 = vmatmul.mubr.f32.gmra.mrb[112].mxu0 %v7175_v10  ;;  %v1598_v6 = vpop.f32.mrb[8].mxu0  ;;  %v7187_v10 = vld [vmem:[#allocation20_spill] sm:$0xff] }
 0x14b   : > { %4139 = vmatprep.mubr.f32.mxu0 %v7176_v62  ;;  %v6293_v2 = vadd.f32 %v6197_v23, %v1598_v6  ;;  %v1600_v43 = vpop.f32.mrb[9].mxu0 }
 0x14c   : > { %3759 = vmatmul.mubr.msk.f32.gmra.mrb[128].mxu1 %vm1043_vm0, %v7147_v0  ;;  %v6296_v46 = vpop.f32.mrb[24].mxu1  ;;  %v7196_v43 = vld [vmem:[#allocation57_spill] sm:$0xff] }
 0x14d   : > { %2627 = vmatprep.mubr.f32.mxu1 %v5725_v42  ;;  %v6299_v32 = vpop.f32.mrb[25].mxu1 }
 0x14e   : > { %4140 = vmatmul.mubr.f32.gmra.mrb[114].mxu0 %v7177_v58  ;;  %v1603_v53 = vpop.f32.mrb[10].mxu0 }
 0x14f   : > { %4142 = vmatprep.mubr.f32.mxu0 %v7178_v19  ;;  %v6304_v0 = vadd.f32 %v6194_v52, %v1603_v53  ;;  %v1605_v42 = vpop.f32.mrb[11].mxu0  ;;  %v7189_v52 = vld [vmem:[#allocation18_spill] sm:$0xff] }
 0x150   : > { %2628 = vmatmul.mubr.f32.gmra.mrb[130].mxu1 %v5242_v60  ;;  %v7197_v42 = vld [vmem:[#allocation73_spill] sm:$0xff] }
 0x151   : > { %2632 = vmatprep.mubr.f32.mxu1 %v5731_v24 }
 0x152   : > { %4143 = vmatmul.mubr.f32.gmra.mrb[116].mxu0 %v7179_v18  ;;  %v6307_v39 = vpop.f32.mrb[26].mxu1 }
 0x153   : > { %4145 = vmatprep.mubr.f32.mxu0 %v7180_v9  ;;  %v6310_v16 = vpop.f32.mrb[27].mxu1  ;;  %v1608_v60 = vpop.f32.mrb[12].mxu0 }
 0x154   : > { %3760 = vmatmul.mubr.msk.f32.gmra.mrb[132].mxu1 %vm1043_vm0, %v7148_v17  ;;  %v6317_v24 = vadd.f32 %v6205_v35, %v1608_v60  ;;  %v1610_v62 = vpop.f32.mrb[13].mxu0 }
 0x155   : > { %2637 = vmatprep.mubr.f32.mxu1 %v7187_v10 }
 0x156   : > { %4146 = vmatmul.mubr.f32.gmra.mrb[118].mxu0 %v7181_v47  ;;  %v6320_v58 = vpop.f32.mrb[28].mxu1 }
 0x157   : > { %4148 = vmatprep.mubr.f32.mxu0 %v7182_v28  ;;  %v6323_v19 = vpop.f32.mrb[29].mxu1  ;;  %v1613_v18 = vpop.f32.mrb[14].mxu0  ;;  %v7188_v28 = vld [vmem:[#allocation32_spill] sm:$0xff] }
 0x158   : > { %2638 = vmatmul.mubr.f32.gmra.mrb[134].mxu1 %v5334_v38  ;;  %v6328_v17 = vadd.f32 %v6202_v56, %v1613_v18  ;;  %v1615_v9 = vpop.f32.mrb[15].mxu0  ;;  %v7190_v56 = vld [vmem:[#allocation50_spill] sm:$0xff] }
 0x159   : > { %2642 = vmatprep.mubr.f32.mxu1 %v5746_v37  ;;  %v7198_v9 = vld [vmem:[#allocation74_spill] sm:$0xff] }
 0x15a   : > { %4149 = vmatmul.mubr.f32.gmra.mrb[120].mxu0 %v7183_v49  ;;  %v6331_v3 = vpop.f32.mrb[30].mxu1 }
 0x15b   : > { %4151 = vmatprep.mubr.f32.mxu0 %v7184_v54  ;;  %v6334_v47 = vpop.f32.mrb[31].mxu1  ;;  %v1618_v38 = vpop.f32.mrb[16].mxu0 }
 0x15c   : > { %3761 = vmatmul.mubr.msk.f32.gmra.mrb[136].mxu1 %vm1043_vm0, %v7149_v29  ;;  %v6341_v37 = vadd.f32 %v6215_v33, %v1618_v38  ;;  %v1620_v61 = vpop.f32.mrb[17].mxu0  ;;  %v7191_v29 = vld [vmem:[#allocation71_spill] sm:$0xff] }
 0x15d   : > { %2647 = vmatprep.mubr.f32.mxu1 %v7188_v28 }
 0x15e   : > { %4152 = vmatmul.mubr.f32.gmra.mrb[122].mxu0 %v7185_v21  ;;  %v7193_v21 = vld [vmem:[#allocation30_spill] sm:$0xff] }
 0x15f   : > { %v2028_v49 = vpop.f32.mrb[32].mxu1  ;;  %4154 = vmatprep.mubr.f32.mxu0 %v7189_v52  ;;  %v1623_v35 = vpop.f32.mrb[18].mxu0  ;;  %v7199_v52 = vld [vmem:[#allocation59_spill] sm:$0xff] }
 0x160   : > { %v6346_v54 = vadd.f32 %v2028_v49, %v6247_v20  ;;  %v2030_v23 = vpop.f32.mrb[33].mxu1  ;;  %2648 = vmatmul.mubr.f32.gmra.mrb[138].mxu1 %v7190_v56  ;;  %v6351_v12 = vadd.f32 %v6212_v27, %v1623_v35  ;;  %v1625_v33 = vpop.f32.mrb[19].mxu0 }
 0x161   : > { %2652 = vmatprep.mubr.f32.mxu1 %v7191_v29  ;;  %v7200_v23 = vld [vmem:[#allocation27_spill] sm:$0xff]  ;;  %v7201_v33 = vld [vmem:[#allocation64_spill] sm:$0xff] }
 0x162   : > { %4155 = vmatmul.mubr.f32.gmra.mrb[124].mxu0 %v7192_v31  ;;  %v7202_v31 = vld [vmem:[#allocation75_spill] sm:$0xff] }
 0x163   : > { %v2033_v30 = vpop.f32.mrb[34].mxu1  ;;  %4157 = vmatprep.mubr.f32.mxu0 %v7193_v21  ;;  %v1628_v13 = vpop.f32.mrb[20].mxu0 }
 0x164   : > { %v6356_v15 = vadd.f32 %v2033_v30, %v6257_v55  ;;  %v2035_v20 = vpop.f32.mrb[35].mxu1  ;;  %3762 = vmatmul.mubr.msk.f32.gmra.mrb[140].mxu1 %vm1043_vm0, %v7194_v44  ;;  %v6363_v27 = vadd.f32 %v6223_v11, %v1628_v13  ;;  %v1630_v63 = vpop.f32.mrb[21].mxu0  ;;  %v7203_v13 = vld [vmem:[#allocation65_spill] sm:$0xff] }
 0x165   : > { %2657 = vmatprep.mubr.f32.mxu1 %v7195_v8  ;;  %v7204_v8 = vld [vmem:[#allocation76_spill] sm:$0xff] }
 0x166   : > { %4158 = vmatmul.mubr.f32.gmra.mrb[126].mxu0 %v7193_v21 }
 0x167   : > { %v2038_v41 = vpop.f32.mrb[36].mxu1 }
 0x168   : > { %v6367_v6 = vadd.f32 %v2038_v41, %v6269_v25  ;;  %v2040_v55 = vpop.f32.mrb[37].mxu1  ;;  %2658 = vmatmul.mubr.f32.gmra.mrb[142].mxu1 %v7196_v43 }
 0x169   : > { %v1633_v53 = vpop.f32.mrb[22].mxu0  ;;  %2662 = vmatprep.mubr.f32.mxu1 %v7197_v42  ;;  %v7206_v42 = vld [vmem:[#allocation77_spill] sm:$0xff] }
 0x16a   : > { %v6372_v60 = vadd.f32 %v6220_v36, %v1633_v53  ;;  %v1635_v10 = vpop.f32.mrb[23].mxu0 }
 0x16b   : > { %v2043_v62 = vpop.f32.mrb[38].mxu1 }
 0x16c   : > { %v6375_v11 = vadd.f32 %v2043_v62, %v6280_v45  ;;  %v2045_v18 = vpop.f32.mrb[39].mxu1  ;;  %3763 = vmatmul.mubr.msk.f32.gmra.mrb[144].mxu1 %vm1043_vm0, %v7152_v22 }
 0x16d   : > { %v1638_v25 = vpop.f32.mrb[24].mxu0  ;;  %2667 = vmatprep.mubr.f32.mxu1 %v7198_v9  ;;  %v7207_v9 = vld [vmem:[#allocation68_spill] sm:$0xff] }
 0x16e   : > { %v6382_v38 = vadd.f32 %v6233_v59, %v1638_v25  ;;  %v1640_v28 = vpop.f32.mrb[25].mxu0 }
 0x16f   : > { %v2048_v61 = vpop.f32.mrb[40].mxu1  ;;  %v7208_v28 = vld [vmem:[#allocation70_spill] sm:$0xff] }
 0x170   : > { %v6385_v36 = vadd.f32 %v2048_v61, %v6293_v2  ;;  %v2050_v49 = vpop.f32.mrb[41].mxu1  ;;  %2668 = vmatmul.mubr.f32.gmra.mrb[146].mxu1 %v7199_v52 }
 0x171   : > { %v1643_v45 = vpop.f32.mrb[26].mxu0  ;;  %2672 = vmatprep.mubr.f32.mxu1 %v7200_v23 }
 0x172   : > { %v1869_v56 = vadd.f32 %v6230_v50, %v1643_v45  ;;  %v1645_v22 = vpop.f32.mrb[27].mxu0 }
 0x173   : > { %v2053_v35 = vpop.f32.mrb[42].mxu1 }
 0x174   : > { %v6391_v29 = vadd.f32 %v2053_v35, %v6304_v0  ;;  %v2055_v59 = vpop.f32.mrb[43].mxu1  ;;  %3764 = vmatmul.mubr.msk.f32.gmra.mrb[148].mxu1 %vm1043_vm0, %v7201_v33 }
 0x175   : > { %v1648_v2 = vpop.f32.mrb[28].mxu0  ;;  %2677 = vmatprep.mubr.f32.mxu1 %v7202_v31 }
 0x176   : > { %v1874_v30 = vadd.f32 %v6241_v51, %v1648_v2  ;;  %v1650_v21 = vpop.f32.mrb[29].mxu0  ;;  %v7205_v51 = vld [vmem:[#allocation22_spill] sm:$0xff] }
 0x177   : > { %v2058_v20 = vpop.f32.mrb[44].mxu1 }
 0x178   : > { %v6399_v44 = vadd.f32 %v2058_v20, %v6317_v24  ;;  %v2060_v50 = vpop.f32.mrb[45].mxu1  ;;  %2678 = vmatmul.mubr.f32.gmra.mrb[150].mxu1 %v7203_v13 }
 0x179   : > { %v1653_v0 = vpop.f32.mrb[30].mxu0  ;;  %2682 = vmatprep.mubr.f32.mxu1 %v7204_v8 }
 0x17a   : > { %v1879_v63 = vadd.f32 %v6238_v34, %v1653_v0  ;;  %v1655_v41 = vpop.f32.mrb[31].mxu0 }
 0x17b   : > { %v2063_v55 = vpop.f32.mrb[46].mxu1 }
 0x17c   : > { %v6405_v43 = vadd.f32 %v2063_v55, %v6328_v17  ;;  %v2065_v53 = vpop.f32.mrb[47].mxu1  ;;  %3765 = vmatmul.mubr.msk.f32.gmra.mrb[152].mxu1 %vm1043_vm0, %v7205_v51 }
 0x17d   : > { %v1658_v24 = vpop.f32.mrb[32].mxu0  ;;  %2687 = vmatprep.mubr.f32.mxu1 %v7206_v42 }
 0x17e   : > { %v1884_v10 = vadd.f32 %v6253_v5, %v1658_v24  ;;  %v1660_v62 = vpop.f32.mrb[33].mxu0  ;;  %v7209_v5 = vmov 0.0  }
 0x17f   : > { %v2068_v18 = vpop.f32.mrb[48].mxu1 }
 0x180   : > { %v6413_v25 = vadd.f32 %v2068_v18, %v6341_v37  ;;  %v2070_v34 = vpop.f32.mrb[49].mxu1  ;;  %2688 = vmatmul.mubr.f32.gmra.mrb[154].mxu1 %v7207_v9 }
 0x181   : > { %v1663_v17 = vpop.f32.mrb[34].mxu0  ;;  %2692 = vmatprep.mubr.f32.mxu1 %v7208_v28 }
 0x182   : > { %v1889_v61 = vadd.f32 %v6250_v57, %v1663_v17  ;;  %v1665_v48 = vpop.f32.mrb[35].mxu0 }
 0x183   : > { %v2073_v49 = vpop.f32.mrb[50].mxu1 }
 0x184   : > { %v6419_v52 = vadd.f32 %v2073_v49, %v6351_v12  ;;  %v2075_v45 = vpop.f32.mrb[51].mxu1  ;;  %2693 = vmatmul.mubr.f32.gmra.mrb[156].mxu1 %v7209_v5 }
 0x185   : > { %v1668_v23 = vpop.f32.mrb[36].mxu0  ;;  %2697 = vmatprep.mubr.f32.mxu1 %v7208_v28 }
 0x186   : > { %v1894_v37 = vadd.f32 %v6263_v7, %v1668_v23  ;;  %v1670_v22 = vpop.f32.mrb[37].mxu0 }
 0x187   : > { %v2078_v35 = vpop.f32.mrb[52].mxu1 }
 0x188   : > { %v6425_v59 = vadd.f32 %v2078_v35, %v6363_v27  ;;  %v2080_v33 = vpop.f32.mrb[53].mxu1  ;;  %2698 = vmatmul.mubr.f32.gmra.mrb[158].mxu1 %v7209_v5 }
 0x189   : > { %v1673_v57 = vpop.f32.mrb[38].mxu0 }
 0x18a   : > { %v1899_v12 = vadd.f32 %v6260_v26, %v1673_v57  ;;  %v1675_v2 = vpop.f32.mrb[39].mxu0 }
 0x18b   : > { %v2083_v31 = vpop.f32.mrb[54].mxu1 }
 0x18c   : > { %v6430_v21 = vadd.f32 %v2083_v31, %v6372_v60  ;;  %v2085_v20 = vpop.f32.mrb[55].mxu1 }
 0x18d   : > { %v1678_v50 = vpop.f32.mrb[40].mxu0 }
 0x18e   : > { %v1904_v7 = vadd.f32 %v6275_v1, %v1678_v50  ;;  %v1680_v13 = vpop.f32.mrb[41].mxu0 }
 0x18f   : > { %v2088_v0 = vpop.f32.mrb[56].mxu1 }
 0x190   : > { %v6434_v27 = vadd.f32 %v2088_v0, %v6382_v38  ;;  %v2090_v8 = vpop.f32.mrb[57].mxu1 }
 0x191   : > { %v1683_v41 = vpop.f32.mrb[42].mxu0 }
 0x192   : > { %v1909_v55 = vadd.f32 %v6272_v40, %v1683_v41  ;;  %v1685_v53 = vpop.f32.mrb[43].mxu0 }
 0x193   : > { %v2093_v26 = vpop.f32.mrb[58].mxu1 }
 0x194   : > { %v6437_v51 = vadd.f32 %v2093_v26, %v1869_v56  ;;  %v2095_v24 = vpop.f32.mrb[59].mxu1 }
 0x195   : > { %v1688_v60 = vpop.f32.mrb[44].mxu0 }
 0x196   : > { %v1914_v42 = vadd.f32 %v6286_v4, %v1688_v60  ;;  %v1690_v62 = vpop.f32.mrb[45].mxu0 }
 0x197   : > { %v2098_v18 = vpop.f32.mrb[60].mxu1 }
 0x198   : > { %v6440_v1 = vadd.f32 %v2098_v18, %v1874_v30  ;;  %v2100_v34 = vpop.f32.mrb[61].mxu1 }
 0x199   : > { %v1693_v9 = vpop.f32.mrb[46].mxu0 }
 0x19a   : > { %v1919_v38 = vadd.f32 %v6283_v14, %v1693_v9  ;;  %v1695_v17 = vpop.f32.mrb[47].mxu0 }
 0x19b   : > { %v2103_v28 = vpop.f32.mrb[62].mxu1 }
 0x19c   : > { %v6443_v48 = vadd.f32 %v2103_v28, %v1879_v63  ;;  %v2105_v40 = vpop.f32.mrb[63].mxu1 }
 0x19d   : > { %v1698_v49 = vpop.f32.mrb[48].mxu0 }
 0x19e   : > { %v1924_v56 = vadd.f32 %v6299_v32, %v1698_v49  ;;  %v1700_v45 = vpop.f32.mrb[49].mxu0 }
 0x19f   : > { %v2108_v5 = vpop.f32.mrb[64].mxu1 }
 0x1a0   : > { %v6446_v23 = vadd.f32 %v2108_v5, %v1884_v10  ;;  %v2110_v4 = vpop.f32.mrb[65].mxu1 }
 0x1a1   : > { %v1703_v22 = vpop.f32.mrb[50].mxu0 }
 0x1a2   : > { %v1929_v30 = vadd.f32 %v6296_v46, %v1703_v22  ;;  %v1705_v35 = vpop.f32.mrb[51].mxu0 }
 0x1a3   : > { %v2113_v33 = vpop.f32.mrb[66].mxu1 }
 0x1a4   : > { %v6449_v57 = vadd.f32 %v2113_v33, %v1889_v61  ;;  %v2115_v14 = vpop.f32.mrb[67].mxu1 }
 0x1a5   : > { %v1708_v2 = vpop.f32.mrb[52].mxu0 }
 0x1a6   : > { %v1934_v63 = vadd.f32 %v6310_v16, %v1708_v2  ;;  %v1710_v31 = vpop.f32.mrb[53].mxu0 }
 0x1a7   : > { %v2118_v20 = vpop.f32.mrb[68].mxu1 }
 0x1a8   : > { %v6452_v50 = vadd.f32 %v2118_v20, %v1894_v37  ;;  %v2120_v32 = vpop.f32.mrb[69].mxu1 }
 0x1a9   : > { %v1713_v13 = vpop.f32.mrb[54].mxu0 }
 0x1aa   : > { %v1939_v10 = vadd.f32 %v6307_v39, %v1713_v13  ;;  %v1715_v0 = vpop.f32.mrb[55].mxu0 }
 0x1ab   : > { %v2123_v8 = vpop.f32.mrb[70].mxu1 }
 0x1ac   : > { %v6455_v41 = vadd.f32 %v2123_v8, %v1899_v12  ;;  %v2125_v46 = vpop.f32.mrb[71].mxu1 }
 0x1ad   : > { %v1718_v53 = vpop.f32.mrb[56].mxu0 }
 0x1ae   : > { %v1944_v61 = vadd.f32 %v6323_v19, %v1718_v53  ;;  %v1720_v26 = vpop.f32.mrb[57].mxu0 }
 0x1af   : > { %v2128_v24 = vpop.f32.mrb[72].mxu1 }
 0x1b0   : > { %v6458_v60 = vadd.f32 %v2128_v24, %v1904_v7  ;;  %v2130_v16 = vpop.f32.mrb[73].mxu1 }
 0x1b1   : > { %v1723_v62 = vpop.f32.mrb[58].mxu0 }
 0x1b2   : > { %v1949_v37 = vadd.f32 %v6320_v58, %v1723_v62  ;;  %v1725_v18 = vpop.f32.mrb[59].mxu0 }
 0x1b3   : > { %v2133_v34 = vpop.f32.mrb[74].mxu1 }
 0x1b4   : > { %v6461_v9 = vadd.f32 %v2133_v34, %v1909_v55  ;;  %v2135_v39 = vpop.f32.mrb[75].mxu1 }
 0x1b5   : > { %v1728_v17 = vpop.f32.mrb[60].mxu0 }
 0x1b6   : > { %v1954_v12 = vadd.f32 %v6334_v47, %v1728_v17  ;;  %v1730_v28 = vpop.f32.mrb[61].mxu0 }
 0x1b7   : > { %v2138_v40 = vpop.f32.mrb[76].mxu1 }
 0x1b8   : > { %v6464_v49 = vadd.f32 %v2138_v40, %v1914_v42  ;;  %v2140_v19 = vpop.f32.mrb[77].mxu1 }
 0x1b9   : > { %v1733_v45 = vpop.f32.mrb[62].mxu0 }
 0x1ba   : > { %v1959_v7 = vadd.f32 %v6331_v3, %v1733_v45  ;;  %v1735_v5 = vpop.f32.mrb[63].mxu0 }
 0x1bb   : > { %v2143_v4 = vpop.f32.mrb[78].mxu1 }
 0x1bc   : > { %v6467_v22 = vadd.f32 %v2143_v4, %v1919_v38  ;;  %v2145_v58 = vpop.f32.mrb[79].mxu1 }
 0x1bd   : > { %v4034_v35 = vpop.f32.mrb[64].mxu0 }
 0x1be   : > { %v6470_v55 = vadd.f32 %v4034_v35, %v6356_v15  ;;  %v2253_v33 = vpop.f32.mrb[65].mxu0 }
 0x1bf   : > { %v2148_v14 = vpop.f32.mrb[80].mxu1  ;;  %v6473_v47 = vadd.f32 %v2253_v33, %v6346_v54 }
 0x1c0   : > { %v6475_v42 = vadd.f32 %v2148_v14, %v1924_v56  ;;  %v2150_v2 = vpop.f32.mrb[81].mxu1 }
 0x1c1   : > { %v4037_v31 = vpop.f32.mrb[66].mxu0 }
 0x1c2   : > { %v6478_v3 = vadd.f32 %v4037_v31, %v6375_v11  ;;  %v2263_v20 = vpop.f32.mrb[67].mxu0 }
 0x1c3   : > { %v2153_v38 = vpop.f32.mrb[82].mxu1  ;;  %v6481_v32 = vadd.f32 %v2263_v20, %v6367_v6 }
 0x1c4   : > { %v6483_v13 = vadd.f32 %v2153_v38, %v1929_v30  ;;  %v2155_v15 = vpop.f32.mrb[83].mxu1 }
 0x1c5   : > { %v4040_v0 = vpop.f32.mrb[68].mxu0 }
 0x1c6   : > { %v6486_v8 = vadd.f32 %v4040_v0, %v6391_v29  ;;  %v2273_v54 = vpop.f32.mrb[69].mxu0 }
 0x1c7   : > { %v2158_v56 = vpop.f32.mrb[84].mxu1  ;;  %v6489_v46 = vadd.f32 %v2273_v54, %v6385_v36 }
 0x1c8   : > { %v6491_v53 = vadd.f32 %v2158_v56, %v1934_v63  ;;  %v2160_v11 = vpop.f32.mrb[85].mxu1 }
 0x1c9   : > { %v4043_v26 = vpop.f32.mrb[70].mxu0 }
 0x1ca   : > { %v6494_v24 = vadd.f32 %v4043_v26, %v6405_v43  ;;  %v2283_v6 = vpop.f32.mrb[71].mxu0 }
 0x1cb   : > { %v2163_v30 = vpop.f32.mrb[86].mxu1  ;;  %v6497_v16 = vadd.f32 %v2283_v6, %v6399_v44 }
 0x1cc   : > { %v2164_v62 = vadd.f32 %v2163_v30, %v1939_v10  ;;  %v2165_v29 = vpop.f32.mrb[87].mxu1 }
 0x1cd   : > { %v4046_v18 = vpop.f32.mrb[72].mxu0 }
 0x1ce   : > { %v6500_v34 = vadd.f32 %v4046_v18, %v6419_v52  ;;  %v2293_v36 = vpop.f32.mrb[73].mxu0 }
 0x1cf   : > { %v2168_v39 = vpop.f32.mrb[88].mxu1  ;;  %v6503_v63 = vadd.f32 %v2293_v36, %v6413_v25 }
 0x1d0   : > { %v2169_v17 = vadd.f32 %v2168_v39, %v1944_v61  ;;  %v2170_v28 = vpop.f32.mrb[89].mxu1 }
 0x1d1   : > { %v4049_v43 = vpop.f32.mrb[74].mxu0 }
 0x1d2   : > { %v6506_v40 = vadd.f32 %v4049_v43, %v6430_v21  ;;  %v2303_v19 = vpop.f32.mrb[75].mxu0 }
 0x1d3   : > { %v2173_v44 = vpop.f32.mrb[90].mxu1  ;;  %v6509_v10 = vadd.f32 %v2303_v19, %v6425_v59 }
 0x1d4   : > { %v2174_v45 = vadd.f32 %v2173_v44, %v1949_v37  ;;  %v2175_v5 = vpop.f32.mrb[91].mxu1 }
 0x1d5   : > { %v4052_v52 = vpop.f32.mrb[76].mxu0 }
 0x1d6   : > { %v6512_v4 = vadd.f32 %v4052_v52, %v6437_v51  ;;  %v2313_v58 = vpop.f32.mrb[77].mxu0 }
 0x1d7   : > { %v2178_v25 = vpop.f32.mrb[92].mxu1  ;;  %v6515_v61 = vadd.f32 %v2313_v58, %v6434_v27 }
 0x1d8   : > { %v2179_v35 = vadd.f32 %v2178_v25, %v1954_v12  ;;  %v2180_v33 = vpop.f32.mrb[93].mxu1 }
 0x1d9   : > { %v4055_v21 = vpop.f32.mrb[78].mxu0 }
 0x1da   : > { %v6518_v14 = vadd.f32 %v4055_v21, %v6443_v48  ;;  %v2323_v2 = vpop.f32.mrb[79].mxu0 }
 0x1db   : > { %v2183_v59 = vpop.f32.mrb[94].mxu1  ;;  %v6521_v37 = vadd.f32 %v2323_v2, %v6440_v1 }
 0x1dc   : > { %v2184_v31 = vadd.f32 %v2183_v59, %v1959_v7  ;;  %v2185_v20 = vpop.f32.mrb[95].mxu1 }
 0x1dd   : > { %v4058_v51 = vpop.f32.mrb[80].mxu0 }
 0x1de   : > { %v6524_v38 = vadd.f32 %v4058_v51, %v6449_v57  ;;  %v2333_v15 = vpop.f32.mrb[81].mxu0 }
 0x1df   : > { %v6527_v27 = vadd.f32 %v2333_v15, %v6446_v23  ;;  %v2544_v12 = vpop.f32.mrb[96].mxu1 }
 0x1e0   : > { %v2546_v0 = vpop.f32.mrb[97].mxu1 }
 0x1e1   : > { %v4061_v54 = vpop.f32.mrb[82].mxu0 }
 0x1e2   : > { %v6530_v48 = vadd.f32 %v4061_v54, %v6455_v41  ;;  %v2343_v56 = vpop.f32.mrb[83].mxu0 }
 0x1e3   : > { %v6533_v1 = vadd.f32 %v2343_v56, %v6452_v50  ;;  %v2549_v7 = vpop.f32.mrb[98].mxu1 }
 0x1e4   : > { %v2551_v11 = vpop.f32.mrb[99].mxu1 }
 0x1e5   : > { %v4064_v26 = vpop.f32.mrb[84].mxu0 }
 0x1e6   : > { %v6536_v57 = vadd.f32 %v4064_v26, %v6461_v9  ;;  %v2353_v6 = vpop.f32.mrb[85].mxu0 }
 0x1e7   : > { %v6539_v23 = vadd.f32 %v2353_v6, %v6458_v60  ;;  %v2554_v30 = vpop.f32.mrb[100].mxu1 }
 0x1e8   : > { %v2556_v29 = vpop.f32.mrb[101].mxu1 }
 0x1e9   : > { %v4067_v18 = vpop.f32.mrb[86].mxu0 }
 0x1ea   : > { %v6542_v41 = vadd.f32 %v4067_v18, %v6467_v22  ;;  %v2363_v36 = vpop.f32.mrb[87].mxu0 }
 0x1eb   : > { %v6545_v50 = vadd.f32 %v2363_v36, %v6464_v49  ;;  %v2559_v39 = vpop.f32.mrb[102].mxu1 }
 0x1ec   : > { %v2561_v28 = vpop.f32.mrb[103].mxu1 }
 0x1ed   : > { %v4070_v43 = vpop.f32.mrb[88].mxu0 }
 0x1ee   : > { %v6548_v9 = vadd.f32 %v4070_v43, %v6483_v13  ;;  %v2373_v19 = vpop.f32.mrb[89].mxu0 }
 0x1ef   : > { %v6551_v60 = vadd.f32 %v2373_v19, %v6475_v42  ;;  %v2564_v44 = vpop.f32.mrb[104].mxu1 }
 0x1f0   : > { %v2566_v5 = vpop.f32.mrb[105].mxu1 }
 0x1f1   : > { %v4073_v52 = vpop.f32.mrb[90].mxu0 }
 0x1f2   : > { %v6553_v58 = vadd.f32 %v4073_v52, %v2164_v62  ;;  %v2383_v22 = vpop.f32.mrb[91].mxu0 }
 0x1f3   : > { %v6556_v25 = vadd.f32 %v2383_v22, %v6491_v53  ;;  %v2569_v49 = vpop.f32.mrb[106].mxu1 }
 0x1f4   : > { %v2571_v33 = vpop.f32.mrb[107].mxu1 }
 0x1f5   : > { %v4076_v21 = vpop.f32.mrb[92].mxu0 }
 0x1f6   : > { %v6558_v2 = vadd.f32 %v4076_v21, %v2174_v45  ;;  %v2393_v13 = vpop.f32.mrb[93].mxu0  ;;  %v6569_v45 = vld [vmem:[%s6882_s4] ss:$0 sm:$0xff] }
 0x1f7   : > { %v6560_v59 = vadd.f32 %v2393_v13, %v2169_v17  ;;  %v2574_v20 = vpop.f32.mrb[108].mxu1 }
 0x1f8   : > { %v2576_v42 = vpop.f32.mrb[109].mxu1 }
 0x1f9   : > { %v4079_v51 = vpop.f32.mrb[94].mxu0 }
 0x1fa   : > { %v6562_v15 = vadd.f32 %v4079_v51, %v2184_v31  ;;  %v2403_v0 = vpop.f32.mrb[95].mxu0 }
 0x1fb   : > { %v6564_v62 = vadd.f32 %v2403_v0, %v2179_v35  ;;  %v2579_v54 = vpop.f32.mrb[110].mxu1 }
 0x1fc   : > { %v2581_v56 = vpop.f32.mrb[111].mxu1 }
 0x1fd   : > { %v4114_v53 = vpop.f32.mrb[96].mxu0 }
 0x1fe   : > { %v2775_v11 = vadd.f32 %v4114_v53, %v2549_v7  ;;  %v2769_v26 = vpop.f32.mrb[97].mxu0 }
 0x1ff   : > { %v2584_v17 = vpop.f32.mrb[112].mxu1  ;;  %v2770_v6 = vadd.f32 %v2769_v26, %v2544_v12 }
 0x200   : > { %v2929_v31 = vadd.f32 %v2775_v11, %v6470_v55  ;;  %v2586_v29 = vpop.f32.mrb[113].mxu1 }
 0x201   : > { %v2928_v35 = vadd.f32 %v2770_v6, %v6473_v47  ;;  %v4117_v18 = vpop.f32.mrb[98].mxu0 }
 0x202   : > { %v6574_v36 = vadd.f32 %v6569_v45, %v2929_v31  ;;  %v2785_v28 = vadd.f32 %v4117_v18, %v2559_v39  ;;  %v2779_v7 = vpop.f32.mrb[99].mxu0 }
 0x203   : > { %v6577_v43 = vadd.f32 %v6569_v45, %v2928_v35  ;;  %v2589_v19 = vpop.f32.mrb[114].mxu1  ;;  %v2780_v5 = vadd.f32 %v2779_v7, %v2554_v30 }
 0x204   : > { %3000 = vst [vmem:[%s4524_s9 + $0x8] sm:$0xff] %v6574_v36  ;;  %v2931_v55 = vadd.f32 %v2785_v28, %v6478_v3  ;;  %v2591_v12 = vpop.f32.mrb[115].mxu1 }
 0x205   : > { %2999 = vst [vmem:[%s4524_s9] sm:$0xff] %v6577_v43  ;;  %v2930_v47 = vadd.f32 %v2780_v5, %v6481_v32  ;;  %v4120_v52 = vpop.f32.mrb[100].mxu0  ;;  %v3031_v21 = vadd.f32 %v6574_v36, %v6577_v43 }
 0x206   : > { %v6586_v39 = vadd.f32 %v6569_v45, %v2931_v55  ;;  %v2795_v22 = vadd.f32 %v4120_v52, %v2569_v49  ;;  %v2789_v33 = vpop.f32.mrb[101].mxu0 }
 0x207   : > { %v6591_v30 = vadd.f32 %v6569_v45, %v2930_v47  ;;  %v2594_v13 = vpop.f32.mrb[116].mxu1  ;;  %v2790_v3 = vadd.f32 %v2789_v33, %v2564_v44 }
 0x208   : > { %3002 = vst [vmem:[%s4524_s9 + $0x18] sm:$0xff] %v6586_v39  ;;  %v2933_v42 = vadd.f32 %v2795_v22, %v6486_v8  ;;  %v2596_v32 = vpop.f32.mrb[117].mxu1 }
 0x209   : > { %3001 = vst [vmem:[%s4524_s9 + $0x10] sm:$0xff] %v6591_v30  ;;  %v3032_v49 = vadd.f32 %v3031_v21, %v6591_v30  ;;  %v2932_v51 = vadd.f32 %v2790_v3, %v6489_v46  ;;  %v4123_v0 = vpop.f32.mrb[102].mxu0 }
 0x20a   : > { %v6601_v56 = vadd.f32 %v6569_v45, %v2933_v42  ;;  %v2805_v53 = vadd.f32 %v4123_v0, %v2579_v54  ;;  %v2799_v11 = vpop.f32.mrb[103].mxu0 }
 0x20b   : > { %v6604_v44 = vadd.f32 %v6569_v45, %v2932_v51  ;;  %v3033_v26 = vadd.f32 %v3032_v49, %v6586_v39  ;;  %v2599_v8 = vpop.f32.mrb[118].mxu1  ;;  %v2800_v6 = vadd.f32 %v2799_v11, %v2574_v20 }
 0x20c   : > { %3004 = vst [vmem:[%s4524_s9 + $0x28] sm:$0xff] %v6601_v56  ;;  %v2935_v31 = vadd.f32 %v2805_v53, %v6494_v24  ;;  %v2601_v46 = vpop.f32.mrb[119].mxu1 }
 0x20d   : > { %3003 = vst [vmem:[%s4524_s9 + $0x20] sm:$0xff] %v6604_v44  ;;  %v3034_v29 = vadd.f32 %v3033_v26, %v6604_v44  ;;  %v2934_v54 = vadd.f32 %v2800_v6, %v6497_v16  ;;  %v4126_v35 = vpop.f32.mrb[104].mxu0 }
 0x20e   : > { %v6615_v18 = vadd.f32 %v6569_v45, %v2935_v31  ;;  %v2815_v28 = vadd.f32 %v4126_v35, %v2589_v19  ;;  %v2809_v7 = vpop.f32.mrb[105].mxu0 }
 0x20f   : > { %v6618_v20 = vadd.f32 %v6569_v45, %v2934_v54  ;;  %v3035_v5 = vadd.f32 %v3034_v29, %v6601_v56  ;;  %v2604_v24 = vpop.f32.mrb[120].mxu1  ;;  %v2810_v55 = vadd.f32 %v2809_v7, %v2584_v17 }
 0x210   : > { %3006 = vst [vmem:[%s4524_s9 + $0x38] sm:$0xff] %v6615_v18  ;;  %v2937_v12 = vadd.f32 %v2815_v28, %v6500_v34  ;;  %v2606_v16 = vpop.f32.mrb[121].mxu1 }
 0x211   : > { %3005 = vst [vmem:[%s4524_s9 + $0x30] sm:$0xff] %v6618_v20  ;;  %v3036_v47 = vadd.f32 %v3035_v5, %v6618_v20  ;;  %v2936_v19 = vadd.f32 %v2810_v55, %v6503_v63  ;;  %v4129_v52 = vpop.f32.mrb[106].mxu0 }
 0x212   : > { %v6629_v22 = vadd.f32 %v6569_v45, %v2937_v12  ;;  %v2825_v33 = vadd.f32 %v4129_v52, %v2599_v8  ;;  %v2819_v21 = vpop.f32.mrb[107].mxu0 }
 0x213   : > { %v6632_v17 = vadd.f32 %v6569_v45, %v2936_v19  ;;  %v3037_v3 = vadd.f32 %v3036_v47, %v6615_v18  ;;  %v2609_v34 = vpop.f32.mrb[122].mxu1  ;;  %v2820_v42 = vadd.f32 %v2819_v21, %v2594_v13 }
 0x214   : > { %3008 = vst [vmem:[%s4524_s9 + $0x48] sm:$0xff] %v6629_v22  ;;  %v2939_v32 = vadd.f32 %v2825_v33, %v6506_v40  ;;  %v2611_v63 = vpop.f32.mrb[123].mxu1 }
 0x215   : > { %3007 = vst [vmem:[%s4524_s9 + $0x40] sm:$0xff] %v6632_v17  ;;  %v3038_v49 = vadd.f32 %v3037_v3, %v6632_v17  ;;  %v2938_v51 = vadd.f32 %v2820_v42, %v6509_v10  ;;  %v4132_v0 = vpop.f32.mrb[108].mxu0 }
 0x216   : > { %v6643_v53 = vadd.f32 %v6569_v45, %v2939_v32  ;;  %v2835_v11 = vadd.f32 %v4132_v0, %v2609_v34  ;;  %v2829_v26 = vpop.f32.mrb[109].mxu0 }
 0x217   : > { %v6646_v13 = vadd.f32 %v6569_v45, %v2938_v51  ;;  %v3039_v40 = vadd.f32 %v3038_v49, %v6629_v22  ;;  %v2614_v8 = vpop.f32.mrb[124].mxu1  ;;  %v2830_v6 = vadd.f32 %v2829_v26, %v2604_v24 }
 0x218   : > { %3010 = vst [vmem:[%s4524_s9 + $0x58] sm:$0xff] %v6643_v53  ;;  %v2941_v31 = vadd.f32 %v2835_v11, %v6512_v4  ;;  %v2616_v10 = vpop.f32.mrb[125].mxu1 }
 0x219   : > { %3009 = vst [vmem:[%s4524_s9 + $0x50] sm:$0xff] %v6646_v13  ;;  %v2940_v46 = vadd.f32 %v2830_v6, %v6515_v61  ;;  %v4135_v29 = vpop.f32.mrb[110].mxu0  ;;  %v3040_v54 = vadd.f32 %v3039_v40, %v6646_v13 }
 0x21a   : > { %v6657_v35 = vadd.f32 %v6569_v45, %v2941_v31  ;;  %v2839_v28 = vpop.f32.mrb[111].mxu0 }
 0x21b   : > { %v6660_v7 = vadd.f32 %v6569_v45, %v2940_v46  ;;  %v2619_v5 = vpop.f32.mrb[126].mxu1  ;;  %v2840_v24 = vadd.f32 %v2839_v28, %v2614_v8  ;;  %v3041_v16 = vadd.f32 %v3040_v54, %v6643_v53 }
 0x21c   : > { %3012 = vst [vmem:[%s4524_s9 + $0x68] sm:$0xff] %v6657_v35  ;;  %v2845_v4 = vadd.f32 %v4135_v29, %v2619_v5  ;;  %v2621_v55 = vpop.f32.mrb[127].mxu1 }
 0x21d   : > { %3011 = vst [vmem:[%s4524_s9 + $0x60] sm:$0xff] %v6660_v7  ;;  %v2942_v61 = vadd.f32 %v2840_v24, %v6521_v37  ;;  %v4138_v12 = vpop.f32.mrb[112].mxu0  ;;  %v3042_v37 = vadd.f32 %v3041_v16, %v6660_v7 }
 0x21e   : > { %v2943_v47 = vadd.f32 %v2845_v4, %v6518_v14  ;;  %v2849_v19 = vpop.f32.mrb[113].mxu0 }
 0x21f   : > { %v6670_v52 = vadd.f32 %v6569_v45, %v2942_v61  ;;  %v2624_v33 = vpop.f32.mrb[128].mxu1  ;;  %v3043_v26 = vadd.f32 %v3042_v37, %v6657_v35 }
 0x220   : > { %v6673_v21 = vadd.f32 %v6569_v45, %v2943_v47  ;;  %v2850_v3 = vadd.f32 %v2849_v19, %v2624_v33  ;;  %v2626_v34 = vpop.f32.mrb[129].mxu1 }
 0x221   : > { %3013 = vst [vmem:[%s4524_s9 + $0x70] sm:$0xff] %v6670_v52  ;;  %v4141_v42 = vpop.f32.mrb[114].mxu0  ;;  %v3044_v29 = vadd.f32 %v3043_v26, %v6670_v52 }
 0x222   : > { %3014 = vst [vmem:[%s4524_s9 + $0x78] sm:$0xff] %v6673_v21  ;;  %v2944_v14 = vadd.f32 %v2850_v3, %v6527_v27  ;;  %v2859_v32 = vpop.f32.mrb[115].mxu0 }
 0x223   : > { %v2629_v63 = vpop.f32.mrb[130].mxu1  ;;  %v3045_v61 = vadd.f32 %v3044_v29, %v6673_v21 }
 0x224   : > { %v6682_v49 = vadd.f32 %v6569_v45, %v2944_v14  ;;  %v2855_v51 = vadd.f32 %v4138_v12, %v2629_v63  ;;  %v2631_v0 = vpop.f32.mrb[131].mxu1 }
 0x225   : > { %v4144_v11 = vpop.f32.mrb[116].mxu0 }
 0x226   : > { %3015 = vst [vmem:[%s4524_s9 + $0x80] sm:$0xff] %v6682_v49  ;;  %v2945_v40 = vadd.f32 %v2855_v51, %v6524_v38  ;;  %v2869_v8 = vpop.f32.mrb[117].mxu0  ;;  %v3046_v34 = vadd.f32 %v3045_v61, %v6682_v49 }
 0x227   : > { %v2634_v6 = vpop.f32.mrb[132].mxu1 }
 0x228   : > { %v6689_v27 = vadd.f32 %v6569_v45, %v2945_v40  ;;  %v2860_v31 = vadd.f32 %v2859_v32, %v2634_v6  ;;  %v2636_v10 = vpop.f32.mrb[133].mxu1 }
 0x229   : > { %v4147_v46 = vpop.f32.mrb[118].mxu0 }
 0x22a   : > { %3016 = vst [vmem:[%s4524_s9 + $0x88] sm:$0xff] %v6689_v27  ;;  %v2946_v54 = vadd.f32 %v2860_v31, %v6533_v1  ;;  %v2879_v28 = vpop.f32.mrb[119].mxu0  ;;  %v3047_v32 = vadd.f32 %v3046_v34, %v6689_v27 }
 0x22b   : > { %v2639_v5 = vpop.f32.mrb[134].mxu1 }
 0x22c   : > { %v6696_v38 = vadd.f32 %v6569_v45, %v2946_v54  ;;  %v2865_v24 = vadd.f32 %v4141_v42, %v2639_v5  ;;  %v2641_v4 = vpop.f32.mrb[135].mxu1 }
 0x22d   : > { %v4150_v55 = vpop.f32.mrb[120].mxu0 }
 0x22e   : > { %3017 = vst [vmem:[%s4524_s9 + $0x90] sm:$0xff] %v6696_v38  ;;  %v2947_v12 = vadd.f32 %v2865_v24, %v6530_v48  ;;  %v2889_v16 = vpop.f32.mrb[121].mxu0  ;;  %v3048_v26 = vadd.f32 %v3047_v32, %v6696_v38 }
 0x22f   : > { %v2644_v47 = vpop.f32.mrb[136].mxu1 }
 0x230   : > { %v6703_v1 = vadd.f32 %v6569_v45, %v2947_v12  ;;  %v2870_v19 = vadd.f32 %v2869_v8, %v2644_v47  ;;  %v2646_v33 = vpop.f32.mrb[137].mxu1 }
 0x231   : > { %v4153_v3 = vpop.f32.mrb[122].mxu0 }
 0x232   : > { %3018 = vst [vmem:[%s4524_s9 + $0x98] sm:$0xff] %v6703_v1  ;;  %v2948_v42 = vadd.f32 %v2870_v19, %v6539_v23  ;;  %v2899_v37 = vpop.f32.mrb[123].mxu0  ;;  %v3049_v6 = vadd.f32 %v3048_v26, %v6703_v1 }
 0x233   : > { %v2649_v14 = vpop.f32.mrb[138].mxu1 }
 0x234   : > { %v6711_v48 = vadd.f32 %v6569_v45, %v2948_v42  ;;  %v2875_v63 = vadd.f32 %v4144_v11, %v2649_v14  ;;  %v2651_v51 = vpop.f32.mrb[139].mxu1 }
 0x235   : > { %v4156_v0 = vpop.f32.mrb[124].mxu0 }
 0x236   : > { %3019 = vst [vmem:[%s4524_s9 + $0xa0] sm:$0xff] %v6711_v48  ;;  %v2949_v40 = vadd.f32 %v2875_v63, %v6536_v57  ;;  %v2909_v8 = vpop.f32.mrb[125].mxu0  ;;  %v3050_v11 = vadd.f32 %v3049_v6, %v6711_v48 }
 0x237   : > { %v2654_v23 = vpop.f32.mrb[140].mxu1 }
 0x238   : > { %v6719_v31 = vadd.f32 %v6569_v45, %v2949_v40  ;;  %v2880_v10 = vadd.f32 %v2879_v28, %v2654_v23  ;;  %v2656_v29 = vpop.f32.mrb[141].mxu1 }
 0x239   : > { %v6721_v54 = vpop.f32.mrb[126].mxu0 }
 0x23a   : > { %3020 = vst [vmem:[%s4524_s9 + $0xa8] sm:$0xff] %v6719_v31  ;;  %v2950_v5 = vadd.f32 %v2880_v10, %v6545_v50  ;;  %v2919_v57 = vpop.f32.mrb[127].mxu0  ;;  %v3051_v4 = vadd.f32 %v3050_v11, %v6719_v31 }
 0x23b   : > { %v2659_v24 = vpop.f32.mrb[142].mxu1 }
 0x23c   : > { %v6729_v61 = vadd.f32 %v6569_v45, %v2950_v5  ;;  %v2885_v12 = vadd.f32 %v4147_v46, %v2659_v24  ;;  %v2661_v28 = vpop.f32.mrb[143].mxu1 }
 0x23e   : > { %3021 = vst [vmem:[%s4524_s9 + $0xb0] sm:$0xff] %v6729_v61  ;;  %v3052_v47 = vadd.f32 %v3051_v4, %v6729_v61  ;;  %v2951_v19 = vadd.f32 %v2885_v12, %v6542_v41 }
 0x23f   : > { %v2664_v33 = vpop.f32.mrb[144].mxu1 }
 0x240   : > { %v6736_v34 = vadd.f32 %v6569_v45, %v2951_v19  ;;  %v2890_v50 = vadd.f32 %v2889_v16, %v2664_v33  ;;  %v2666_v42 = vpop.f32.mrb[145].mxu1 }
 0x242   : > { %3022 = vst [vmem:[%s4524_s9 + $0xb8] sm:$0xff] %v6736_v34  ;;  %v3053_v14 = vadd.f32 %v3052_v47, %v6736_v34  ;;  %v2952_v46 = vadd.f32 %v2890_v50, %v6551_v60 }
 0x243   : > { %v2669_v32 = vpop.f32.mrb[146].mxu1 }
 0x244   : > { %v6743_v63 = vadd.f32 %v6569_v45, %v2952_v46  ;;  %v2895_v51 = vadd.f32 %v4150_v55, %v2669_v32  ;;  %v2671_v41 = vpop.f32.mrb[147].mxu1 }
 0x246   : > { %3023 = vst [vmem:[%s4524_s9 + $0xc0] sm:$0xff] %v6743_v63  ;;  %v3054_v26 = vadd.f32 %v3053_v14, %v6743_v63  ;;  %v2953_v16 = vadd.f32 %v2895_v51, %v6548_v9 }
 0x247   : > { %v2674_v40 = vpop.f32.mrb[148].mxu1 }
 0x248   : > { %v6750_v23 = vadd.f32 %v6569_v45, %v2953_v16  ;;  %v2900_v6 = vadd.f32 %v2899_v37, %v2674_v40  ;;  %v2676_v60 = vpop.f32.mrb[149].mxu1 }
 0x24a   : > { %3024 = vst [vmem:[%s4524_s9 + $0xc8] sm:$0xff] %v6750_v23  ;;  %v3055_v10 = vadd.f32 %v3054_v26, %v6750_v23  ;;  %v2954_v55 = vadd.f32 %v2900_v6, %v6556_v25 }
 0x24b   : > { %v2679_v29 = vpop.f32.mrb[150].mxu1 }
 0x24c   : > { %v6757_v11 = vadd.f32 %v6569_v45, %v2954_v55  ;;  %v2905_v5 = vadd.f32 %v4153_v3, %v2679_v29  ;;  %v2681_v9 = vpop.f32.mrb[151].mxu1 }
 0x24e   : > { %3025 = vst [vmem:[%s4524_s9 + $0xd0] sm:$0xff] %v6757_v11  ;;  %v3056_v24 = vadd.f32 %v3055_v10, %v6757_v11  ;;  %v2955_v37 = vadd.f32 %v2905_v5, %v6553_v58 }
 0x24f   : > { %v2684_v4 = vpop.f32.mrb[152].mxu1 }
 0x250   : > { %v6764_v12 = vadd.f32 %v6569_v45, %v2955_v37  ;;  %v2910_v28 = vadd.f32 %v2909_v8, %v2684_v4  ;;  %v2686_v25 = vpop.f32.mrb[153].mxu1 }
 0x252   : > { %3026 = vst [vmem:[%s4524_s9 + $0xd8] sm:$0xff] %v6764_v12  ;;  %v3057_v47 = vadd.f32 %v3056_v24, %v6764_v12  ;;  %v2956_v3 = vadd.f32 %v2910_v28, %v6560_v59 }
 0x253   : > { %v2689_v19 = vpop.f32.mrb[154].mxu1 }
 0x254   : > { %v6771_v33 = vadd.f32 %v6569_v45, %v2956_v3  ;;  %v2915_v50 = vadd.f32 %v4156_v0, %v2689_v19  ;;  %v2691_v58 = vpop.f32.mrb[155].mxu1 }
 0x256   : > { %3027 = vst [vmem:[%s4524_s9 + $0xe0] sm:$0xff] %v6771_v33  ;;  %v3058_v42 = vadd.f32 %v3057_v47, %v6771_v33  ;;  %v2957_v8 = vadd.f32 %v2915_v50, %v6558_v2 }
 0x257   : > { %v2694_v14 = vpop.f32.mrb[156].mxu1 }
 0x258   : > { %v6778_v46 = vadd.f32 %v6569_v45, %v2957_v8  ;;  %v2920_v32 = vadd.f32 %v2919_v57, %v2694_v14  ;;  %v2696_v59 = vpop.f32.mrb[157].mxu1 }
 0x25a   : > { %3028 = vst [vmem:[%s4524_s9 + $0xe8] sm:$0xff] %v6778_v46  ;;  %v3059_v51 = vadd.f32 %v3058_v42, %v6778_v46  ;;  %v2958_v0 = vadd.f32 %v2920_v32, %v6564_v62 }
 0x25b   : > { %v2699_v41 = vpop.f32.mrb[158].mxu1 }
 0x25c   : > { %v6785_v26 = vadd.f32 %v6569_v45, %v2958_v0  ;;  %v2925_v16 = vadd.f32 %v6721_v54, %v2699_v41  ;;  %v2701_v2 = vpop.f32.mrb[159].mxu1 }
 0x25e   : > { %3029 = vst [vmem:[%s4524_s9 + $0xf0] sm:$0xff] %v6785_v26  ;;  %v3060_v40 = vadd.f32 %v3059_v51, %v6785_v26  ;;  %v2959_v57 = vadd.f32 %v2925_v16, %v6562_v15 }
 0x260   : > { %v6793_v6 = vadd.f32 %v6569_v45, %v2959_v57 }
 0x262   : > { %3030 = vst [vmem:[%s4524_s9 + $0xf8] sm:$0xff] %v6793_v6  ;;  %v3061_v62 = vadd.f32 %v3060_v40, %v6793_v6 }
 0x264   : > { %v3062_v60 = vrot.slane %v3061_v62, 4 }
 0x266   : > { %v3063_v10 = vadd.f32 %v3062_v60, %v3061_v62 }
 0x268   : > { %v3064_v55 = vrot.slane %v3063_v10, 2 }
 0x26a   : > { %v3065_v29 = vadd.f32 %v3064_v55, %v3063_v10 }
 0x26c   : > { %v3066_v5 = vrot.slane %v3065_v29, 1 }
 0x26e   : > { %v6798_v54 = vadd.f32 %v3066_v5, %v3065_v29 }
 0x270   : > { %v6801_v9 = vmul.f32 0.00390625, %v6798_v54 }
 0x272   : > { %v3070_v15 = vsub.f32 %v6577_v43, %v6801_v9  ;;  %v3071_v45 = vsub.f32 %v6574_v36, %v6801_v9  ;;  %v3072_v24 = vsub.f32 %v6591_v30, %v6801_v9  ;;  %v3073_v28 = vsub.f32 %v6586_v39, %v6801_v9 }
 0x273   : > { %v3074_v25 = vsub.f32 %v6604_v44, %v6801_v9  ;;  %v3075_v19 = vsub.f32 %v6601_v56, %v6801_v9  ;;  %v3076_v36 = vsub.f32 %v6618_v20, %v6801_v9  ;;  %v3077_v42 = vsub.f32 %v6615_v18, %v6801_v9 }
 0x274   : > { %v3102_v37 = vmul.f32 %v3070_v15, %v3070_v15  ;;  %v3103_v4 = vmul.f32 %v3071_v45, %v3071_v45  ;;  %v3104_v47 = vmul.f32 %v3072_v24, %v3072_v24  ;;  %v3105_v43 = vmul.f32 %v3073_v28, %v3073_v28 }
 0x275   : > { %v3106_v58 = vmul.f32 %v3074_v25, %v3074_v25  ;;  %v3107_v8 = vmul.f32 %v3075_v19, %v3075_v19  ;;  %v3078_v44 = vsub.f32 %v6632_v17, %v6801_v9  ;;  %v3108_v14 = vmul.f32 %v3076_v36, %v3076_v36 }
 0x276   : > { %v3134_v3 = vadd.f32 %v3103_v4, %v3102_v37  ;;  %v3079_v56 = vsub.f32 %v6629_v22, %v6801_v9  ;;  %v3109_v59 = vmul.f32 %v3077_v42, %v3077_v42  ;;  %v3080_v20 = vsub.f32 %v6646_v13, %v6801_v9 }
 0x277   : > { %v3110_v0 = vmul.f32 %v3078_v44, %v3078_v44  ;;  %v3081_v18 = vsub.f32 %v6643_v53, %v6801_v9  ;;  %v3082_v17 = vsub.f32 %v6660_v7, %v6801_v9  ;;  %v3083_v22 = vsub.f32 %v6657_v35, %v6801_v9 }
 0x278   : > { %v3135_v50 = vadd.f32 %v3134_v3, %v3104_v47  ;;  %v3111_v16 = vmul.f32 %v3079_v56, %v3079_v56  ;;  %v3112_v40 = vmul.f32 %v3080_v20, %v3080_v20  ;;  %v3084_v13 = vsub.f32 %v6670_v52, %v6801_v9 }
 0x279   : > { %v3113_v62 = vmul.f32 %v3081_v18, %v3081_v18  ;;  %v3114_v10 = vmul.f32 %v3082_v17, %v3082_v17  ;;  %v3085_v53 = vsub.f32 %v6673_v21, %v6801_v9  ;;  %v3115_v29 = vmul.f32 %v3083_v22, %v3083_v22 }
 0x27a   : > { %v3136_v30 = vadd.f32 %v3135_v50, %v3105_v43  ;;  %v3086_v7 = vsub.f32 %v6682_v49, %v6801_v9  ;;  %v3116_v15 = vmul.f32 %v3084_v13, %v3084_v13  ;;  %v3087_v35 = vsub.f32 %v6689_v27, %v6801_v9 }
 0x27b   : > { %v3117_v24 = vmul.f32 %v3085_v53, %v3085_v53  ;;  %v3088_v52 = vsub.f32 %v6696_v38, %v6801_v9  ;;  %v3089_v21 = vsub.f32 %v6703_v1, %v6801_v9  ;;  %v3090_v49 = vsub.f32 %v6711_v48, %v6801_v9 }
 0x27c   : > { %v3137_v39 = vadd.f32 %v3136_v30, %v3106_v58  ;;  %v3118_v4 = vmul.f32 %v3086_v7, %v3086_v7  ;;  %v3119_v25 = vmul.f32 %v3087_v35, %v3087_v35  ;;  %v3091_v27 = vsub.f32 %v6719_v31, %v6801_v9 }
 0x27d   : > { %v3120_v3 = vmul.f32 %v3088_v52, %v3088_v52  ;;  %v3121_v43 = vmul.f32 %v3089_v21, %v3089_v21  ;;  %v3092_v38 = vsub.f32 %v6729_v61, %v6801_v9  ;;  %v3122_v36 = vmul.f32 %v3090_v49, %v3090_v49 }
 0x27e   : > { %v3138_v32 = vadd.f32 %v3137_v39, %v3107_v8  ;;  %v3093_v1 = vsub.f32 %v6736_v34, %v6801_v9  ;;  %v3123_v30 = vmul.f32 %v3091_v27, %v3091_v27  ;;  %v3094_v48 = vsub.f32 %v6743_v63, %v6801_v9 }
 0x27f   : > { %v3124_v8 = vmul.f32 %v3092_v38, %v3092_v38  ;;  %v3095_v31 = vsub.f32 %v6750_v23, %v6801_v9  ;;  %v3096_v61 = vsub.f32 %v6757_v11, %v6801_v9  ;;  %v3097_v34 = vsub.f32 %v6764_v12, %v6801_v9 }
 0x280   : > { %v3139_v51 = vadd.f32 %v3138_v32, %v3108_v14  ;;  %v3125_v44 = vmul.f32 %v3093_v1, %v3093_v1  ;;  %v3126_v32 = vmul.f32 %v3094_v48, %v3094_v48  ;;  %v3098_v63 = vsub.f32 %v6771_v33, %v6801_v9 }
 0x281   : > { %v3128_v20 = vmul.f32 %v3096_v61, %v3096_v61  ;;  %v3099_v23 = vsub.f32 %v6778_v46, %v6801_v9  ;;  %v3100_v11 = vsub.f32 %v6785_v26, %v6801_v9  ;;  %v3101_v12 = vsub.f32 %v6793_v6, %v6801_v9 }
 0x282   : > { %v3140_v41 = vadd.f32 %v3139_v51, %v3109_v59  ;;  %v3127_v59 = vmul.f32 %v3095_v31, %v3095_v31 }
 0x283   : > { %v3131_v17 = vmul.f32 %v3099_v23, %v3099_v23  ;;  %v3133_v22 = vmul.f32 %v3101_v12, %v3101_v12 }
 0x284   : > { %v3141_v2 = vadd.f32 %v3140_v41, %v3110_v0  ;;  %v3129_v41 = vmul.f32 %v3097_v34, %v3097_v34 }
 0x286   : > { %v3142_v57 = vadd.f32 %v3141_v2, %v3111_v16  ;;  %v3130_v16 = vmul.f32 %v3098_v63, %v3098_v63 }
 0x288   : > { %v3143_v60 = vadd.f32 %v3142_v57, %v3112_v40  ;;  %v3132_v57 = vmul.f32 %v3100_v11, %v3100_v11 }
 0x28a   : > { %v3144_v55 = vadd.f32 %v3143_v60, %v3113_v62 }
 0x28c   : > { %v3145_v5 = vadd.f32 %v3144_v55, %v3114_v10 }
 0x28e   : > { %v3146_v45 = vadd.f32 %v3145_v5, %v3115_v29 }
 0x290   : > { %v3147_v37 = vadd.f32 %v3146_v45, %v3116_v15 }
 0x292   : > { %v3148_v28 = vadd.f32 %v3147_v37, %v3117_v24 }
 0x294   : > { %v3149_v47 = vadd.f32 %v3148_v28, %v3118_v4 }
 0x296   : > { %v3150_v19 = vadd.f32 %v3149_v47, %v3119_v25 }
 0x298   : > { %v3151_v50 = vadd.f32 %v3150_v19, %v3120_v3 }
 0x29a   : > { %v3152_v58 = vadd.f32 %v3151_v50, %v3121_v43 }
 0x29c   : > { %v3153_v42 = vadd.f32 %v3152_v58, %v3122_v36 }
 0x29e   : > { %v3154_v39 = vadd.f32 %v3153_v42, %v3123_v30 }
 0x2a0   : > { %v3155_v14 = vadd.f32 %v3154_v39, %v3124_v8 }
 0x2a2   : > { %v3156_v56 = vadd.f32 %v3155_v14, %v3125_v44 }
 0x2a4   : > { %v3157_v51 = vadd.f32 %v3156_v56, %v3126_v32 }
 0x2a6   : > { %v3158_v0 = vadd.f32 %v3157_v51, %v3127_v59 }
 0x2a8   : > { %v3159_v18 = vadd.f32 %v3158_v0, %v3128_v20 }
 0x2aa   : > { %v3160_v2 = vadd.f32 %v3159_v18, %v3129_v41 }
 0x2ac   : > { %v3161_v40 = vadd.f32 %v3160_v2, %v3130_v16 }
 0x2ae   : > { %v3162_v33 = vadd.f32 %v3161_v40, %v3131_v17 }
 0x2b0   : > { %v3163_v62 = vadd.f32 %v3162_v33, %v3132_v57 }
 0x2b2   : > { %v3164_v60 = vadd.f32 %v3163_v62, %v3133_v22 }
 0x2b4   : > { %v3165_v13 = vrot.slane %v3164_v60, 4 }
 0x2b6   : > { %v3166_v46 = vadd.f32 %v3165_v13, %v3164_v60 }
 0x2b8   : > { %v3167_v10 = vrot.slane %v3166_v46, 2 }
 0x2ba   : > { %v3168_v55 = vadd.f32 %v3167_v10, %v3166_v46 }
 0x2bc   : > { %v3169_v53 = vrot.slane %v3168_v55, 1 }
 0x2be   : > { %v3170_v26 = vadd.f32 %v3169_v53, %v3168_v55 }
 0x2c0   : > { %v3172_v29 = vsel %vm3171_vm4, %v6798_v54, %v3170_v26 }
 0x2c1   : > { %3173 = vst [vmem:[%s4529_s12] sm:$0x3] %v3172_v29 }
 0x2c2 PF: > { %s17_s23 = sadd.s32 1, %s4450_s23   ;;  %s7210_s21 = smov %s4446_s22 }
 0x2c3   : > { %p14_p5 = scmp.ge.s32.totalorder %s17_s23, 4   ;;  %s7211_s22 = smov %s7213_s24 }
 0x2c5   :  { %16 = sbr.rel (!%p14_p5) target bundleno = 2 (0x2), region = 388 }
 0x2cc   :  { %3226 = vsyncmov [#allocation3] }
 0x2cf   :  { %s3227_s9 = vpop.sfrf %3226 }
 0x2d0   :  { %p3769_p6 = scmp.ne.s32.totalorder %s3227_s9, 0 }
 0x2d2   :  { %3231 = shalt.err (%p3769_p6)  }
 0x2d3   :  { %3233 = vsyncmov [#allocation3 + $0x1] }
 0x2d6   :  { %s3234_s25 = vpop.sfrf %3233 }
 0x2d7   :  { %p3770_p7 = scmp.ne.s32.totalorder %s3234_s25, 0 }
 0x2d9   :  { %3238 = shalt.err (%p3770_p7)  }
 0x2da   :  { %3240 = vsyncmov [#allocation3 + $0x2] }
 0x2dd   :  { %s3241_s12 = vpop.sfrf %3240 }
 0x2de   :  { %p3771_p8 = scmp.ne.s32.totalorder %s3241_s12, 0 }
 0x2e0   :  { %3245 = shalt.err (%p3771_p8)  }
 0x2e1   :  { %3247 = vsyncmov [#allocation3 + $0x3] }
 0x2e4   :  { %s3248_s26 = vpop.sfrf %3247 }
 0x2e5   :  { %p3772_p9 = scmp.ne.s32.totalorder %s3248_s26, 0 }
 0x2e7   :  { %3252 = shalt.err (%p3772_p9)  }
 0x2e8   :  { %3254 = vsyncmov [#allocation3 + $0x4] }
 0x2eb   :  { %s3255_s24 = vpop.sfrf %3254 }
 0x2ec   :  { %p3773_p10 = scmp.ne.s32.totalorder %s3255_s24, 0 }
 0x2ee   :  { %3259 = shalt.err (%p3773_p10)  }
 0x2ef   :  { %3261 = vsyncmov [#allocation3 + $0x5] }
 0x2f2   :  { %s3262_s0 = vpop.sfrf %3261 }
 0x2f3   :  { %p3774_p11 = scmp.ne.s32.totalorder %s3262_s0, 0 }
 0x2f5   :  { %3266 = shalt.err (%p3774_p11)  }

</bundles_post_ra>
